<compile_context>
chip_gen: v6e
topology: v6e:2x2x1
jax: 0.10.0
libtpu: 0.0.40
codegen_flags: <defaults>
</compile_context>

<pallas_src>
import functools
import math

import jax
import jax.numpy as jnp
from jax import lax
from jax.experimental import pallas as pl
from jax.experimental.pallas import tpu as pltpu


VMEM_LIMIT = 48 * 1024 * 1024  # safe on v5e/v6e (128 MiB) and v7x (64 MiB) VMEM


def _pick_tile(dim, candidates, min_blocks=1):
    """Largest candidate tile dividing dim (prefer >= min_blocks grid steps)."""
    for c in candidates:
        if dim % c == 0 and dim // c >= min_blocks:
            return c
    for c in candidates:
        if dim % c == 0:
            return c
    return dim


# ----------------------------------------------------------------------------
# Dense matmul (+ bias, + optional fused GELU, + optional fused residual add)
# ----------------------------------------------------------------------------

def _dense_kernel(x_ref, w_ref, b_ref, *rest, activation, has_residual):
    if has_residual:
        r_ref, o_ref, acc_ref = rest
    else:
        o_ref, acc_ref = rest
        r_ref = None

    k = pl.program_id(2)

    @pl.when(k == 0)
    def _():
        acc_ref[...] = jnp.zeros_like(acc_ref)

    acc_ref[...] += jnp.dot(x_ref[...], w_ref[...],
                            preferred_element_type=jnp.float32)

    @pl.when(k == pl.num_programs(2) - 1)
    def _():
        y = acc_ref[...] + b_ref[...]
        if activation == "gelu":
            y = jax.nn.gelu(y, approximate=True)
        if has_residual:
            y = y + r_ref[...].astype(jnp.float32)
        o_ref[...] = y.astype(o_ref.dtype)


def dense(x, w, b=None, activation=None, residual=None, out_dtype=jnp.bfloat16):
    """y = act(x @ w + b) [+ residual]; bf16 inputs, f32 MXU accumulation."""
    M, K = x.shape
    K2, N = w.shape
    assert K == K2
    tm = _pick_tile(M, (256, 128, 64, 32, 16, 8), min_blocks=2)
    tn = _pick_tile(N, (512, 256, 128, 64, 32, 16, 8))
    tk = _pick_tile(K, (512, 256, 128, 64, 32, 16, 8))

    b2 = (jnp.zeros((1, N), jnp.float32) if b is None
          else b.reshape(1, N).astype(jnp.float32))

    has_residual = residual is not None
    in_specs = [
        pl.BlockSpec((tm, tk), lambda i, j, k: (i, k)),
        pl.BlockSpec((tk, tn), lambda i, j, k: (k, j)),
        pl.BlockSpec((1, tn), lambda i, j, k: (0, j)),
    ]
    inputs = [x.astype(jnp.bfloat16), w.astype(jnp.bfloat16), b2]
    if has_residual:
        in_specs.append(pl.BlockSpec((tm, tn), lambda i, j, k: (i, j)))
        inputs.append(residual.astype(jnp.bfloat16))

    kernel = functools.partial(_dense_kernel, activation=activation,
                               has_residual=has_residual)
    return pl.pallas_call(
        kernel,
        out_shape=jax.ShapeDtypeStruct((M, N), out_dtype),
        grid_spec=pltpu.PrefetchScalarGridSpec(
            num_scalar_prefetch=0,
            grid=(M // tm, N // tn, K // tk),
            in_specs=in_specs,
            out_specs=pl.BlockSpec((tm, tn), lambda i, j, k: (i, j)),
            scratch_shapes=[pltpu.VMEM((tm, tn), jnp.float32)],
        ),
        compiler_params=pltpu.CompilerParams(
            dimension_semantics=("parallel", "parallel", "arbitrary"),
            vmem_limit_bytes=VMEM_LIMIT),
    )(*inputs)


# ----------------------------------------------------------------------------
# LayerNorm (f32 statistics, bf16 in/out)
# ----------------------------------------------------------------------------

def _layernorm_kernel(x_ref, g_ref, b_ref, o_ref, *, eps):
    x = x_ref[...].astype(jnp.float32)
    mean = jnp.mean(x, axis=-1, keepdims=True)
    var = jnp.mean(jnp.square(x - mean), axis=-1, keepdims=True)
    xn = (x - mean) * lax.rsqrt(var + eps)
    o_ref[...] = (xn * g_ref[...] + b_ref[...]).astype(o_ref.dtype)


def layernorm(x, gamma, beta, eps=1e-5, out_dtype=jnp.bfloat16):
    M, H = x.shape
    tm = _pick_tile(M, (256, 128, 64, 32, 16, 8), min_blocks=2)
    kernel = functools.partial(_layernorm_kernel, eps=eps)
    return pl.pallas_call(
        kernel,
        out_shape=jax.ShapeDtypeStruct((M, H), out_dtype),
        grid_spec=pltpu.PrefetchScalarGridSpec(
            num_scalar_prefetch=0,
            grid=(M // tm,),
            in_specs=[
                pl.BlockSpec((tm, H), lambda i: (i, 0)),
                pl.BlockSpec((1, H), lambda i: (0, 0)),
                pl.BlockSpec((1, H), lambda i: (0, 0)),
            ],
            out_specs=pl.BlockSpec((tm, H), lambda i: (i, 0)),
        ),
        compiler_params=pltpu.CompilerParams(
            dimension_semantics=("parallel",),
            vmem_limit_bytes=VMEM_LIMIT),
    )(x, gamma.reshape(1, H).astype(jnp.float32),
      beta.reshape(1, H).astype(jnp.float32))


# ----------------------------------------------------------------------------
# Causal attention with fused GPT-J rotary embedding (per-batch, all heads)
# ----------------------------------------------------------------------------

def _attention_kernel(qkv_ref, mask_ref, cos_ref, sin_ref, p_ref, o_ref, *,
                      scale, num_heads, head_dim):
    S = qkv_ref.shape[1]
    H = num_heads * head_dim

    cos = cos_ref[...]          # (S, d)  f32 (1.0 past rotary_dim)
    sin = sin_ref[...]          # (S, d)  f32 (sign-folded; 0.0 past rotary_dim)
    perm = p_ref[...]           # (d, d)  f32 pair-swap matrix

    key_mask = mask_ref[0]      # (1, S)  f32, 1.0 = valid key
    row = lax.broadcasted_iota(jnp.int32, (S, S), 0)
    col = lax.broadcasted_iota(jnp.int32, (S, S), 1)
    valid = (col <= row) & (key_mask > 0.5)   # causal AND key padding mask

    qkv = qkv_ref[0]            # (S, 3H) bf16

    def rope(t):                # interleaved "rotate-every-two" rotary, f32
        swapped = jnp.dot(t, perm, preferred_element_type=jnp.float32)
        return t * cos + swapped * sin

    outs = []
    for h in range(num_heads):
        lo = h * head_dim
        q = qkv[:, lo:lo + head_dim].astype(jnp.float32)
        k = qkv[:, H + lo:H + lo + head_dim].astype(jnp.float32)
        v = qkv[:, 2 * H + lo:2 * H + lo + head_dim]

        q = (rope(q) * scale).astype(jnp.bfloat16)
        k = rope(k).astype(jnp.bfloat16)

        # q @ k^T without explicit transpose (contract last dims)
        scores = lax.dot_general(q, k, (((1,), (1,)), ((), ())),
                                 preferred_element_type=jnp.float32)  # (S, S)
        scores = jnp.where(valid, scores, -1e30)

        # softmax in fp32 (attention_softmax_fp32=True)
        m = jnp.max(scores, axis=-1, keepdims=True)
        p = jnp.exp(scores - m)
        denom = jnp.sum(p, axis=-1, keepdims=True)
        attn = p * pl.reciprocal(denom, approx=True)

        out_h = jnp.dot(attn.astype(jnp.bfloat16), v,
                        preferred_element_type=jnp.float32)
        outs.append(out_h.astype(o_ref.dtype))

    o_ref[0] = jnp.concatenate(outs, axis=-1)


def attention(qkv, key_mask, cos_t, sin_t, perm, *, num_heads, head_dim, scale):
    """qkv: (B, S, 3H) bf16; key_mask: (B, 1, S) f32 -> (B, S, H) bf16."""
    B, S, threeH = qkv.shape
    H = num_heads * head_dim
    kernel = functools.partial(_attention_kernel, scale=scale,
                               num_heads=num_heads, head_dim=head_dim)
    # TODO(synk): for long sequences this should tile S (flash-style online softmax).
    return pl.pallas_call(
        kernel,
        out_shape=jax.ShapeDtypeStruct((B, S, H), jnp.bfloat16),
        grid_spec=pltpu.PrefetchScalarGridSpec(
            num_scalar_prefetch=0,
            grid=(B,),
            in_specs=[
                pl.BlockSpec((1, S, threeH), lambda b: (b, 0, 0)),
                pl.BlockSpec((1, 1, S), lambda b: (b, 0, 0)),
                pl.BlockSpec((S, head_dim), lambda b: (0, 0)),
                pl.BlockSpec((S, head_dim), lambda b: (0, 0)),
                pl.BlockSpec((head_dim, head_dim), lambda b: (0, 0)),
            ],
            out_specs=pl.BlockSpec((1, S, H), lambda b: (b, 0, 0)),
        ),
        compiler_params=pltpu.CompilerParams(
            dimension_semantics=("parallel",),
            vmem_limit_bytes=VMEM_LIMIT),
    )(qkv, key_mask, cos_t, sin_t, perm)


# ----------------------------------------------------------------------------
# Fused tied LM head + masked cross-entropy ("flash-CE", logits never hit HBM)
# ----------------------------------------------------------------------------

def _lm_head_ce_kernel(x_ref, w_ref, lab_ref, mask_ref, o_ref,
                       m_ref, l_ref, ll_ref, *, tv):
    j = pl.program_id(1)

    @pl.when(j == 0)
    def _():
        m_ref[...] = jnp.full(m_ref.shape, -1e30, jnp.float32)
        l_ref[...] = jnp.zeros_like(l_ref)
        ll_ref[...] = jnp.zeros_like(ll_ref)

    # logits tile = x @ wte^T (contract hidden dims), f32 accumulation
    logits = lax.dot_general(x_ref[...], w_ref[...],
                             (((1,), (1,)), ((), ())),
                             preferred_element_type=jnp.float32)   # (tm, tv)

    labels = lab_ref[...]                                          # (tm, 1) int32
    col = lax.broadcasted_iota(jnp.int32, logits.shape, 1) + j * tv
    ll_ref[...] += jnp.sum(jnp.where(col == labels, logits, 0.0),
                           axis=-1, keepdims=True)

    # online logsumexp over vocab tiles
    m_prev = m_ref[...]
    m_new = jnp.maximum(m_prev, jnp.max(logits, axis=-1, keepdims=True))
    l_ref[...] = (l_ref[...] * jnp.exp(m_prev - m_new)
                  + jnp.sum(jnp.exp(logits - m_new), axis=-1, keepdims=True))
    m_ref[...] = m_new

    @pl.when(j == pl.num_programs(1) - 1)
    def _():
        lse = m_ref[...] + jnp.log(l_ref[...])
        o_ref[...] = (lse - ll_ref[...]) * mask_ref[...]


def lm_head_cross_entropy(x, emb, labels, mask):
    """Per-token masked CE with the tied embedding as LM head.
    x: (M, H), emb: (V, H), labels/mask: (M,) -> (M, 1) f32."""
    M, H = x.shape
    V, H2 = emb.shape
    assert H == H2
    tm = _pick_tile(M, (256, 128, 64, 32, 16, 8), min_blocks=2)
    tv = _pick_tile(V, (512, 256, 128, 64, 32, 16, 8))
    kernel = functools.partial(_lm_head_ce_kernel, tv=tv)
    return pl.pallas_call(
        kernel,
        out_shape=jax.ShapeDtypeStruct((M, 1), jnp.float32),
        grid_spec=pltpu.PrefetchScalarGridSpec(
            num_scalar_prefetch=0,
            grid=(M // tm, V // tv),
            in_specs=[
                pl.BlockSpec((tm, H), lambda i, j: (i, 0)),
                pl.BlockSpec((tv, H), lambda i, j: (j, 0)),
                pl.BlockSpec((tm, 1), lambda i, j: (i, 0)),
                pl.BlockSpec((tm, 1), lambda i, j: (i, 0)),
            ],
            out_specs=pl.BlockSpec((tm, 1), lambda i, j: (i, 0)),
            scratch_shapes=[pltpu.VMEM((tm, 1), jnp.float32),
                            pltpu.VMEM((tm, 1), jnp.float32),
                            pltpu.VMEM((tm, 1), jnp.float32)],
        ),
        compiler_params=pltpu.CompilerParams(
            dimension_semantics=("parallel", "arbitrary"),
            vmem_limit_bytes=VMEM_LIMIT),
    )(x.astype(jnp.bfloat16), emb.astype(jnp.bfloat16),
      labels.reshape(M, 1).astype(jnp.int32),
      mask.reshape(M, 1).astype(jnp.float32))


# ----------------------------------------------------------------------------
# GPT-J model (parallel attn+FFN residual, rotary positions, tied LM head)
# ----------------------------------------------------------------------------

CFG = dict(
    vocab_size=512,
    hidden_size=128,
    num_heads=4,
    num_layers=2,
    ffn_size=512,          # 4 * hidden
    rotary_dim=8,          # int(hidden/num_heads * 0.25)
    layer_norm_eps=1e-5,
)


def init_params(key, cfg):
    H, V, F, L = cfg["hidden_size"], cfg["vocab_size"], cfg["ffn_size"], cfg["num_layers"]
    std = 0.02
    keys = jax.random.split(key, 1 + 4 * L)
    params = {
        "wte": (jax.random.normal(keys[0], (V, H), jnp.float32) * std).astype(jnp.bfloat16),
        "lnf_g": jnp.ones((H,), jnp.float32),
        "lnf_b": jnp.zeros((H,), jnp.float32),
        "layers": [],
    }
    ki = 1
    for _ in range(L):
        lp = {
            "ln_g": jnp.ones((H,), jnp.float32),
            "ln_b": jnp.zeros((H,), jnp.float32),
            # fused Q|K|V projection (GPT-J attention has no bias)
            "w_qkv": (jax.random.normal(keys[ki + 0], (H, 3 * H), jnp.float32) * std).astype(jnp.bfloat16),
            "wo": (jax.random.normal(keys[ki + 1], (H, H), jnp.float32) * std).astype(jnp.bfloat16),
            # FFN with bias, gelu
            "w1": (jax.random.normal(keys[ki + 2], (H, F), jnp.float32) * std).astype(jnp.bfloat16),
            "b1": jnp.zeros((F,), jnp.float32),
            "w2": (jax.random.normal(keys[ki + 3], (F, H), jnp.float32) * std).astype(jnp.bfloat16),
            "b2": jnp.zeros((H,), jnp.float32),
        }
        params["layers"].append(lp)
        ki += 4
    return params


def rotary_tables(seq_len, head_dim, rotary_dim):
    """GPT-J interleaved rotary as elementwise tables + a pair-swap matrix.
    rotated = x * cos_t + (x @ perm) * sin_t."""
    positions = jnp.arange(seq_len, dtype=jnp.float32)
    inv_freq = 1.0 / (10000.0 ** (jnp.arange(0, rotary_dim, 2, dtype=jnp.float32)
                                  / rotary_dim))
    ang = positions[:, None] * inv_freq[None, :]               # (S, rot/2)
    cos = jnp.repeat(jnp.cos(ang), 2, axis=-1)                 # (S, rot)
    sin = jnp.repeat(jnp.sin(ang), 2, axis=-1)                 # (S, rot)
    sign = jnp.tile(jnp.array([-1.0, 1.0], jnp.float32), rotary_dim // 2)
    sin = sin * sign[None, :]
    cos_t = jnp.concatenate(
        [cos, jnp.ones((seq_len, head_dim - rotary_dim), jnp.float32)], axis=-1)
    sin_t = jnp.concatenate(
        [sin, jnp.zeros((seq_len, head_dim - rotary_dim), jnp.float32)], axis=-1)
    ii = jnp.arange(head_dim)[:, None]
    jj = jnp.arange(head_dim)[None, :]
    swap = jnp.where(jj % 2 == 0, ii == jj + 1, ii == jj - 1)
    perm = jnp.where(jj < rotary_dim, swap, False).astype(jnp.float32)
    return cos_t, sin_t, perm


def gptj_training_step(params, input_ids, attention_mask, labels, cfg=CFG):
    """Mirrors GptjModel.training_step (reduce_batch=True, loss_scaling='num_tokens',
    loss_weight=1.0). Returns the scalar loss."""
    B, S = input_ids.shape
    H, nH = cfg["hidden_size"], cfg["num_heads"]
    d = H // nH
    M = B * S
    scale = 1.0 / math.sqrt(d)

    # embedding lookup (glue)
    x = params["wte"][input_ids].reshape(M, H).astype(jnp.bfloat16)

    mask_f = attention_mask.astype(jnp.float32)
    key_mask = mask_f.reshape(B, 1, S)
    cos_t, sin_t, perm = rotary_tables(S, d, cfg["rotary_dim"])

    for lp in params["layers"]:
        # GPT-J parallel residual: x + attn(ln(x)) + ffn(ln(x))
        h = layernorm(x, lp["ln_g"], lp["ln_b"], cfg["layer_norm_eps"])

        qkv = dense(h, lp["w_qkv"])                               # (M, 3H) fused QKV
        attn = attention(qkv.reshape(B, S, 3 * H), key_mask, cos_t, sin_t, perm,
                         num_heads=nH, head_dim=d, scale=scale)   # (B, S, H)
        attn = attn.reshape(M, H)

        t = dense(attn, lp["wo"], residual=x)                     # x + attn_out
        ffn_h = dense(h, lp["w1"], lp["b1"], activation="gelu")
        x = dense(ffn_h, lp["w2"], lp["b2"], residual=t)          # + ffn_out

    x = layernorm(x, params["lnf_g"], params["lnf_b"], cfg["layer_norm_eps"])

    # tied LM head + GPTLMHeadModelLoss (loss_scaling='num_tokens'), fused flash-CE
    per_tok = lm_head_cross_entropy(x, params["wte"],
                                    labels.reshape(M), attention_mask.reshape(M))
    num_tokens = jnp.maximum(jnp.sum(mask_f), 1.0)
    return jnp.sum(per_tok) / num_tokens


# TODO(synk): eval metrics (perplexity/accuracy), MoE load-balancing loss, and the
# autoregressive inference_step (implicit-loop token sampling) are host/framework-side
# constructs with no clean single-kernel Pallas equivalent; only the training forward
# (loss) is implemented here.


if __name__ == "__main__":
    B, S = 2, 128
    key = jax.random.PRNGKey(0)
    kp, k1, k2 = jax.random.split(key, 3)

    params = init_params(kp, CFG)

    input_ids = jax.random.randint(k1, (B, S), 0, CFG["vocab_size"], dtype=jnp.int32)
    labels = jax.random.randint(k2, (B, S), 0, CFG["vocab_size"], dtype=jnp.int32)
    # attention_mask: 1 for valid tokens, pad out the tail of sequence 1
    attention_mask = jnp.ones((B, S), jnp.int32).at[1, S - 16:].set(0)

    loss = jax.jit(gptj_training_step)(params, input_ids, attention_mask, labels)
    loss = jax.block_until_ready(loss)
    assert loss.shape == () and bool(jnp.isfinite(loss))
    print("KERNEL_OK")
</pallas_src>

<mosaic_0001>
module attributes {stable_mosaic.version = 11 : i64} {
  func.func @_dense_kernel(%arg0: i32, %arg1: i32, %arg2: i32, %arg3: memref<128x128xbf16, #tpu.memory_space<vmem>>, %arg4: memref<128x128xbf16, #tpu.memory_space<vmem>>, %arg5: memref<1x128xf32, #tpu.memory_space<vmem>>, %arg6: memref<128x128xbf16, #tpu.memory_space<vmem>>, %arg7: memref<128x128xf32, #tpu.memory_space<vmem>>) attributes {dimension_semantics = [#tpu.dimension_semantics<parallel>, #tpu.dimension_semantics<parallel>, #tpu.dimension_semantics<arbitrary>], iteration_bounds = array<i64: 2, 3, 1>, scalar_prefetch = 0 : i64, scratch_operands = 1 : i64, tpu.core_type = #tpu.core_type<tc>, window_params = [{transform_indices = @transform_0, window_bounds = array<i64: 128, 128>}, {transform_indices = @transform_1, window_bounds = array<i64: 128, 128>}, {transform_indices = @transform_2, window_bounds = array<i64: 1, 128>}, {transform_indices = @transform_3, window_bounds = array<i64: 128, 128>}]} {
    %c0_i32 = arith.constant 0 : i32
    %0 = arith.cmpi eq, %arg2, %c0_i32 : i32
    %1 = arith.extui %0 : i1 to i32
    %c0_i32_0 = arith.constant 0 : i32
    %2 = arith.cmpi ne, %1, %c0_i32_0 : i32
    scf.if %2 {
      %cst_10 = arith.constant 0.000000e+00 : f32
      %12 = vector.broadcast %cst_10 : f32 to vector<128x128xf32>
      %c0_11 = arith.constant 0 : index
      %c0_12 = arith.constant 0 : index
      %13 = vector.load %arg7[%c0_11, %c0_12] : memref<128x128xf32, #tpu.memory_space<vmem>>, vector<128x128xf32>
      tpu.vector_store %arg7[%c0_11, %c0_12], %12 {strides = array<i32>} : memref<128x128xf32, #tpu.memory_space<vmem>>, vector<128x128xf32>,
    } else {
    }
    %c0 = arith.constant 0 : index
    %c0_1 = arith.constant 0 : index
    %3 = vector.load %arg7[%c0, %c0_1] : memref<128x128xf32, #tpu.memory_space<vmem>>, vector<128x128xf32>
    %c0_2 = arith.constant 0 : index
    %c0_3 = arith.constant 0 : index
    %4 = vector.load %arg3[%c0_2, %c0_3] : memref<128x128xbf16, #tpu.memory_space<vmem>>, vector<128x128xbf16>
    %c0_4 = arith.constant 0 : index
    %c0_5 = arith.constant 0 : index
    %5 = vector.load %arg4[%c0_4, %c0_5] : memref<128x128xbf16, #tpu.memory_space<vmem>>, vector<128x128xbf16>
    %cst = arith.constant dense<0.000000e+00> : vector<128x128xf32>
    %6 = tpu.matmul %4, %5, %cst {dimension_numbers = #tpu.dot_dimension_numbers<[1], [0], [0], [1], [0, 0, 1, 1], [], []>} : vector<128x128xbf16>, vector<128x128xbf16>, vector<128x128xf32> -> vector<128x128xf32>
    %7 = arith.addf %3, %6 : vector<128x128xf32>
    %c0_6 = arith.constant 0 : index
    %c0_7 = arith.constant 0 : index
    %8 = vector.load %arg7[%c0_6, %c0_7] : memref<128x128xf32, #tpu.memory_space<vmem>>, vector<128x128xf32>
    tpu.vector_store %arg7[%c0_6, %c0_7], %7 {strides = array<i32>} : memref<128x128xf32, #tpu.memory_space<vmem>>, vector<128x128xf32>,
    %c0_i32_8 = arith.constant 0 : i32
    %9 = arith.cmpi eq, %arg2, %c0_i32_8 : i32
    %10 = arith.extui %9 : i1 to i32
    %c0_i32_9 = arith.constant 0 : i32
    %11 = arith.cmpi ne, %10, %c0_i32_9 : i32
    scf.if %11 {
      %c0_10 = arith.constant 0 : index
      %c0_11 = arith.constant 0 : index
      %12 = vector.load %arg7[%c0_10, %c0_11] : memref<128x128xf32, #tpu.memory_space<vmem>>, vector<128x128xf32>
      %c0_12 = arith.constant 0 : index
      %c0_13 = arith.constant 0 : index
      %13 = vector.load %arg5[%c0_12, %c0_13] : memref<1x128xf32, #tpu.memory_space<vmem>>, vector<1x128xf32>
      %14 = vector.broadcast %13 : vector<1x128xf32> to vector<128x128xf32>
      %15 = arith.addf %12, %14 : vector<128x128xf32>
      %16 = arith.truncf %15 : vector<128x128xf32> to vector<128x128xbf16>
      %c0_14 = arith.constant 0 : index
      %c0_15 = arith.constant 0 : index
      %17 = vector.load %arg6[%c0_14, %c0_15] : memref<128x128xbf16, #tpu.memory_space<vmem>>, vector<128x128xbf16>
      tpu.vector_store %arg6[%c0_14, %c0_15], %16 {strides = array<i32>} : memref<128x128xbf16, #tpu.memory_space<vmem>>, vector<128x128xbf16>,
    } else {
    }
    return
  }
  func.func @transform_0(%arg0: i32, %arg1: i32, %arg2: i32) -> (i32, i32) {
    %c0_i32 = arith.constant 0 : i32
    return %arg0, %arg2 : i32, i32
  }
  func.func @transform_1(%arg0: i32, %arg1: i32, %arg2: i32) -> (i32, i32) {
    %c0_i32 = arith.constant 0 : i32
    return %arg2, %arg1 : i32, i32
  }
  func.func @transform_2(%arg0: i32, %arg1: i32, %arg2: i32) -> (i32, i32) {
    %c0_i32 = arith.constant 0 : i32
    %c0_i32_0 = arith.constant 0 : i32
    return %c0_i32, %arg1 : i32, i32
  }
  func.func @transform_3(%arg0: i32, %arg1: i32, %arg2: i32) -> (i32, i32) {
    %c0_i32 = arith.constant 0 : i32
    return %arg0, %arg1 : i32, i32
  }
}

module attributes {stable_mosaic.version = 11 : i64} {
  func.func @_layernorm_kernel(%arg0: i32, %arg1: memref<128x128xbf16, #tpu.memory_space<vmem>>, %arg2: memref<1x128xf32, #tpu.memory_space<vmem>>, %arg3: memref<1x128xf32, #tpu.memory_space<vmem>>, %arg4: memref<128x128xbf16, #tpu.memory_space<vmem>>) attributes {dimension_semantics = [#tpu.dimension_semantics<parallel>], iteration_bounds = array<i64: 2>, scalar_prefetch = 0 : i64, scratch_operands = 0 : i64, tpu.core_type = #tpu.core_type<tc>, window_params = [{transform_indices = @transform_0, window_bounds = array<i64: 128, 128>}, {pipeline_mode = #tpu.pipeline_mode<synchronous>, transform_indices = @transform_1, window_bounds = array<i64: 1, 128>}, {pipeline_mode = #tpu.pipeline_mode<synchronous>, transform_indices = @transform_2, window_bounds = array<i64: 1, 128>}, {transform_indices = @transform_3, window_bounds = array<i64: 128, 128>}]} {
    %c0 = arith.constant 0 : index
    %c0_0 = arith.constant 0 : index
    %0 = vector.load %arg1[%c0, %c0_0] : memref<128x128xbf16, #tpu.memory_space<vmem>>, vector<128x128xbf16>
    %1 = arith.extf %0 : vector<128x128xbf16> to vector<128x128xf32>
    %cst = arith.constant dense<0.000000e+00> : vector<128xf32>
    %2 = vector.multi_reduction <add>, %1, %cst [1] : vector<128x128xf32> to vector<128xf32>
    %3 = vector.shape_cast %2 : vector<128xf32> to vector<128x1xf32>
    %cst_1 = arith.constant 1.280000e+02 : f32
    %4 = vector.broadcast %cst_1 : f32 to vector<128x1xf32>
    %5 = arith.divf %3, %4 : vector<128x1xf32>
    %6 = vector.broadcast %5 : vector<128x1xf32> to vector<128x128xf32>
    %7 = arith.subf %1, %6 : vector<128x128xf32>
    %8 = arith.mulf %7, %7 : vector<128x128xf32>
    %cst_2 = arith.constant dense<0.000000e+00> : vector<128xf32>
    %9 = vector.multi_reduction <add>, %8, %cst_2 [1] : vector<128x128xf32> to vector<128xf32>
    %10 = vector.shape_cast %9 : vector<128xf32> to vector<128x1xf32>
    %cst_3 = arith.constant 1.280000e+02 : f32
    %11 = vector.broadcast %cst_3 : f32 to vector<128x1xf32>
    %12 = arith.divf %10, %11 : vector<128x1xf32>
    %13 = vector.broadcast %5 : vector<128x1xf32> to vector<128x128xf32>
    %14 = arith.subf %1, %13 : vector<128x128xf32>
    %cst_4 = arith.constant 9.99999974E-6 : f32
    %15 = vector.broadcast %cst_4 : f32 to vector<128x1xf32>
    %16 = arith.addf %12, %15 : vector<128x1xf32>
    %17 = math.rsqrt %16 : vector<128x1xf32>
    %18 = vector.broadcast %17 : vector<128x1xf32> to vector<128x128xf32>
    %19 = arith.mulf %14, %18 : vector<128x128xf32>
    %c0_5 = arith.constant 0 : index
    %c0_6 = arith.constant 0 : index
    %20 = vector.load %arg2[%c0_5, %c0_6] : memref<1x128xf32, #tpu.memory_space<vmem>>, vector<1x128xf32>
    %21 = vector.broadcast %20 : vector<1x128xf32> to vector<128x128xf32>
    %22 = arith.mulf %19, %21 : vector<128x128xf32>
    %c0_7 = arith.constant 0 : index
    %c0_8 = arith.constant 0 : index
    %23 = vector.load %arg3[%c0_7, %c0_8] : memref<1x128xf32, #tpu.memory_space<vmem>>, vector<1x128xf32>
    %24 = vector.broadcast %23 : vector<1x128xf32> to vector<128x128xf32>
    %25 = arith.addf %22, %24 : vector<128x128xf32>
    %26 = arith.truncf %25 : vector<128x128xf32> to vector<128x128xbf16>
    %c0_9 = arith.constant 0 : index
    %c0_10 = arith.constant 0 : index
    %27 = vector.load %arg4[%c0_9, %c0_10] : memref<128x128xbf16, #tpu.memory_space<vmem>>, vector<128x128xbf16>
    tpu.vector_store %arg4[%c0_9, %c0_10], %26 {strides = array<i32>} : memref<128x128xbf16, #tpu.memory_space<vmem>>, vector<128x128xbf16>,
    return
  }
  func.func @transform_0(%arg0: i32) -> (i32, i32) {
    %c0_i32 = arith.constant 0 : i32
    %c0_i32_0 = arith.constant 0 : i32
    return %arg0, %c0_i32 : i32, i32
  }
  func.func @transform_1(%arg0: i32) -> (i32, i32) {
    %c0_i32 = arith.constant 0 : i32
    %c0_i32_0 = arith.constant 0 : i32
    %c0_i32_1 = arith.constant 0 : i32
    return %c0_i32, %c0_i32_0 : i32, i32
  }
  func.func @transform_2(%arg0: i32) -> (i32, i32) {
    %c0_i32 = arith.constant 0 : i32
    %c0_i32_0 = arith.constant 0 : i32
    %c0_i32_1 = arith.constant 0 : i32
    return %c0_i32, %c0_i32_0 : i32, i32
  }
  func.func @transform_3(%arg0: i32) -> (i32, i32) {
    %c0_i32 = arith.constant 0 : i32
    %c0_i32_0 = arith.constant 0 : i32
    return %arg0, %c0_i32 : i32, i32
  }
}

module attributes {stable_mosaic.version = 11 : i64} {
  func.func @_attention_kernel(%arg0: i32, %arg1: memref<1x128x384xbf16, #tpu.memory_space<vmem>>, %arg2: memref<1x1x128xf32, #tpu.memory_space<vmem>>, %arg3: memref<128x32xf32, #tpu.memory_space<vmem>>, %arg4: memref<128x32xf32, #tpu.memory_space<vmem>>, %arg5: memref<32x32xf32, #tpu.memory_space<vmem>>, %arg6: memref<1x128x128xbf16, #tpu.memory_space<vmem>>) attributes {dimension_semantics = [#tpu.dimension_semantics<parallel>], iteration_bounds = array<i64: 2>, scalar_prefetch = 0 : i64, scratch_operands = 0 : i64, tpu.core_type = #tpu.core_type<tc>, window_params = [{transform_indices = @transform_0, window_bounds = array<i64: 1, 128, 384>}, {transform_indices = @transform_1, window_bounds = array<i64: 1, 1, 128>}, {pipeline_mode = #tpu.pipeline_mode<synchronous>, transform_indices = @transform_2, window_bounds = array<i64: 128, 32>}, {pipeline_mode = #tpu.pipeline_mode<synchronous>, transform_indices = @transform_3, window_bounds = array<i64: 128, 32>}, {pipeline_mode = #tpu.pipeline_mode<synchronous>, transform_indices = @transform_4, window_bounds = array<i64: 32, 32>}, {transform_indices = @transform_5, window_bounds = array<i64: 1, 128, 128>}]} {
    %c0 = arith.constant 0 : index
    %c0_0 = arith.constant 0 : index
    %0 = vector.load %arg3[%c0, %c0_0] : memref<128x32xf32, #tpu.memory_space<vmem>>, vector<128x32xf32>
    %c0_1 = arith.constant 0 : index
    %c0_2 = arith.constant 0 : index
    %1 = vector.load %arg4[%c0_1, %c0_2] : memref<128x32xf32, #tpu.memory_space<vmem>>, vector<128x32xf32>
    %c0_3 = arith.constant 0 : index
    %c0_4 = arith.constant 0 : index
    %2 = vector.load %arg5[%c0_3, %c0_4] : memref<32x32xf32, #tpu.memory_space<vmem>>, vector<32x32xf32>
    %c0_5 = arith.constant 0 : index
    %c0_6 = arith.constant 0 : index
    %c0_7 = arith.constant 0 : index
    %3 = vector.load %arg2[%c0_5, %c0_6, %c0_7] : memref<1x1x128xf32, #tpu.memory_space<vmem>>, vector<1x1x128xf32>
    %4 = vector.shape_cast %3 : vector<1x1x128xf32> to vector<1x128xf32>
    %5 = tpu.iota {dimensions = array<i32: 0>} : vector<128x128xi32>
    %6 = tpu.iota {dimensions = array<i32: 1>} : vector<128x128xi32>
    %7 = arith.cmpi sle, %6, %5 : vector<128x128xi32>
    %cst = arith.constant 5.000000e-01 : f32
    %8 = vector.broadcast %cst : f32 to vector<1x128xf32>
    %9 = arith.cmpf ogt, %4, %8 : vector<1x128xf32>
    %10 = vector.broadcast %9 : vector<1x128xi1> to vector<128x128xi1>
    %11 = arith.andi %7, %10 : vector<128x128xi1>
    %c0_8 = arith.constant 0 : index
    %c0_9 = arith.constant 0 : index
    %c0_10 = arith.constant 0 : index
    %12 = vector.load %arg1[%c0_8, %c0_9, %c0_10] : memref<1x128x384xbf16, #tpu.memory_space<vmem>>, vector<1x128x384xbf16>
    %13 = vector.shape_cast %12 : vector<1x128x384xbf16> to vector<128x384xbf16>
    %14 = vector.extract_strided_slice %13 {offsets = [0, 0], sizes = [128, 32], strides = [1, 1]} : vector<128x384xbf16> to vector<128x32xbf16>
    %15 = arith.extf %14 : vector<128x32xbf16> to vector<128x32xf32>
    %16 = vector.extract_strided_slice %13 {offsets = [0, 128], sizes = [128, 32], strides = [1, 1]} : vector<128x384xbf16> to vector<128x32xbf16>
    %17 = arith.extf %16 : vector<128x32xbf16> to vector<128x32xf32>
    %18 = vector.extract_strided_slice %13 {offsets = [0, 256], sizes = [128, 32], strides = [1, 1]} : vector<128x384xbf16> to vector<128x32xbf16>
    %cst_11 = arith.constant dense<0.000000e+00> : vector<128x32xf32>
    %19 = tpu.matmul %15, %2, %cst_11 {dimension_numbers = #tpu.dot_dimension_numbers<[1], [0], [0], [1], [0, 0, 1, 1], [], []>} : vector<128x32xf32>, vector<32x32xf32>, vector<128x32xf32> -> vector<128x32xf32>
    %20 = arith.mulf %15, %0 : vector<128x32xf32>
    %21 = arith.mulf %19, %1 : vector<128x32xf32>
    %22 = arith.addf %20, %21 : vector<128x32xf32>
    %cst_12 = arith.constant 0.176776692 : f32
    %23 = vector.broadcast %cst_12 : f32 to vector<128x32xf32>
    %24 = arith.mulf %22, %23 : vector<128x32xf32>
    %25 = arith.truncf %24 : vector<128x32xf32> to vector<128x32xbf16>
    %cst_13 = arith.constant dense<0.000000e+00> : vector<128x32xf32>
    %26 = tpu.matmul %17, %2, %cst_13 {dimension_numbers = #tpu.dot_dimension_numbers<[1], [0], [0], [1], [0, 0, 1, 1], [], []>} : vector<128x32xf32>, vector<32x32xf32>, vector<128x32xf32> -> vector<128x32xf32>
    %27 = arith.mulf %17, %0 : vector<128x32xf32>
    %28 = arith.mulf %26, %1 : vector<128x32xf32>
    %29 = arith.addf %27, %28 : vector<128x32xf32>
    %30 = arith.truncf %29 : vector<128x32xf32> to vector<128x32xbf16>
    %cst_14 = arith.constant dense<0.000000e+00> : vector<128x128xf32>
    %31 = tpu.matmul %25, %30, %cst_14 {dimension_numbers = #tpu.dot_dimension_numbers<[1], [1], [0], [0], [0, 0, 1, 0], [], []>} : vector<128x32xbf16>, vector<128x32xbf16>, vector<128x128xf32> -> vector<128x128xf32>
    %cst_15 = arith.constant -1.000000e+30 : f32
    %32 = vector.broadcast %cst_15 : f32 to vector<128x128xf32>
    %33 = arith.select %11, %31, %32 : vector<128x128xi1>, vector<128x128xf32>
    %cst_16 = arith.constant dense<0xFF800000> : vector<128xf32>
    %34 = vector.multi_reduction <maximumf>, %33, %cst_16 [1] : vector<128x128xf32> to vector<128xf32>
    %35 = vector.shape_cast %34 : vector<128xf32> to vector<128x1xf32>
    %36 = vector.broadcast %35 : vector<128x1xf32> to vector<128x128xf32>
    %37 = arith.subf %33, %36 : vector<128x128xf32>
    %38 = math.exp %37 : vector<128x128xf32>
    %cst_17 = arith.constant dense<0.000000e+00> : vector<128xf32>
    %39 = vector.multi_reduction <add>, %38, %cst_17 [1] : vector<128x128xf32> to vector<128xf32>
    %40 = vector.shape_cast %39 : vector<128xf32> to vector<128x1xf32>
    %41 = tpu.reciprocal %40 {approx = true} : vector<128x1xf32> -> vector<128x1xf32>
    %42 = vector.broadcast %41 : vector<128x1xf32> to vector<128x128xf32>
    %43 = arith.mulf %38, %42 : vector<128x128xf32>
    %44 = arith.truncf %43 : vector<128x128xf32> to vector<128x128xbf16>
    %cst_18 = arith.constant dense<0.000000e+00> : vector<128x32xf32>
    %45 = tpu.matmul %44, %18, %cst_18 {dimension_numbers = #tpu.dot_dimension_numbers<[1], [0], [0], [1], [0, 0, 1, 1], [], []>} : vector<128x128xbf16>, vector<128x32xbf16>, vector<128x32xf32> -> vector<128x32xf32>
    %46 = arith.truncf %45 : vector<128x32xf32> to vector<128x32xbf16>
    %47 = vector.extract_strided_slice %13 {offsets = [0, 32], sizes = [128, 32], strides = [1, 1]} : vector<128x384xbf16> to vector<128x32xbf16>
    %48 = arith.extf %47 : vector<128x32xbf16> to vector<128x32xf32>
    %49 = vector.extract_strided_slice %13 {offsets = [0, 160], sizes = [128, 32], strides = [1, 1]} : vector<128x384xbf16> to vector<128x32xbf16>
    %50 = arith.extf %49 : vector<128x32xbf16> to vector<128x32xf32>
    %51 = vector.extract_strided_slice %13 {offsets = [0, 288], sizes = [128, 32], strides = [1, 1]} : vector<128x384xbf16> to vector<128x32xbf16>
    %cst_19 = arith.constant dense<0.000000e+00> : vector<128x32xf32>
    %52 = tpu.matmul %48, %2, %cst_19 {dimension_numbers = #tpu.dot_dimension_numbers<[1], [0], [0], [1], [0, 0, 1, 1], [], []>} : vector<128x32xf32>, vector<32x32xf32>, vector<128x32xf32> -> vector<128x32xf32>
    %53 = arith.mulf %48, %0 : vector<128x32xf32>
    %54 = arith.mulf %52, %1 : vector<128x32xf32>
    %55 = arith.addf %53, %54 : vector<128x32xf32>
    %cst_20 = arith.constant 0.176776692 : f32
    %56 = vector.broadcast %cst_20 : f32 to vector<128x32xf32>
    %57 = arith.mulf %55, %56 : vector<128x32xf32>
    %58 = arith.truncf %57 : vector<128x32xf32> to vector<128x32xbf16>
    %cst_21 = arith.constant dense<0.000000e+00> : vector<128x32xf32>
    %59 = tpu.matmul %50, %2, %cst_21 {dimension_numbers = #tpu.dot_dimension_numbers<[1], [0], [0], [1], [0, 0, 1, 1], [], []>} : vector<128x32xf32>, vector<32x32xf32>, vector<128x32xf32> -> vector<128x32xf32>
    %60 = arith.mulf %50, %0 : vector<128x32xf32>
    %61 = arith.mulf %59, %1 : vector<128x32xf32>
    %62 = arith.addf %60, %61 : vector<128x32xf32>
    %63 = arith.truncf %62 : vector<128x32xf32> to vector<128x32xbf16>
    %cst_22 = arith.constant dense<0.000000e+00> : vector<128x128xf32>
    %64 = tpu.matmul %58, %63, %cst_22 {dimension_numbers = #tpu.dot_dimension_numbers<[1], [1], [0], [0], [0, 0, 1, 0], [], []>} : vector<128x32xbf16>, vector<128x32xbf16>, vector<128x128xf32> -> vector<128x128xf32>
    %cst_23 = arith.constant -1.000000e+30 : f32
    %65 = vector.broadcast %cst_23 : f32 to vector<128x128xf32>
    %66 = arith.select %11, %64, %65 : vector<128x128xi1>, vector<128x128xf32>
    %cst_24 = arith.constant dense<0xFF800000> : vector<128xf32>
    %67 = vector.multi_reduction <maximumf>, %66, %cst_24 [1] : vector<128x128xf32> to vector<128xf32>
    %68 = vector.shape_cast %67 : vector<128xf32> to vector<128x1xf32>
    %69 = vector.broadcast %68 : vector<128x1xf32> to vector<128x128xf32>
    %70 = arith.subf %66, %69 : vector<128x128xf32>
    %71 = math.exp %70 : vector<128x128xf32>
    %cst_25 = arith.constant dense<0.000000e+00> : vector<128xf32>
    %72 = vector.multi_reduction <add>, %71, %cst_25 [1] : vector<128x128xf32> to vector<128xf32>
    %73 = vector.shape_cast %72 : vector<128xf32> to vector<128x1xf32>
    %74 = tpu.reciprocal %73 {approx = true} : vector<128x1xf32> -> vector<128x1xf32>
    %75 = vector.broadcast %74 : vector<128x1xf32> to vector<128x128xf32>
    %76 = arith.mulf %71, %75 : vector<128x128xf32>
    %77 = arith.truncf %76 : vector<128x128xf32> to vector<128x128xbf16>
    %cst_26 = arith.constant dense<0.000000e+00> : vector<128x32xf32>
    %78 = tpu.matmul %77, %51, %cst_26 {dimension_numbers = #tpu.dot_dimension_numbers<[1], [0], [0], [1], [0, 0, 1, 1], [], []>} : vector<128x128xbf16>, vector<128x32xbf16>, vector<128x32xf32> -> vector<128x32xf32>
    %79 = arith.truncf %78 : vector<128x32xf32> to vector<128x32xbf16>
    %80 = vector.extract_strided_slice %13 {offsets = [0, 64], sizes = [128, 32], strides = [1, 1]} : vector<128x384xbf16> to vector<128x32xbf16>
    %81 = arith.extf %80 : vector<128x32xbf16> to vector<128x32xf32>
    %82 = vector.extract_strided_slice %13 {offsets = [0, 192], sizes = [128, 32], strides = [1, 1]} : vector<128x384xbf16> to vector<128x32xbf16>
    %83 = arith.extf %82 : vector<128x32xbf16> to vector<128x32xf32>
    %84 = vector.extract_strided_slice %13 {offsets = [0, 320], sizes = [128, 32], strides = [1, 1]} : vector<128x384xbf16> to vector<128x32xbf16>
    %cst_27 = arith.constant dense<0.000000e+00> : vector<128x32xf32>
    %85 = tpu.matmul %81, %2, %cst_27 {dimension_numbers = #tpu.dot_dimension_numbers<[1], [0], [0], [1], [0, 0, 1, 1], [], []>} : vector<128x32xf32>, vector<32x32xf32>, vector<128x32xf32> -> vector<128x32xf32>
    %86 = arith.mulf %81, %0 : vector<128x32xf32>
    %87 = arith.mulf %85, %1 : vector<128x32xf32>
    %88 = arith.addf %86, %87 : vector<128x32xf32>
    %cst_28 = arith.constant 0.176776692 : f32
    %89 = vector.broadcast %cst_28 : f32 to vector<128x32xf32>
    %90 = arith.mulf %88, %89 : vector<128x32xf32>
    %91 = arith.truncf %90 : vector<128x32xf32> to vector<128x32xbf16>
    %cst_29 = arith.constant dense<0.000000e+00> : vector<128x32xf32>
    %92 = tpu.matmul %83, %2, %cst_29 {dimension_numbers = #tpu.dot_dimension_numbers<[1], [0], [0], [1], [0, 0, 1, 1], [], []>} : vector<128x32xf32>, vector<32x32xf32>, vector<128x32xf32> -> vector<128x32xf32>
    %93 = arith.mulf %83, %0 : vector<128x32xf32>
    %94 = arith.mulf %92, %1 : vector<128x32xf32>
    %95 = arith.addf %93, %94 : vector<128x32xf32>
    %96 = arith.truncf %95 : vector<128x32xf32> to vector<128x32xbf16>
    %cst_30 = arith.constant dense<0.000000e+00> : vector<128x128xf32>
    %97 = tpu.matmul %91, %96, %cst_30 {dimension_numbers = #tpu.dot_dimension_numbers<[1], [1], [0], [0], [0, 0, 1, 0], [], []>} : vector<128x32xbf16>, vector<128x32xbf16>, vector<128x128xf32> -> vector<128x128xf32>
    %cst_31 = arith.constant -1.000000e+30 : f32
    %98 = vector.broadcast %cst_31 : f32 to vector<128x128xf32>
    %99 = arith.select %11, %97, %98 : vector<128x128xi1>, vector<128x128xf32>
    %cst_32 = arith.constant dense<0xFF800000> : vector<128xf32>
    %100 = vector.multi_reduction <maximumf>, %99, %cst_32 [1] : vector<128x128xf32> to vector<128xf32>
    %101 = vector.shape_cast %100 : vector<128xf32> to vector<128x1xf32>
    %102 = vector.broadcast %101 : vector<128x1xf32> to vector<128x128xf32>
    %103 = arith.subf %99, %102 : vector<128x128xf32>
    %104 = math.exp %103 : vector<128x128xf32>
    %cst_33 = arith.constant dense<0.000000e+00> : vector<128xf32>
    %105 = vector.multi_reduction <add>, %104, %cst_33 [1] : vector<128x128xf32> to vector<128xf32>
    %106 = vector.shape_cast %105 : vector<128xf32> to vector<128x1xf32>
    %107 = tpu.reciprocal %106 {approx = true} : vector<128x1xf32> -> vector<128x1xf32>
    %108 = vector.broadcast %107 : vector<128x1xf32> to vector<128x128xf32>
    %109 = arith.mulf %104, %108 : vector<128x128xf32>
    %110 = arith.truncf %109 : vector<128x128xf32> to vector<128x128xbf16>
    %cst_34 = arith.constant dense<0.000000e+00> : vector<128x32xf32>
    %111 = tpu.matmul %110, %84, %cst_34 {dimension_numbers = #tpu.dot_dimension_numbers<[1], [0], [0], [1], [0, 0, 1, 1], [], []>} : vector<128x128xbf16>, vector<128x32xbf16>, vector<128x32xf32> -> vector<128x32xf32>
    %112 = arith.truncf %111 : vector<128x32xf32> to vector<128x32xbf16>
    %113 = vector.extract_strided_slice %13 {offsets = [0, 96], sizes = [128, 32], strides = [1, 1]} : vector<128x384xbf16> to vector<128x32xbf16>
    %114 = arith.extf %113 : vector<128x32xbf16> to vector<128x32xf32>
    %115 = vector.extract_strided_slice %13 {offsets = [0, 224], sizes = [128, 32], strides = [1, 1]} : vector<128x384xbf16> to vector<128x32xbf16>
    %116 = arith.extf %115 : vector<128x32xbf16> to vector<128x32xf32>
    %117 = vector.extract_strided_slice %13 {offsets = [0, 352], sizes = [128, 32], strides = [1, 1]} : vector<128x384xbf16> to vector<128x32xbf16>
    %cst_35 = arith.constant dense<0.000000e+00> : vector<128x32xf32>
    %118 = tpu.matmul %114, %2, %cst_35 {dimension_numbers = #tpu.dot_dimension_numbers<[1], [0], [0], [1], [0, 0, 1, 1], [], []>} : vector<128x32xf32>, vector<32x32xf32>, vector<128x32xf32> -> vector<128x32xf32>
    %119 = arith.mulf %114, %0 : vector<128x32xf32>
    %120 = arith.mulf %118, %1 : vector<128x32xf32>
    %121 = arith.addf %119, %120 : vector<128x32xf32>
    %cst_36 = arith.constant 0.176776692 : f32
    %122 = vector.broadcast %cst_36 : f32 to vector<128x32xf32>
    %123 = arith.mulf %121, %122 : vector<128x32xf32>
    %124 = arith.truncf %123 : vector<128x32xf32> to vector<128x32xbf16>
    %cst_37 = arith.constant dense<0.000000e+00> : vector<128x32xf32>
    %125 = tpu.matmul %116, %2, %cst_37 {dimension_numbers = #tpu.dot_dimension_numbers<[1], [0], [0], [1], [0, 0, 1, 1], [], []>} : vector<128x32xf32>, vector<32x32xf32>, vector<128x32xf32> -> vector<128x32xf32>
    %126 = arith.mulf %116, %0 : vector<128x32xf32>
    %127 = arith.mulf %125, %1 : vector<128x32xf32>
    %128 = arith.addf %126, %127 : vector<128x32xf32>
    %129 = arith.truncf %128 : vector<128x32xf32> to vector<128x32xbf16>
    %cst_38 = arith.constant dense<0.000000e+00> : vector<128x128xf32>
    %130 = tpu.matmul %124, %129, %cst_38 {dimension_numbers = #tpu.dot_dimension_numbers<[1], [1], [0], [0], [0, 0, 1, 0], [], []>} : vector<128x32xbf16>, vector<128x32xbf16>, vector<128x128xf32> -> vector<128x128xf32>
    %cst_39 = arith.constant -1.000000e+30 : f32
    %131 = vector.broadcast %cst_39 : f32 to vector<128x128xf32>
    %132 = arith.select %11, %130, %131 : vector<128x128xi1>, vector<128x128xf32>
    %cst_40 = arith.constant dense<0xFF800000> : vector<128xf32>
    %133 = vector.multi_reduction <maximumf>, %132, %cst_40 [1] : vector<128x128xf32> to vector<128xf32>
    %134 = vector.shape_cast %133 : vector<128xf32> to vector<128x1xf32>
    %135 = vector.broadcast %134 : vector<128x1xf32> to vector<128x128xf32>
    %136 = arith.subf %132, %135 : vector<128x128xf32>
    %137 = math.exp %136 : vector<128x128xf32>
    %cst_41 = arith.constant dense<0.000000e+00> : vector<128xf32>
    %138 = vector.multi_reduction <add>, %137, %cst_41 [1] : vector<128x128xf32> to vector<128xf32>
    %139 = vector.shape_cast %138 : vector<128xf32> to vector<128x1xf32>
    %140 = tpu.reciprocal %139 {approx = true} : vector<128x1xf32> -> vector<128x1xf32>
    %141 = vector.broadcast %140 : vector<128x1xf32> to vector<128x128xf32>
    %142 = arith.mulf %137, %141 : vector<128x128xf32>
    %143 = arith.truncf %142 : vector<128x128xf32> to vector<128x128xbf16>
    %cst_42 = arith.constant dense<0.000000e+00> : vector<128x32xf32>
    %144 = tpu.matmul %143, %117, %cst_42 {dimension_numbers = #tpu.dot_dimension_numbers<[1], [0], [0], [1], [0, 0, 1, 1], [], []>} : vector<128x128xbf16>, vector<128x32xbf16>, vector<128x32xf32> -> vector<128x32xf32>
    %145 = arith.truncf %144 : vector<128x32xf32> to vector<128x32xbf16>
    %146 = tpu.concatenate %46, %79, %112, %145 in 1 : vector<128x32xbf16>, vector<128x32xbf16>, vector<128x32xbf16>, vector<128x32xbf16> -> vector<128x128xbf16>
    %c0_43 = arith.constant 0 : index
    %c0_44 = arith.constant 0 : index
    %c0_45 = arith.constant 0 : index
    %147 = vector.load %arg6[%c0_43, %c0_44, %c0_45] : memref<1x128x128xbf16, #tpu.memory_space<vmem>>, vector<1x128x128xbf16>
    %148 = vector.shape_cast %147 : vector<1x128x128xbf16> to vector<128x128xbf16>
    %149 = vector.shape_cast %146 : vector<128x128xbf16> to vector<1x128x128xbf16>
    tpu.vector_store %arg6[%c0_43, %c0_44, %c0_45], %149 {strides = array<i32>} : memref<1x128x128xbf16, #tpu.memory_space<vmem>>, vector<1x128x128xbf16>,
    return
  }
  func.func @transform_0(%arg0: i32) -> (i32, i32, i32) {
    %c0_i32 = arith.constant 0 : i32
    %c0_i32_0 = arith.constant 0 : i32
    %c0_i32_1 = arith.constant 0 : i32
    return %arg0, %c0_i32, %c0_i32_0 : i32, i32, i32
  }
  func.func @transform_1(%arg0: i32) -> (i32, i32, i32) {
    %c0_i32 = arith.constant 0 : i32
    %c0_i32_0 = arith.constant 0 : i32
    %c0_i32_1 = arith.constant 0 : i32
    return %arg0, %c0_i32, %c0_i32_0 : i32, i32, i32
  }
  func.func @transform_2(%arg0: i32) -> (i32, i32) {
    %c0_i32 = arith.constant 0 : i32
    %c0_i32_0 = arith.constant 0 : i32
    %c0_i32_1 = arith.constant 0 : i32
    return %c0_i32, %c0_i32_0 : i32, i32
  }
  func.func @transform_3(%arg0: i32) -> (i32, i32) {
    %c0_i32 = arith.constant 0 : i32
    %c0_i32_0 = arith.constant 0 : i32
    %c0_i32_1 = arith.constant 0 : i32
    return %c0_i32, %c0_i32_0 : i32, i32
  }
  func.func @transform_4(%arg0: i32) -> (i32, i32) {
    %c0_i32 = arith.constant 0 : i32
    %c0_i32_0 = arith.constant 0 : i32
    %c0_i32_1 = arith.constant 0 : i32
    return %c0_i32, %c0_i32_0 : i32, i32
  }
  func.func @transform_5(%arg0: i32) -> (i32, i32, i32) {
    %c0_i32 = arith.constant 0 : i32
    %c0_i32_0 = arith.constant 0 : i32
    %c0_i32_1 = arith.constant 0 : i32
    return %arg0, %c0_i32, %c0_i32_0 : i32, i32, i32
  }
}

module attributes {stable_mosaic.version = 11 : i64} {
  func.func @_dense_kernel(%arg0: i32, %arg1: i32, %arg2: i32, %arg3: memref<128x128xbf16, #tpu.memory_space<vmem>>, %arg4: memref<128x128xbf16, #tpu.memory_space<vmem>>, %arg5: memref<1x128xf32, #tpu.memory_space<vmem>>, %arg6: memref<128x128xbf16, #tpu.memory_space<vmem>>, %arg7: memref<128x128xbf16, #tpu.memory_space<vmem>>, %arg8: memref<128x128xf32, #tpu.memory_space<vmem>>) attributes {dimension_semantics = [#tpu.dimension_semantics<parallel>, #tpu.dimension_semantics<parallel>, #tpu.dimension_semantics<arbitrary>], iteration_bounds = array<i64: 2, 1, 1>, scalar_prefetch = 0 : i64, scratch_operands = 1 : i64, tpu.core_type = #tpu.core_type<tc>, window_params = [{transform_indices = @transform_0, window_bounds = array<i64: 128, 128>}, {transform_indices = @transform_1, window_bounds = array<i64: 128, 128>}, {transform_indices = @transform_2, window_bounds = array<i64: 1, 128>}, {transform_indices = @transform_3, window_bounds = array<i64: 128, 128>}, {transform_indices = @transform_4, window_bounds = array<i64: 128, 128>}]} {
    %c0_i32 = arith.constant 0 : i32
    %0 = arith.cmpi eq, %arg2, %c0_i32 : i32
    %1 = arith.extui %0 : i1 to i32
    %c0_i32_0 = arith.constant 0 : i32
    %2 = arith.cmpi ne, %1, %c0_i32_0 : i32
    scf.if %2 {
      %cst_10 = arith.constant 0.000000e+00 : f32
      %12 = vector.broadcast %cst_10 : f32 to vector<128x128xf32>
      %c0_11 = arith.constant 0 : index
      %c0_12 = arith.constant 0 : index
      %13 = vector.load %arg8[%c0_11, %c0_12] : memref<128x128xf32, #tpu.memory_space<vmem>>, vector<128x128xf32>
      tpu.vector_store %arg8[%c0_11, %c0_12], %12 {strides = array<i32>} : memref<128x128xf32, #tpu.memory_space<vmem>>, vector<128x128xf32>,
    } else {
    }
    %c0 = arith.constant 0 : index
    %c0_1 = arith.constant 0 : index
    %3 = vector.load %arg8[%c0, %c0_1] : memref<128x128xf32, #tpu.memory_space<vmem>>, vector<128x128xf32>
    %c0_2 = arith.constant 0 : index
    %c0_3 = arith.constant 0 : index
    %4 = vector.load %arg3[%c0_2, %c0_3] : memref<128x128xbf16, #tpu.memory_space<vmem>>, vector<128x128xbf16>
    %c0_4 = arith.constant 0 : index
    %c0_5 = arith.constant 0 : index
    %5 = vector.load %arg4[%c0_4, %c0_5] : memref<128x128xbf16, #tpu.memory_space<vmem>>, vector<128x128xbf16>
    %cst = arith.constant dense<0.000000e+00> : vector<128x128xf32>
    %6 = tpu.matmul %4, %5, %cst {dimension_numbers = #tpu.dot_dimension_numbers<[1], [0], [0], [1], [0, 0, 1, 1], [], []>} : vector<128x128xbf16>, vector<128x128xbf16>, vector<128x128xf32> -> vector<128x128xf32>
    %7 = arith.addf %3, %6 : vector<128x128xf32>
    %c0_6 = arith.constant 0 : index
    %c0_7 = arith.constant 0 : index
    %8 = vector.load %arg8[%c0_6, %c0_7] : memref<128x128xf32, #tpu.memory_space<vmem>>, vector<128x128xf32>
    tpu.vector_store %arg8[%c0_6, %c0_7], %7 {strides = array<i32>} : memref<128x128xf32, #tpu.memory_space<vmem>>, vector<128x128xf32>,
    %c0_i32_8 = arith.constant 0 : i32
    %9 = arith.cmpi eq, %arg2, %c0_i32_8 : i32
    %10 = arith.extui %9 : i1 to i32
    %c0_i32_9 = arith.constant 0 : i32
    %11 = arith.cmpi ne, %10, %c0_i32_9 : i32
    scf.if %11 {
      %c0_10 = arith.constant 0 : index
      %c0_11 = arith.constant 0 : index
      %12 = vector.load %arg8[%c0_10, %c0_11] : memref<128x128xf32, #tpu.memory_space<vmem>>, vector<128x128xf32>
      %c0_12 = arith.constant 0 : index
      %c0_13 = arith.constant 0 : index
      %13 = vector.load %arg5[%c0_12, %c0_13] : memref<1x128xf32, #tpu.memory_space<vmem>>, vector<1x128xf32>
      %14 = vector.broadcast %13 : vector<1x128xf32> to vector<128x128xf32>
      %15 = arith.addf %12, %14 : vector<128x128xf32>
      %c0_14 = arith.constant 0 : index
      %c0_15 = arith.constant 0 : index
      %16 = vector.load %arg6[%c0_14, %c0_15] : memref<128x128xbf16, #tpu.memory_space<vmem>>, vector<128x128xbf16>
      %17 = arith.extf %16 : vector<128x128xbf16> to vector<128x128xf32>
      %18 = arith.addf %15, %17 : vector<128x128xf32>
      %19 = arith.truncf %18 : vector<128x128xf32> to vector<128x128xbf16>
      %c0_16 = arith.constant 0 : index
      %c0_17 = arith.constant 0 : index
      %20 = vector.load %arg7[%c0_16, %c0_17] : memref<128x128xbf16, #tpu.memory_space<vmem>>, vector<128x128xbf16>
      tpu.vector_store %arg7[%c0_16, %c0_17], %19 {strides = array<i32>} : memref<128x128xbf16, #tpu.memory_space<vmem>>, vector<128x128xbf16>,
    } else {
    }
    return
  }
  func.func @transform_0(%arg0: i32, %arg1: i32, %arg2: i32) -> (i32, i32) {
    %c0_i32 = arith.constant 0 : i32
    return %arg0, %arg2 : i32, i32
  }
  func.func @transform_1(%arg0: i32, %arg1: i32, %arg2: i32) -> (i32, i32) {
    %c0_i32 = arith.constant 0 : i32
    return %arg2, %arg1 : i32, i32
  }
  func.func @transform_2(%arg0: i32, %arg1: i32, %arg2: i32) -> (i32, i32) {
    %c0_i32 = arith.constant 0 : i32
    %c0_i32_0 = arith.constant 0 : i32
    return %c0_i32, %arg1 : i32, i32
  }
  func.func @transform_3(%arg0: i32, %arg1: i32, %arg2: i32) -> (i32, i32) {
    %c0_i32 = arith.constant 0 : i32
    return %arg0, %arg1 : i32, i32
  }
  func.func @transform_4(%arg0: i32, %arg1: i32, %arg2: i32) -> (i32, i32) {
    %c0_i32 = arith.constant 0 : i32
    return %arg0, %arg1 : i32, i32
  }
}

module attributes {stable_mosaic.version = 11 : i64} {
  func.func @_dense_kernel(%arg0: i32, %arg1: i32, %arg2: i32, %arg3: memref<128x128xbf16, #tpu.memory_space<vmem>>, %arg4: memref<128x512xbf16, #tpu.memory_space<vmem>>, %arg5: memref<1x512xf32, #tpu.memory_space<vmem>>, %arg6: memref<128x512xbf16, #tpu.memory_space<vmem>>, %arg7: memref<128x512xf32, #tpu.memory_space<vmem>>) attributes {dimension_semantics = [#tpu.dimension_semantics<parallel>, #tpu.dimension_semantics<parallel>, #tpu.dimension_semantics<arbitrary>], iteration_bounds = array<i64: 2, 1, 1>, scalar_prefetch = 0 : i64, scratch_operands = 1 : i64, tpu.core_type = #tpu.core_type<tc>, window_params = [{transform_indices = @transform_0, window_bounds = array<i64: 128, 128>}, {transform_indices = @transform_1, window_bounds = array<i64: 128, 512>}, {transform_indices = @transform_2, window_bounds = array<i64: 1, 512>}, {transform_indices = @transform_3, window_bounds = array<i64: 128, 512>}]} {
    %c0_i32 = arith.constant 0 : i32
    %0 = arith.cmpi eq, %arg2, %c0_i32 : i32
    %1 = arith.extui %0 : i1 to i32
    %c0_i32_0 = arith.constant 0 : i32
    %2 = arith.cmpi ne, %1, %c0_i32_0 : i32
    scf.if %2 {
      %cst_10 = arith.constant 0.000000e+00 : f32
      %12 = vector.broadcast %cst_10 : f32 to vector<128x512xf32>
      %c0_11 = arith.constant 0 : index
      %c0_12 = arith.constant 0 : index
      %13 = vector.load %arg7[%c0_11, %c0_12] : memref<128x512xf32, #tpu.memory_space<vmem>>, vector<128x512xf32>
      tpu.vector_store %arg7[%c0_11, %c0_12], %12 {strides = array<i32>} : memref<128x512xf32, #tpu.memory_space<vmem>>, vector<128x512xf32>,
    } else {
    }
    %c0 = arith.constant 0 : index
    %c0_1 = arith.constant 0 : index
    %3 = vector.load %arg7[%c0, %c0_1] : memref<128x512xf32, #tpu.memory_space<vmem>>, vector<128x512xf32>
    %c0_2 = arith.constant 0 : index
    %c0_3 = arith.constant 0 : index
    %4 = vector.load %arg3[%c0_2, %c0_3] : memref<128x128xbf16, #tpu.memory_space<vmem>>, vector<128x128xbf16>
    %c0_4 = arith.constant 0 : index
    %c0_5 = arith.constant 0 : index
    %5 = vector.load %arg4[%c0_4, %c0_5] : memref<128x512xbf16, #tpu.memory_space<vmem>>, vector<128x512xbf16>
    %cst = arith.constant dense<0.000000e+00> : vector<128x512xf32>
    %6 = tpu.matmul %4, %5, %cst {dimension_numbers = #tpu.dot_dimension_numbers<[1], [0], [0], [1], [0, 0, 1, 1], [], []>} : vector<128x128xbf16>, vector<128x512xbf16>, vector<128x512xf32> -> vector<128x512xf32>
    %7 = arith.addf %3, %6 : vector<128x512xf32>
    %c0_6 = arith.constant 0 : index
    %c0_7 = arith.constant 0 : index
    %8 = vector.load %arg7[%c0_6, %c0_7] : memref<128x512xf32, #tpu.memory_space<vmem>>, vector<128x512xf32>
    tpu.vector_store %arg7[%c0_6, %c0_7], %7 {strides = array<i32>} : memref<128x512xf32, #tpu.memory_space<vmem>>, vector<128x512xf32>,
    %c0_i32_8 = arith.constant 0 : i32
    %9 = arith.cmpi eq, %arg2, %c0_i32_8 : i32
    %10 = arith.extui %9 : i1 to i32
    %c0_i32_9 = arith.constant 0 : i32
    %11 = arith.cmpi ne, %10, %c0_i32_9 : i32
    scf.if %11 {
      %c0_10 = arith.constant 0 : index
      %c0_11 = arith.constant 0 : index
      %12 = vector.load %arg7[%c0_10, %c0_11] : memref<128x512xf32, #tpu.memory_space<vmem>>, vector<128x512xf32>
      %c0_12 = arith.constant 0 : index
      %c0_13 = arith.constant 0 : index
      %13 = vector.load %arg5[%c0_12, %c0_13] : memref<1x512xf32, #tpu.memory_space<vmem>>, vector<1x512xf32>
      %14 = vector.broadcast %13 : vector<1x512xf32> to vector<128x512xf32>
      %15 = arith.addf %12, %14 : vector<128x512xf32>
      %16 = arith.mulf %15, %15 : vector<128x512xf32>
      %17 = arith.mulf %15, %16 : vector<128x512xf32>
      %cst_14 = arith.constant 4.471500e-02 : f32
      %18 = vector.broadcast %cst_14 : f32 to vector<128x512xf32>
      %19 = arith.mulf %18, %17 : vector<128x512xf32>
      %20 = arith.addf %15, %19 : vector<128x512xf32>
      %cst_15 = arith.constant 0.797884583 : f32
      %21 = vector.broadcast %cst_15 : f32 to vector<128x512xf32>
      %22 = arith.mulf %21, %20 : vector<128x512xf32>
      %23 = math.tanh %22 : vector<128x512xf32>
      %cst_16 = arith.constant 1.000000e+00 : f32
      %24 = vector.broadcast %cst_16 : f32 to vector<128x512xf32>
      %25 = arith.addf %24, %23 : vector<128x512xf32>
      %cst_17 = arith.constant 5.000000e-01 : f32
      %26 = vector.broadcast %cst_17 : f32 to vector<128x512xf32>
      %27 = arith.mulf %26, %25 : vector<128x512xf32>
      %28 = arith.mulf %15, %27 : vector<128x512xf32>
      %29 = arith.truncf %28 : vector<128x512xf32> to vector<128x512xbf16>
      %c0_18 = arith.constant 0 : index
      %c0_19 = arith.constant 0 : index
      %30 = vector.load %arg6[%c0_18, %c0_19] : memref<128x512xbf16, #tpu.memory_space<vmem>>, vector<128x512xbf16>
      tpu.vector_store %arg6[%c0_18, %c0_19], %29 {strides = array<i32>} : memref<128x512xbf16, #tpu.memory_space<vmem>>, vector<128x512xbf16>,
    } else {
    }
    return
  }
  func.func @transform_0(%arg0: i32, %arg1: i32, %arg2: i32) -> (i32, i32) {
    %c0_i32 = arith.constant 0 : i32
    return %arg0, %arg2 : i32, i32
  }
  func.func @transform_1(%arg0: i32, %arg1: i32, %arg2: i32) -> (i32, i32) {
    %c0_i32 = arith.constant 0 : i32
    return %arg2, %arg1 : i32, i32
  }
  func.func @transform_2(%arg0: i32, %arg1: i32, %arg2: i32) -> (i32, i32) {
    %c0_i32 = arith.constant 0 : i32
    %c0_i32_0 = arith.constant 0 : i32
    return %c0_i32, %arg1 : i32, i32
  }
  func.func @transform_3(%arg0: i32, %arg1: i32, %arg2: i32) -> (i32, i32) {
    %c0_i32 = arith.constant 0 : i32
    return %arg0, %arg1 : i32, i32
  }
}

module attributes {stable_mosaic.version = 11 : i64} {
  func.func @_dense_kernel(%arg0: i32, %arg1: i32, %arg2: i32, %arg3: memref<128x512xbf16, #tpu.memory_space<vmem>>, %arg4: memref<512x128xbf16, #tpu.memory_space<vmem>>, %arg5: memref<1x128xf32, #tpu.memory_space<vmem>>, %arg6: memref<128x128xbf16, #tpu.memory_space<vmem>>, %arg7: memref<128x128xbf16, #tpu.memory_space<vmem>>, %arg8: memref<128x128xf32, #tpu.memory_space<vmem>>) attributes {dimension_semantics = [#tpu.dimension_semantics<parallel>, #tpu.dimension_semantics<parallel>, #tpu.dimension_semantics<arbitrary>], iteration_bounds = array<i64: 2, 1, 1>, scalar_prefetch = 0 : i64, scratch_operands = 1 : i64, tpu.core_type = #tpu.core_type<tc>, window_params = [{transform_indices = @transform_0, window_bounds = array<i64: 128, 512>}, {transform_indices = @transform_1, window_bounds = array<i64: 512, 128>}, {transform_indices = @transform_2, window_bounds = array<i64: 1, 128>}, {transform_indices = @transform_3, window_bounds = array<i64: 128, 128>}, {transform_indices = @transform_4, window_bounds = array<i64: 128, 128>}]} {
    %c0_i32 = arith.constant 0 : i32
    %0 = arith.cmpi eq, %arg2, %c0_i32 : i32
    %1 = arith.extui %0 : i1 to i32
    %c0_i32_0 = arith.constant 0 : i32
    %2 = arith.cmpi ne, %1, %c0_i32_0 : i32
    scf.if %2 {
      %cst_10 = arith.constant 0.000000e+00 : f32
      %12 = vector.broadcast %cst_10 : f32 to vector<128x128xf32>
      %c0_11 = arith.constant 0 : index
      %c0_12 = arith.constant 0 : index
      %13 = vector.load %arg8[%c0_11, %c0_12] : memref<128x128xf32, #tpu.memory_space<vmem>>, vector<128x128xf32>
      tpu.vector_store %arg8[%c0_11, %c0_12], %12 {strides = array<i32>} : memref<128x128xf32, #tpu.memory_space<vmem>>, vector<128x128xf32>,
    } else {
    }
    %c0 = arith.constant 0 : index
    %c0_1 = arith.constant 0 : index
    %3 = vector.load %arg8[%c0, %c0_1] : memref<128x128xf32, #tpu.memory_space<vmem>>, vector<128x128xf32>
    %c0_2 = arith.constant 0 : index
    %c0_3 = arith.constant 0 : index
    %4 = vector.load %arg3[%c0_2, %c0_3] : memref<128x512xbf16, #tpu.memory_space<vmem>>, vector<128x512xbf16>
    %c0_4 = arith.constant 0 : index
    %c0_5 = arith.constant 0 : index
    %5 = vector.load %arg4[%c0_4, %c0_5] : memref<512x128xbf16, #tpu.memory_space<vmem>>, vector<512x128xbf16>
    %cst = arith.constant dense<0.000000e+00> : vector<128x128xf32>
    %6 = tpu.matmul %4, %5, %cst {dimension_numbers = #tpu.dot_dimension_numbers<[1], [0], [0], [1], [0, 0, 1, 1], [], []>} : vector<128x512xbf16>, vector<512x128xbf16>, vector<128x128xf32> -> vector<128x128xf32>
    %7 = arith.addf %3, %6 : vector<128x128xf32>
    %c0_6 = arith.constant 0 : index
    %c0_7 = arith.constant 0 : index
    %8 = vector.load %arg8[%c0_6, %c0_7] : memref<128x128xf32, #tpu.memory_space<vmem>>, vector<128x128xf32>
    tpu.vector_store %arg8[%c0_6, %c0_7], %7 {strides = array<i32>} : memref<128x128xf32, #tpu.memory_space<vmem>>, vector<128x128xf32>,
    %c0_i32_8 = arith.constant 0 : i32
    %9 = arith.cmpi eq, %arg2, %c0_i32_8 : i32
    %10 = arith.extui %9 : i1 to i32
    %c0_i32_9 = arith.constant 0 : i32
    %11 = arith.cmpi ne, %10, %c0_i32_9 : i32
    scf.if %11 {
      %c0_10 = arith.constant 0 : index
      %c0_11 = arith.constant 0 : index
      %12 = vector.load %arg8[%c0_10, %c0_11] : memref<128x128xf32, #tpu.memory_space<vmem>>, vector<128x128xf32>
      %c0_12 = arith.constant 0 : index
      %c0_13 = arith.constant 0 : index
      %13 = vector.load %arg5[%c0_12, %c0_13] : memref<1x128xf32, #tpu.memory_space<vmem>>, vector<1x128xf32>
      %14 = vector.broadcast %13 : vector<1x128xf32> to vector<128x128xf32>
      %15 = arith.addf %12, %14 : vector<128x128xf32>
      %c0_14 = arith.constant 0 : index
      %c0_15 = arith.constant 0 : index
      %16 = vector.load %arg6[%c0_14, %c0_15] : memref<128x128xbf16, #tpu.memory_space<vmem>>, vector<128x128xbf16>
      %17 = arith.extf %16 : vector<128x128xbf16> to vector<128x128xf32>
      %18 = arith.addf %15, %17 : vector<128x128xf32>
      %19 = arith.truncf %18 : vector<128x128xf32> to vector<128x128xbf16>
      %c0_16 = arith.constant 0 : index
      %c0_17 = arith.constant 0 : index
      %20 = vector.load %arg7[%c0_16, %c0_17] : memref<128x128xbf16, #tpu.memory_space<vmem>>, vector<128x128xbf16>
      tpu.vector_store %arg7[%c0_16, %c0_17], %19 {strides = array<i32>} : memref<128x128xbf16, #tpu.memory_space<vmem>>, vector<128x128xbf16>,
    } else {
    }
    return
  }
  func.func @transform_0(%arg0: i32, %arg1: i32, %arg2: i32) -> (i32, i32) {
    %c0_i32 = arith.constant 0 : i32
    return %arg0, %arg2 : i32, i32
  }
  func.func @transform_1(%arg0: i32, %arg1: i32, %arg2: i32) -> (i32, i32) {
    %c0_i32 = arith.constant 0 : i32
    return %arg2, %arg1 : i32, i32
  }
  func.func @transform_2(%arg0: i32, %arg1: i32, %arg2: i32) -> (i32, i32) {
    %c0_i32 = arith.constant 0 : i32
    %c0_i32_0 = arith.constant 0 : i32
    return %c0_i32, %arg1 : i32, i32
  }
  func.func @transform_3(%arg0: i32, %arg1: i32, %arg2: i32) -> (i32, i32) {
    %c0_i32 = arith.constant 0 : i32
    return %arg0, %arg1 : i32, i32
  }
  func.func @transform_4(%arg0: i32, %arg1: i32, %arg2: i32) -> (i32, i32) {
    %c0_i32 = arith.constant 0 : i32
    return %arg0, %arg1 : i32, i32
  }
}

module attributes {stable_mosaic.version = 11 : i64} {
  func.func @_lm_head_ce_kernel(%arg0: i32, %arg1: i32, %arg2: memref<128x128xbf16, #tpu.memory_space<vmem>>, %arg3: memref<512x128xbf16, #tpu.memory_space<vmem>>, %arg4: memref<128x1xi32, #tpu.memory_space<vmem>>, %arg5: memref<128x1xf32, #tpu.memory_space<vmem>>, %arg6: memref<128x1xf32, #tpu.memory_space<vmem>>, %arg7: memref<128x1xf32, #tpu.memory_space<vmem>>, %arg8: memref<128x1xf32, #tpu.memory_space<vmem>>, %arg9: memref<128x1xf32, #tpu.memory_space<vmem>>) attributes {dimension_semantics = [#tpu.dimension_semantics<parallel>, #tpu.dimension_semantics<arbitrary>], iteration_bounds = array<i64: 2, 1>, scalar_prefetch = 0 : i64, scratch_operands = 3 : i64, tpu.core_type = #tpu.core_type<tc>, window_params = [{transform_indices = @transform_0, window_bounds = array<i64: 128, 128>}, {transform_indices = @transform_1, window_bounds = array<i64: 512, 128>}, {transform_indices = @transform_2, window_bounds = array<i64: 128, 1>}, {transform_indices = @transform_3, window_bounds = array<i64: 128, 1>}, {transform_indices = @transform_4, window_bounds = array<i64: 128, 1>}]} {
    %c0_i32 = arith.constant 0 : i32
    %0 = arith.cmpi eq, %arg1, %c0_i32 : i32
    %1 = arith.extui %0 : i1 to i32
    %c0_i32_0 = arith.constant 0 : i32
    %2 = arith.cmpi ne, %1, %c0_i32_0 : i32
    scf.if %2 {
      %cst_24 = arith.constant -1.000000e+30 : f32
      %39 = vector.broadcast %cst_24 : f32 to vector<128x1xf32>
      %c0_25 = arith.constant 0 : index
      %c0_26 = arith.constant 0 : index
      %40 = vector.load %arg7[%c0_25, %c0_26] : memref<128x1xf32, #tpu.memory_space<vmem>>, vector<128x1xf32>
      tpu.vector_store %arg7[%c0_25, %c0_26], %39 {strides = array<i32>} : memref<128x1xf32, #tpu.memory_space<vmem>>, vector<128x1xf32>,
      %cst_27 = arith.constant 0.000000e+00 : f32
      %41 = vector.broadcast %cst_27 : f32 to vector<128x1xf32>
      %c0_28 = arith.constant 0 : index
      %c0_29 = arith.constant 0 : index
      %42 = vector.load %arg8[%c0_28, %c0_29] : memref<128x1xf32, #tpu.memory_space<vmem>>, vector<128x1xf32>
      tpu.vector_store %arg8[%c0_28, %c0_29], %41 {strides = array<i32>} : memref<128x1xf32, #tpu.memory_space<vmem>>, vector<128x1xf32>,
      %cst_30 = arith.constant 0.000000e+00 : f32
      %43 = vector.broadcast %cst_30 : f32 to vector<128x1xf32>
      %c0_31 = arith.constant 0 : index
      %c0_32 = arith.constant 0 : index
      %44 = vector.load %arg9[%c0_31, %c0_32] : memref<128x1xf32, #tpu.memory_space<vmem>>, vector<128x1xf32>
      tpu.vector_store %arg9[%c0_31, %c0_32], %43 {strides = array<i32>} : memref<128x1xf32, #tpu.memory_space<vmem>>, vector<128x1xf32>,
    } else {
    }
    %c0 = arith.constant 0 : index
    %c0_1 = arith.constant 0 : index
    %3 = vector.load %arg2[%c0, %c0_1] : memref<128x128xbf16, #tpu.memory_space<vmem>>, vector<128x128xbf16>
    %c0_2 = arith.constant 0 : index
    %c0_3 = arith.constant 0 : index
    %4 = vector.load %arg3[%c0_2, %c0_3] : memref<512x128xbf16, #tpu.memory_space<vmem>>, vector<512x128xbf16>
    %cst = arith.constant dense<0.000000e+00> : vector<128x512xf32>
    %5 = tpu.matmul %3, %4, %cst {dimension_numbers = #tpu.dot_dimension_numbers<[1], [1], [0], [0], [0, 0, 1, 0], [], []>} : vector<128x128xbf16>, vector<512x128xbf16>, vector<128x512xf32> -> vector<128x512xf32>
    %c0_4 = arith.constant 0 : index
    %c0_5 = arith.constant 0 : index
    %6 = vector.load %arg4[%c0_4, %c0_5] : memref<128x1xi32, #tpu.memory_space<vmem>>, vector<128x1xi32>
    %7 = tpu.iota {dimensions = array<i32: 1>} : vector<128x512xi32>
    %c512_i32 = arith.constant 512 : i32
    %8 = arith.muli %arg1, %c512_i32 : i32
    %9 = vector.broadcast %8 : i32 to vector<128x512xi32>
    %10 = arith.addi %7, %9 : vector<128x512xi32>
    %c0_6 = arith.constant 0 : index
    %c0_7 = arith.constant 0 : index
    %11 = vector.load %arg9[%c0_6, %c0_7] : memref<128x1xf32, #tpu.memory_space<vmem>>, vector<128x1xf32>
    %12 = vector.broadcast %6 : vector<128x1xi32> to vector<128x512xi32>
    %13 = arith.cmpi eq, %10, %12 : vector<128x512xi32>
    %cst_8 = arith.constant 0.000000e+00 : f32
    %14 = vector.broadcast %cst_8 : f32 to vector<128x512xf32>
    %15 = arith.select %13, %5, %14 : vector<128x512xi1>, vector<128x512xf32>
    %cst_9 = arith.constant dense<0.000000e+00> : vector<128xf32>
    %16 = vector.multi_reduction <add>, %15, %cst_9 [1] : vector<128x512xf32> to vector<128xf32>
    %17 = vector.shape_cast %16 : vector<128xf32> to vector<128x1xf32>
    %18 = arith.addf %11, %17 : vector<128x1xf32>
    %c0_10 = arith.constant 0 : index
    %c0_11 = arith.constant 0 : index
    %19 = vector.load %arg9[%c0_10, %c0_11] : memref<128x1xf32, #tpu.memory_space<vmem>>, vector<128x1xf32>
    tpu.vector_store %arg9[%c0_10, %c0_11], %18 {strides = array<i32>} : memref<128x1xf32, #tpu.memory_space<vmem>>, vector<128x1xf32>,
    %c0_12 = arith.constant 0 : index
    %c0_13 = arith.constant 0 : index
    %20 = vector.load %arg7[%c0_12, %c0_13] : memref<128x1xf32, #tpu.memory_space<vmem>>, vector<128x1xf32>
    %cst_14 = arith.constant dense<0xFF800000> : vector<128xf32>
    %21 = vector.multi_reduction <maximumf>, %5, %cst_14 [1] : vector<128x512xf32> to vector<128xf32>
    %22 = vector.shape_cast %21 : vector<128xf32> to vector<128x1xf32>
    %23 = arith.maximumf %20, %22 : vector<128x1xf32>
    %c0_15 = arith.constant 0 : index
    %c0_16 = arith.constant 0 : index
    %24 = vector.load %arg8[%c0_15, %c0_16] : memref<128x1xf32, #tpu.memory_space<vmem>>, vector<128x1xf32>
    %25 = arith.subf %20, %23 : vector<128x1xf32>
    %26 = math.exp %25 : vector<128x1xf32>
    %27 = arith.mulf %24, %26 : vector<128x1xf32>
    %28 = vector.broadcast %23 : vector<128x1xf32> to vector<128x512xf32>
    %29 = arith.subf %5, %28 : vector<128x512xf32>
    %30 = math.exp %29 : vector<128x512xf32>
    %cst_17 = arith.constant dense<0.000000e+00> : vector<128xf32>
    %31 = vector.multi_reduction <add>, %30, %cst_17 [1] : vector<128x512xf32> to vector<128xf32>
    %32 = vector.shape_cast %31 : vector<128xf32> to vector<128x1xf32>
    %33 = arith.addf %27, %32 : vector<128x1xf32>
    %c0_18 = arith.constant 0 : index
    %c0_19 = arith.constant 0 : index
    %34 = vector.load %arg8[%c0_18, %c0_19] : memref<128x1xf32, #tpu.memory_space<vmem>>, vector<128x1xf32>
    tpu.vector_store %arg8[%c0_18, %c0_19], %33 {strides = array<i32>} : memref<128x1xf32, #tpu.memory_space<vmem>>, vector<128x1xf32>,
    %c0_20 = arith.constant 0 : index
    %c0_21 = arith.constant 0 : index
    %35 = vector.load %arg7[%c0_20, %c0_21] : memref<128x1xf32, #tpu.memory_space<vmem>>, vector<128x1xf32>
    tpu.vector_store %arg7[%c0_20, %c0_21], %23 {strides = array<i32>} : memref<128x1xf32, #tpu.memory_space<vmem>>, vector<128x1xf32>,
    %c0_i32_22 = arith.constant 0 : i32
    %36 = arith.cmpi eq, %arg1, %c0_i32_22 : i32
    %37 = arith.extui %36 : i1 to i32
    %c0_i32_23 = arith.constant 0 : i32
    %38 = arith.cmpi ne, %37, %c0_i32_23 : i32
    scf.if %38 {
      %c0_24 = arith.constant 0 : index
      %c0_25 = arith.constant 0 : index
      %39 = vector.load %arg7[%c0_24, %c0_25] : memref<128x1xf32, #tpu.memory_space<vmem>>, vector<128x1xf32>
      %c0_26 = arith.constant 0 : index
      %c0_27 = arith.constant 0 : index
      %40 = vector.load %arg8[%c0_26, %c0_27] : memref<128x1xf32, #tpu.memory_space<vmem>>, vector<128x1xf32>
      %41 = math.log %40 : vector<128x1xf32>
      %42 = arith.addf %39, %41 : vector<128x1xf32>
      %c0_28 = arith.constant 0 : index
      %c0_29 = arith.constant 0 : index
      %43 = vector.load %arg9[%c0_28, %c0_29] : memref<128x1xf32, #tpu.memory_space<vmem>>, vector<128x1xf32>
      %44 = arith.subf %42, %43 : vector<128x1xf32>
      %c0_30 = arith.constant 0 : index
      %c0_31 = arith.constant 0 : index
      %45 = vector.load %arg5[%c0_30, %c0_31] : memref<128x1xf32, #tpu.memory_space<vmem>>, vector<128x1xf32>
      %46 = arith.mulf %44, %45 : vector<128x1xf32>
      %c0_32 = arith.constant 0 : index
      %c0_33 = arith.constant 0 : index
      %47 = vector.load %arg6[%c0_32, %c0_33] : memref<128x1xf32, #tpu.memory_space<vmem>>, vector<128x1xf32>
      tpu.vector_store %arg6[%c0_32, %c0_33], %46 {strides = array<i32>} : memref<128x1xf32, #tpu.memory_space<vmem>>, vector<128x1xf32>,
    } else {
    }
    return
  }
  func.func @transform_0(%arg0: i32, %arg1: i32) -> (i32, i32) {
    %c0_i32 = arith.constant 0 : i32
    %c0_i32_0 = arith.constant 0 : i32
    return %arg0, %c0_i32 : i32, i32
  }
  func.func @transform_1(%arg0: i32, %arg1: i32) -> (i32, i32) {
    %c0_i32 = arith.constant 0 : i32
    %c0_i32_0 = arith.constant 0 : i32
    return %arg1, %c0_i32 : i32, i32
  }
  func.func @transform_2(%arg0: i32, %arg1: i32) -> (i32, i32) {
    %c0_i32 = arith.constant 0 : i32
    %c0_i32_0 = arith.constant 0 : i32
    return %arg0, %c0_i32 : i32, i32
  }
  func.func @transform_3(%arg0: i32, %arg1: i32) -> (i32, i32) {
    %c0_i32 = arith.constant 0 : i32
    %c0_i32_0 = arith.constant 0 : i32
    return %arg0, %c0_i32 : i32, i32
  }
  func.func @transform_4(%arg0: i32, %arg1: i32) -> (i32, i32) {
    %c0_i32 = arith.constant 0 : i32
    %c0_i32_0 = arith.constant 0 : i32
    return %arg0, %c0_i32 : i32, i32
  }
}

</mosaic_0001>

<bundles_post_ra>
// kernel: tile.6
= control target key start
LH: loop header
LB: loop body
LE: loop exit
PB: predicated region body
PF: predicated region fallthrough
CT: control target
= control target key end

     0   :  { %s22_s0 = inlined_call_operand.vmem [shape: f32[2], index: 0, kind: input, shape index: {}]   ;;  %s23_s1 = inlined_call_operand.vmem [shape: f32[4,2], index: 1, kind: output, shape index: {}]  }
   0x1   :  { %v4_v0 = vld [vmem:[%s22_s0] ss:$0 sm:$0xff] }
   0x2   :  { %5 = vst [vmem:[%s23_s1] sm:$0xf] %v4_v0 }

// kernel: mul.21
= control target key start
LH: loop header
LB: loop body
LE: loop exit
PB: predicated region body
PF: predicated region fallthrough
CT: control target
= control target key end

     0   :  { %vm8_vm0 = vcmask 15360   ;;  %s40_s8 = smov 2   ;;  %s41_s9 = smov 4   ;;  %vm14_vm1 = vcmask 64560   ;;  %vm20_vm2 = vcmask 48160   ;;  %vm26_vm3 = vcmask 31760   ;;  %s58_s0 = inlined_call_operand.vmem [shape: f32[4,2], index: 0, kind: input, shape index: {}]   ;;  %s59_s1 = inlined_call_operand.vmem [shape: f32[8], index: 1, kind: output, shape index: {}]  }
   0x1   :  { %v5_v0 = vld [vmem:[%s58_s0] sm:$0xf]  ;;  %s39_s0 = smov 6  }
   0x2   :  { %6 = vst [vmem:[#allocation1] sm:$0xf] %v5_v0 }
   0x9   :  { %v11_v1 = vld [vmem:[#allocation1 + $0x3] sm:$0x1]   ;;  %v23_v2 = vld [vmem:[#allocation1 + $0x1] sm:$0x1]   ;;  %v7_v3 = vld [vmem:[#allocation1] sm:$0x1]  }
   0xa   :  { %12 = vrot.lane.b32.xlu0 %v11_v1, %s39_s0  ;;  %24 = vrot.lane.b32.xlu1 %v23_v2, %s40_s8  ;;  %v17_v4 = vld [vmem:[#allocation1 + $0x2] sm:$0x1]   ;;  %9 = vst.msk [vmem:[#allocation0] sm:$0x1] %vm8_vm0, %v7_v3  }
   0xe   :  { %18 = vrot.lane.b32.xlu0 %v17_v4, %s41_s9 }
  0x7c   :  { %v13_v5 = vpop.permute.xlu0 %12   ;;  %v25_v6 = vpop.permute.xlu1 %24  }
  0x7d   :  { %15 = vst.msk [vmem:[#allocation0] sm:$0x1] %vm14_vm1, %v13_v5  }
  0x80   :  { %v19_v7 = vpop.permute.xlu0 %18  }
  0x81   :  { %21 = vst.msk [vmem:[#allocation0] sm:$0x1] %vm20_vm2, %v19_v7  }
  0x82   :  { %27 = vst.msk [vmem:[#allocation0] sm:$0x1] %vm26_vm3, %v25_v6  }
  0x89   :  { %v32_v8 = vld [vmem:[#allocation0] sm:$0x1] }
  0x8a   :  { %35 = vst [vmem:[%s59_s1] sm:$0x1] %v32_v8 }

// kernel: gptj_training_step.15
= control target key start
LH: loop header
LB: loop body
LE: loop exit
PB: predicated region body
PF: predicated region fallthrough
CT: control target
= control target key end

     0   :  { %s1329_s12 = smov 0   ;;  %s1331_s13 = smov 0   ;;  %s1520_s0 = inlined_call_operand.vmem [shape: bf16[256,128], index: 0, kind: input, shape index: {}]   ;;  %s1521_s1 = inlined_call_operand.vmem [shape: bf16[128,384], index: 1, kind: input, shape index: {}]   ;;  %s1522_s2 = inlined_call_operand.vmem [shape: f32[1,384], index: 2, kind: input, shape index: {}]   ;;  %s1523_s3 = inlined_call_operand.vmem [shape: bf16[256,384], index: 3, kind: output, shape index: {}]  }
   0x1   :  { %s1333_s14 = smov 0   ;;  %s1335_s15 = smov 0  }
   0x2   :  { %s1337_s16 = smov 0   ;;  %s1339_s17 = smov 0  }
   0x3   :  { %s1341_s18 = smov 0   ;;  %s1343_s19 = smov 0  }
   0x4   :  { %s1345_s20 = smov 0  }
   0x5 LB: > { %s971_s21 = sadd.s32 4294967295, %s1307_s20   ;;  %s28_s22 = sadd.s32 1, %s1299_s18  ;;  %s1307_s20 = sphi %s1345_s20, %s13_s20   ;;  %s1303_s19 = sphi %s1343_s19, %s1532_s19   ;;  %s1299_s18 = sphi %s1341_s18, %s1531_s18   ;;  %s1295_s17 = sphi %s1339_s17, %s1530_s17   ;;  %s1291_s16 = sphi %s1337_s16, %s1529_s16   ;;  %s1287_s15 = sphi %s1335_s15, %s1528_s15   ;;  %s1283_s14 = sphi %s1333_s14, %s1527_s14   ;;  %s1279_s13 = sphi %s1331_s13, %s1526_s13   ;;  %s1275_s12 = sphi %s1329_s12, %s1525_s12  }
   0x6   : > { %p30_p0 = scmp.ge.s32.totalorder %s28_s22, 3  ;;  %s32_s23 = sadd.s32 1, %s1303_s19 }
   0x7   : > { %s69_s24 = sadd.s32 1, %s1287_s15  ;;  %p76_p1 = scmp.ne.s32.totalorder %s1287_s15, %s1283_s14 }
   0x8   : > { %s1534_s22 = smov (%p30_p0, %s28_s22), 0  ;;  %s1536_s23 = smov (!%p30_p0, %s32_s23), %s1303_s19 }
   0x9   : > { %s65_s25 = ssub.s32 %s1299_s18, %s1534_s22  ;;  %p77_p2 = scmp.eq.s32.totalorder %s1307_s20, 0 }
   0xa   : > { %p34_p3 = scmp.ge.s32.totalorder %s1536_s23, 2  ;;  %p67_p4 = scmp.eq.s32.totalorder %s65_s25, 0 }
   0xb   : > { %p78_p5 = por %p77_p2, %p76_p1  ;;  %s123_s26 = sadd.s32 1, %s1279_s13 }
   0xc   : > { %s1538_s23 = smov (%p34_p3, %s1536_s23), 0  ;;  %p133_p6 = scmp.ne.s32.totalorder %s1279_s13, %s1275_s12 }
   0xd   : > { %s1390_s27 = scalar_select %p67_p4, %s1287_s15, %s69_s24  }
   0xe   : > { %s118_s28 = ssub.s32 %s1303_s19, %s1538_s23  ;;  %p134_p7 = scmp.eq.s32.totalorder %s971_s21, 5 }
   0xf   : > { %s120_s29 = sor.u32 %s118_s28, %s65_s25  ;;  %p974_p10 = scmp.ge.s32.totalorder %s1307_s20, 6 }
  0x10   : > { %p121_p8 = scmp.eq.s32.totalorder %s120_s29, 0  ;;  %p1396_p9 = por %p134_p7, %p133_p6 }
  0x11   : > { %156 = sbr.rel (%p974_p10) target bundleno = 36 (0x24), region = 16 }
  0x12   : > { %s1401_s4 = scalar_select %p121_p8, %s1279_s13, %s123_s26  }
  0x16   : > { %171 = sbr.rel (!%p78_p5) target bundleno = 36 (0x24), region = 24  ;;  %s173_s5 = sand.u32 (%p78_p5), 1, %s1287_s15  }
  0x17   : > { %s976_s6 = sshll.u32 (%p78_p5), %s1299_s18, 2  ;;  %s975_s7 = sshll.u32 (%p78_p5), %s173_s5, 6 }
  0x18   : > { %s1409_s10 = scalar_lea.vmem (%p78_p5), %s1521_s1, %s976_s6  ;;  %s175_s11 = scalar_lea.vmem (%p78_p5), [#allocation3], %s975_s7 }
  0x19   : > { %v197_v0 = vld [vmem:[%s1409_s10] sm:$0xf] (%p78_p5)  ;;  %v199_v1 = vld [vmem:[%s1409_s10 + $0xc] sm:$0xf] (%p78_p5)  ;;  %v201_v2 = vld [vmem:[%s1409_s10 + $0x18] sm:$0xf] (%p78_p5) }
  0x1a   : > { %198 = vst [vmem:[%s175_s11] sm:$0xf] (%p78_p5), %v197_v0  ;;  %200 = vst [vmem:[%s175_s11 + $0x4] sm:$0xf] (%p78_p5), %v199_v1  ;;  %v203_v3 = vld [vmem:[%s1409_s10 + $0x24] sm:$0xf] (%p78_p5) }
  0x1b   : > { %v205_v4 = vld [vmem:[%s1409_s10 + $0x30] sm:$0xf]  ;;  %202 = vst [vmem:[%s175_s11 + $0x8] sm:$0xf] %v201_v2  ;;  %204 = vst [vmem:[%s175_s11 + $0xc] sm:$0xf] %v203_v3 }
  0x1c   : > { %206 = vst [vmem:[%s175_s11 + $0x10] sm:$0xf] %v205_v4  ;;  %v207_v5 = vld [vmem:[%s1409_s10 + $0x3c] sm:$0xf]  ;;  %v209_v6 = vld [vmem:[%s1409_s10 + $0x48] sm:$0xf] }
  0x1d   : > { %v211_v7 = vld [vmem:[%s1409_s10 + $0x54] sm:$0xf]  ;;  %208 = vst [vmem:[%s175_s11 + $0x14] sm:$0xf] %v207_v5  ;;  %210 = vst [vmem:[%s175_s11 + $0x18] sm:$0xf] %v209_v6 }
  0x1e   : > { %212 = vst [vmem:[%s175_s11 + $0x1c] sm:$0xf] %v211_v7  ;;  %v213_v8 = vld [vmem:[%s1409_s10 + $0x60] sm:$0xf]  ;;  %v215_v9 = vld [vmem:[%s1409_s10 + $0x6c] sm:$0xf] }
  0x1f   : > { %v217_v10 = vld [vmem:[%s1409_s10 + $0x78] sm:$0xf]  ;;  %214 = vst [vmem:[%s175_s11 + $0x20] sm:$0xf] %v213_v8  ;;  %216 = vst [vmem:[%s175_s11 + $0x24] sm:$0xf] %v215_v9 }
  0x20   : > { %218 = vst [vmem:[%s175_s11 + $0x28] sm:$0xf] %v217_v10  ;;  %v219_v11 = vld [vmem:[%s1409_s10 + $0x84] sm:$0xf]  ;;  %v221_v12 = vld [vmem:[%s1409_s10 + $0x90] sm:$0xf] }
  0x21   : > { %v223_v13 = vld [vmem:[%s1409_s10 + $0x9c] sm:$0xf]  ;;  %220 = vst [vmem:[%s175_s11 + $0x2c] sm:$0xf] %v219_v11  ;;  %222 = vst [vmem:[%s175_s11 + $0x30] sm:$0xf] %v221_v12 }
  0x22   : > { %224 = vst [vmem:[%s175_s11 + $0x34] sm:$0xf] %v223_v13  ;;  %v225_v14 = vld [vmem:[%s1409_s10 + $0xa8] sm:$0xf]  ;;  %v227_v15 = vld [vmem:[%s1409_s10 + $0xb4] sm:$0xf] }
  0x23   : > { %226 = vst [vmem:[%s175_s11 + $0x38] sm:$0xf] %v225_v14  ;;  %228 = vst [vmem:[%s175_s11 + $0x3c] sm:$0xf] %v227_v15 }
  0x24 PF: > { %p977_p11 = scmp.ge.s32.totalorder %s1307_s20, 1  ;;  %p289_p12 = scmp.lt.s32.totalorder %s1307_s20, 7 }
  0x26   : > { %p290_p13 = pnand %p977_p11, %p289_p12 }
  0x27   : > { %s296_s21 = sand.u32 (!%p290_p13), 1, %s1283_s14   ;;  %s980_s24 = sshll.u32 (!%p290_p13), %s1295_s17, 4 }
  0x28   : > { %293 = sbr.rel (%p290_p13) target bundleno = 300 (0x12c), region = 69  ;;  %s978_s25 = sshll.u32 (!%p290_p13), %s296_s21, 6 }
  0x29   : > { %p330_p0 = scmp.lt.s32.totalorder (!%p290_p13), %s980_s24, 31  ;;  %s1431_s26 = scalar_lea.vmem (!%p290_p13), [#allocation3], %s978_s25 }
  0x2a   : > { %p339_p1 = scmp.lt.s32.totalorder (!%p290_p13), %s1291_s16, 2  ;;  %s326_s10 = sand.u32 (!%p290_p13), 1, %s1275_s12  }
  0x2b   : > { %s979_s11 = sshll.u32 (!%p290_p13), %s326_s10, 6 }
  0x2c   : > { %s1460_s12 = scalar_lea.vmem (!%p290_p13), [#allocation4], %s979_s11 }
  0x2d   : > { %v1221_v16 = vld [vmem:[%s1431_s26 + $0x38] sm:$0xff]   ;;  %s1540_s24 = smov (!%p330_p0, %s980_s24), 31  ;;  %v1222_v17 = vld [vmem:[%s1431_s26 + $0x30] sm:$0xff]   ;;  %v1223_v18 = vld [vmem:[%s1431_s26 + $0x28] sm:$0xff]   ;;  %s1148_s21 = smul.u32 (%p1396_p9), 48, %s1295_s17 }
  0x2e   : > { %1100 = vmatprep.subr.bf16.mxu0 %v1221_v16  ;;  %1132 = vmatprep.subr.bf16.mxu1 %v1221_v16  ;;  %s981_s28 = sshll.u32 %s1540_s24, 2  ;;  %v1224_v19 = vld [vmem:[%s1431_s26 + $0x20] sm:$0xff]   ;;  %v1225_v22 = vld [vmem:[%s1431_s26 + $0x18] sm:$0xff]   ;;  %v1226_v23 = vld [vmem:[%s1431_s26 + $0x10] sm:$0xff]  }
  0x2f   : > { %1101 = vmatpush3.bf16.msra.mxu0 %v1221_v16  ;;  %1140 = vmatpush3.bf16.msra.mxu1 %v1221_v16  ;;  %s1439_s5 = scalar_lea.vmem %s1520_s0, %s981_s28  ;;  %v1227_v24 = vld [vmem:[%s1431_s26 + $0x8] sm:$0xff]   ;;  %v1228_v25 = vld [vmem:[%s1431_s26] sm:$0xff]   ;;  %s768_s30 = sadd.s32 (%p1396_p9), %s1291_s16, %s1148_s21 }
  0x30   : > { %1102 = vmatprep.subr.bf16.mxu0 %v1222_v17  ;;  %1133 = vmatprep.subr.bf16.mxu1 %v1222_v17  ;;  %v1229_v20 = vld [vmem:[%s1439_s5] sm:$0xff]   ;;  %v1231_v26 = vld [vmem:[%s1439_s5 + $0x8] sm:$0xff]   ;;  %v1233_v28 = vld [vmem:[%s1439_s5 + $0x10] sm:$0xff]   ;;  %s340_s6 = scalar_select %p339_p1, %s1291_s16, 2 }
  0x31   : > { %v1230_v21 = vld [vmem:[%s1439_s5 + $0x20] sm:$0xff]   ;;  %1116 = vmatprep.mubr.bf16.mxu0 %v1229_v20  ;;  %v1232_v27 = vld [vmem:[%s1439_s5 + $0x28] sm:$0xff]   ;;  %v1234_v29 = vld [vmem:[%s1439_s5 + $0x30] sm:$0xff]   ;;  %s1018_s24 = sshll.u32 (%p1396_p9), %s768_s30, 2 }
  0x32   : > { %1124 = vmatprep.mubr.bf16.mxu1 %v1230_v21  ;;  %v1235_v30 = vld [vmem:[%s1439_s5 + $0x18] sm:$0xff]   ;;  %s341_s9 = scalar_lea.vmem %s1522_s2, %s340_s6  ;;  %s770_s28 = scalar_lea.vmem (%p1396_p9), %s1523_s3, %s1018_s24 }
  0x33   : > { %1103 = vmatpush3.bf16.msra.mxu0 %v1222_v17  ;;  %1141 = vmatpush3.bf16.msra.mxu1 %v1222_v17  ;;  %v1236_v31 = vld [vmem:[%s1439_s5 + $0x38] sm:$0xff]   ;;  %v998_v34 = vld [vmem:[%s341_s9] ss:$0 sm:$0xff] }
  0x34   : > { %1104 = vmatprep.subr.bf16.mxu0 %v1223_v18  ;;  %1134 = vmatprep.subr.bf16.mxu1 %v1223_v18 }
  0x37   : > { %1105 = vmatpush3.bf16.msra.mxu0 %v1223_v18  ;;  %1142 = vmatpush3.bf16.msra.mxu1 %v1223_v18 }
  0x38   : > { %1106 = vmatprep.subr.bf16.mxu0 %v1224_v19  ;;  %1135 = vmatprep.subr.bf16.mxu1 %v1224_v19 }
  0x3b   : > { %1107 = vmatpush3.bf16.msra.mxu0 %v1224_v19  ;;  %1143 = vmatpush3.bf16.msra.mxu1 %v1224_v19 }
  0x3c   : > { %1108 = vmatprep.subr.bf16.mxu0 %v1225_v22  ;;  %1136 = vmatprep.subr.bf16.mxu1 %v1225_v22 }
  0x3f   : > { %1109 = vmatpush3.bf16.msra.mxu0 %v1225_v22  ;;  %1144 = vmatpush3.bf16.msra.mxu1 %v1225_v22 }
  0x40   : > { %1110 = vmatprep.subr.bf16.mxu0 %v1226_v23  ;;  %1137 = vmatprep.subr.bf16.mxu1 %v1226_v23 }
  0x43   : > { %1111 = vmatpush3.bf16.msra.mxu0 %v1226_v23  ;;  %1145 = vmatpush3.bf16.msra.mxu1 %v1226_v23 }
  0x44   : > { %1112 = vmatprep.subr.bf16.mxu0 %v1227_v24  ;;  %1138 = vmatprep.subr.bf16.mxu1 %v1227_v24 }
  0x47   : > { %1113 = vmatpush3.bf16.msra.mxu0 %v1227_v24  ;;  %1146 = vmatpush3.bf16.msra.mxu1 %v1227_v24 }
  0x48   : > { %1114 = vmatprep.subr.bf16.mxu0 %v1228_v25  ;;  %1139 = vmatprep.subr.bf16.mxu1 %v1228_v25 }
  0x4b   : > { %1115 = vmatpush3.bf16.msra.mxu0 %v1228_v25  ;;  %1147 = vmatpush3.bf16.msra.mxu1 %v1228_v25 }
  0x4e   : > { %1117 = vmatmul.mubr.bf16.vlgmr.msra.gmra.mxu0 %v1231_v26  ;;  %1125 = vmatmul.mubr.bf16.vlgmr.msra.gmra.mxu1 %v1232_v27 }
  0x4f   : > { %1120 = vmatprep.mubr.bf16.mxu0 %v1233_v28  ;;  %1128 = vmatprep.mubr.bf16.mxu1 %v1234_v29 }
  0x56   : > { %1121 = vmatmul.mubr.bf16.gmra.mxu0 %v1235_v30  ;;  %1129 = vmatmul.mubr.bf16.gmra.mxu1 %v1236_v31 }
 0x10e   : > { %v1118_v32 = vpop.f32.mrf.mxu0  ;;  %v1126_v33 = vpop.f32.mrf.mxu1 }
 0x10f   : > { %v665_v39 = vadd.f32 %v1118_v32, %v998_v34  ;;  %v673_v40 = vadd.f32 %v1126_v33, %v998_v34 }
 0x110   : > { %v542_v35 = vpop.f32.mrf.mxu0  ;;  %v574_v36 = vpop.f32.mrf.mxu1 }
 0x111   : > { %v663_v43 = vadd.f32 %v998_v34, %v542_v35  ;;  %v671_v44 = vadd.f32 %v998_v34, %v574_v36 }
 0x112   : > { %v1119_v37 = vpop.f32.mrf.mxu0  ;;  %v1127_v38 = vpop.f32.mrf.mxu1 }
 0x113   : > { %v666_v41 = vadd.f32 %v1119_v37, %v998_v34  ;;  %v674_v42 = vadd.f32 %v1127_v38, %v998_v34 }
 0x114   : > { %v545_v45 = vpop.f32.mrf.mxu0  ;;  %v577_v46 = vpop.f32.mrf.mxu1 }
 0x115   : > { %v1045_v47 = vpack.c.bf16 %v666_v41, %v665_v39  ;;  %v1065_v48 = vpack.c.bf16 %v674_v42, %v673_v40  ;;  %v664_v49 = vadd.f32 %v998_v34, %v545_v45  ;;  %v672_v50 = vadd.f32 %v998_v34, %v577_v46 }
 0x116   : > { %v1122_v51 = vpop.f32.mrf.mxu0  ;;  %v1130_v52 = vpop.f32.mrf.mxu1 }
 0x117   : > { %1077 = vst [vmem:[%s1460_s12 + $0x8] sm:$0xff] %v1045_v47   ;;  %1081 = vst [vmem:[%s1460_s12 + $0x28] sm:$0xff] %v1065_v48   ;;  %v1040_v53 = vpack.c.bf16 %v664_v49, %v663_v43  ;;  %v1060_v54 = vpack.c.bf16 %v672_v50, %v671_v44  ;;  %v669_v59 = vadd.f32 %v1122_v51, %v998_v34 }
 0x118   : > { %v558_v55 = vpop.f32.mrf.mxu0  ;;  %v590_v56 = vpop.f32.mrf.mxu1  ;;  %v677_v60 = vadd.f32 %v1130_v52, %v998_v34 }
 0x119   : > { %1041 = vst [vmem:[%s1460_s12] sm:$0xff] %v1040_v53   ;;  %1080 = vst [vmem:[%s1460_s12 + $0x20] sm:$0xff] %v1060_v54   ;;  %v667_v63 = vadd.f32 %v998_v34, %v558_v55  ;;  %v675_v0 = vadd.f32 %v998_v34, %v590_v56 }
 0x11a   : > { %v1123_v57 = vpop.f32.mrf.mxu0  ;;  %v1131_v58 = vpop.f32.mrf.mxu1 }
 0x11b   : > { %v670_v61 = vadd.f32 %v1123_v57, %v998_v34  ;;  %v678_v62 = vadd.f32 %v1131_v58, %v998_v34 }
 0x11c   : > { %v561_v1 = vpop.f32.mrf.mxu0  ;;  %v593_v2 = vpop.f32.mrf.mxu1 }
 0x11d   : > { %v1055_v3 = vpack.c.bf16 %v670_v61, %v669_v59  ;;  %v1075_v4 = vpack.c.bf16 %v678_v62, %v677_v60  ;;  %v668_v5 = vadd.f32 %v998_v34, %v561_v1  ;;  %v676_v6 = vadd.f32 %v998_v34, %v593_v2  ;;  %765 = sbr.rel (!%p1396_p9) target bundleno = 300 (0x12c), region = 85 }
 0x11e   : > { %v791_v11 = vld [vmem:[%s1460_s12 + $0x8] sm:$0xf] (%p1396_p9)  ;;  %v793_v12 = vld [vmem:[%s1460_s12 + $0xc] sm:$0xf] (%p1396_p9) }
 0x11f   : > { %1079 = vst [vmem:[%s1460_s12 + $0x18] sm:$0xff] %v1055_v3   ;;  %1083 = vst [vmem:[%s1460_s12 + $0x38] sm:$0xff] %v1075_v4   ;;  %v1050_v7 = vpack.c.bf16 %v668_v5, %v667_v63  ;;  %v1070_v8 = vpack.c.bf16 %v676_v6, %v675_v0  ;;  %v807_v19 = vld [vmem:[%s1460_s12 + $0x28] sm:$0xf] (%p1396_p9)  ;;  %v809_v20 = vld [vmem:[%s1460_s12 + $0x2c] sm:$0xf] (%p1396_p9) }
 0x120   : > { %v787_v9 = vld [vmem:[%s1460_s12] sm:$0xf] (%p1396_p9)  ;;  %v789_v10 = vld [vmem:[%s1460_s12 + $0x4] sm:$0xf] (%p1396_p9)  ;;  %792 = vst [vmem:[%s770_s28 + $0x18] sm:$0xf] (%p1396_p9), %v791_v11 }
 0x121   : > { %1078 = vst [vmem:[%s1460_s12 + $0x10] sm:$0xff] %v1050_v7   ;;  %1082 = vst [vmem:[%s1460_s12 + $0x30] sm:$0xff] %v1070_v8   ;;  %v803_v17 = vld [vmem:[%s1460_s12 + $0x20] sm:$0xf] (%p1396_p9)  ;;  %v805_v18 = vld [vmem:[%s1460_s12 + $0x24] sm:$0xf] (%p1396_p9) }
 0x122   : > { %788 = vst [vmem:[%s770_s28] sm:$0xf] %v787_v9  ;;  %790 = vst [vmem:[%s770_s28 + $0xc] sm:$0xf] %v789_v10 }
 0x123   : > { %794 = vst [vmem:[%s770_s28 + $0x24] sm:$0xf] %v793_v12  ;;  %804 = vst [vmem:[%s770_s28 + $0x60] sm:$0xf] %v803_v17 }
 0x124   : > { %806 = vst [vmem:[%s770_s28 + $0x6c] sm:$0xf] %v805_v18  ;;  %808 = vst [vmem:[%s770_s28 + $0x78] sm:$0xf] %v807_v19 }
 0x125   : > { %810 = vst [vmem:[%s770_s28 + $0x84] sm:$0xf] %v809_v20 }
 0x126   : > { %v799_v15 = vld [vmem:[%s1460_s12 + $0x18] sm:$0xf]  ;;  %v801_v16 = vld [vmem:[%s1460_s12 + $0x1c] sm:$0xf] }
 0x127   : > { %800 = vst [vmem:[%s770_s28 + $0x48] sm:$0xf] %v799_v15  ;;  %802 = vst [vmem:[%s770_s28 + $0x54] sm:$0xf] %v801_v16  ;;  %v815_v23 = vld [vmem:[%s1460_s12 + $0x38] sm:$0xf] }
 0x128   : > { %v795_v13 = vld [vmem:[%s1460_s12 + $0x10] sm:$0xf]  ;;  %v797_v14 = vld [vmem:[%s1460_s12 + $0x14] sm:$0xf]  ;;  %v817_v24 = vld [vmem:[%s1460_s12 + $0x3c] sm:$0xf] }
 0x129   : > { %v811_v21 = vld [vmem:[%s1460_s12 + $0x30] sm:$0xf]  ;;  %796 = vst [vmem:[%s770_s28 + $0x30] sm:$0xf] %v795_v13  ;;  %798 = vst [vmem:[%s770_s28 + $0x3c] sm:$0xf] %v797_v14 }
 0x12a   : > { %812 = vst [vmem:[%s770_s28 + $0x90] sm:$0xf] %v811_v21  ;;  %v813_v22 = vld [vmem:[%s1460_s12 + $0x34] sm:$0xf]  ;;  %816 = vst [vmem:[%s770_s28 + $0xa8] sm:$0xf] %v815_v23 }
 0x12b   : > { %814 = vst [vmem:[%s770_s28 + $0x9c] sm:$0xf] %v813_v22  ;;  %818 = vst [vmem:[%s770_s28 + $0xb4] sm:$0xf] %v817_v24 }
 0x12c PF: > { %s13_s20 = sadd.s32 1, %s1307_s20   ;;  %s1525_s12 = smov %s1279_s13 }
 0x12d   : > { %p10_p2 = scmp.ge.s32.totalorder %s13_s20, 8   ;;  %s1526_s13 = smov %s1401_s4 }
 0x12e   : > { %s1527_s14 = smov %s1287_s15  ;;  %s1528_s15 = smov %s1390_s27 }
 0x12f   : > { %s1529_s16 = smov %s1299_s18  ;;  %s1530_s17 = smov %s1303_s19 }
 0x130   : > { %s1531_s18 = smov %s1534_s22  ;;  %s1532_s19 = smov %s1538_s23 }
 0x131   :  { %12 = sbr.rel (!%p10_p2) target bundleno = 5 (0x5), region = 163 }

// kernel: gptj_training_step.14
= control target key start
LH: loop header
LB: loop body
LE: loop exit
PB: predicated region body
PF: predicated region fallthrough
CT: control target
= control target key end

     0   :  { %s764_s12 = smov 0   ;;  %s970_s0 = inlined_call_operand.vmem [shape: bf16[256,128], index: 0, kind: input, shape index: {}]   ;;  %s971_s1 = inlined_call_operand.vmem [shape: f32[1,128], index: 1, kind: input, shape index: {}]   ;;  %s972_s2 = inlined_call_operand.vmem [shape: f32[1,128], index: 2, kind: input, shape index: {}]   ;;  %s973_s3 = inlined_call_operand.vmem [shape: bf16[256,128], index: 3, kind: output, shape index: {}]  }
   0x1 LB: > { %s565_s13 = sadd.s32 4294967295, %s742_s12   ;;  %p569_p0 = scmp.ge.s32.totalorder %s742_s12, 1  ;;  %s742_s12 = sphi %s764_s12, %s13_s12  }
   0x2   : > { %p138_p1 = scmp.lt.s32.totalorder %s742_s12, 3 }
   0x4   : > { %p139_p2 = pnand %p569_p0, %p138_p1 }
   0x5   : > { %s570_s14 = sshll.u32 (!%p139_p2), %s565_s13, 4 }
   0x6   : > { %142 = sbr.rel (%p139_p2) target bundleno = 358 (0x166), region = 32  ;;  %p163_p3 = scmp.lt.s32.totalorder (!%p139_p2), %s570_s14, 31 }
   0xb   : > { %s975_s14 = smov (!%p163_p3, %s570_s14), 31 }
   0xc   : > { %s571_s15 = sshll.u32 %s975_s14, 2 }
   0xd   : > { %s780_s18 = scalar_lea.vmem %s970_s0, %s571_s15  ;;  %s918_s25 = scalar_lea.vmem %s973_s3, %s571_s15 }
   0xe   : > { %v611_v0 = vld [vmem:[%s780_s18] sm:$0xff]   ;;  %v682_v1 = vld [vmem:[%s780_s18 + $0x8] sm:$0xff]   ;;  %v683_v6 = vld [vmem:[%s780_s18 + $0x10] sm:$0xff]  }
   0xf   : > { %v612_v2 = vunpack.c.l.bf16 %v611_v0  ;;  %v616_v3 = vunpack.c.l.bf16 %v682_v1  ;;  %v613_v4 = vunpack.c.h.bf16 %v611_v0  ;;  %v617_v5 = vunpack.c.h.bf16 %v682_v1  ;;  %v684_v9 = vld [vmem:[%s780_s18 + $0x18] sm:$0xff]   ;;  %v787_v12 = vld [vmem:[%s780_s18 + $0x20] sm:$0xff]   ;;  %v792_v15 = vld [vmem:[%s780_s18 + $0x28] sm:$0xff]  }
  0x10   : > { %v620_v7 = vunpack.c.l.bf16 %v683_v6  ;;  %v621_v8 = vunpack.c.h.bf16 %v683_v6  ;;  %v624_v10 = vunpack.c.l.bf16 %v684_v9  ;;  %v625_v11 = vunpack.c.h.bf16 %v684_v9  ;;  %v797_v18 = vld [vmem:[%s780_s18 + $0x30] sm:$0xff]   ;;  %v806_v21 = vld [vmem:[%s780_s18 + $0x38] sm:$0xff]  }
  0x11   : > { %206 = vadd.xlane.f32.xlu0 %v612_v2  ;;  %210 = vadd.xlane.f32.xlu1 %v616_v3  ;;  %v628_v13 = vunpack.c.l.bf16 %v787_v12  ;;  %v629_v14 = vunpack.c.h.bf16 %v787_v12  ;;  %v632_v16 = vunpack.c.l.bf16 %v792_v15  ;;  %v633_v17 = vunpack.c.h.bf16 %v792_v15 }
  0x12   : > { %v636_v19 = vunpack.c.l.bf16 %v797_v18  ;;  %v637_v20 = vunpack.c.h.bf16 %v797_v18  ;;  %v640_v22 = vunpack.c.l.bf16 %v806_v21  ;;  %v641_v23 = vunpack.c.h.bf16 %v806_v21 }
  0x15   : > { %208 = vadd.xlane.f32.xlu0 %v613_v4  ;;  %212 = vadd.xlane.f32.xlu1 %v617_v5 }
  0x19   : > { %214 = vadd.xlane.f32.xlu0 %v620_v7  ;;  %216 = vadd.xlane.f32.xlu1 %v621_v8 }
  0x1d   : > { %218 = vadd.xlane.f32.xlu0 %v624_v10  ;;  %220 = vadd.xlane.f32.xlu1 %v625_v11 }
  0x21   : > { %222 = vadd.xlane.f32.xlu0 %v628_v13  ;;  %224 = vadd.xlane.f32.xlu1 %v629_v14 }
  0x25   : > { %226 = vadd.xlane.f32.xlu0 %v632_v16  ;;  %228 = vadd.xlane.f32.xlu1 %v633_v17 }
  0x29   : > { %230 = vadd.xlane.f32.xlu0 %v636_v19  ;;  %232 = vadd.xlane.f32.xlu1 %v637_v20 }
  0x2d   : > { %234 = vadd.xlane.f32.xlu0 %v640_v22  ;;  %236 = vadd.xlane.f32.xlu1 %v641_v23 }
  0x9a   : > { %v207_v24 = vpop.xlane.xlu0 %206  ;;  %v211_v25 = vpop.xlane.xlu1 %210 }
  0x9b   : > { %v239_v26 = vmul.f32 0.0078125, %v207_v24  ;;  %v241_v27 = vmul.f32 0.0078125, %v211_v25 }
  0x9d   : > { %v818_v28 = vsub.f32 %v612_v2, %v239_v26  ;;  %v820_v29 = vsub.f32 %v616_v3, %v241_v27 }
  0x9e   : > { %v209_v30 = vpop.xlane.xlu0 %208  ;;  %v213_v31 = vpop.xlane.xlu1 %212 }
  0x9f   : > { %v240_v32 = vmul.f32 0.0078125, %v209_v30  ;;  %v271_v33 = vmul.f32 %v818_v28, %v818_v28  ;;  %v242_v34 = vmul.f32 0.0078125, %v213_v31  ;;  %v273_v37 = vmul.f32 %v820_v29, %v820_v29 }
  0xa1   : > { %v824_v35 = vsub.f32 %v613_v4, %v240_v32  ;;  %287 = vadd.xlane.f32.xlu0 %v271_v33  ;;  %v826_v36 = vsub.f32 %v617_v5, %v242_v34 }
  0xa2   : > { %v215_v38 = vpop.xlane.xlu0 %214  ;;  %v217_v39 = vpop.xlane.xlu1 %216 }
  0xa3   : > { %v243_v40 = vmul.f32 0.0078125, %v215_v38  ;;  %v272_v41 = vmul.f32 %v824_v35, %v824_v35  ;;  %v244_v42 = vmul.f32 0.0078125, %v217_v39  ;;  %v274_v45 = vmul.f32 %v826_v36, %v826_v36 }
  0xa5   : > { %v832_v43 = vsub.f32 %v620_v7, %v243_v40  ;;  %291 = vadd.xlane.f32.xlu0 %v273_v37  ;;  %289 = vadd.xlane.f32.xlu1 %v272_v41  ;;  %v834_v44 = vsub.f32 %v621_v8, %v244_v42 }
  0xa6   : > { %v219_v46 = vpop.xlane.xlu0 %218  ;;  %v221_v47 = vpop.xlane.xlu1 %220 }
  0xa7   : > { %v245_v48 = vmul.f32 0.0078125, %v219_v46  ;;  %v275_v49 = vmul.f32 %v832_v43, %v832_v43  ;;  %v246_v50 = vmul.f32 0.0078125, %v221_v47  ;;  %v276_v53 = vmul.f32 %v834_v44, %v834_v44 }
  0xa9   : > { %v840_v51 = vsub.f32 %v624_v10, %v245_v48  ;;  %293 = vadd.xlane.f32.xlu1 %v274_v45  ;;  %295 = vadd.xlane.f32.xlu0 %v275_v49  ;;  %v842_v52 = vsub.f32 %v625_v11, %v246_v50 }
  0xaa   : > { %v223_v54 = vpop.xlane.xlu0 %222  ;;  %v225_v55 = vpop.xlane.xlu1 %224 }
  0xab   : > { %v247_v56 = vmul.f32 0.0078125, %v223_v54  ;;  %v277_v57 = vmul.f32 %v840_v51, %v840_v51  ;;  %v248_v58 = vmul.f32 0.0078125, %v225_v55  ;;  %v278_v61 = vmul.f32 %v842_v52, %v842_v52 }
  0xad   : > { %v848_v59 = vsub.f32 %v628_v13, %v247_v56  ;;  %297 = vadd.xlane.f32.xlu1 %v276_v53  ;;  %299 = vadd.xlane.f32.xlu0 %v277_v57  ;;  %v850_v60 = vsub.f32 %v629_v14, %v248_v58  ;;  %v897_v58 = vld [vmem:[%s971_s1] ss:$0 sm:$0xff] }
  0xae   : > { %v227_v62 = vpop.xlane.xlu0 %226  ;;  %v229_v63 = vpop.xlane.xlu1 %228 }
  0xaf   : > { %v249_v0 = vmul.f32 0.0078125, %v227_v62  ;;  %v279_v1 = vmul.f32 %v848_v59, %v848_v59  ;;  %v250_v2 = vmul.f32 0.0078125, %v229_v63  ;;  %v280_v5 = vmul.f32 %v850_v60, %v850_v60 }
  0xb1   : > { %v858_v3 = vsub.f32 %v632_v16, %v249_v0  ;;  %301 = vadd.xlane.f32.xlu1 %v278_v61  ;;  %303 = vadd.xlane.f32.xlu0 %v279_v1  ;;  %v862_v4 = vsub.f32 %v633_v17, %v250_v2 }
  0xb2   : > { %v231_v6 = vpop.xlane.xlu0 %230  ;;  %v233_v7 = vpop.xlane.xlu1 %232 }
  0xb3   : > { %v251_v8 = vmul.f32 0.0078125, %v231_v6  ;;  %v281_v9 = vmul.f32 %v858_v3, %v858_v3  ;;  %v252_v10 = vmul.f32 0.0078125, %v233_v7  ;;  %v282_v13 = vmul.f32 %v862_v4, %v862_v4 }
  0xb5   : > { %v870_v11 = vsub.f32 %v636_v19, %v251_v8  ;;  %305 = vadd.xlane.f32.xlu1 %v280_v5  ;;  %307 = vadd.xlane.f32.xlu0 %v281_v9  ;;  %v874_v12 = vsub.f32 %v637_v20, %v252_v10  ;;  %v904_v9 = vld [vmem:[%s972_s2] ss:$0 sm:$0xff] }
  0xb6   : > { %v235_v14 = vpop.xlane.xlu0 %234  ;;  %v237_v15 = vpop.xlane.xlu1 %236 }
  0xb7   : > { %v253_v16 = vmul.f32 0.0078125, %v235_v14  ;;  %v283_v17 = vmul.f32 %v870_v11, %v870_v11  ;;  %v254_v24 = vmul.f32 0.0078125, %v237_v15  ;;  %v284_v20 = vmul.f32 %v874_v12, %v874_v12 }
  0xb9   : > { %v882_v19 = vsub.f32 %v640_v22, %v253_v16  ;;  %309 = vadd.xlane.f32.xlu1 %v282_v13  ;;  %311 = vadd.xlane.f32.xlu0 %v283_v17  ;;  %v886_v18 = vsub.f32 %v641_v23, %v254_v24 }
  0xbb   : > { %v285_v25 = vmul.f32 %v882_v19, %v882_v19  ;;  %v286_v26 = vmul.f32 %v886_v18, %v886_v18 }
  0xbd   : > { %313 = vadd.xlane.f32.xlu1 %v284_v20  ;;  %315 = vadd.xlane.f32.xlu0 %v285_v25 }
  0xc1   : > { %317 = vadd.xlane.f32.xlu1 %v286_v26 }
 0x12a   : > { %v288_v22 = vpop.xlane.xlu0 %287 }
 0x12b   : > { %v319_v27 = vmul.f32 0.0078125, %v288_v22 }
 0x12d   : > { %v335_v30 = vadd.f32 1e-05, %v319_v27 }
 0x12e   : > { %v290_v31 = vpop.xlane.xlu1 %289  ;;  %v292_v32 = vpop.xlane.xlu0 %291 }
 0x12f   : > { %704 = vrsqrt.f32 %v335_v30  ;;  %v320_v21 = vmul.f32 0.0078125, %v290_v31  ;;  %v321_v23 = vmul.f32 0.0078125, %v292_v32 }
 0x131   : > { %v336_v33 = vadd.f32 1e-05, %v320_v21  ;;  %v337_v34 = vadd.f32 1e-05, %v321_v23 }
 0x132   : > { %v294_v37 = vpop.xlane.xlu1 %293  ;;  %v296_v38 = vpop.xlane.xlu0 %295 }
 0x133   : > { %706 = vrsqrt.f32 %v336_v33  ;;  %v322_v39 = vmul.f32 0.0078125, %v294_v37  ;;  %v323_v40 = vmul.f32 0.0078125, %v296_v38 }
 0x134   : > { %708 = vrsqrt.f32 %v337_v34 }
 0x135   : > { %v338_v41 = vadd.f32 1e-05, %v322_v39  ;;  %v339_v42 = vadd.f32 1e-05, %v323_v40 }
 0x136   : > { %v298_v45 = vpop.xlane.xlu1 %297  ;;  %v300_v46 = vpop.xlane.xlu0 %299 }
 0x137   : > { %710 = vrsqrt.f32 %v338_v41  ;;  %v324_v47 = vmul.f32 0.0078125, %v298_v45  ;;  %v325_v48 = vmul.f32 0.0078125, %v300_v46 }
 0x138   : > { %712 = vrsqrt.f32 %v339_v42 }
 0x139   : > { %v340_v49 = vadd.f32 1e-05, %v324_v47  ;;  %v341_v50 = vadd.f32 1e-05, %v325_v48 }
 0x13a   : > { %v302_v53 = vpop.xlane.xlu1 %301  ;;  %v304_v54 = vpop.xlane.xlu0 %303 }
 0x13b   : > { %714 = vrsqrt.f32 %v340_v49  ;;  %v326_v55 = vmul.f32 0.0078125, %v302_v53  ;;  %v327_v56 = vmul.f32 0.0078125, %v304_v54 }
 0x13c   : > { %v705_v57 = vpop.eup %704  ;;  %716 = vrsqrt.f32 %v341_v50 }
 0x13d   : > { %v367_v61 = vmul.f32 %v705_v57, %v818_v28  ;;  %v342_v62 = vadd.f32 1e-05, %v326_v55  ;;  %v343_v63 = vadd.f32 1e-05, %v327_v56 }
 0x13e   : > { %v306_v0 = vpop.xlane.xlu1 %305  ;;  %v308_v1 = vpop.xlane.xlu0 %307 }
 0x13f   : > { %718 = vrsqrt.f32 %v342_v62  ;;  %v328_v2 = vmul.f32 0.0078125, %v306_v0  ;;  %v329_v5 = vmul.f32 0.0078125, %v308_v1  ;;  %v390_v7 = vmul.f32 %v897_v58, %v367_v61 }
 0x140   : > { %v707_v6 = vpop.eup %706  ;;  %720 = vrsqrt.f32 %v343_v63 }
 0x141   : > { %v709_v8 = vpop.eup %708  ;;  %v368_v10 = vmul.f32 %v707_v6, %v824_v35  ;;  %v344_v28 = vadd.f32 1e-05, %v328_v2  ;;  %v345_v13 = vadd.f32 1e-05, %v329_v5  ;;  %v413_v26 = vadd.f32 %v904_v9, %v390_v7 }
 0x142   : > { %v369_v14 = vmul.f32 %v709_v8, %v820_v29  ;;  %v310_v15 = vpop.xlane.xlu1 %309  ;;  %v312_v16 = vpop.xlane.xlu0 %311 }
 0x143   : > { %v391_v17 = vmul.f32 %v897_v58, %v368_v10  ;;  %722 = vrsqrt.f32 %v344_v28  ;;  %v330_v24 = vmul.f32 0.0078125, %v310_v15  ;;  %v331_v20 = vmul.f32 0.0078125, %v312_v16 }
 0x144   : > { %v711_v25 = vpop.eup %710  ;;  %v392_v22 = vmul.f32 %v897_v58, %v369_v14  ;;  %724 = vrsqrt.f32 %v345_v13 }
 0x145   : > { %v713_v27 = vpop.eup %712  ;;  %v414_v35 = vadd.f32 %v904_v9, %v391_v17  ;;  %v370_v30 = vmul.f32 %v711_v25, %v826_v36  ;;  %v346_v29 = vadd.f32 1e-05, %v330_v24  ;;  %v347_v31 = vadd.f32 1e-05, %v331_v20 }
 0x146   : > { %v371_v32 = vmul.f32 %v713_v27, %v832_v43  ;;  %v314_v21 = vpop.xlane.xlu1 %313  ;;  %v316_v23 = vpop.xlane.xlu0 %315  ;;  %v415_v41 = vadd.f32 %v904_v9, %v392_v22 }
 0x147   : > { %v645_v33 = vpack.c.bf16 %v414_v35, %v413_v26  ;;  %v393_v34 = vmul.f32 %v897_v58, %v370_v30  ;;  %726 = vrsqrt.f32 %v346_v29  ;;  %v332_v37 = vmul.f32 0.0078125, %v314_v21 }
 0x148   : > { %v715_v38 = vpop.eup %714  ;;  %v394_v36 = vmul.f32 %v897_v58, %v371_v32  ;;  %728 = vrsqrt.f32 %v347_v31  ;;  %v333_v39 = vmul.f32 0.0078125, %v316_v23 }
 0x149   : > { %v717_v40 = vpop.eup %716  ;;  %646 = vst [vmem:[%s918_s25] sm:$0xff] %v645_v33   ;;  %v416_v42 = vadd.f32 %v904_v9, %v393_v34  ;;  %v372_v43 = vmul.f32 %v715_v38, %v834_v44  ;;  %v348_v45 = vadd.f32 1e-05, %v332_v37 }
 0x14a   : > { %v373_v46 = vmul.f32 %v717_v40, %v840_v51  ;;  %v349_v47 = vadd.f32 1e-05, %v333_v39  ;;  %v318_v48 = vpop.xlane.xlu1 %317  ;;  %v417_v55 = vadd.f32 %v904_v9, %v394_v36 }
 0x14b   : > { %v650_v49 = vpack.c.bf16 %v416_v42, %v415_v41  ;;  %v395_v50 = vmul.f32 %v897_v58, %v372_v43  ;;  %730 = vrsqrt.f32 %v348_v45  ;;  %v334_v53 = vmul.f32 0.0078125, %v318_v48 }
 0x14c   : > { %v719_v54 = vpop.eup %718  ;;  %732 = vrsqrt.f32 %v349_v47  ;;  %v396_v44 = vmul.f32 %v897_v58, %v373_v46 }
 0x14d   : > { %v721_v56 = vpop.eup %720  ;;  %689 = vst [vmem:[%s918_s25 + $0x8] sm:$0xff] %v650_v49   ;;  %v418_v57 = vadd.f32 %v904_v9, %v395_v50  ;;  %v374_v51 = vmul.f32 %v719_v54, %v842_v52  ;;  %v350_v61 = vadd.f32 1e-05, %v334_v53 }
 0x14e   : > { %v375_v62 = vmul.f32 %v721_v56, %v848_v59  ;;  %v419_v5 = vadd.f32 %v904_v9, %v396_v44 }
 0x14f   : > { %v655_v63 = vpack.c.bf16 %v418_v57, %v417_v55  ;;  %v397_v0 = vmul.f32 %v897_v58, %v374_v51  ;;  %734 = vrsqrt.f32 %v350_v61 }
 0x150   : > { %v723_v1 = vpop.eup %722  ;;  %v398_v7 = vmul.f32 %v897_v58, %v375_v62 }
 0x151   : > { %v725_v2 = vpop.eup %724  ;;  %690 = vst [vmem:[%s918_s25 + $0x10] sm:$0xff] %v655_v63   ;;  %v420_v6 = vadd.f32 %v904_v9, %v397_v0  ;;  %v376_v8 = vmul.f32 %v723_v1, %v850_v60 }
 0x152   : > { %v377_v52 = vmul.f32 %v725_v2, %v858_v3  ;;  %v421_v14 = vadd.f32 %v904_v9, %v398_v7 }
 0x153   : > { %v660_v59 = vpack.c.bf16 %v420_v6, %v419_v5  ;;  %v399_v10 = vmul.f32 %v897_v58, %v376_v8 }
 0x154   : > { %v727_v28 = vpop.eup %726  ;;  %v400_v16 = vmul.f32 %v897_v58, %v377_v52 }
 0x155   : > { %v729_v13 = vpop.eup %728  ;;  %691 = vst [vmem:[%s918_s25 + $0x18] sm:$0xff] %v660_v59   ;;  %v422_v15 = vadd.f32 %v904_v9, %v399_v10  ;;  %v378_v17 = vmul.f32 %v727_v28, %v862_v4 }
 0x156   : > { %v379_v60 = vmul.f32 %v729_v13, %v870_v11  ;;  %v423_v26 = vadd.f32 %v904_v9, %v400_v16 }
 0x157   : > { %v665_v24 = vpack.c.bf16 %v422_v15, %v421_v14  ;;  %v401_v3 = vmul.f32 %v897_v58, %v378_v17 }
 0x158   : > { %v731_v20 = vpop.eup %730  ;;  %v402_v27 = vmul.f32 %v897_v58, %v379_v60 }
 0x159   : > { %v733_v25 = vpop.eup %732  ;;  %692 = vst [vmem:[%s918_s25 + $0x20] sm:$0xff] %v665_v24   ;;  %v424_v22 = vadd.f32 %v904_v9, %v401_v3  ;;  %v380_v35 = vmul.f32 %v731_v20, %v874_v12 }
 0x15a   : > { %v381_v4 = vmul.f32 %v733_v25, %v882_v19  ;;  %v425_v31 = vadd.f32 %v904_v9, %v402_v27 }
 0x15b   : > { %v670_v30 = vpack.c.bf16 %v424_v22, %v423_v26  ;;  %v403_v11 = vmul.f32 %v897_v58, %v380_v35 }
 0x15c   : > { %v735_v29 = vpop.eup %734  ;;  %v404_v21 = vmul.f32 %v897_v58, %v381_v4 }
 0x15d   : > { %693 = vst [vmem:[%s918_s25 + $0x28] sm:$0xff] %v670_v30   ;;  %v426_v32 = vadd.f32 %v904_v9, %v403_v11  ;;  %v382_v23 = vmul.f32 %v735_v29, %v886_v18 }
 0x15e   : > { %v427_v12 = vadd.f32 %v904_v9, %v404_v21 }
 0x15f   : > { %v675_v33 = vpack.c.bf16 %v426_v32, %v425_v31  ;;  %v405_v34 = vmul.f32 %v897_v58, %v382_v23 }
 0x161   : > { %694 = vst [vmem:[%s918_s25 + $0x30] sm:$0xff] %v675_v33   ;;  %v428_v19 = vadd.f32 %v904_v9, %v405_v34 }
 0x163   : > { %v680_v37 = vpack.c.bf16 %v428_v19, %v427_v12 }
 0x165   : > { %695 = vst [vmem:[%s918_s25 + $0x38] sm:$0xff] %v680_v37  }
 0x166 PF: > { %s13_s12 = sadd.s32 1, %s742_s12  }
 0x167   : > { %p10_p4 = scmp.ge.s32.totalorder %s13_s12, 4  }
 0x169   :  { %12 = sbr.rel (!%p10_p4) target bundleno = 1 (0x1), region = 62 }

// kernel: gptj_training_step.17
= control target key start
LH: loop header
LB: loop body
LE: loop exit
PB: predicated region body
PF: predicated region fallthrough
CT: control target
= control target key end

     0   :  { %s1212_s15 = smov 0   ;;  %s1214_s16 = smov 0   ;;  %s1328_s0 = inlined_call_operand.vmem [shape: bf16[256,128], index: 0, kind: input, shape index: {}]   ;;  %s1329_s1 = inlined_call_operand.vmem [shape: bf16[128,128], index: 1, kind: input, shape index: {}]   ;;  %s1330_s2 = inlined_call_operand.vmem [shape: f32[1,128], index: 2, kind: input, shape index: {}]   ;;  %s1331_s3 = inlined_call_operand.vmem [shape: bf16[256,128], index: 3, kind: input, shape index: {}]   ;;  %s1332_s4 = inlined_call_operand.vmem [shape: bf16[256,128], index: 4, kind: output, shape index: {}]  }
   0x1   :  { %s1216_s17 = smov 0  }
   0x2 LB: > { %s33_s18 = sadd.s32 1, %s1181_s16  ;;  %p915_p0 = scmp.ge.s32.totalorder %s1185_s17, 1  ;;  %s1185_s17 = sphi %s1216_s17, %s14_s17   ;;  %s1181_s16 = sphi %s1214_s16, %s1334_s16   ;;  %s1177_s15 = sphi %s1212_s15, %s1333_s15  }
   0x3   : > { %p35_p1 = scmp.ge.s32.totalorder %s33_s18, 2  ;;  %p229_p2 = scmp.lt.s32.totalorder %s1185_s17, 3 }
   0x5   : > { %s1336_s18 = smov (%p35_p1, %s33_s18), 0  ;;  %p230_p3 = pnand %p915_p0, %p229_p2 }
   0x6   : > { %s916_s21 = sshll.u32 (!%p230_p3), %s1177_s15, 4 }
   0x7   : > { %233 = sbr.rel (%p230_p3) target bundleno = 259 (0x103), region = 36  ;;  %p281_p4 = scmp.lt.s32.totalorder (!%p230_p3), %s916_s21, 31 }
   0xc   : > { %v1147_v0 = vld [vmem:[%s1329_s1 + $0x38] sm:$0xff]   ;;  %v1148_v1 = vld [vmem:[%s1329_s1 + $0x30] sm:$0xff]   ;;  %s1338_s21 = smov (!%p281_p4, %s916_s21), 31  ;;  %v1149_v2 = vld [vmem:[%s1329_s1 + $0x28] sm:$0xff]  }
   0xd   : > { %1075 = vmatprep.subr.bf16.mxu0 %v1147_v0  ;;  %1107 = vmatprep.subr.bf16.mxu1 %v1147_v0  ;;  %s1239_s26 = sshll.u32 %s1338_s21, 2  ;;  %v1150_v3 = vld [vmem:[%s1329_s1 + $0x20] sm:$0xff]   ;;  %v1151_v6 = vld [vmem:[%s1329_s1 + $0x18] sm:$0xff]   ;;  %v1152_v7 = vld [vmem:[%s1329_s1 + $0x10] sm:$0xff]  }
   0xe   : > { %1076 = vmatpush3.bf16.msra.mxu0 %v1147_v0  ;;  %1115 = vmatpush3.bf16.msra.mxu1 %v1147_v0  ;;  %s1245_s29 = scalar_lea.vmem %s1328_s0, %s1239_s26  ;;  %v1153_v8 = vld [vmem:[%s1329_s1 + $0x8] sm:$0xff]   ;;  %v1154_v9 = vld [vmem:[%s1329_s1] sm:$0xff]   ;;  %s1274_s19 = scalar_lea.vmem %s1331_s3, %s1239_s26 }
   0xf   : > { %1077 = vmatprep.subr.bf16.mxu0 %v1148_v1  ;;  %1108 = vmatprep.subr.bf16.mxu1 %v1148_v1  ;;  %v1155_v4 = vld [vmem:[%s1245_s29] sm:$0xff]   ;;  %v1157_v10 = vld [vmem:[%s1245_s29 + $0x8] sm:$0xff]   ;;  %v1159_v12 = vld [vmem:[%s1245_s29 + $0x10] sm:$0xff]   ;;  %s1299_s24 = scalar_lea.vmem %s1332_s4, %s1239_s26 }
  0x10   : > { %v1156_v5 = vld [vmem:[%s1245_s29 + $0x20] sm:$0xff]   ;;  %1091 = vmatprep.mubr.bf16.mxu0 %v1155_v4  ;;  %v1158_v11 = vld [vmem:[%s1245_s29 + $0x28] sm:$0xff]   ;;  %v1160_v13 = vld [vmem:[%s1245_s29 + $0x30] sm:$0xff]  }
  0x11   : > { %1099 = vmatprep.mubr.bf16.mxu1 %v1156_v5  ;;  %v1161_v14 = vld [vmem:[%s1245_s29 + $0x18] sm:$0xff]   ;;  %v1279_v16 = vld [vmem:[%s1330_s2] ss:$0 sm:$0xff]  ;;  %v1045_v17 = vld [vmem:[%s1274_s19 + $0x8] sm:$0xff]  }
  0x12   : > { %1078 = vmatpush3.bf16.msra.mxu0 %v1148_v1  ;;  %1116 = vmatpush3.bf16.msra.mxu1 %v1148_v1  ;;  %v1162_v15 = vld [vmem:[%s1245_s29 + $0x38] sm:$0xff]   ;;  %v1049_v18 = vld [vmem:[%s1274_s19 + $0x28] sm:$0xff]   ;;  %v974_v21 = vld [vmem:[%s1274_s19] sm:$0xff]   ;;  %v979_v24 = vunpack.c.l.bf16 %v1045_v17  ;;  %v980_v29 = vunpack.c.h.bf16 %v1045_v17 }
  0x13   : > { %1079 = vmatprep.subr.bf16.mxu0 %v1149_v2  ;;  %1109 = vmatprep.subr.bf16.mxu1 %v1149_v2  ;;  %v1048_v22 = vld [vmem:[%s1274_s19 + $0x20] sm:$0xff]   ;;  %v995_v26 = vunpack.c.l.bf16 %v1049_v18  ;;  %v996_v30 = vunpack.c.h.bf16 %v1049_v18  ;;  %v975_v32 = vunpack.c.l.bf16 %v974_v21  ;;  %v976_v39 = vunpack.c.h.bf16 %v974_v21  ;;  %v1047_v49 = vld [vmem:[%s1274_s19 + $0x18] sm:$0xff]   ;;  %v1046_v59 = vld [vmem:[%s1274_s19 + $0x10] sm:$0xff]  }
  0x14   : > { %v991_v34 = vunpack.c.l.bf16 %v1048_v22  ;;  %v992_v40 = vunpack.c.h.bf16 %v1048_v22  ;;  %v1051_v50 = vld [vmem:[%s1274_s19 + $0x38] sm:$0xff]   ;;  %v1050_v60 = vld [vmem:[%s1274_s19 + $0x30] sm:$0xff]   ;;  %v987_v62 = vunpack.c.l.bf16 %v1047_v49  ;;  %v988_v5 = vunpack.c.h.bf16 %v1047_v49 }
  0x15   : > { %v1003_v0 = vunpack.c.l.bf16 %v1051_v50  ;;  %v1000_v17 = vunpack.c.h.bf16 %v1050_v60 }
  0x16   : > { %1080 = vmatpush3.bf16.msra.mxu0 %v1149_v2  ;;  %1117 = vmatpush3.bf16.msra.mxu1 %v1149_v2 }
  0x17   : > { %1081 = vmatprep.subr.bf16.mxu0 %v1150_v3  ;;  %1110 = vmatprep.subr.bf16.mxu1 %v1150_v3 }
  0x1a   : > { %1082 = vmatpush3.bf16.msra.mxu0 %v1150_v3  ;;  %1118 = vmatpush3.bf16.msra.mxu1 %v1150_v3 }
  0x1b   : > { %1083 = vmatprep.subr.bf16.mxu0 %v1151_v6  ;;  %1111 = vmatprep.subr.bf16.mxu1 %v1151_v6 }
  0x1e   : > { %1084 = vmatpush3.bf16.msra.mxu0 %v1151_v6  ;;  %1119 = vmatpush3.bf16.msra.mxu1 %v1151_v6  ;;  %v1004_v6 = vunpack.c.h.bf16 %v1051_v50 }
  0x1f   : > { %1085 = vmatprep.subr.bf16.mxu0 %v1152_v7  ;;  %1112 = vmatprep.subr.bf16.mxu1 %v1152_v7 }
  0x22   : > { %1086 = vmatpush3.bf16.msra.mxu0 %v1152_v7  ;;  %1120 = vmatpush3.bf16.msra.mxu1 %v1152_v7 }
  0x23   : > { %1087 = vmatprep.subr.bf16.mxu0 %v1153_v8  ;;  %1113 = vmatprep.subr.bf16.mxu1 %v1153_v8 }
  0x26   : > { %1088 = vmatpush3.bf16.msra.mxu0 %v1153_v8  ;;  %1121 = vmatpush3.bf16.msra.mxu1 %v1153_v8  ;;  %v983_v8 = vunpack.c.l.bf16 %v1046_v59 }
  0x27   : > { %1089 = vmatprep.subr.bf16.mxu0 %v1154_v9  ;;  %1114 = vmatprep.subr.bf16.mxu1 %v1154_v9 }
  0x2a   : > { %1090 = vmatpush3.bf16.msra.mxu0 %v1154_v9  ;;  %1122 = vmatpush3.bf16.msra.mxu1 %v1154_v9 }
  0x2d   : > { %1092 = vmatmul.mubr.bf16.vlgmr.msra.gmra.mxu0 %v1157_v10  ;;  %1100 = vmatmul.mubr.bf16.vlgmr.msra.gmra.mxu1 %v1158_v11  ;;  %v999_v10 = vunpack.c.l.bf16 %v1050_v60 }
  0x2e   : > { %1095 = vmatprep.mubr.bf16.mxu0 %v1159_v12  ;;  %1103 = vmatprep.mubr.bf16.mxu1 %v1160_v13 }
  0x35   : > { %1096 = vmatmul.mubr.bf16.gmra.mxu0 %v1161_v14  ;;  %1104 = vmatmul.mubr.bf16.gmra.mxu1 %v1162_v15  ;;  %v984_v15 = vunpack.c.h.bf16 %v1046_v59 }
  0xed   : > { %v1093_v19 = vpop.f32.mrf.mxu0  ;;  %v1101_v20 = vpop.f32.mrf.mxu1 }
  0xee   : > { %v641_v23 = vadd.f32 %v1093_v19, %v1279_v16  ;;  %v649_v25 = vadd.f32 %v1101_v20, %v1279_v16 }
  0xef   : > { %v518_v27 = vpop.f32.mrf.mxu0  ;;  %v550_v28 = vpop.f32.mrf.mxu1 }
  0xf0   : > { %v639_v31 = vadd.f32 %v1279_v16, %v518_v27  ;;  %v647_v33 = vadd.f32 %v1279_v16, %v550_v28  ;;  %v689_v41 = vadd.f32 %v979_v24, %v641_v23  ;;  %v697_v42 = vadd.f32 %v995_v26, %v649_v25 }
  0xf1   : > { %v1094_v35 = vpop.f32.mrf.mxu0  ;;  %v1102_v36 = vpop.f32.mrf.mxu1 }
  0xf2   : > { %v642_v37 = vadd.f32 %v1094_v35, %v1279_v16  ;;  %v650_v38 = vadd.f32 %v1102_v36, %v1279_v16  ;;  %v687_v51 = vadd.f32 %v975_v32, %v639_v31  ;;  %v695_v52 = vadd.f32 %v991_v34, %v647_v33 }
  0xf3   : > { %v521_v43 = vpop.f32.mrf.mxu0  ;;  %v553_v44 = vpop.f32.mrf.mxu1 }
  0xf4   : > { %v690_v45 = vadd.f32 %v980_v29, %v642_v37  ;;  %v698_v46 = vadd.f32 %v996_v30, %v650_v38  ;;  %v640_v47 = vadd.f32 %v1279_v16, %v521_v43  ;;  %v648_v48 = vadd.f32 %v1279_v16, %v553_v44 }
  0xf5   : > { %v1097_v53 = vpop.f32.mrf.mxu0  ;;  %v1105_v54 = vpop.f32.mrf.mxu1 }
  0xf6   : > { %v1013_v55 = vpack.c.bf16 %v690_v45, %v689_v41  ;;  %v1033_v56 = vpack.c.bf16 %v698_v46, %v697_v42  ;;  %v688_v57 = vadd.f32 %v976_v39, %v640_v47  ;;  %v696_v58 = vadd.f32 %v992_v40, %v648_v48 }
  0xf7   : > { %v645_v61 = vadd.f32 %v1097_v53, %v1279_v16  ;;  %v653_v63 = vadd.f32 %v1105_v54, %v1279_v16  ;;  %v534_v1 = vpop.f32.mrf.mxu0  ;;  %v566_v2 = vpop.f32.mrf.mxu1 }
  0xf8   : > { %1052 = vst [vmem:[%s1299_s24 + $0x8] sm:$0xff] %v1013_v55   ;;  %1056 = vst [vmem:[%s1299_s24 + $0x28] sm:$0xff] %v1033_v56   ;;  %v1008_v3 = vpack.c.bf16 %v688_v57, %v687_v51  ;;  %v1028_v4 = vpack.c.bf16 %v696_v58, %v695_v52  ;;  %v643_v7 = vadd.f32 %v1279_v16, %v534_v1 }
  0xf9   : > { %v651_v9 = vadd.f32 %v1279_v16, %v566_v2  ;;  %v1098_v11 = vpop.f32.mrf.mxu0  ;;  %v1106_v12 = vpop.f32.mrf.mxu1  ;;  %v693_v18 = vadd.f32 %v987_v62, %v645_v61  ;;  %v701_v19 = vadd.f32 %v1003_v0, %v653_v63 }
  0xfa   : > { %1009 = vst [vmem:[%s1299_s24] sm:$0xff] %v1008_v3   ;;  %1055 = vst [vmem:[%s1299_s24 + $0x20] sm:$0xff] %v1028_v4   ;;  %v646_v13 = vadd.f32 %v1098_v11, %v1279_v16  ;;  %v654_v14 = vadd.f32 %v1106_v12, %v1279_v16  ;;  %v691_v26 = vadd.f32 %v983_v8, %v643_v7 }
  0xfb   : > { %v537_v20 = vpop.f32.mrf.mxu0  ;;  %v569_v21 = vpop.f32.mrf.mxu1  ;;  %v699_v27 = vadd.f32 %v999_v10, %v651_v9 }
  0xfc   : > { %v694_v22 = vadd.f32 %v988_v5, %v646_v13  ;;  %v702_v23 = vadd.f32 %v1004_v6, %v654_v14  ;;  %v644_v24 = vadd.f32 %v1279_v16, %v537_v20  ;;  %v652_v25 = vadd.f32 %v1279_v16, %v569_v21 }
  0xfe   : > { %v1023_v28 = vpack.c.bf16 %v694_v22, %v693_v18  ;;  %v1043_v29 = vpack.c.bf16 %v702_v23, %v701_v19  ;;  %v692_v30 = vadd.f32 %v984_v15, %v644_v24  ;;  %v700_v31 = vadd.f32 %v1000_v17, %v652_v25 }
 0x100   : > { %1054 = vst [vmem:[%s1299_s24 + $0x18] sm:$0xff] %v1023_v28   ;;  %1058 = vst [vmem:[%s1299_s24 + $0x38] sm:$0xff] %v1043_v29   ;;  %v1018_v32 = vpack.c.bf16 %v692_v30, %v691_v26  ;;  %v1038_v33 = vpack.c.bf16 %v700_v31, %v699_v27 }
 0x102   : > { %1053 = vst [vmem:[%s1299_s24 + $0x10] sm:$0xff] %v1018_v32   ;;  %1057 = vst [vmem:[%s1299_s24 + $0x30] sm:$0xff] %v1038_v33  }
 0x103 PF: > { %s14_s17 = sadd.s32 1, %s1185_s17   ;;  %s1333_s15 = smov %s1181_s16 }
 0x104   : > { %p11_p5 = scmp.ge.s32.totalorder %s14_s17, 4   ;;  %s1334_s16 = smov %s1336_s18 }
 0x106   :  { %13 = sbr.rel (!%p11_p5) target bundleno = 2 (0x2), region = 83 }

// kernel: gptj_training_step.19
= control target key start
LH: loop header
LB: loop body
LE: loop exit
PB: predicated region body
PF: predicated region fallthrough
CT: control target
= control target key end

     0   :  { %s1818_s15 = smov 0   ;;  %s1820_s16 = smov 0   ;;  %s2036_s0 = inlined_call_operand.vmem [shape: bf16[256,512], index: 0, kind: input, shape index: {}]   ;;  %s2037_s1 = inlined_call_operand.vmem [shape: bf16[512,128], index: 1, kind: input, shape index: {}]   ;;  %s2038_s2 = inlined_call_operand.vmem [shape: f32[1,128], index: 2, kind: input, shape index: {}]   ;;  %s2039_s3 = inlined_call_operand.vmem [shape: bf16[256,128], index: 3, kind: input, shape index: {}]   ;;  %s2040_s4 = inlined_call_operand.vmem [shape: bf16[256,128], index: 4, kind: output, shape index: {}]  }
   0x1   :  { %s1822_s17 = smov 0  }
   0x2 LB: > { %s33_s18 = sadd.s32 1, %s1787_s16  ;;  %p1343_p0 = scmp.ge.s32.totalorder %s1791_s17, 1  ;;  %s1791_s17 = sphi %s1822_s17, %s14_s17   ;;  %s1787_s16 = sphi %s1820_s16, %s2042_s16   ;;  %s1783_s15 = sphi %s1818_s15, %s2041_s15  }
   0x3   : > { %p35_p1 = scmp.ge.s32.totalorder %s33_s18, 2  ;;  %p232_p2 = scmp.lt.s32.totalorder %s1791_s17, 3 }
   0x5   : > { %s2044_s18 = smov (%p35_p1, %s33_s18), 0  ;;  %p233_p3 = pnand %p1343_p0, %p232_p2 }
   0x6   : > { %s1344_s29 = sshll.u32 (!%p233_p3), %s1783_s15, 4 }
   0x7   : > { %236 = sbr.rel (%p233_p3) target bundleno = 313 (0x139), region = 36  ;;  %p287_p4 = scmp.lt.s32.totalorder (!%p233_p3), %s1344_s29, 31 }
   0xc   : > { %v1689_v0 = vld [vmem:[%s2037_s1 + $0x78] sm:$0xff]   ;;  %v1693_v4 = vld [vmem:[%s2037_s1 + $0x70] sm:$0xff]   ;;  %v1697_v8 = vld [vmem:[%s2037_s1 + $0x68] sm:$0xff]   ;;  %s2046_s29 = smov (!%p287_p4, %s1344_s29), 31 }
   0xd   : > { %v1690_v1 = vld [vmem:[%s2037_s1 + $0xf8] sm:$0xff]   ;;  %1537 = vmatprep.subr.bf16.mxu0 %v1689_v0  ;;  %v1694_v5 = vld [vmem:[%s2037_s1 + $0xf0] sm:$0xff]   ;;  %v1698_v9 = vld [vmem:[%s2037_s1 + $0xe8] sm:$0xff]   ;;  %s1434_s30 = sshll.u32 %s2046_s29, 4  ;;  %s1348_s21 = sshll.u32 %s2046_s29, 2 }
   0xe   : > { %v1691_v2 = vld [vmem:[%s2037_s1 + $0x38] sm:$0xff]   ;;  %1601 = vmatprep.subr.bf16.mxu1 %v1690_v1  ;;  %v1695_v6 = vld [vmem:[%s2037_s1 + $0x30] sm:$0xff]   ;;  %v1699_v10 = vld [vmem:[%s2037_s1 + $0x28] sm:$0xff]   ;;  %s1935_s12 = scalar_lea.vmem %s2036_s0, %s1434_s30  ;;  %s1981_s24 = scalar_lea.vmem %s2039_s3, %s1348_s21 }
   0xf   : > { %v1692_v3 = vld [vmem:[%s2037_s1 + $0xb8] sm:$0xff]   ;;  %1538 = vmatpush3.bf16.msra.mxu0 %v1691_v2  ;;  %v1696_v7 = vld [vmem:[%s2037_s1 + $0xb0] sm:$0xff]   ;;  %v1700_v11 = vld [vmem:[%s2037_s1 + $0xa8] sm:$0xff]   ;;  %s1996_s30 = scalar_lea.vmem %s2040_s4, %s1348_s21 }
  0x10   : > { %1602 = vmatpush3.bf16.msra.mxu1 %v1692_v3  ;;  %1539 = vmatprep.subr.bf16.mxu0 %v1693_v4  ;;  %v1701_v12 = vld [vmem:[%s2037_s1 + $0x60] sm:$0xff]   ;;  %v1705_v16 = vld [vmem:[%s2037_s1 + $0x58] sm:$0xff]   ;;  %v1709_v20 = vld [vmem:[%s2037_s1 + $0x50] sm:$0xff]  }
  0x11   : > { %1603 = vmatprep.subr.bf16.mxu1 %v1694_v5  ;;  %v1702_v13 = vld [vmem:[%s2037_s1 + $0xe0] sm:$0xff]   ;;  %v1706_v17 = vld [vmem:[%s2037_s1 + $0xd8] sm:$0xff]   ;;  %v1710_v21 = vld [vmem:[%s2037_s1 + $0xd0] sm:$0xff]  }
  0x12   : > { %v1703_v14 = vld [vmem:[%s2037_s1 + $0x20] sm:$0xff]   ;;  %v1707_v18 = vld [vmem:[%s2037_s1 + $0x18] sm:$0xff]   ;;  %v1711_v22 = vld [vmem:[%s2037_s1 + $0x10] sm:$0xff]  }
  0x13   : > { %1540 = vmatpush3.bf16.msra.mxu0 %v1695_v6  ;;  %v1704_v15 = vld [vmem:[%s2037_s1 + $0xa0] sm:$0xff]   ;;  %v1708_v19 = vld [vmem:[%s2037_s1 + $0x98] sm:$0xff]   ;;  %v1712_v23 = vld [vmem:[%s2037_s1 + $0x90] sm:$0xff]  }
  0x14   : > { %1604 = vmatpush3.bf16.msra.mxu1 %v1696_v7  ;;  %1541 = vmatprep.subr.bf16.mxu0 %v1697_v8  ;;  %v1713_v24 = vld [vmem:[%s2037_s1 + $0x48] sm:$0xff]   ;;  %v1717_v28 = vld [vmem:[%s2037_s1 + $0x40] sm:$0xff]  }
  0x15   : > { %1605 = vmatprep.subr.bf16.mxu1 %v1698_v9  ;;  %v1714_v25 = vld [vmem:[%s2037_s1 + $0xc8] sm:$0xff]   ;;  %v1718_v29 = vld [vmem:[%s2037_s1 + $0xc0] sm:$0xff]  }
  0x16   : > { %v1715_v26 = vld [vmem:[%s2037_s1 + $0x8] sm:$0xff]   ;;  %v1719_v30 = vld [vmem:[%s2037_s1] sm:$0xff]  }
  0x17   : > { %1542 = vmatpush3.bf16.msra.mxu0 %v1699_v10  ;;  %v1716_v27 = vld [vmem:[%s2037_s1 + $0x88] sm:$0xff]   ;;  %v1720_v31 = vld [vmem:[%s2037_s1 + $0x80] sm:$0xff]  }
  0x18   : > { %1606 = vmatpush3.bf16.msra.mxu1 %v1700_v11  ;;  %1543 = vmatprep.subr.bf16.mxu0 %v1701_v12  ;;  %v1721_v32 = vld [vmem:[%s1935_s12] ss:$16 sps:$4 sm:$0xff]   ;;  %v1723_v33 = vld [vmem:[%s1935_s12 + $0x4] ss:$16 sps:$4 sm:$0xff]   ;;  %v1724_v34 = vld [vmem:[%s1935_s12 + $0x8] ss:$16 sps:$4 sm:$0xff]  }
  0x19   : > { %1607 = vmatprep.subr.bf16.mxu1 %v1702_v13  ;;  %v1726_v35 = vld [vmem:[%s1935_s12 + $0xc] ss:$16 sps:$4 sm:$0xff]   ;;  %844 = vmatprep.mubr.bf16.mxu0 %v1723_v33  ;;  %v1727_v36 = vld [vmem:[%s1935_s12 + $0x24] ss:$16 sps:$4 sm:$0xff]   ;;  %v1731_v38 = vld [vmem:[%s1935_s12 + $0x20] ss:$16 sps:$4 sm:$0xff]  }
  0x1a   : > { %941 = vmatprep.mubr.bf16.mxu1 %v1726_v35  ;;  %v1729_v37 = vld [vmem:[%s1935_s12 + $0x2c] ss:$16 sps:$4 sm:$0xff]   ;;  %v1732_v39 = vld [vmem:[%s1935_s12 + $0x28] ss:$16 sps:$4 sm:$0xff]   ;;  %v1733_v40 = vld [vmem:[%s1935_s12 + $0x44] ss:$16 sps:$4 sm:$0xff]  }
  0x1b   : > { %1544 = vmatpush3.bf16.msra.mxu0 %v1703_v14  ;;  %v1735_v41 = vld [vmem:[%s1935_s12 + $0x4c] ss:$16 sps:$4 sm:$0xff]   ;;  %v1737_v42 = vld [vmem:[%s1935_s12 + $0x40] ss:$16 sps:$4 sm:$0xff]   ;;  %v1738_v43 = vld [vmem:[%s1935_s12 + $0x48] ss:$16 sps:$4 sm:$0xff]  }
  0x1c   : > { %1608 = vmatpush3.bf16.msra.mxu1 %v1704_v15  ;;  %1545 = vmatprep.subr.bf16.mxu0 %v1705_v16  ;;  %v1739_v44 = vld [vmem:[%s1935_s12 + $0x64] ss:$16 sps:$4 sm:$0xff]   ;;  %v1741_v45 = vld [vmem:[%s1935_s12 + $0x6c] ss:$16 sps:$4 sm:$0xff]   ;;  %v1743_v46 = vld [vmem:[%s1935_s12 + $0x60] ss:$16 sps:$4 sm:$0xff]  }
  0x1d   : > { %1609 = vmatprep.subr.bf16.mxu1 %v1706_v17  ;;  %v1744_v47 = vld [vmem:[%s1935_s12 + $0x68] ss:$16 sps:$4 sm:$0xff]   ;;  %v1745_v48 = vld [vmem:[%s1935_s12 + $0x84] ss:$16 sps:$4 sm:$0xff]   ;;  %v1747_v49 = vld [vmem:[%s1935_s12 + $0x8c] ss:$16 sps:$4 sm:$0xff]  }
  0x1e   : > { %v1749_v50 = vld [vmem:[%s1935_s12 + $0x80] ss:$16 sps:$4 sm:$0xff]   ;;  %v1750_v51 = vld [vmem:[%s1935_s12 + $0x88] ss:$16 sps:$4 sm:$0xff]   ;;  %v1751_v52 = vld [vmem:[%s1935_s12 + $0xa4] ss:$16 sps:$4 sm:$0xff]  }
  0x1f   : > { %1546 = vmatpush3.bf16.msra.mxu0 %v1707_v18  ;;  %v1753_v53 = vld [vmem:[%s1935_s12 + $0xac] ss:$16 sps:$4 sm:$0xff]   ;;  %v1755_v54 = vld [vmem:[%s1935_s12 + $0xa0] ss:$16 sps:$4 sm:$0xff]   ;;  %v1756_v55 = vld [vmem:[%s1935_s12 + $0xa8] ss:$16 sps:$4 sm:$0xff]  }
  0x20   : > { %1610 = vmatpush3.bf16.msra.mxu1 %v1708_v19  ;;  %1547 = vmatprep.subr.bf16.mxu0 %v1709_v20  ;;  %v1757_v56 = vld [vmem:[%s1935_s12 + $0xc4] ss:$16 sps:$4 sm:$0xff]   ;;  %v1759_v57 = vld [vmem:[%s1935_s12 + $0xcc] ss:$16 sps:$4 sm:$0xff]   ;;  %v1761_v58 = vld [vmem:[%s1935_s12 + $0xc0] ss:$16 sps:$4 sm:$0xff]  }
  0x21   : > { %1611 = vmatprep.subr.bf16.mxu1 %v1710_v21  ;;  %v1762_v59 = vld [vmem:[%s1935_s12 + $0xc8] ss:$16 sps:$4 sm:$0xff]   ;;  %v1763_v60 = vld [vmem:[%s1935_s12 + $0xe4] ss:$16 sps:$4 sm:$0xff]   ;;  %v1765_v61 = vld [vmem:[%s1935_s12 + $0xec] ss:$16 sps:$4 sm:$0xff]  }
  0x22   : > { %v1767_v62 = vld [vmem:[%s1935_s12 + $0xe0] ss:$16 sps:$4 sm:$0xff]   ;;  %v1768_v63 = vld [vmem:[%s1935_s12 + $0xe8] ss:$16 sps:$4 sm:$0xff]  }
  0x23   : > { %1548 = vmatpush3.bf16.msra.mxu0 %v1711_v22  ;;  %v1986_v10 = vld [vmem:[%s2038_s2] ss:$0 sm:$0xff] }
  0x24   : > { %1612 = vmatpush3.bf16.msra.mxu1 %v1712_v23  ;;  %1549 = vmatprep.subr.bf16.mxu0 %v1713_v24  ;;  %v1452_v11 = vld [vmem:[%s1981_s24] sm:$0xff]  }
  0x25   : > { %1613 = vmatprep.subr.bf16.mxu1 %v1714_v25  ;;  %v1453_v18 = vunpack.c.l.bf16 %v1452_v11  ;;  %v1454_v20 = vunpack.c.h.bf16 %v1452_v11 }
  0x27   : > { %1550 = vmatpush3.bf16.msra.mxu0 %v1715_v26 }
  0x28   : > { %1614 = vmatpush3.bf16.msra.mxu1 %v1716_v27  ;;  %1551 = vmatprep.subr.bf16.mxu0 %v1717_v28 }
  0x29   : > { %1615 = vmatprep.subr.bf16.mxu1 %v1718_v29 }
  0x2b   : > { %1552 = vmatpush3.bf16.msra.mxu0 %v1719_v30 }
  0x2c   : > { %1616 = vmatpush3.bf16.msra.mxu1 %v1720_v31 }
  0x2e   : > { %845 = vmatmul.mubr.bf16.vlgmr.msra.gmra.mxu0 %v1721_v32  ;;  %v1523_v32 = vld [vmem:[%s1981_s24 + $0x8] sm:$0xff]  }
  0x2f   : > { %942 = vmatmul.mubr.bf16.vlgmr.msra.gmra.mxu1 %v1724_v34  ;;  %852 = vmatprep.mubr.bf16.mxu0 %v1727_v36 }
  0x30   : > { %949 = vmatprep.mubr.bf16.mxu1 %v1729_v37 }
  0x36   : > { %853 = vmatmul.mubr.bf16.gmra.mxu0 %v1731_v38 }
  0x37   : > { %950 = vmatmul.mubr.bf16.gmra.mxu1 %v1732_v39  ;;  %860 = vmatprep.mubr.bf16.mxu0 %v1733_v40  ;;  %v1457_v40 = vunpack.c.l.bf16 %v1523_v32 }
  0x38   : > { %957 = vmatprep.mubr.bf16.mxu1 %v1735_v41 }
  0x3e   : > { %861 = vmatmul.mubr.bf16.gmra.mxu0 %v1737_v42  ;;  %v1458_v42 = vunpack.c.h.bf16 %v1523_v32 }
  0x3f   : > { %958 = vmatmul.mubr.bf16.gmra.mxu1 %v1738_v43  ;;  %868 = vmatprep.mubr.bf16.mxu0 %v1739_v44 }
  0x40   : > { %965 = vmatprep.mubr.bf16.mxu1 %v1741_v45 }
  0x46   : > { %869 = vmatmul.mubr.bf16.gmra.mxu0 %v1743_v46 }
  0x47   : > { %966 = vmatmul.mubr.bf16.gmra.mxu1 %v1744_v47  ;;  %876 = vmatprep.mubr.bf16.mxu0 %v1745_v48 }
  0x48   : > { %973 = vmatprep.mubr.bf16.mxu1 %v1747_v49 }
  0x4e   : > { %877 = vmatmul.mubr.bf16.gmra.mxu0 %v1749_v50 }
  0x4f   : > { %974 = vmatmul.mubr.bf16.gmra.mxu1 %v1750_v51  ;;  %884 = vmatprep.mubr.bf16.mxu0 %v1751_v52 }
  0x50   : > { %981 = vmatprep.mubr.bf16.mxu1 %v1753_v53 }
  0x56   : > { %885 = vmatmul.mubr.bf16.gmra.mxu0 %v1755_v54  ;;  %v1524_v54 = vld [vmem:[%s1981_s24 + $0x10] sm:$0xff]  }
  0x57   : > { %982 = vmatmul.mubr.bf16.gmra.mxu1 %v1756_v55  ;;  %892 = vmatprep.mubr.bf16.mxu0 %v1757_v56 }
  0x58   : > { %989 = vmatprep.mubr.bf16.mxu1 %v1759_v57 }
  0x5e   : > { %893 = vmatmul.mubr.bf16.gmra.mxu0 %v1761_v58 }
  0x5f   : > { %990 = vmatmul.mubr.bf16.gmra.mxu1 %v1762_v59  ;;  %900 = vmatprep.mubr.bf16.mxu0 %v1763_v60 }
  0x60   : > { %997 = vmatprep.mubr.bf16.mxu1 %v1765_v61 }
  0x66   : > { %901 = vmatmul.mubr.bf16.gmra.mxu0 %v1767_v62  ;;  %v1461_v62 = vunpack.c.l.bf16 %v1524_v54 }
  0x67   : > { %998 = vmatmul.mubr.bf16.gmra.mxu1 %v1768_v63 }
  0xee   : > { %v1553_v0 = vpop.f32.mrf.mxu0 }
  0xef   : > { %v1617_v1 = vpop.f32.mrf.mxu1 }
  0xf0   : > { %v1554_v2 = vpop.f32.mrf.mxu0 }
  0xf1   : > { %v1555_v3 = vadd.f32 %v1554_v2, %v1553_v0  ;;  %v1618_v4 = vpop.f32.mrf.mxu1  ;;  %v1462_v0 = vunpack.c.h.bf16 %v1524_v54 }
  0xf2   : > { %v1619_v5 = vadd.f32 %v1618_v4, %v1617_v1  ;;  %v1556_v6 = vpop.f32.mrf.mxu0 }
  0xf3   : > { %v1620_v7 = vpop.f32.mrf.mxu1 }
  0xf4   : > { %v944_v8 = vadd.f32 %v1619_v5, %v1555_v3  ;;  %v1557_v9 = vpop.f32.mrf.mxu0 }
  0xf5   : > { %v1558_v12 = vadd.f32 %v1557_v9, %v1556_v6  ;;  %v1621_v13 = vpop.f32.mrf.mxu1 }
  0xf6   : > { %v1622_v14 = vadd.f32 %v1621_v13, %v1620_v7  ;;  %v1559_v15 = vpop.f32.mrf.mxu0  ;;  %v1064_v17 = vadd.f32 %v1986_v10, %v944_v8  ;;  %v1525_v13 = vld [vmem:[%s1981_s24 + $0x18] sm:$0xff]  }
  0xf7   : > { %v1623_v16 = vpop.f32.mrf.mxu1 }
  0xf8   : > { %v947_v19 = vadd.f32 %v1622_v14, %v1558_v12  ;;  %v1560_v21 = vpop.f32.mrf.mxu0  ;;  %v1112_v28 = vadd.f32 %v1453_v18, %v1064_v17 }
  0xf9   : > { %v1561_v22 = vadd.f32 %v1560_v21, %v1559_v15  ;;  %v1624_v23 = vpop.f32.mrf.mxu1  ;;  %v1465_v21 = vunpack.c.l.bf16 %v1525_v13 }
  0xfa   : > { %v1065_v24 = vadd.f32 %v1986_v10, %v947_v19  ;;  %v1625_v25 = vadd.f32 %v1624_v23, %v1623_v16  ;;  %v1562_v26 = vpop.f32.mrf.mxu0  ;;  %v1466_v23 = vunpack.c.h.bf16 %v1525_v13 }
  0xfb   : > { %v1626_v27 = vpop.f32.mrf.mxu1 }
  0xfc   : > { %v1113_v29 = vadd.f32 %v1454_v20, %v1065_v24  ;;  %v952_v30 = vadd.f32 %v1625_v25, %v1561_v22  ;;  %v1563_v31 = vpop.f32.mrf.mxu0 }
  0xfd   : > { %v1564_v33 = vadd.f32 %v1563_v31, %v1562_v26  ;;  %v1627_v34 = vpop.f32.mrf.mxu1 }
  0xfe   : > { %v1486_v35 = vpack.c.bf16 %v1113_v29, %v1112_v28  ;;  %v1628_v36 = vadd.f32 %v1627_v34, %v1626_v27  ;;  %v1565_v37 = vpop.f32.mrf.mxu0  ;;  %v1066_v39 = vadd.f32 %v1986_v10, %v952_v30 }
  0xff   : > { %v1629_v38 = vpop.f32.mrf.mxu1 }
 0x100   : > { %1487 = vst [vmem:[%s1996_s30] sm:$0xff] %v1486_v35   ;;  %v955_v41 = vadd.f32 %v1628_v36, %v1564_v33  ;;  %v1566_v43 = vpop.f32.mrf.mxu0  ;;  %v1114_v50 = vadd.f32 %v1457_v40, %v1066_v39  ;;  %v1526_v35 = vld [vmem:[%s1981_s24 + $0x20] sm:$0xff]  }
 0x101   : > { %v1567_v44 = vadd.f32 %v1566_v43, %v1565_v37  ;;  %v1630_v45 = vpop.f32.mrf.mxu1  ;;  %v1469_v43 = vunpack.c.l.bf16 %v1526_v35 }
 0x102   : > { %v1067_v46 = vadd.f32 %v1986_v10, %v955_v41  ;;  %v1631_v47 = vadd.f32 %v1630_v45, %v1629_v38  ;;  %v1568_v48 = vpop.f32.mrf.mxu0  ;;  %v1470_v45 = vunpack.c.h.bf16 %v1526_v35 }
 0x103   : > { %v1632_v49 = vpop.f32.mrf.mxu1 }
 0x104   : > { %v1115_v51 = vadd.f32 %v1458_v42, %v1067_v46  ;;  %v960_v52 = vadd.f32 %v1631_v47, %v1567_v44  ;;  %v1569_v53 = vpop.f32.mrf.mxu0 }
 0x105   : > { %v1570_v55 = vadd.f32 %v1569_v53, %v1568_v48  ;;  %v1633_v56 = vpop.f32.mrf.mxu1 }
 0x106   : > { %v1491_v57 = vpack.c.bf16 %v1115_v51, %v1114_v50  ;;  %v1634_v58 = vadd.f32 %v1633_v56, %v1632_v49  ;;  %v1571_v59 = vpop.f32.mrf.mxu0  ;;  %v1068_v61 = vadd.f32 %v1986_v10, %v960_v52 }
 0x107   : > { %v1635_v60 = vpop.f32.mrf.mxu1 }
 0x108   : > { %1530 = vst [vmem:[%s1996_s30 + $0x8] sm:$0xff] %v1491_v57   ;;  %v963_v63 = vadd.f32 %v1634_v58, %v1570_v55  ;;  %v1572_v1 = vpop.f32.mrf.mxu0  ;;  %v1116_v8 = vadd.f32 %v1461_v62, %v1068_v61  ;;  %v1527_v57 = vld [vmem:[%s1981_s24 + $0x28] sm:$0xff]  }
 0x109   : > { %v1573_v2 = vadd.f32 %v1572_v1, %v1571_v59  ;;  %v1636_v3 = vpop.f32.mrf.mxu1  ;;  %v1473_v1 = vunpack.c.l.bf16 %v1527_v57 }
 0x10a   : > { %v1069_v4 = vadd.f32 %v1986_v10, %v963_v63  ;;  %v1637_v5 = vadd.f32 %v1636_v3, %v1635_v60  ;;  %v1574_v6 = vpop.f32.mrf.mxu0  ;;  %v1474_v3 = vunpack.c.h.bf16 %v1527_v57 }
 0x10b   : > { %v1638_v7 = vpop.f32.mrf.mxu1 }
 0x10c   : > { %v1117_v9 = vadd.f32 %v1462_v0, %v1069_v4  ;;  %v968_v11 = vadd.f32 %v1637_v5, %v1573_v2  ;;  %v1575_v12 = vpop.f32.mrf.mxu0 }
 0x10d   : > { %v1576_v14 = vadd.f32 %v1575_v12, %v1574_v6  ;;  %v1639_v15 = vpop.f32.mrf.mxu1 }
 0x10e   : > { %v1496_v16 = vpack.c.bf16 %v1117_v9, %v1116_v8  ;;  %v1640_v17 = vadd.f32 %v1639_v15, %v1638_v7  ;;  %v1577_v18 = vpop.f32.mrf.mxu0  ;;  %v1070_v20 = vadd.f32 %v1986_v10, %v968_v11 }
 0x10f   : > { %v1641_v19 = vpop.f32.mrf.mxu1 }
 0x110   : > { %1531 = vst [vmem:[%s1996_s30 + $0x10] sm:$0xff] %v1496_v16   ;;  %v971_v22 = vadd.f32 %v1640_v17, %v1576_v14  ;;  %v1578_v24 = vpop.f32.mrf.mxu0  ;;  %v1118_v31 = vadd.f32 %v1465_v21, %v1070_v20  ;;  %v1528_v16 = vld [vmem:[%s1981_s24 + $0x30] sm:$0xff]  }
 0x111   : > { %v1579_v25 = vadd.f32 %v1578_v24, %v1577_v18  ;;  %v1642_v26 = vpop.f32.mrf.mxu1  ;;  %v1477_v24 = vunpack.c.l.bf16 %v1528_v16 }
 0x112   : > { %v1071_v27 = vadd.f32 %v1986_v10, %v971_v22  ;;  %v1643_v28 = vadd.f32 %v1642_v26, %v1641_v19  ;;  %v1580_v29 = vpop.f32.mrf.mxu0  ;;  %v1478_v26 = vunpack.c.h.bf16 %v1528_v16 }
 0x113   : > { %v1644_v30 = vpop.f32.mrf.mxu1 }
 0x114   : > { %v1119_v32 = vadd.f32 %v1466_v23, %v1071_v27  ;;  %v976_v33 = vadd.f32 %v1643_v28, %v1579_v25  ;;  %v1581_v34 = vpop.f32.mrf.mxu0 }
 0x115   : > { %v1582_v36 = vadd.f32 %v1581_v34, %v1580_v29  ;;  %v1645_v37 = vpop.f32.mrf.mxu1 }
 0x116   : > { %v1501_v38 = vpack.c.bf16 %v1119_v32, %v1118_v31  ;;  %v1646_v39 = vadd.f32 %v1645_v37, %v1644_v30  ;;  %v1583_v40 = vpop.f32.mrf.mxu0  ;;  %v1072_v42 = vadd.f32 %v1986_v10, %v976_v33 }
 0x117   : > { %v1647_v41 = vpop.f32.mrf.mxu1 }
 0x118   : > { %1532 = vst [vmem:[%s1996_s30 + $0x18] sm:$0xff] %v1501_v38   ;;  %v979_v44 = vadd.f32 %v1646_v39, %v1582_v36  ;;  %v1584_v46 = vpop.f32.mrf.mxu0  ;;  %v1120_v53 = vadd.f32 %v1469_v43, %v1072_v42  ;;  %v1529_v38 = vld [vmem:[%s1981_s24 + $0x38] sm:$0xff]  }
 0x119   : > { %v1585_v47 = vadd.f32 %v1584_v46, %v1583_v40  ;;  %v1648_v48 = vpop.f32.mrf.mxu1  ;;  %v1482_v46 = vunpack.c.h.bf16 %v1529_v38 }
 0x11a   : > { %v1073_v49 = vadd.f32 %v1986_v10, %v979_v44  ;;  %v1649_v50 = vadd.f32 %v1648_v48, %v1647_v41  ;;  %v1586_v51 = vpop.f32.mrf.mxu0  ;;  %v1481_v44 = vunpack.c.l.bf16 %v1529_v38 }
 0x11b   : > { %v1650_v52 = vpop.f32.mrf.mxu1 }
 0x11c   : > { %v1121_v54 = vadd.f32 %v1470_v45, %v1073_v49  ;;  %v984_v55 = vadd.f32 %v1649_v50, %v1585_v47  ;;  %v1587_v56 = vpop.f32.mrf.mxu0 }
 0x11d   : > { %v1588_v58 = vadd.f32 %v1587_v56, %v1586_v51  ;;  %v1651_v59 = vpop.f32.mrf.mxu1 }
 0x11e   : > { %v1506_v60 = vpack.c.bf16 %v1121_v54, %v1120_v53  ;;  %v1652_v61 = vadd.f32 %v1651_v59, %v1650_v52  ;;  %v1589_v62 = vpop.f32.mrf.mxu0  ;;  %v1074_v0 = vadd.f32 %v1986_v10, %v984_v55 }
 0x11f   : > { %v1653_v63 = vpop.f32.mrf.mxu1 }
 0x120   : > { %1533 = vst [vmem:[%s1996_s30 + $0x20] sm:$0xff] %v1506_v60   ;;  %v987_v2 = vadd.f32 %v1652_v61, %v1588_v58  ;;  %v1590_v4 = vpop.f32.mrf.mxu0  ;;  %v1122_v12 = vadd.f32 %v1473_v1, %v1074_v0 }
 0x121   : > { %v1591_v5 = vadd.f32 %v1590_v4, %v1589_v62  ;;  %v1654_v6 = vpop.f32.mrf.mxu1 }
 0x122   : > { %v1075_v7 = vadd.f32 %v1986_v10, %v987_v2  ;;  %v1655_v8 = vadd.f32 %v1654_v6, %v1653_v63  ;;  %v1592_v9 = vpop.f32.mrf.mxu0 }
 0x123   : > { %v1656_v11 = vpop.f32.mrf.mxu1 }
 0x124   : > { %v1123_v13 = vadd.f32 %v1474_v3, %v1075_v7  ;;  %v992_v14 = vadd.f32 %v1655_v8, %v1591_v5  ;;  %v1593_v15 = vpop.f32.mrf.mxu0 }
 0x125   : > { %v1594_v17 = vadd.f32 %v1593_v15, %v1592_v9  ;;  %v1657_v18 = vpop.f32.mrf.mxu1 }
 0x126   : > { %v1511_v19 = vpack.c.bf16 %v1123_v13, %v1122_v12  ;;  %v1658_v20 = vadd.f32 %v1657_v18, %v1656_v11  ;;  %v1595_v21 = vpop.f32.mrf.mxu0  ;;  %v1076_v23 = vadd.f32 %v1986_v10, %v992_v14 }
 0x127   : > { %v1659_v22 = vpop.f32.mrf.mxu1 }
 0x128   : > { %1534 = vst [vmem:[%s1996_s30 + $0x28] sm:$0xff] %v1511_v19   ;;  %v995_v25 = vadd.f32 %v1658_v20, %v1594_v17  ;;  %v1596_v27 = vpop.f32.mrf.mxu0  ;;  %v1124_v34 = vadd.f32 %v1477_v24, %v1076_v23 }
 0x129   : > { %v1597_v28 = vadd.f32 %v1596_v27, %v1595_v21  ;;  %v1660_v29 = vpop.f32.mrf.mxu1 }
 0x12a   : > { %v1077_v30 = vadd.f32 %v1986_v10, %v995_v25  ;;  %v1661_v31 = vadd.f32 %v1660_v29, %v1659_v22  ;;  %v1598_v32 = vpop.f32.mrf.mxu0 }
 0x12b   : > { %v1662_v33 = vpop.f32.mrf.mxu1 }
 0x12c   : > { %v1125_v35 = vadd.f32 %v1478_v26, %v1077_v30  ;;  %v1000_v36 = vadd.f32 %v1661_v31, %v1597_v28  ;;  %v1599_v37 = vpop.f32.mrf.mxu0 }
 0x12d   : > { %v1600_v39 = vadd.f32 %v1599_v37, %v1598_v32  ;;  %v1663_v40 = vpop.f32.mrf.mxu1 }
 0x12e   : > { %v1516_v41 = vpack.c.bf16 %v1125_v35, %v1124_v34  ;;  %v1664_v42 = vadd.f32 %v1663_v40, %v1662_v33  ;;  %v1078_v43 = vadd.f32 %v1986_v10, %v1000_v36 }
 0x130   : > { %1535 = vst [vmem:[%s1996_s30 + $0x30] sm:$0xff] %v1516_v41   ;;  %v1003_v45 = vadd.f32 %v1664_v42, %v1600_v39  ;;  %v1126_v48 = vadd.f32 %v1481_v44, %v1078_v43 }
 0x132   : > { %v1079_v47 = vadd.f32 %v1986_v10, %v1003_v45 }
 0x134   : > { %v1127_v49 = vadd.f32 %v1482_v46, %v1079_v47 }
 0x136   : > { %v1521_v50 = vpack.c.bf16 %v1127_v49, %v1126_v48 }
 0x138   : > { %1536 = vst [vmem:[%s1996_s30 + $0x38] sm:$0xff] %v1521_v50  }
 0x139 PF: > { %s14_s17 = sadd.s32 1, %s1791_s17   ;;  %s2041_s15 = smov %s1787_s16 }
 0x13a   : > { %p11_p5 = scmp.ge.s32.totalorder %s14_s17, 4   ;;  %s2042_s16 = smov %s2044_s18 }
 0x13c   :  { %13 = sbr.rel (!%p11_p5) target bundleno = 2 (0x2), region = 83 }

// kernel: gptj_training_step.16
= control target key start
LH: loop header
LB: loop body
LE: loop exit
PB: predicated region body
PF: predicated region fallthrough
CT: control target
= control target key end

     0   :  { %s6919_s18 = smov 0   ;;  %s9849_s0 = inlined_call_operand.vmem [shape: bf16[2,128,384], index: 0, kind: input, shape index: {}]   ;;  %s9850_s1 = inlined_call_operand.vmem [shape: f32[2,1,128], index: 1, kind: input, shape index: {}]   ;;  %s9851_s2 = inlined_call_operand.vmem [shape: f32[128,32], index: 2, kind: input, shape index: {}]   ;;  %s9852_s3 = inlined_call_operand.vmem [shape: f32[128,32], index: 3, kind: input, shape index: {}]   ;;  %s9853_s4 = inlined_call_operand.vmem [shape: f32[32,32], index: 4, kind: input, shape index: {}]   ;;  %s9854_s5 = inlined_call_operand.vmem [shape: bf16[2,128,128], index: 5, kind: output, shape index: {}]  }
   0x1 LB: > { %s5274_s19 = sadd.s32 4294967295, %s6883_s18   ;;  %p5278_p0 = scmp.ge.s32.totalorder %s6883_s18, 1  ;;  %s6883_s18 = sphi %s6919_s18, %s15_s18  }
   0x2   : > { %p195_p1 = scmp.lt.s32.totalorder %s6883_s18, 3 }
   0x4   : > { %p196_p2 = pnand %p5278_p0, %p195_p1 }
   0x6   : > { %199 = sbr.rel (%p196_p2) target bundleno = 4300 (0x10cc), region = 40 }
   0xb   : > { %v6930_v0 = vld [vmem:[%s9853_s4 + $0x18] sm:$0xff]  ;;  %v6935_v1 = vld [vmem:[%s9853_s4 + $0x10] sm:$0xff]  ;;  %p226_p3 = scmp.lt.s32.totalorder %s5274_s19, 1  ;;  %v6943_v2 = vld [vmem:[%s9853_s4 + $0x8] sm:$0xff]  ;;  %vm9868_vm0 = vcmask 261120   ;;  %s6886_s10 = smov 96  }
   0xc   : > { %5789 = vmatprep.subr.mxu1 %v6930_v0  ;;  %5757 = vmatprep.subr.mxu0 %v6930_v0  ;;  %v6954_v3 = vld [vmem:[%s9853_s4] sm:$0xff]  ;;  %s6887_s21 = smov 32   ;;  %s6888_s26 = smov 64  }
   0xd   : > { %5790 = vmatpush3.msra.mxu1 %v6930_v0  ;;  %s10411_s19 = smov (!%p226_p3, %s5274_s19), 1  ;;  %5758 = vmatpush3.msra.mxu0 %v6930_v0 }
   0xe   : > { %5791 = vmatprep.subr.mxu1 %v6935_v1  ;;  %5759 = vmatprep.subr.mxu0 %v6935_v1  ;;  %s6301_s28 = smul.u32 192, %s10411_s19  ;;  %s233_s7 = scalar_lea.vmem %s9850_s1, %s10411_s19 }
   0xf   : > { %5792 = vmatpush3.msra.mxu1 %v6935_v1  ;;  %5760 = vmatpush3.msra.mxu0 %v6935_v1 }
  0x10   : > { %5793 = vmatprep.subr.mxu1 %v6943_v2  ;;  %5761 = vmatprep.subr.mxu0 %v6943_v2  ;;  %s6964_s6 = scalar_lea.vmem %s9849_s0, %s6301_s28 }
  0x11   : > { %5794 = vmatpush3.msra.mxu1 %v6943_v2  ;;  %5762 = vmatpush3.msra.mxu0 %v6943_v2  ;;  %v335_v4 = vld [vmem:[%s6964_s6] sm:$0xff]  ;;  %v337_v5 = vld [vmem:[%s6964_s6 + $0xc] sm:$0xff]  ;;  %v339_v6 = vld [vmem:[%s6964_s6 + $0x18] sm:$0xff] }
  0x12   : > { %5795 = vmatprep.subr.mxu1 %v6954_v3  ;;  %5763 = vmatprep.subr.mxu0 %v6954_v3  ;;  %v6973_v7 = vunpack.c.l.bf16 %v335_v4  ;;  %v399_v8 = vrot.slane %v335_v4, 4  ;;  %v6975_v9 = vunpack.c.l.bf16 %v337_v5  ;;  %v400_v10 = vrot.slane %v337_v5, 4  ;;  %v341_v11 = vld [vmem:[%s6964_s6 + $0x24] sm:$0xff]  ;;  %v343_v12 = vld [vmem:[%s6964_s6 + $0x30] sm:$0xff]  ;;  %v345_v19 = vld [vmem:[%s6964_s6 + $0x3c] sm:$0xff] }
  0x13   : > { %5796 = vmatpush3.msra.mxu1 %v6954_v3  ;;  %5764 = vmatpush3.msra.mxu0 %v6954_v3  ;;  %v6980_v13 = vunpack.c.l.bf16 %v339_v6  ;;  %v401_v14 = vrot.slane %v339_v6, 4  ;;  %v402_v15 = vrot.slane %v341_v11, 4  ;;  %v403_v18 = vrot.slane %v343_v12, 4  ;;  %v347_v22 = vld [vmem:[%s6964_s6 + $0x48] sm:$0xff]  ;;  %v349_v28 = vld [vmem:[%s6964_s6 + $0x54] sm:$0xff]  ;;  %v351_v30 = vld [vmem:[%s6964_s6 + $0x60] sm:$0xff] }
  0x14   : > { %9989 = vst [vmem:[#allocation2_spill] sm:$0xff] %v6973_v7  ;;  %9990 = vst [vmem:[#allocation3_spill] sm:$0xff] %v6975_v9  ;;  %v6982_v16 = vunpack.c.l.bf16 %v399_v8  ;;  %v6984_v17 = vunpack.c.l.bf16 %v400_v10  ;;  %5765 = vmatprep.mubr.msk.f32.mxu0 %vm9868_vm0, %v6973_v7  ;;  %v6991_v21 = vunpack.c.l.bf16 %v341_v11  ;;  %v6998_v23 = vunpack.c.l.bf16 %v343_v12  ;;  %v353_v36 = vld [vmem:[%s6964_s6 + $0x6c] sm:$0xff]  ;;  %v355_v38 = vld [vmem:[%s6964_s6 + $0x78] sm:$0xff] }
  0x15   : > { %v6989_v20 = vunpack.c.l.bf16 %v401_v14  ;;  %5766 = vmatmul.mubr.msk.f32.vlgmr.msra.gmra.mxu0 %vm9868_vm0, %v6975_v9  ;;  %v7004_v24 = vunpack.c.l.bf16 %v402_v15  ;;  %v404_v25 = vrot.slane %v345_v19, 4  ;;  %v7008_v26 = vunpack.c.l.bf16 %v403_v18  ;;  %v357_v44 = vld [vmem:[%s6964_s6 + $0x84] sm:$0xff]  ;;  %v359_v46 = vld [vmem:[%s6964_s6 + $0x90] sm:$0xff]  ;;  %v361_v52 = vld [vmem:[%s6964_s6 + $0x9c] sm:$0xff] }
  0x16   : > { %5797 = vmatprep.mubr.msk.f32.mxu1 %vm9868_vm0, %v6982_v16  ;;  %5768 = vmatprep.mubr.msk.f32.mxu0 %vm9868_vm0, %v6980_v13  ;;  %v405_v27 = vrot.slane %v347_v22, 4  ;;  %v7011_v29 = vunpack.c.l.bf16 %v345_v19  ;;  %v7016_v31 = vunpack.c.l.bf16 %v347_v22  ;;  %v406_v33 = vrot.slane %v349_v28, 4  ;;  %v363_v54 = vld [vmem:[%s6964_s6 + $0xa8] sm:$0xff]  ;;  %v7083_v60 = vld [vmem:[%s6964_s6 + $0xb4] sm:$0xff]  ;;  %v240_v12 = vld [vmem:[%s9851_s2] sm:$0xff] }
  0x17   : > { %5798 = vmatmul.mubr.msk.f32.vlgmr.msra.gmra.mxu1 %vm9868_vm0, %v6984_v17  ;;  %v7022_v32 = vunpack.c.l.bf16 %v404_v25  ;;  %v407_v35 = vrot.slane %v351_v30, 4  ;;  %v7029_v37 = vunpack.c.l.bf16 %v349_v28  ;;  %v7034_v39 = vunpack.c.l.bf16 %v351_v30  ;;  %9991 = vst [vmem:[#allocation4_spill] sm:$0xff] %v7083_v60  ;;  %v241_v10 = vld [vmem:[%s9851_s2 + $0x8] sm:$0xff] }
  0x18   : > { %5800 = vmatprep.mubr.msk.f32.mxu1 %vm9868_vm0, %v6989_v20  ;;  %v7026_v34 = vunpack.c.l.bf16 %v405_v27  ;;  %v7040_v40 = vunpack.c.l.bf16 %v406_v33  ;;  %v408_v41 = vrot.slane %v353_v36, 4  ;;  %v409_v43 = vrot.slane %v355_v38, 4  ;;  %v257_v14 = vld [vmem:[%s9852_s3 + $0x8] sm:$0xff]  ;;  %v256_v27 = vld [vmem:[%s9852_s3] sm:$0xff] }
  0x19   : > { %5769 = vmatmul.mubr.msk.f32.gmra.mxu0 %vm9868_vm0, %v6991_v21  ;;  %v7044_v42 = vunpack.c.l.bf16 %v407_v35  ;;  %v7047_v45 = vunpack.c.l.bf16 %v353_v36  ;;  %v7052_v47 = vunpack.c.l.bf16 %v355_v38  ;;  %v410_v49 = vrot.slane %v357_v44, 4 }
  0x1a   : > { %5771 = vmatprep.mubr.msk.f32.mxu0 %vm9868_vm0, %v6998_v23  ;;  %v7058_v48 = vunpack.c.l.bf16 %v408_v41  ;;  %v7062_v50 = vunpack.c.l.bf16 %v409_v43  ;;  %v411_v51 = vrot.slane %v359_v46, 4  ;;  %v7065_v53 = vunpack.c.l.bf16 %v357_v44 }
  0x1b   : > { %5801 = vmatmul.mubr.msk.f32.gmra.mxu1 %vm9868_vm0, %v7004_v24  ;;  %v7070_v55 = vunpack.c.l.bf16 %v359_v46  ;;  %v7076_v56 = vunpack.c.l.bf16 %v410_v49  ;;  %v412_v57 = vrot.slane %v361_v52, 4  ;;  %v413_v59 = vrot.slane %v363_v54, 4 }
  0x1c   : > { %5803 = vmatprep.mubr.msk.f32.mxu1 %vm9868_vm0, %v7008_v26  ;;  %v7080_v58 = vunpack.c.l.bf16 %v411_v51  ;;  %v7085_v61 = vunpack.c.l.bf16 %v361_v52  ;;  %v7089_v62 = vunpack.c.l.bf16 %v363_v54  ;;  %v414_v4 = vrot.slane %v7083_v60, 4 }
  0x1d   : > { %5772 = vmatmul.mubr.msk.f32.gmra.mxu0 %vm9868_vm0, %v7011_v29  ;;  %v7095_v63 = vunpack.c.l.bf16 %v412_v57  ;;  %v445_v5 = vunpack.c.l.bf16 %v413_v59  ;;  %v7101_v6 = vunpack.c.l.bf16 %v7083_v60  ;;  %v642_v11 = vmul.f32 %v6975_v9, %v241_v10 }
  0x1e   : > { %5774 = vmatprep.mubr.msk.f32.mxu0 %vm9868_vm0, %v7016_v31  ;;  %9992 = vst [vmem:[#allocation5_spill] sm:$0xff] %v7089_v62  ;;  %v446_v8 = vunpack.c.l.bf16 %v414_v4  ;;  %v907_v18 = vmul.f32 %v6984_v17, %v241_v10  ;;  %v641_v22 = vmul.f32 %v6973_v7, %v240_v12  ;;  %v906_v30 = vmul.f32 %v6982_v16, %v240_v12 }
  0x1f   : > { %5804 = vmatmul.mubr.msk.f32.gmra.mxu1 %vm9868_vm0, %v7022_v32  ;;  %9993 = vst [vmem:[#allocation6_spill] sm:$0xff] %v7101_v6 }
  0x20   : > { %5806 = vmatprep.mubr.msk.f32.mxu1 %vm9868_vm0, %v7026_v34 }
  0x21   : > { %5775 = vmatmul.mubr.msk.f32.gmra.mxu0 %vm9868_vm0, %v7029_v37 }
  0x22   : > { %5777 = vmatprep.mubr.msk.f32.mxu0 %vm9868_vm0, %v7034_v39 }
  0x23   : > { %5807 = vmatmul.mubr.msk.f32.gmra.mxu1 %vm9868_vm0, %v7040_v40 }
  0x24   : > { %5809 = vmatprep.mubr.msk.f32.mxu1 %vm9868_vm0, %v7044_v42 }
  0x25   : > { %5778 = vmatmul.mubr.msk.f32.gmra.mxu0 %vm9868_vm0, %v7047_v45 }
  0x26   : > { %5780 = vmatprep.mubr.msk.f32.mxu0 %vm9868_vm0, %v7052_v47 }
  0x27   : > { %5810 = vmatmul.mubr.msk.f32.gmra.mxu1 %vm9868_vm0, %v7058_v48 }
  0x28   : > { %5812 = vmatprep.mubr.msk.f32.mxu1 %vm9868_vm0, %v7062_v50 }
  0x29   : > { %5781 = vmatmul.mubr.msk.f32.gmra.mxu0 %vm9868_vm0, %v7065_v53 }
  0x2a   : > { %5783 = vmatprep.mubr.msk.f32.mxu0 %vm9868_vm0, %v7070_v55 }
  0x2b   : > { %5813 = vmatmul.mubr.msk.f32.gmra.mxu1 %vm9868_vm0, %v7076_v56 }
  0x2c   : > { %5815 = vmatprep.mubr.msk.f32.mxu1 %vm9868_vm0, %v7080_v58 }
  0x2d   : > { %5784 = vmatmul.mubr.msk.f32.gmra.mxu0 %vm9868_vm0, %v7085_v61 }
  0x2e   : > { %5786 = vmatprep.mubr.msk.f32.mxu0 %vm9868_vm0, %v7089_v62 }
  0x2f   : > { %5816 = vmatmul.mubr.msk.f32.gmra.mxu1 %vm9868_vm0, %v7095_v63 }
  0x30   : > { %5818 = vmatprep.mubr.msk.f32.mxu1 %vm9868_vm0, %v445_v5 }
  0x31   : > { %5787 = vmatmul.mubr.msk.f32.gmra.mxu0 %vm9868_vm0, %v7101_v6 }
  0x33   : > { %5819 = vmatmul.mubr.msk.f32.gmra.mxu1 %vm9868_vm0, %v446_v8 }
  0xd5   : > { %v5767_v15 = vpop.f32.mrf.mxu0 }
  0xd6   : > { %v658_v19 = vmul.f32 %v5767_v15, %v257_v14 }
  0xd7   : > { %v5799_v25 = vpop.f32.mrf.mxu1  ;;  %v562_v28 = vpop.f32.mrf.mxu0 }
  0xd8   : > { %v923_v33 = vmul.f32 %v5799_v25, %v257_v14  ;;  %v674_v35 = vadd.f32 %v658_v19, %v642_v11  ;;  %v657_v36 = vmul.f32 %v562_v28, %v256_v27  ;;  %v7147_v19 = vld [vmem:[%s9851_s2 + $0x60] sm:$0xff]  ;;  %v7162_v28 = vld [vmem:[%s9852_s3 + $0x78] sm:$0xff] }
  0xd9   : > { %v827_v38 = vpop.f32.mrf.mxu1  ;;  %9995 = vst [vmem:[#allocation8_spill] sm:$0xff] %v7162_v28 }
  0xda   : > { %v939_v41 = vadd.f32 %v923_v33, %v907_v18  ;;  %v922_v43 = vmul.f32 %v827_v38, %v256_v27  ;;  %v690_v44 = vmul.f32 0.17677669, %v674_v35  ;;  %v673_v46 = vadd.f32 %v657_v36, %v641_v22  ;;  %v7152_v22 = vld [vmem:[%s9852_s3 + $0x60] sm:$0xff]  ;;  %v7157_v27 = vld [vmem:[%s9851_s2 + $0x78] sm:$0xff]  ;;  %v7172_v33 = vld [vmem:[%s9851_s2 + $0x68] sm:$0xff] }
  0xdb   : > { %v7129_v17 = vpop.f32.mrf.mxu1  ;;  %9994 = vst [vmem:[#allocation7_spill] sm:$0xff] %v7157_v27  ;;  %v7177_v35 = vld [vmem:[%s9852_s3 + $0x68] sm:$0xff]  ;;  %v918_v36 = vmul.f32 %v7080_v58, %v7147_v19 }
  0xdc   : > { %v938_v49 = vadd.f32 %v922_v43, %v906_v30  ;;  %v689_v51 = vmul.f32 0.17677669, %v673_v46  ;;  %v7167_v30 = vld [vmem:[%s9851_s2 + $0x70] sm:$0xff] }
  0xdd   : > { %v7131_v52 = vpop.f32.mrf.mxu1  ;;  %9996 = vst [vmem:[#allocation9_spill] sm:$0xff] %v7167_v30 }
  0xde   : > { %v7133_v54 = vpack.c.bf16 %v939_v41, %v938_v49  ;;  %v705_v57 = vpack.c.bf16 %v690_v44, %v689_v51  ;;  %v7184_v41 = vld [vmem:[%s9852_s3 + $0x70] sm:$0xff]  ;;  %v921_v44 = vmul.f32 %v446_v8, %v7157_v27  ;;  %v920_v49 = vmul.f32 %v445_v5, %v7167_v30 }
  0xdf   : > { %v7135_v59 = vpop.f32.mrf.mxu1  ;;  %9997 = vst [vmem:[#allocation10_spill] sm:$0xff] %v7184_v41  ;;  %v7202_v5 = vld [vmem:[%s9852_s3 + $0x50] sm:$0xff] }
  0xe0   : > { %5837 = vmatprep.mubr.msk.bf16.mxu0 %vm9868_vm0, %v705_v57  ;;  %v919_v57 = vmul.f32 %v7095_v63, %v7172_v33  ;;  %v7207_v63 = vld [vmem:[%s9851_s2 + $0x58] sm:$0xff] }
  0xe1   : > { %v7138_v16 = vpop.f32.mrf.mxu1 }
  0xe3   : > { %v7140_v4 = vpop.f32.mrf.mxu1 }
  0xe5   : > { %v7142_v10 = vpop.f32.mrf.mxu1 }
  0xe7   : > { %v5811_v11 = vpop.f32.mrf.mxu1 }
  0xe9   : > { %v867_v12 = vpop.f32.mrf.mxu1 }
  0xeb   : > { %v5814_v14 = vpop.f32.mrf.mxu1 }
  0xed   : > { %v877_v15 = vpop.f32.mrf.mxu1 }
  0xef   : > { %v5817_v18 = vpop.f32.mrf.mxu1 }
  0xf0   : > { %v935_v58 = vmul.f32 %v5817_v18, %v7177_v35 }
  0xf1   : > { %v887_v25 = vpop.f32.mrf.mxu1 }
  0xf2   : > { %v934_v43 = vmul.f32 %v887_v25, %v7152_v22  ;;  %v7197_v25 = vld [vmem:[%s9851_s2 + $0x50] sm:$0xff]  ;;  %v951_v8 = vadd.f32 %v935_v58, %v919_v57 }
  0xf3   : > { %v5820_v38 = vpop.f32.mrf.mxu1  ;;  %v916_v18 = vmul.f32 %v7062_v50, %v7197_v25  ;;  %v7226_v50 = vld [vmem:[%s9851_s2 + $0x40] sm:$0xff] }
  0xf4   : > { %v937_v46 = vmul.f32 %v5820_v38, %v7162_v28  ;;  %v950_v9 = vadd.f32 %v934_v43, %v918_v36  ;;  %v932_v36 = vmul.f32 %v877_v15, %v7202_v5 }
  0xf5   : > { %v897_v51 = vpop.f32.mrf.mxu1 }
  0xf6   : > { %v936_v60 = vmul.f32 %v897_v51, %v7184_v41  ;;  %v953_v7 = vadd.f32 %v937_v46, %v921_v44  ;;  %v960_v43 = vpack.c.bf16 %v951_v8, %v950_v9  ;;  %v948_v46 = vadd.f32 %v932_v36, %v916_v18  ;;  %v7231_v9 = vld [vmem:[%s9852_s3 + $0x40] sm:$0xff]  ;;  %v7254_v36 = vld [vmem:[%s9851_s2 + $0x30] sm:$0xff] }
  0xf7   : > { %v930_v51 = vmul.f32 %v867_v12, %v7231_v9 }
  0xf8   : > { %v952_v62 = vadd.f32 %v936_v60, %v920_v49  ;;  %v7212_v60 = vld [vmem:[%s9852_s3 + $0x58] sm:$0xff]  ;;  %v914_v49 = vmul.f32 %v7044_v42, %v7226_v50  ;;  %v1005_v58 = vsel %vm9868_vm0, %v960_v43, 0  ;;  %v7259_v42 = vld [vmem:[%s9852_s3 + $0x30] sm:$0xff] }
  0xf9   : > { %v933_v44 = vmul.f32 %v5814_v14, %v7212_v60  ;;  %v7241_v14 = vld [vmem:[%s9852_s3 + $0x48] sm:$0xff] }
  0xfa   : > { %v961_v38 = vpack.c.bf16 %v953_v7, %v952_v62  ;;  %v917_v62 = vmul.f32 %v7076_v56, %v7207_v63  ;;  %v7236_v56 = vld [vmem:[%s9851_s2 + $0x48] sm:$0xff]  ;;  %v946_v18 = vadd.f32 %v930_v51, %v914_v49  ;;  %v5770_v49 = vpop.f32.mrf.mxu0 }
  0xfb   : > { %v915_v8 = vmul.f32 %v7058_v48, %v7236_v56  ;;  %v7264_v48 = vld [vmem:[%s9851_s2 + $0x38] sm:$0xff] }
  0xfc   : > { %6269 = vmatprep.subr.msk.bf16.mxu0 %vm9868_vm0, %v961_v38  ;;  %v1008_v7 = vsel %vm9868_vm0, %v961_v38, 0  ;;  %v949_v15 = vadd.f32 %v933_v44, %v917_v62  ;;  %v931_v38 = vmul.f32 %v5811_v11, %v7241_v14  ;;  %v7269_v11 = vld [vmem:[%s9852_s3 + $0x38] sm:$0xff] }
  0xfd   : > { %5822 = vmatpush3.bf16.xpose.msra.mxu0 %v1008_v7  ;;  %v928_v7 = vmul.f32 %v7142_v10, %v7259_v42  ;;  %v260_v10 = vld [vmem:[%s9852_s3 + $0x20] sm:$0xff] }
  0xfe   : > { %6270 = vmatprep.subr.msk.bf16.mxu0 %vm9868_vm0, %v960_v43  ;;  %v959_v57 = vpack.c.bf16 %v949_v15, %v948_v46  ;;  %v947_v12 = vadd.f32 %v931_v38, %v915_v8  ;;  %v912_v43 = vmul.f32 %v7026_v34, %v7254_v36  ;;  %v913_v46 = vmul.f32 %v7040_v40, %v7264_v48  ;;  %v244_v34 = vld [vmem:[%s9851_s2 + $0x20] sm:$0xff]  ;;  %v245_v40 = vld [vmem:[%s9851_s2 + $0x28] sm:$0xff] }
  0xff   : > { %v929_v15 = vmul.f32 %v7140_v4, %v7269_v11  ;;  %v261_v4 = vld [vmem:[%s9852_s3 + $0x28] sm:$0xff]  ;;  %v910_v8 = vmul.f32 %v7008_v26, %v244_v34  ;;  %v926_v38 = vmul.f32 %v7138_v16, %v260_v10  ;;  %v258_v26 = vld [vmem:[%s9852_s3 + $0x10] sm:$0xff] }
 0x100   : > { %v958_v62 = vpack.c.bf16 %v947_v12, %v946_v18  ;;  %v1002_v44 = vsel %vm9868_vm0, %v959_v57, 0  ;;  %v944_v51 = vadd.f32 %v928_v7, %v912_v43  ;;  %v911_v43 = vmul.f32 %v7022_v32, %v245_v40  ;;  %v243_v32 = vld [vmem:[%s9851_s2 + $0x18] sm:$0xff] }
 0x101   : > { %v927_v7 = vmul.f32 %v7135_v59, %v261_v4  ;;  %v259_v59 = vld [vmem:[%s9852_s3 + $0x18] sm:$0xff] }
 0x102   : > { %v999_v12 = vsel %vm9868_vm0, %v958_v62, 0 }
 0x103   : > { %v943_v16 = vadd.f32 %v927_v7, %v911_v43  ;;  %v925_v43 = vmul.f32 %v7129_v17, %v259_v59 }
 0x105   : > { %5824 = vmatpush3.bf16.xpose.msra.mxu0 %v1005_v58  ;;  %v572_v58 = vpop.f32.mrf.mxu0 }
 0x106   : > { %6271 = vmatprep.subr.msk.bf16.mxu0 %vm9868_vm0, %v959_v57  ;;  %v945_v57 = vadd.f32 %v929_v15, %v913_v46  ;;  %v942_v46 = vadd.f32 %v926_v38, %v910_v8  ;;  %v242_v15 = vld [vmem:[%s9851_s2 + $0x10] sm:$0xff] }
 0x108   : > { %v957_v18 = vpack.c.bf16 %v945_v57, %v944_v51  ;;  %v924_v57 = vmul.f32 %v7131_v52, %v258_v26  ;;  %v956_v8 = vpack.c.bf16 %v943_v16, %v942_v46  ;;  %v645_v46 = vmul.f32 %v6998_v23, %v244_v34 }
 0x109   : > { %v987_v34 = vsel %vm9868_vm0, %v7133_v54, 0 }
 0x10a   : > { %v996_v38 = vsel %vm9868_vm0, %v957_v18, 0  ;;  %v993_v27 = vsel %vm9868_vm0, %v956_v8, 0 }
 0x10d   : > { %5826 = vmatpush3.bf16.xpose.msra.mxu0 %v1002_v44  ;;  %v5773_v44 = vpop.f32.mrf.mxu0 }
 0x10e   : > { %6272 = vmatprep.subr.msk.bf16.mxu0 %vm9868_vm0, %v958_v62  ;;  %v908_v62 = vmul.f32 %v6989_v20, %v242_v15  ;;  %v662_v17 = vmul.f32 %v5773_v44, %v261_v4 }
 0x10f   : > { %v582_v51 = vpop.f32.mrf.mxu0 }
 0x110   : > { %v940_v41 = vadd.f32 %v924_v57, %v908_v62  ;;  %v661_v16 = vmul.f32 %v582_v51, %v260_v10  ;;  %v659_v62 = vmul.f32 %v572_v58, %v258_v26  ;;  %v647_v10 = vmul.f32 %v7016_v31, %v7254_v36 }
 0x111   : > { %v5776_v7 = vpop.f32.mrf.mxu0  ;;  %v649_v58 = vmul.f32 %v7034_v39, %v7226_v50 }
 0x113   : > { %v592_v30 = vpop.f32.mrf.mxu0 }
 0x115   : > { %5828 = vmatpush3.bf16.xpose.msra.mxu0 %v999_v12  ;;  %v909_v12 = vmul.f32 %v7004_v24, %v243_v32  ;;  %v5779_v20 = vpop.f32.mrf.mxu0  ;;  %v646_v24 = vmul.f32 %v7011_v29, %v245_v40  ;;  %v648_v40 = vmul.f32 %v7029_v37, %v7264_v48 }
 0x116   : > { %6273 = vmatprep.subr.msk.bf16.mxu0 %vm9868_vm0, %v957_v18 }
 0x117   : > { %v941_v28 = vadd.f32 %v925_v43, %v909_v12  ;;  %v602_v52 = vpop.f32.mrf.mxu0 }
 0x118   : > { %v665_v26 = vmul.f32 %v602_v52, %v7231_v9  ;;  %v652_v9 = vmul.f32 %v7065_v53, %v7207_v63 }
 0x119   : > { %v955_v6 = vpack.c.bf16 %v941_v28, %v940_v41  ;;  %v644_v28 = vmul.f32 %v6991_v21, %v243_v32  ;;  %v660_v41 = vmul.f32 %v5770_v49, %v259_v59  ;;  %v5782_v57 = vpop.f32.mrf.mxu0  ;;  %v650_v49 = vmul.f32 %v7047_v45, %v7236_v56 }
 0x11a   : > { %v663_v32 = vmul.f32 %v592_v30, %v7259_v42  ;;  %v654_v30 = vmul.f32 %v7085_v61, %v7172_v33  ;;  %v653_v42 = vmul.f32 %v7070_v55, %v7147_v19 }
 0x11b   : > { %v990_v18 = vsel %vm9868_vm0, %v955_v6, 0  ;;  %v612_v43 = vpop.f32.mrf.mxu0 }
 0x11d   : > { %5830 = vmatpush3.bf16.xpose.msra.mxu0 %v996_v38  ;;  %v677_v38 = vadd.f32 %v661_v16, %v645_v46  ;;  %v5785_v36 = vpop.f32.mrf.mxu0 }
 0x11e   : > { %6274 = vmatprep.subr.msk.bf16.mxu0 %vm9868_vm0, %v956_v8  ;;  %v678_v8 = vadd.f32 %v662_v17, %v646_v24  ;;  %v679_v17 = vadd.f32 %v663_v32, %v647_v10  ;;  %v10003_v10 = vld [vmem:[#allocation10_spill] sm:$0xff] }
 0x11f   : > { %v693_v44 = vmul.f32 0.17677669, %v677_v38  ;;  %v622_v46 = vpop.f32.mrf.mxu0  ;;  %v10000_v38 = vld [vmem:[#allocation9_spill] sm:$0xff] }
 0x120   : > { %v694_v4 = vmul.f32 0.17677669, %v678_v8  ;;  %v669_v52 = vmul.f32 %v622_v46, %v7152_v22  ;;  %v695_v16 = vmul.f32 0.17677669, %v679_v17 }
 0x121   : > { %v5788_v33 = vpop.f32.mrf.mxu0 }
 0x122   : > { %v707_v56 = vpack.c.bf16 %v694_v4, %v693_v44 }
 0x125   : > { %5832 = vmatpush3.bf16.xpose.msra.mxu0 %v993_v27  ;;  %v643_v27 = vmul.f32 %v6980_v13, %v242_v15  ;;  %v666_v15 = vmul.f32 %v5779_v20, %v7241_v14  ;;  %v651_v14 = vmul.f32 %v7052_v47, %v7197_v25  ;;  %v670_v20 = vmul.f32 %v5785_v36, %v7177_v35 }
 0x126   : > { %6275 = vmatprep.subr.msk.bf16.mxu0 %vm9868_vm0, %v955_v6  ;;  %v676_v6 = vadd.f32 %v660_v41, %v644_v28  ;;  %v668_v25 = vmul.f32 %v5782_v57, %v7212_v60  ;;  %v667_v28 = vmul.f32 %v612_v43, %v7202_v5  ;;  %v685_v35 = vadd.f32 %v669_v52, %v653_v42  ;;  %v632_v60 = vpop.f32.mrf.mxu0  ;;  %v9999_v57 = vld [vmem:[#allocation6_spill] sm:$0xff] }
 0x127   : > { %v675_v12 = vadd.f32 %v659_v62, %v643_v27  ;;  %v682_v59 = vadd.f32 %v666_v15, %v650_v49  ;;  %v686_v41 = vadd.f32 %v670_v20, %v654_v30  ;;  %v671_v49 = vmul.f32 %v632_v60, %v10003_v10 }
 0x128   : > { %v692_v48 = vmul.f32 0.17677669, %v676_v6  ;;  %v683_v27 = vadd.f32 %v667_v28, %v651_v14  ;;  %v701_v62 = vmul.f32 0.17677669, %v685_v35  ;;  %v10001_v6 = vld [vmem:[#allocation5_spill] sm:$0xff]  ;;  %v10007_v30 = vmov 0 }
 0x129   : > { %v691_v51 = vmul.f32 0.17677669, %v675_v12  ;;  %v702_v5 = vmul.f32 0.17677669, %v686_v41  ;;  %v10010_v20 = vmov 0 }
 0x12a   : > { %v699_v43 = vmul.f32 0.17677669, %v683_v27 }
 0x12b   : > { %v706_v50 = vpack.c.bf16 %v692_v48, %v691_v51  ;;  %v277_v51 = vlaneseq }
 0x12d   : > { %5834 = vmatpush3.bf16.xpose.msra.mxu0 %v990_v18  ;;  %v681_v18 = vadd.f32 %v665_v26, %v649_v58  ;;  %v7377_v32 = vshrl.u32 %v277_v51, 7 }
 0x12e   : > { %6276 = vmatprep.subr.msk.bf16.mxu0 %vm9868_vm0, %v7133_v54  ;;  %v664_v54 = vmul.f32 %v5776_v7, %v7269_v11  ;;  %v698_v11 = vmul.f32 0.17677669, %v682_v59 }
 0x12f   : > { %v697_v7 = vmul.f32 0.17677669, %v681_v18  ;;  %v316_v36 = vsub.s32 0, %v7377_v32  ;;  %v280_v18 = vadd.s32 16, %v7377_v32  ;;  %v281_v17 = vadd.s32 24, %v7377_v32 }
 0x130   : > { %v680_v24 = vadd.f32 %v664_v54, %v648_v40  ;;  %v10002_v40 = vld [vmem:[#allocation8_spill] sm:$0xff]  ;;  %v276_v54 = vld [vmem:[%s233_s7] sm:$0x1]  ;;  %v279_v46 = vadd.s32 8, %v7377_v32  ;;  %v286_v27 = vadd.s32 64, %v7377_v32 }
 0x131   : > { %v709_v19 = vpack.c.bf16 %v698_v11, %v697_v7  ;;  %vm312_vm1 = vcmp.gt.f32.partialorder %v276_v54, 0.5  ;;  %v282_v11 = vadd.s32 32, %v7377_v32  ;;  %v292_v54 = vadd.s32 112, %v7377_v32 }
 0x132   : > { %v696_v63 = vmul.f32 0.17677669, %v680_v24 }
 0x134   : > { %v708_v22 = vpack.c.bf16 %v696_v63, %v695_v16  ;;  %v10013_v16 = vmov 0 }
 0x135   : > { %5836 = vmatpush3.bf16.xpose.msra.mxu0 %v987_v34  ;;  %v672_v34 = vmul.f32 %v5788_v33, %v10002_v40  ;;  %v283_v33 = vadd.s32 40, %v7377_v32 }
 0x136   : > { %5917 = vmatprep.subr.mxu0 %v6930_v0 }
 0x13c   : > { %5838 = vmatmul.mubr.msk.bf16.vlgmr.msra.gmra.mxu0 %vm9868_vm0, %v706_v50  ;;  %v7381_v50 = vand.u32 127, %v277_v51  ;;  %v10034_v51 = vmov 0 }
 0x13d   : > { %5841 = vmatprep.mubr.msk.bf16.mxu0 %vm9868_vm0, %v707_v56  ;;  %5918 = vmatpush3.msra.mxu0 %v6930_v0  ;;  %v684_v0 = vadd.f32 %v668_v25, %v652_v9  ;;  %v6885_v56 = vmov 0   ;;  %v10004_v9 = vmov 0  ;;  %v284_v25 = vadd.s32 48, %v7377_v32 }
 0x13e   : > { %5919 = vmatprep.subr.mxu0 %v6935_v1  ;;  %v313_v59 = vsel %vm312_vm1, 1, %v6885_v56  ;;  %vm298_vm2 = vcmp.le.s32.totalorder %v7381_v50, %v280_v18  ;;  %vm296_vm4 = vcmp.le.s32.totalorder %v7381_v50, %v7377_v32  ;;  %vm299_vm6 = vcmp.le.s32.totalorder %v7381_v50, %v281_v17 }
 0x13f   : > { %5920 = vmatpush3.msra.mxu0 %v6935_v1  ;;  %v9998_v1 = vld [vmem:[#allocation7_spill] sm:$0xff]  ;;  %v700_v12 = vmul.f32 0.17677669, %v684_v0  ;;  %v7383_v24 = vrot.slane %v313_v59, %v316_v36  ;;  %vm297_vm8 = vcmp.le.s32.totalorder %v7381_v50, %v279_v46  ;;  %vm300_vm11 = vcmp.le.s32.totalorder %v7381_v50, %v282_v11 }
 0x140   : > { %5921 = vmatprep.subr.mxu0 %v6943_v2  ;;  %v656_v8 = vmul.f32 %v9999_v57, %v9998_v1  ;;  %vm302_vm13 = vcmp.le.s32.totalorder %v7381_v50, %v284_v25  ;;  %v285_v0 = vadd.s32 56, %v7377_v32  ;;  %vm301_vm14 = vcmp.le.s32.totalorder %v7381_v50, %v283_v33 }
 0x141   : > { %5922 = vmatpush3.msra.mxu0 %v6943_v2  ;;  %v655_v2 = vmul.f32 %v10001_v6, %v10000_v38  ;;  %v710_v58 = vpack.c.bf16 %v700_v12, %v699_v43  ;;  %vm318_vm3 = vcmp.eq.s32.totalorder %v7383_v24, 1  ;;  %v288_v38 = vadd.s32 80, %v7377_v32 }
 0x142   : > { %5923 = vmatprep.subr.mxu0 %v6954_v3  ;;  %v688_v4 = vadd.f32 %v672_v34, %v656_v8  ;;  %vm7393_vm5 = vmand %vm298_vm2, %vm318_vm3  ;;  %v10022_v8 = vmov 0  ;;  %vm303_vm2 = vcmp.le.s32.totalorder %v7381_v50, %v285_v0  ;;  %v10025_v34 = vmov 0 }
 0x143   : > { %5924 = vmatpush3.msra.mxu0 %v6954_v3  ;;  %v711_v3 = vpack.c.bf16 %v702_v5, %v701_v62  ;;  %v687_v44 = vadd.f32 %v671_v49, %v655_v2  ;;  %v10005_v9 = vsel %vm7393_vm5, 4294967295, %v10004_v9  ;;  %vm7400_vm7 = vmand %vm296_vm4, %vm318_vm3  ;;  %v10019_v62 = vmov 0 }
 0x144   : > { %5842 = vmatmul.mubr.msk.bf16.gmra.mxu0 %vm9868_vm0, %v708_v22  ;;  %v704_v15 = vmul.f32 0.17677669, %v688_v4  ;;  %10006 = vst [vmem:[#allocation7_spill] sm:$0xff] %v10005_v9  ;;  %v10008_v30 = vsel %vm7400_vm7, 4294967295, %v10007_v30  ;;  %vm7413_vm9 = vmand %vm299_vm6, %vm318_vm3  ;;  %v10016_v22 = vmov 0  ;;  %vm304_vm4 = vcmp.le.s32.totalorder %v7381_v50, %v286_v27 }
 0x145   : > { %5845 = vmatprep.mubr.msk.bf16.mxu0 %vm9868_vm0, %v709_v19  ;;  %v703_v26 = vmul.f32 0.17677669, %v687_v44  ;;  %10009 = vst [vmem:[#allocation6_spill] sm:$0xff] %v10008_v30  ;;  %v10011_v20 = vsel %vm7413_vm9, 4294967295, %v10010_v20  ;;  %vm7424_vm10 = vmand %vm297_vm8, %vm318_vm3  ;;  %v287_v2 = vadd.s32 72, %v7377_v32  ;;  %v10028_v49 = vmov 0 }
 0x146   : > { %10012 = vst [vmem:[#allocation9_spill] sm:$0xff] %v10011_v20  ;;  %v10014_v16 = vsel %vm7424_vm10, 4294967295, %v10013_v16  ;;  %vm7443_vm12 = vmand %vm300_vm11, %vm318_vm3  ;;  %vm306_vm11 = vcmp.le.s32.totalorder %v7381_v50, %v288_v38  ;;  %v291_v36 = vadd.s32 104, %v7377_v32  ;;  %v10037_v17 = vmov 0  ;;  %v6435_v38 = vld [vmem:[%s6964_s6 + $0x98] ss:$12 sps:$4 sm:$0xff]  }
 0x147   : > { %v712_v48 = vpack.c.bf16 %v704_v15, %v703_v26  ;;  %10015 = vst [vmem:[#allocation5_spill] sm:$0xff] %v10014_v16  ;;  %v10017_v22 = vsel %vm7443_vm12, 4294967295, %v10016_v22  ;;  %vm7457_vm15 = vmand %vm302_vm13, %vm318_vm3  ;;  %vm305_vm13 = vcmp.le.s32.totalorder %v7381_v50, %v287_v2  ;;  %v10031_v26 = vmov 0 }
 0x148   : > { %10018 = vst [vmem:[#allocation8_spill] sm:$0xff] %v10017_v22  ;;  %v10020_v62 = vsel %vm7457_vm15, 4294967295, %v10019_v62  ;;  %vm7464_vm1 = vmand %vm301_vm14, %vm318_vm3  ;;  %v293_v11 = vadd.s32 120, %v7377_v32  ;;  %v10043_v33 = vmov 0 }
 0x149   : > { %10021 = vst [vmem:[#allocation10_spill] sm:$0xff] %v10020_v62  ;;  %v10023_v8 = vsel %vm7464_vm1, 4294967295, %v10022_v8  ;;  %vm7482_vm6 = vmand %vm303_vm2, %vm318_vm3 }
 0x14a   : > { %10024 = vst [vmem:[#allocation11_spill] sm:$0xff] %v10023_v8  ;;  %v10026_v34 = vsel %vm7482_vm6, 4294967295, %v10025_v34  ;;  %vm7490_vm8 = vmand %vm304_vm4, %vm318_vm3 }
 0x14b   : > { %10027 = vst [vmem:[#allocation12_spill] sm:$0xff] %v10026_v34  ;;  %v10029_v49 = vsel %vm7490_vm8, 4294967295, %v10028_v49  ;;  %vm7508_vm14 = vmand %vm306_vm11, %vm318_vm3 }
 0x14c   : > { %5846 = vmatmul.mubr.msk.bf16.gmra.mxu0 %vm9868_vm0, %v710_v58  ;;  %10030 = vst [vmem:[#allocation13_spill] sm:$0xff] %v10029_v49  ;;  %v290_v58 = vadd.s32 96, %v7377_v32  ;;  %v10032_v26 = vsel %vm7508_vm14, 4294967295, %v10031_v26  ;;  %vm7516_vm2 = vmand %vm305_vm13, %vm318_vm3 }
 0x14d   : > { %5849 = vmatprep.mubr.msk.bf16.mxu0 %vm9868_vm0, %v711_v3  ;;  %v289_v3 = vadd.s32 88, %v7377_v32  ;;  %10033 = vst [vmem:[#allocation14_spill] sm:$0xff] %v10032_v26  ;;  %v10035_v51 = vsel %vm7516_vm2, 4294967295, %v10034_v51 }
 0x14e   : > { %10036 = vst [vmem:[#allocation15_spill] sm:$0xff] %v10035_v51  ;;  %vm308_vm11 = vcmp.le.s32.totalorder %v7381_v50, %v290_v58 }
 0x14f   : > { %vm307_vm4 = vcmp.le.s32.totalorder %v7381_v50, %v289_v3 }
 0x150   : > { %vm7534_vm13 = vmand %vm307_vm4, %vm318_vm3 }
 0x151   : > { %v10038_v17 = vsel %vm7534_vm13, 4294967295, %v10037_v17 }
 0x152   : > { %10039 = vst [vmem:[#allocation16_spill] sm:$0xff] %v10038_v17 }
 0x154   : > { %5850 = vmatmul.mubr.msk.bf16.gmra.mxu0 %vm9868_vm0, %v712_v48  ;;  %vm7542_vm0 = vmand %vm308_vm11, %vm318_vm3 }
 0x1fc   : > { %v5839_v14 = vpop.f32.mrf.mxu0 }
 0x1fd   : > { %v7406_v42 = vsel %vm7393_vm5, %v5839_v14, -1e+30  ;;  %v10040_v14 = vmov 0 }
 0x1fe   : > { %1127 = vmax.xlane.f32.xlu1 %v7406_v42  ;;  %v1044_v7 = vpop.f32.mrf.mxu0  ;;  %v10041_v14 = vsel %vm7542_vm0, 4294967295, %v10040_v14 }
 0x1ff   : > { %v7419_v52 = vsel %vm7400_vm7, %v1044_v7, -1e+30  ;;  %10042 = vst [vmem:[#allocation17_spill] sm:$0xff] %v10041_v14  ;;  %v7991_v14 = vld [vmem:[%s9851_s2 + $0x78] sm:$0xff] }
 0x200   : > { %1123 = vmax.xlane.f32.xlu0 %v7419_v52  ;;  %v5840_v63 = vpop.f32.mrf.mxu0 }
 0x201   : > { %v7431_v28 = vsel %vm7413_vm9, %v5840_v63, -1e+30 }
 0x202   : > { %1129 = vmax.xlane.f32.xlu1 %v7431_v28  ;;  %v1047_v19 = vpop.f32.mrf.mxu0 }
 0x203   : > { %v7438_v41 = vsel %vm7424_vm10, %v1047_v19, -1e+30  ;;  %v10046_v19 = vmov 0 }
 0x204   : > { %1125 = vmax.xlane.f32.xlu0 %v7438_v41  ;;  %v5843_v35 = vpop.f32.mrf.mxu0 }
 0x205   : > { %v7474_v43 = vsel %vm7457_vm15, %v5843_v35, -1e+30 }
 0x206   : > { %v1060_v60 = vpop.f32.mrf.mxu0 }
 0x207   : > { %v7453_v5 = vsel %vm7443_vm12, %v1060_v60, -1e+30  ;;  %v10049_v60 = vmov 0 }
 0x208   : > { %1131 = vmax.xlane.f32.xlu0 %v7453_v5  ;;  %v5844_v1 = vpop.f32.mrf.mxu0 }
 0x209   : > { %v7500_v44 = vsel %vm7482_vm6, %v5844_v1, -1e+30  ;;  %v6434_v1 = vld [vmem:[%s6964_s6 + $0xb0] ss:$12 sps:$4 sm:$0xff]  }
 0x20a   : > { %v1063_v12 = vpop.f32.mrf.mxu0  ;;  %5853 = vmatprep.subr.bf16.mxu1 %v6434_v1 }
 0x20b   : > { %v7478_v40 = vsel %vm7464_vm1, %v1063_v12, -1e+30  ;;  %5854 = vmatpush3.bf16.msra.mxu1 %v6434_v1 }
 0x20c   : > { %1135 = vmax.xlane.f32.xlu0 %v7474_v43  ;;  %1133 = vmax.xlane.f32.xlu1 %v7478_v40  ;;  %v5847_v10 = vpop.f32.mrf.mxu0 }
 0x20d   : > { %v7526_v59 = vsel %vm7508_vm14, %v5847_v10, -1e+30  ;;  %5855 = vmatprep.subr.bf16.mxu1 %v6435_v38 }
 0x20e   : > { %v1076_v4 = vpop.f32.mrf.mxu0 }
 0x20f   : > { %v7504_v15 = vsel %vm7490_vm8, %v1076_v4, -1e+30  ;;  %vm309_vm8 = vcmp.le.s32.totalorder %v7381_v50, %v291_v36  ;;  %5856 = vmatpush3.bf16.msra.mxu1 %v6435_v38 }
 0x210   : > { %1137 = vmax.xlane.f32.xlu1 %v7500_v44  ;;  %1139 = vmax.xlane.f32.xlu0 %v7504_v15  ;;  %v5848_v48 = vpop.f32.mrf.mxu0  ;;  %vm7567_vm11 = vmand %vm309_vm8, %vm318_vm3 }
 0x211   : > { %v7551_v63 = vsel %vm7534_vm13, %v5848_v48, -1e+30  ;;  %v10047_v19 = vsel %vm7567_vm11, 4294967295, %v10046_v19 }
 0x212   : > { %v1079_v56 = vpop.f32.mrf.mxu0  ;;  %10048 = vst [vmem:[#allocation19_spill] sm:$0xff] %v10047_v19 }
 0x213   : > { %v7530_v18 = vsel %vm7516_vm2, %v1079_v56, -1e+30  ;;  %vm310_vm2 = vcmp.le.s32.totalorder %v7381_v50, %v292_v54 }
 0x214   : > { %1143 = vmax.xlane.f32.xlu0 %v7526_v59  ;;  %1141 = vmax.xlane.f32.xlu1 %v7530_v18  ;;  %v5851_v46 = vpop.f32.mrf.mxu0  ;;  %vm7559_vm4 = vmand %vm310_vm2, %vm318_vm3 }
 0x215   : > { %v10044_v33 = vsel %vm7559_vm4, 4294967295, %v10043_v33  ;;  %v7574_v0 = vsel %vm7559_vm4, %v5851_v46, -1e+30 }
 0x216   : > { %v1092_v7 = vpop.f32.mrf.mxu0  ;;  %10045 = vst [vmem:[#allocation18_spill] sm:$0xff] %v10044_v33  ;;  %v7998_v33 = vld [vmem:[%s9851_s2 + $0x70] sm:$0xff] }
 0x217   : > { %v7555_v25 = vsel %vm7542_vm0, %v1092_v7, -1e+30  ;;  %vm311_vm0 = vcmp.le.s32.totalorder %v7381_v50, %v293_v11 }
 0x218   : > { %1145 = vmax.xlane.f32.xlu1 %v7551_v63  ;;  %1147 = vmax.xlane.f32.xlu0 %v7555_v25  ;;  %v5852_v32 = vpop.f32.mrf.mxu0  ;;  %vm7584_vm8 = vmand %vm311_vm0, %vm318_vm3  ;;  %vm10066_vm0 = vcmask 261120  }
 0x219   : > { %v10050_v60 = vsel %vm7584_vm8, 4294967295, %v10049_v60  ;;  %v7590_v50 = vsel %vm7584_vm8, %v5852_v32, -1e+30  ;;  %vm10067_vm3 = vmmov %vm10066_vm0 }
 0x21a   : > { %v1095_v35 = vpop.f32.mrf.mxu0  ;;  %10051 = vst [vmem:[#allocation20_spill] sm:$0xff] %v10050_v60  ;;  %vm10068_vm2 = vmmov %vm10066_vm0  ;;  %v7984_v60 = vld [vmem:[%s9851_s2 + $0x60] sm:$0xff] }
 0x21b   : > { %v7578_v27 = vsel %vm7567_vm11, %v1095_v35, -1e+30  ;;  %vm10069_vm11 = vmmov %vm10066_vm0 }
 0x21c   : > { %1151 = vmax.xlane.f32.xlu0 %v7574_v0  ;;  %1149 = vmax.xlane.f32.xlu1 %v7578_v27  ;;  %vm10070_vm8 = vmmov %vm10066_vm0 }
 0x21d   : > { %vm10089_vm4 = vmmov %vm10066_vm0 }
 0x21e   : > { %vm10114_vm13 = vmmov %vm10066_vm0 }
 0x21f   : > { %vm10115_vm14 = vmmov %vm10066_vm0 }
 0x220   : > { %1153 = vmax.xlane.f32.xlu1 %v7590_v50 }
 0x287   : > { %v1128_v2 = vpop.xlane.xlu1 %1127 }
 0x288   : > { %v1157_v12 = vsub.f32 %v7406_v42, %v1128_v2 }
 0x289   : > { %v1124_v24 = vpop.xlane.xlu0 %1123 }
 0x28a   : > { %v1155_v10 = vsub.f32 %v7419_v52, %v1124_v24  ;;  %v1175_v4 = vmul.f32 1.442695, %v1157_v12 }
 0x28b   : > { %v1130_v3 = vpop.xlane.xlu1 %1129 }
 0x28c   : > { %v1171_v58 = vmul.f32 1.442695, %v1155_v10  ;;  %v1158_v48 = vsub.f32 %v7431_v28, %v1130_v3 }
 0x28d   : > { %v1126_v54 = vpop.xlane.xlu0 %1125 }
 0x28e   : > { %6442 = vpow2.f32 %v1171_v58  ;;  %v1156_v36 = vsub.f32 %v7438_v41, %v1126_v54  ;;  %v1177_v46 = vmul.f32 1.442695, %v1158_v48 }
 0x28f   : > { %6444 = vpow2.f32 %v1175_v4 }
 0x290   : > { %v1173_v56 = vmul.f32 1.442695, %v1156_v36 }
 0x291   : > { %v1132_v11 = vpop.xlane.xlu0 %1131 }
 0x292   : > { %6446 = vpow2.f32 %v1173_v56  ;;  %v1159_v7 = vsub.f32 %v7453_v5, %v1132_v11 }
 0x293   : > { %6448 = vpow2.f32 %v1177_v46 }
 0x294   : > { %v1179_v42 = vmul.f32 1.442695, %v1159_v7 }
 0x295   : > { %v1136_v32 = vpop.xlane.xlu0 %1135  ;;  %v1134_v52 = vpop.xlane.xlu1 %1133 }
 0x296   : > { %6450 = vpow2.f32 %v1179_v42  ;;  %v1161_v35 = vsub.f32 %v7474_v43, %v1136_v32  ;;  %v1160_v28 = vsub.f32 %v7478_v40, %v1134_v52 }
 0x298   : > { %v1183_v1 = vmul.f32 1.442695, %v1161_v35  ;;  %v1181_v38 = vmul.f32 1.442695, %v1160_v28 }
 0x299   : > { %v1138_v2 = vpop.xlane.xlu1 %1137  ;;  %v1140_v41 = vpop.xlane.xlu0 %1139 }
 0x29a   : > { %6452 = vpow2.f32 %v1183_v1  ;;  %v1162_v12 = vsub.f32 %v7500_v44, %v1138_v2  ;;  %v1163_v24 = vsub.f32 %v7504_v15, %v1140_v41 }
 0x29b   : > { %v7604_v10 = vpop.eup %6442  ;;  %6454 = vpow2.f32 %v1181_v38 }
 0x29c   : > { %v1185_v5 = vmul.f32 1.442695, %v1162_v12  ;;  %v1187_v3 = vmul.f32 1.442695, %v1163_v24  ;;  %1203 = vadd.xlane.f32.xlu0 %v7604_v10  ;;  %v7607_v4 = vpop.eup %6444  ;;  %v6437_v12 = vld [vmem:[%s6964_s6 + $0x68] ss:$12 sps:$4 sm:$0xff]  }
 0x29d   : > { %v1144_v58 = vpop.xlane.xlu0 %1143  ;;  %v1142_v43 = vpop.xlane.xlu1 %1141 }
 0x29e   : > { %6456 = vpow2.f32 %v1185_v5  ;;  %v1165_v40 = vsub.f32 %v7526_v59, %v1144_v58  ;;  %v1164_v48 = vsub.f32 %v7530_v18, %v1142_v43  ;;  %v6438_v58 = vld [vmem:[%s6964_s6 + $0x50] ss:$12 sps:$4 sm:$0xff]  }
 0x29f   : > { %v7611_v54 = vpop.eup %6446  ;;  %6458 = vpow2.f32 %v1187_v3 }
 0x2a0   : > { %v1191_v44 = vmul.f32 1.442695, %v1165_v40  ;;  %v1189_v15 = vmul.f32 1.442695, %v1164_v48  ;;  %1207 = vadd.xlane.f32.xlu0 %v7607_v4  ;;  %1205 = vadd.xlane.f32.xlu1 %v7611_v54  ;;  %v7615_v46 = vpop.eup %6448  ;;  %v6439_v40 = vld [vmem:[%s6964_s6 + $0x38] ss:$12 sps:$4 sm:$0xff]  }
 0x2a1   : > { %v1146_v36 = vpop.xlane.xlu1 %1145  ;;  %v1148_v56 = vpop.xlane.xlu0 %1147 }
 0x2a2   : > { %6460 = vpow2.f32 %v1191_v44  ;;  %v1166_v11 = vsub.f32 %v7551_v63, %v1146_v36  ;;  %v1167_v59 = vsub.f32 %v7555_v25, %v1148_v56  ;;  %v6436_v63 = vld [vmem:[%s6964_s6 + $0x80] ss:$12 sps:$4 sm:$0xff]  }
 0x2a3   : > { %v7619_v18 = vpop.eup %6450  ;;  %6462 = vpow2.f32 %v1189_v15  ;;  %5857 = vmatprep.subr.bf16.mxu1 %v6436_v63  ;;  %v6440_v36 = vld [vmem:[%s6964_s6 + $0x20] ss:$12 sps:$4 sm:$0xff]  }
 0x2a4   : > { %v1193_v7 = vmul.f32 1.442695, %v1166_v11  ;;  %v1195_v42 = vmul.f32 1.442695, %v1167_v59  ;;  %1211 = vadd.xlane.f32.xlu0 %v7619_v18  ;;  %1209 = vadd.xlane.f32.xlu1 %v7615_v46  ;;  %v6441_v11 = vld [vmem:[%s6964_s6 + $0x8] ss:$12 sps:$4 sm:$0xff]  }
 0x2a5   : > { %v1152_v32 = vpop.xlane.xlu0 %1151  ;;  %v1150_v52 = vpop.xlane.xlu1 %1149  ;;  %5858 = vmatpush3.bf16.msra.mxu1 %v6436_v63  ;;  %v7668_v59 = vld [vmem:[%s9853_s4 + $0x18] sm:$0xff]  ;;  %v7695_v63 = vpack.i.bf16 %v7029_v37, %v7016_v31 }
 0x2a6   : > { %6464 = vpow2.f32 %v1193_v7  ;;  %v1169_v35 = vsub.f32 %v7574_v0, %v1152_v32  ;;  %v1168_v28 = vsub.f32 %v7578_v27, %v1150_v52  ;;  %5859 = vmatprep.subr.bf16.mxu1 %v6437_v12  ;;  %v7673_v7 = vpack.i.bf16 %v6991_v21, %v6980_v13  ;;  %v10054_v32 = vld [vmem:[#allocation3_spill] sm:$0xff] }
 0x2a7   : > { %v7626_v1 = vpop.eup %6452  ;;  %6466 = vpow2.f32 %v1195_v42  ;;  %v10053_v42 = vld [vmem:[#allocation2_spill] sm:$0xff]  ;;  %10058 = vst [vmem:[#allocation24_spill] sm:$0xff] %v7695_v63 }
 0x2a8   : > { %v7628_v25 = vpop.eup %6454  ;;  %v1199_v38 = vmul.f32 1.442695, %v1169_v35  ;;  %v1197_v2 = vmul.f32 1.442695, %v1168_v28  ;;  %1215 = vadd.xlane.f32.xlu0 %v7626_v1  ;;  %10052 = vst [vmem:[#allocation21_spill] sm:$0xff] %v7673_v7  ;;  %v7677_v52 = vpack.i.bf16 %v10054_v32, %v10053_v42  ;;  %v7683_v35 = vpack.i.bf16 %v7011_v29, %v6998_v23 }
 0x2a9   : > { %1213 = vadd.xlane.f32.xlu1 %v7628_v25  ;;  %v1154_v41 = vpop.xlane.xlu1 %1153  ;;  %5860 = vmatpush3.bf16.msra.mxu1 %v6437_v12  ;;  %v7689_v28 = vpack.i.bf16 %v7047_v45, %v7034_v39  ;;  %v7719_v12 = vpack.i.bf16 %v9999_v57, %v10001_v6 }
 0x2aa   : > { %6468 = vpow2.f32 %v1199_v38  ;;  %v1170_v0 = vsub.f32 %v7590_v50, %v1154_v41  ;;  %5861 = vmatprep.subr.bf16.mxu1 %v6438_v58  ;;  %10055 = vst [vmem:[#allocation2_spill] sm:$0xff] %v7677_v52  ;;  %10056 = vst [vmem:[#allocation22_spill] sm:$0xff] %v7683_v35  ;;  %v7701_v38 = vpack.i.bf16 %v7085_v61, %v7070_v55  ;;  %v6699_v41 = vld [vmem:[%s6964_s6 + $0xc] sm:$0xff] }
 0x2ab   : > { %v7633_v27 = vpop.eup %6456  ;;  %6470 = vpow2.f32 %v1197_v2  ;;  %10057 = vst [vmem:[#allocation23_spill] sm:$0xff] %v7689_v28  ;;  %v7707_v2 = vpack.i.bf16 %v7065_v53, %v7052_v47  ;;  %10061 = vst [vmem:[#allocation27_spill] sm:$0xff] %v7719_v12 }
 0x2ac   : > { %v7636_v24 = vpop.eup %6458  ;;  %v1201_v5 = vmul.f32 1.442695, %v1170_v0  ;;  %10059 = vst [vmem:[#allocation25_spill] sm:$0xff] %v7701_v38  ;;  %v6700_v0 = vld [vmem:[%s6964_s6] sm:$0xff] }
 0x2ad   : > { %1219 = vadd.xlane.f32.xlu0 %v7636_v24  ;;  %1217 = vadd.xlane.f32.xlu1 %v7633_v27  ;;  %10060 = vst [vmem:[#allocation26_spill] sm:$0xff] %v7707_v2 }
 0x2ae   : > { %6472 = vpow2.f32 %v1201_v5  ;;  %5862 = vmatpush3.bf16.msra.mxu1 %v6438_v58  ;;  %v6701_v5 = vld [vmem:[%s6964_s6 + $0x18] sm:$0xff]  ;;  %v6702_v58 = vld [vmem:[%s6964_s6 + $0x30] sm:$0xff] }
 0x2af   : > { %v7640_v3 = vpop.eup %6460  ;;  %5863 = vmatprep.subr.bf16.mxu1 %v6439_v40 }
 0x2b0   : > { %v7643_v50 = vpop.eup %6462 }
 0x2b1   : > { %1223 = vadd.xlane.f32.xlu0 %v7640_v3  ;;  %1221 = vadd.xlane.f32.xlu1 %v7643_v50 }
 0x2b2   : > { %5864 = vmatpush3.bf16.msra.mxu1 %v6439_v40  ;;  %v6703_v40 = vld [vmem:[%s6964_s6 + $0x24] sm:$0xff] }
 0x2b3   : > { %v7647_v43 = vpop.eup %6464  ;;  %5865 = vmatprep.subr.bf16.mxu1 %v6440_v36 }
 0x2b4   : > { %v7650_v48 = vpop.eup %6466 }
 0x2b5   : > { %1227 = vadd.xlane.f32.xlu0 %v7650_v48  ;;  %1225 = vadd.xlane.f32.xlu1 %v7647_v43 }
 0x2b6   : > { %5866 = vmatpush3.bf16.msra.mxu1 %v6440_v36  ;;  %v6704_v36 = vld [vmem:[%s6964_s6 + $0x48] sm:$0xff] }
 0x2b7   : > { %v7654_v44 = vpop.eup %6468  ;;  %5867 = vmatprep.subr.bf16.mxu1 %v6441_v11 }
 0x2b8   : > { %v7656_v15 = vpop.eup %6470 }
 0x2b9   : > { %1231 = vadd.xlane.f32.xlu0 %v7654_v44  ;;  %1229 = vadd.xlane.f32.xlu1 %v7656_v15 }
 0x2ba   : > { %5868 = vmatpush3.bf16.msra.mxu1 %v6441_v11  ;;  %v6705_v11 = vld [vmem:[%s6964_s6 + $0x3c] sm:$0xff] }
 0x2bb   : > { %v7661_v56 = vpop.eup %6472  ;;  %5885 = vmatprep.subr.mxu1 %v7668_v59 }
 0x2bd   : > { %1233 = vadd.xlane.f32.xlu1 %v7661_v56 }
 0x2ce   : > { %6320 = vrot.lane.b32.xlu1 %v7673_v7, %s6886_s10 }
 0x2cf   : > { %6315 = vrot.lane.b32.xlu0 %v7677_v52, %s6886_s10 }
 0x2d2   : > { %6325 = vrot.lane.b32.xlu1 %v7683_v35, %s6886_s10 }
 0x2d3   : > { %6335 = vrot.lane.b32.xlu0 %v7689_v28, %s6886_s10 }
 0x2d6   : > { %6330 = vrot.lane.b32.xlu1 %v7695_v63, %s6886_s10 }
 0x2d7   : > { %6345 = vrot.lane.b32.xlu0 %v7701_v38, %s6886_s10  ;;  %v6712_v38 = vld [vmem:[%s6964_s6 + $0xa8] sm:$0xff] }
 0x2da   : > { %6340 = vrot.lane.b32.xlu1 %v7707_v2, %s6886_s10 }
 0x2db   : > { %1430 = vrot.lane.b32.xlu0 %v6699_v41, %s6886_s10  ;;  %v6706_v41 = vld [vmem:[%s6964_s6 + $0x60] sm:$0xff] }
 0x2de   : > { %1428 = vrot.lane.b32.xlu1 %v6700_v0, %s6886_s10  ;;  %v6707_v0 = vld [vmem:[%s6964_s6 + $0x54] sm:$0xff] }
 0x2df   : > { %1432 = vrot.lane.b32.xlu0 %v6701_v5, %s6886_s10  ;;  %v6708_v5 = vld [vmem:[%s6964_s6 + $0x78] sm:$0xff] }
 0x2e2   : > { %6350 = vrot.lane.b32.xlu1 %v7719_v12, %s6886_s10 }
 0x2e3   : > { %1436 = vrot.lane.b32.xlu0 %v6702_v58, %s6886_s10  ;;  %v6709_v58 = vld [vmem:[%s6964_s6 + $0x6c] sm:$0xff] }
 0x2e6   : > { %1434 = vrot.lane.b32.xlu1 %v6703_v40, %s6886_s10  ;;  %v6710_v40 = vld [vmem:[%s6964_s6 + $0x90] sm:$0xff] }
 0x2e7   : > { %1440 = vrot.lane.b32.xlu0 %v6704_v36, %s6886_s10  ;;  %v6711_v36 = vld [vmem:[%s6964_s6 + $0x84] sm:$0xff] }
 0x2ea   : > { %1438 = vrot.lane.b32.xlu1 %v6705_v11, %s6886_s10  ;;  %v6713_v11 = vld [vmem:[%s6964_s6 + $0x9c] sm:$0xff] }
 0x2eb   : > { %1444 = vrot.lane.b32.xlu0 %v6706_v41, %s6886_s10  ;;  %v10062_v41 = vld [vmem:[#allocation4_spill] sm:$0xff] }
 0x2ee   : > { %1442 = vrot.lane.b32.xlu1 %v6707_v0, %s6886_s10 }
 0x2ef   : > { %1448 = vrot.lane.b32.xlu0 %v6708_v5, %s6886_s10 }
 0x2f2   : > { %1446 = vrot.lane.b32.xlu1 %v6709_v58, %s6886_s10 }
 0x2f3   : > { %1452 = vrot.lane.b32.xlu0 %v6710_v40, %s6886_s10 }
 0x2f6   : > { %1450 = vrot.lane.b32.xlu1 %v6711_v36, %s6886_s10 }
 0x2f7   : > { %1456 = vrot.lane.b32.xlu0 %v6712_v38, %s6886_s10 }
 0x2fa   : > { %1454 = vrot.lane.b32.xlu1 %v6713_v11, %s6886_s10 }
 0x2fe   : > { %1458 = vrot.lane.b32.xlu1 %v10062_v41, %s6886_s10 }
 0x325   : > { %v1204_v0 = vpop.xlane.xlu0 %1203 }
 0x326   : > { %6474 = vrcp.f32 %v1204_v0 }
 0x329   : > { %v1208_v5 = vpop.xlane.xlu0 %1207  ;;  %v1206_v28 = vpop.xlane.xlu1 %1205 }
 0x32a   : > { %6476 = vrcp.f32 %v1206_v28 }
 0x32b   : > { %6478 = vrcp.f32 %v1208_v5 }
 0x32d   : > { %v1212_v58 = vpop.xlane.xlu0 %1211  ;;  %v1210_v40 = vpop.xlane.xlu1 %1209 }
 0x32e   : > { %6480 = vrcp.f32 %v1210_v40 }
 0x32f   : > { %6482 = vrcp.f32 %v1212_v58 }
 0x331   : > { %v1216_v36 = vpop.xlane.xlu0 %1215 }
 0x332   : > { %v1214_v52 = vpop.xlane.xlu1 %1213 }
 0x333   : > { %6484 = vrcp.f32 %v1214_v52  ;;  %v6475_v38 = vpop.eup %6474 }
 0x334   : > { %6486 = vrcp.f32 %v1216_v36  ;;  %v1251_v41 = vmul.f32 %v6475_v38, %v7604_v10 }
 0x336   : > { %v1220_v12 = vpop.xlane.xlu0 %1219  ;;  %v1218_v11 = vpop.xlane.xlu1 %1217 }
 0x337   : > { %v6477_v2 = vpop.eup %6476  ;;  %6488 = vrcp.f32 %v1218_v11 }
 0x338   : > { %v1252_v0 = vmul.f32 %v6477_v2, %v7611_v54  ;;  %v6479_v63 = vpop.eup %6478  ;;  %6490 = vrcp.f32 %v1220_v12 }
 0x339   : > { %v1253_v52 = vmul.f32 %v6479_v63, %v7607_v4 }
 0x33a   : > { %v1224_v28 = vpop.xlane.xlu0 %1223  ;;  %v1222_v5 = vpop.xlane.xlu1 %1221  ;;  %v1267_v35 = vpack.c.bf16 %v1252_v0, %v1251_v41 }
 0x33b   : > { %v6481_v40 = vpop.eup %6480  ;;  %6492 = vrcp.f32 %v1222_v5 }
 0x33c   : > { %5869 = vmatprep.mubr.bf16.mxu1 %v1267_v35  ;;  %v1254_v58 = vmul.f32 %v6481_v40, %v7615_v46  ;;  %v6483_v36 = vpop.eup %6482  ;;  %6494 = vrcp.f32 %v1224_v28  ;;  %v7761_v46 = vld [vmem:[%s9853_s4 + $0x10] sm:$0xff]  ;;  %v7777_v28 = vld [vmem:[%s9853_s4] sm:$0xff] }
 0x33d   : > { %v1255_v54 = vmul.f32 %v6483_v36, %v7619_v18  ;;  %10063 = vst [vmem:[#allocation4_spill] sm:$0xff] %v7761_v46  ;;  %v7768_v18 = vld [vmem:[%s9853_s4 + $0x8] sm:$0xff]  ;;  %10065 = vst [vmem:[#allocation29_spill] sm:$0xff] %v7777_v28 }
 0x33e   : > { %v1228_v7 = vpop.xlane.xlu0 %1227  ;;  %v1226_v11 = vpop.xlane.xlu1 %1225  ;;  %v1268_v19 = vpack.c.bf16 %v1254_v58, %v1253_v52  ;;  %10064 = vst [vmem:[#allocation28_spill] sm:$0xff] %v7768_v18 }
 0x33f   : > { %6496 = vrcp.f32 %v1226_v11 }
 0x340   : > { %v6485_v10 = vpop.eup %6484  ;;  %5870 = vmatmul.mubr.bf16.vlgmr.msra.gmra.mxu1 %v1268_v19  ;;  %6498 = vrcp.f32 %v1228_v7 }
 0x341   : > { %v1256_v2 = vmul.f32 %v6485_v10, %v7628_v25  ;;  %5886 = vmatpush3.msra.mxu1 %v7668_v59  ;;  %v6487_v4 = vpop.eup %6486 }
 0x342   : > { %v1232_v35 = vpop.xlane.xlu0 %1231  ;;  %v1230_v12 = vpop.xlane.xlu1 %1229  ;;  %5887 = vmatprep.subr.mxu1 %v7761_v46  ;;  %v1257_v7 = vmul.f32 %v6487_v4, %v7626_v1 }
 0x343   : > { %v1269_v63 = vpack.c.bf16 %v1256_v2, %v1255_v54  ;;  %6500 = vrcp.f32 %v1230_v12  ;;  %5888 = vmatpush3.msra.mxu1 %v7761_v46 }
 0x344   : > { %v6489_v19 = vpop.eup %6488  ;;  %6502 = vrcp.f32 %v1232_v35  ;;  %5889 = vmatprep.subr.mxu1 %v7768_v18 }
 0x345   : > { %5873 = vmatprep.mubr.bf16.mxu1 %v1269_v63  ;;  %v1258_v38 = vmul.f32 %v6489_v19, %v7633_v27  ;;  %5890 = vmatpush3.msra.mxu1 %v7768_v18  ;;  %v6491_v0 = vpop.eup %6490 }
 0x346   : > { %v1234_v25 = vpop.xlane.xlu1 %1233  ;;  %v6316_v41 = vpop.permute.xlu0 %6315  ;;  %5891 = vmatprep.subr.mxu1 %v7777_v28  ;;  %v1259_v27 = vmul.f32 %v6491_v0, %v7636_v24 }
 0x347   : > { %6504 = vrcp.f32 %v1234_v25  ;;  %v1270_v5 = vpack.c.bf16 %v1258_v38, %v1257_v7  ;;  %5892 = vmatpush3.msra.mxu1 %v7777_v28 }
 0x348   : > { %v6493_v40 = vpop.eup %6492 }
 0x349   : > { %5874 = vmatmul.mubr.bf16.gmra.mxu1 %v1270_v5  ;;  %v1260_v52 = vmul.f32 %v6493_v40, %v7643_v50  ;;  %v6495_v36 = vpop.eup %6494 }
 0x34a   : > { %v6321_v1 = vpop.permute.xlu1 %6320  ;;  %v7783_v58 = vpop.permute.xlu0 %6335  ;;  %v1261_v2 = vmul.f32 %v6495_v36, %v7640_v3 }
 0x34b   : > { %v1271_v11 = vpack.c.bf16 %v1260_v52, %v1259_v27  ;;  %v6317_v52 = vunpack.i.l.bf16 %v6316_v41 }
 0x34c   : > { %v6497_v10 = vpop.eup %6496 }
 0x34d   : > { %5877 = vmatprep.mubr.bf16.mxu1 %v1271_v11  ;;  %v1262_v35 = vmul.f32 %v6497_v10, %v7647_v43  ;;  %v6499_v4 = vpop.eup %6498 }
 0x34e   : > { %v7785_v54 = vpop.permute.xlu1 %6325  ;;  %v7789_v12 = vpop.permute.xlu0 %6345  ;;  %v1263_v25 = vmul.f32 %v6499_v4, %v7650_v48 }
 0x34f   : > { %v1272_v63 = vpack.c.bf16 %v1262_v35, %v1261_v2 }
 0x350   : > { %v6501_v19 = vpop.eup %6500 }
 0x351   : > { %v6503_v24 = vpop.eup %6502  ;;  %5878 = vmatmul.mubr.bf16.gmra.mxu1 %v1272_v63  ;;  %v1264_v7 = vmul.f32 %v6501_v19, %v7656_v15 }
 0x352   : > { %v7791_v50 = vpop.permute.xlu1 %6330  ;;  %v1431_v38 = vpop.permute.xlu0 %1430  ;;  %v1265_v3 = vmul.f32 %v6503_v24, %v7654_v44  ;;  %v6322_v24 = vunpack.i.l.bf16 %v6321_v1 }
 0x353   : > { %v1273_v5 = vpack.c.bf16 %v1264_v7, %v1263_v25  ;;  %v1461_v11 = vrot.slane %v1431_v38, 4  ;;  %v6323_v7 = vunpack.i.h.bf16 %v6321_v1 }
 0x354   : > { %v6505_v0 = vpop.eup %6504 }
 0x355   : > { %v1266_v43 = vmul.f32 %v6505_v0, %v7661_v56  ;;  %5881 = vmatprep.mubr.bf16.mxu1 %v1273_v5  ;;  %v7800_v15 = vunpack.c.l.bf16 %v1461_v11  ;;  %v6318_v56 = vunpack.i.h.bf16 %v6316_v41  ;;  %v6327_v41 = vunpack.i.l.bf16 %v7785_v54 }
 0x356   : > { %v7797_v40 = vpop.permute.xlu1 %6340  ;;  %v1433_v27 = vpop.permute.xlu0 %1432  ;;  %v6332_v11 = vunpack.i.l.bf16 %v7791_v50 }
 0x357   : > { %v1274_v36 = vpack.c.bf16 %v1266_v43, %v1265_v3  ;;  %v1462_v10 = vrot.slane %v1433_v27, 4 }
 0x359   : > { %5882 = vmatmul.mubr.bf16.gmra.mxu1 %v1274_v36  ;;  %v7804_v44 = vunpack.c.l.bf16 %v1462_v10 }
 0x35a   : > { %v1429_v2 = vpop.permute.xlu1 %1428  ;;  %v1437_v48 = vpop.permute.xlu0 %1436  ;;  %5893 = vmatprep.mubr.msk.f32.mxu1 %vm10066_vm0, %v6317_v52  ;;  %v6328_v52 = vunpack.i.h.bf16 %v7785_v54  ;;  %v6333_v54 = vunpack.i.h.bf16 %v7791_v50  ;;  %v6338_v50 = vunpack.i.h.bf16 %v7783_v58 }
 0x35b   : > { %v1460_v35 = vrot.slane %v1429_v2, 4  ;;  %v1464_v25 = vrot.slane %v1437_v48, 4 }
 0x35d   : > { %v7802_v4 = vunpack.c.l.bf16 %v1460_v35  ;;  %v7817_v3 = vunpack.c.l.bf16 %v1464_v25 }
 0x35e   : > { %v7806_v63 = vpop.permute.xlu1 %6350  ;;  %v1441_v19 = vpop.permute.xlu0 %1440 }
 0x35f   : > { %5925 = vmatprep.mubr.msk.f32.mxu0 %vm10067_vm3, %v7802_v4  ;;  %v1466_v43 = vrot.slane %v1441_v19, 4  ;;  %vm10071_vm3 = vmmov %vm10066_vm0  ;;  %v6337_v19 = vunpack.i.l.bf16 %v7783_v58 }
 0x360   : > { %5926 = vmatmul.mubr.msk.f32.vlgmr.msra.gmra.mxu0 %vm10068_vm2, %v7800_v15  ;;  %vm10073_vm2 = vmmov %vm10066_vm0 }
 0x361   : > { %5928 = vmatprep.mubr.msk.f32.mxu0 %vm10066_vm0, %v7804_v44  ;;  %5894 = vmatmul.mubr.msk.f32.vlgmr.msra.gmra.mxu1 %vm10069_vm11, %v6318_v56  ;;  %vm10072_vm11 = vmmov %vm10066_vm0  ;;  %v7827_v2 = vunpack.c.l.bf16 %v1466_v43 }
 0x362   : > { %v1435_v38 = vpop.permute.xlu1 %1434  ;;  %v1445_v0 = vpop.permute.xlu0 %1444  ;;  %5896 = vmatprep.mubr.msk.f32.mxu1 %vm10070_vm8, %v6322_v24  ;;  %vm10074_vm8 = vmmov %vm10066_vm0 }
 0x363   : > { %v1463_v5 = vrot.slane %v1435_v38, 4  ;;  %v1468_v48 = vrot.slane %v1445_v0, 4 }
 0x365   : > { %v7819_v27 = vunpack.c.l.bf16 %v1463_v5  ;;  %5897 = vmatmul.mubr.msk.f32.gmra.mxu1 %vm10071_vm3, %v6323_v7  ;;  %vm10075_vm3 = vmmov %vm10066_vm0  ;;  %v7839_v7 = vunpack.c.l.bf16 %v1468_v48  ;;  %v6342_v5 = vunpack.i.l.bf16 %v7797_v40  ;;  %v6347_v48 = vunpack.i.l.bf16 %v7789_v12 }
 0x366   : > { %v1439_v36 = vpop.permute.xlu1 %1438  ;;  %v1449_v1 = vpop.permute.xlu0 %1448  ;;  %5899 = vmatprep.mubr.msk.f32.mxu1 %vm10073_vm2, %v6327_v41  ;;  %vm10077_vm2 = vmmov %vm10066_vm0 }
 0x367   : > { %v1465_v10 = vrot.slane %v1439_v36, 4  ;;  %5929 = vmatmul.mubr.msk.f32.gmra.mxu0 %vm10072_vm11, %v7819_v27  ;;  %vm10076_vm11 = vmmov %vm10066_vm0  ;;  %v1470_v38 = vrot.slane %v1449_v1, 4 }
 0x368   : > { %5931 = vmatprep.mubr.msk.f32.mxu0 %vm10074_vm8, %v7817_v3  ;;  %vm10078_vm8 = vmmov %vm10066_vm0 }
 0x369   : > { %v7831_v35 = vunpack.c.l.bf16 %v1465_v10  ;;  %5900 = vmatmul.mubr.msk.f32.gmra.mxu1 %vm10066_vm0, %v6328_v52  ;;  %v7851_v52 = vunpack.c.l.bf16 %v1470_v38  ;;  %v6352_v38 = vunpack.i.l.bf16 %v7806_v63 }
 0x36a   : > { %v1443_v56 = vpop.permute.xlu1 %1442  ;;  %5902 = vmatprep.mubr.msk.f32.mxu1 %vm10076_vm11, %v6332_v11  ;;  %v1453_v25 = vpop.permute.xlu0 %1452  ;;  %vm10080_vm11 = vmmov %vm10066_vm0  ;;  %v6343_v11 = vunpack.i.h.bf16 %v7797_v40  ;;  %v6348_v40 = vunpack.i.h.bf16 %v7789_v12  ;;  %v6353_v12 = vunpack.i.h.bf16 %v7806_v63  ;;  %v7896_v63 = vld [vmem:[%s9851_s2 + $0x8] sm:$0xff] }
 0x36b   : > { %v1467_v24 = vrot.slane %v1443_v56, 4  ;;  %5932 = vmatmul.mubr.msk.f32.gmra.mxu0 %vm10075_vm3, %v7831_v35  ;;  %vm10079_vm3 = vmmov %vm10066_vm0  ;;  %v1472_v36 = vrot.slane %v1453_v25, 4  ;;  %10092 = vst [vmem:[#allocation30_spill] sm:$0xff] %v7896_v63  ;;  %1735 = vrot.lane.b32.xlu1 %v7896_v63, %s6887_s21  ;;  %v2111_v22 = vmul.f32 %v7896_v63, %v7800_v15 }
 0x36c   : > { %5934 = vmatprep.mubr.msk.f32.mxu0 %vm10077_vm2, %v7827_v2  ;;  %vm10081_vm2 = vmmov %vm10066_vm0 }
 0x36d   : > { %v7843_v0 = vunpack.c.l.bf16 %v1467_v24  ;;  %5903 = vmatmul.mubr.msk.f32.gmra.mxu1 %vm10078_vm8, %v6333_v54  ;;  %vm10082_vm8 = vmmov %vm10066_vm0  ;;  %v7863_v56 = vunpack.c.l.bf16 %v1472_v36 }
 0x36e   : > { %v1447_v41 = vpop.permute.xlu1 %1446  ;;  %5905 = vmatprep.mubr.msk.f32.mxu1 %vm10079_vm3, %v6337_v19  ;;  %v1457_v58 = vpop.permute.xlu0 %1456  ;;  %vm10083_vm3 = vmmov %vm10066_vm0 }
 0x36f   : > { %v1469_v43 = vrot.slane %v1447_v41, 4  ;;  %5935 = vmatmul.mubr.msk.f32.gmra.mxu0 %vm10066_vm0, %v7843_v0  ;;  %v1474_v19 = vrot.slane %v1457_v58, 4 }
 0x370   : > { %5937 = vmatprep.mubr.msk.f32.mxu0 %vm10080_vm11, %v7839_v7  ;;  %vm10084_vm11 = vmmov %vm10066_vm0 }
 0x371   : > { %v7855_v1 = vunpack.c.l.bf16 %v1469_v43  ;;  %5906 = vmatmul.mubr.msk.f32.gmra.mxu1 %vm10081_vm2, %v6338_v50  ;;  %vm10085_vm2 = vmmov %vm10066_vm0  ;;  %v7875_v41 = vunpack.c.l.bf16 %v1474_v19  ;;  %v7928_v19 = vld [vmem:[%s9851_s2 + $0x20] sm:$0xff] }
 0x372   : > { %v1451_v10 = vpop.permute.xlu1 %1450  ;;  %5908 = vmatprep.mubr.msk.f32.mxu1 %vm10066_vm0, %v6342_v5 }
 0x373   : > { %v1471_v54 = vrot.slane %v1451_v10, 4  ;;  %5938 = vmatmul.mubr.msk.f32.gmra.mxu0 %vm10082_vm8, %v7855_v1  ;;  %vm10086_vm8 = vmmov %vm10066_vm0  ;;  %v7907_v10 = vld [vmem:[%s9851_s2 + $0x18] sm:$0xff] }
 0x374   : > { %5940 = vmatprep.mubr.msk.f32.mxu0 %vm10083_vm3, %v7851_v52  ;;  %vm10087_vm3 = vmmov %vm10066_vm0  ;;  %1739 = vrot.lane.b32.xlu1 %v7907_v10, %s6887_s21 }
 0x375   : > { %v7867_v24 = vunpack.c.l.bf16 %v1471_v54  ;;  %5909 = vmatmul.mubr.msk.f32.gmra.mxu1 %vm10084_vm11, %v6343_v11  ;;  %vm10088_vm11 = vmmov %vm10066_vm0  ;;  %v6718_v11 = vld [vmem:[%s9851_s2] sm:$0xff]  ;;  %v7921_v54 = vld [vmem:[%s9851_s2 + $0x28] sm:$0xff] }
 0x376   : > { %v1455_v25 = vpop.permute.xlu1 %1454  ;;  %5911 = vmatprep.mubr.msk.f32.mxu1 %vm10086_vm8, %v6347_v48  ;;  %vm10091_vm8 = vmmov %vm10066_vm0  ;;  %1733 = vrot.lane.b32.xlu0 %v6718_v11, %s6887_s21  ;;  %v7914_v48 = vld [vmem:[%s9851_s2 + $0x10] sm:$0xff]  ;;  %v2110_v28 = vmul.f32 %v6718_v11, %v7802_v4 }
 0x377   : > { %v1473_v50 = vrot.slane %v1455_v25, 4  ;;  %5941 = vmatmul.mubr.msk.f32.gmra.mxu0 %vm10085_vm2, %v7867_v24  ;;  %vm10090_vm2 = vmmov %vm10066_vm0  ;;  %v7942_v25 = vld [vmem:[%s9851_s2 + $0x30] sm:$0xff] }
 0x378   : > { %5943 = vmatprep.mubr.msk.f32.mxu0 %vm10066_vm0, %v7863_v56  ;;  %1743 = vrot.lane.b32.xlu1 %v7921_v54, %s6887_s21 }
 0x379   : > { %v7879_v5 = vunpack.c.l.bf16 %v1473_v50  ;;  %5912 = vmatmul.mubr.msk.f32.gmra.mxu1 %vm10087_vm3, %v6348_v40  ;;  %v7935_v40 = vld [vmem:[%s9851_s2 + $0x38] sm:$0xff]  ;;  %v7956_v50 = vld [vmem:[%s9851_s2 + $0x40] sm:$0xff]  ;;  %vm10110_vm3 = vmmov %vm10066_vm0 }
 0x37a   : > { %v1459_v43 = vpop.permute.xlu1 %1458  ;;  %5914 = vmatprep.mubr.msk.f32.mxu1 %vm10089_vm4, %v6352_v38  ;;  %1737 = vrot.lane.b32.xlu0 %v7914_v48, %s6887_s21  ;;  %v7949_v38 = vld [vmem:[%s9851_s2 + $0x48] sm:$0xff]  ;;  %vm10109_vm4 = vmmov %vm10066_vm0 }
 0x37b   : > { %v1475_v36 = vrot.slane %v1459_v43, 4  ;;  %5944 = vmatmul.mubr.msk.f32.gmra.mxu0 %vm10088_vm11, %v7879_v5  ;;  %v7970_v43 = vld [vmem:[%s9851_s2 + $0x50] sm:$0xff]  ;;  %vm10111_vm11 = vmmov %vm10066_vm0 }
 0x37c   : > { %5946 = vmatprep.mubr.msk.f32.mxu0 %vm10090_vm2, %v7875_v41  ;;  %1747 = vrot.lane.b32.xlu1 %v7935_v40, %s6887_s21  ;;  %vm10112_vm2 = vmmov %vm10066_vm0 }
 0x37d   : > { %v7888_v58 = vunpack.c.l.bf16 %v1475_v36  ;;  %5915 = vmatmul.mubr.msk.f32.gmra.mxu1 %vm10091_vm8, %v6353_v12  ;;  %v7963_v12 = vld [vmem:[%s9851_s2 + $0x58] sm:$0xff]  ;;  %v7977_v36 = vld [vmem:[%s9851_s2 + $0x68] sm:$0xff]  ;;  %vm10113_vm8 = vmmov %vm10066_vm0 }
 0x37e   : > { %1741 = vrot.lane.b32.xlu0 %v7928_v19, %s6887_s21 }
 0x37f   : > { %5947 = vmatmul.mubr.msk.f32.gmra.mxu0 %vm10066_vm0, %v7888_v58 }
 0x380   : > { %1751 = vrot.lane.b32.xlu1 %v7949_v38, %s6887_s21 }
 0x382   : > { %1745 = vrot.lane.b32.xlu0 %v7942_v25, %s6887_s21 }
 0x384   : > { %1755 = vrot.lane.b32.xlu1 %v7963_v12, %s6887_s21 }
 0x386   : > { %1749 = vrot.lane.b32.xlu0 %v7956_v50, %s6887_s21 }
 0x388   : > { %1759 = vrot.lane.b32.xlu1 %v7977_v36, %s6887_s21 }
 0x38a   : > { %1753 = vrot.lane.b32.xlu0 %v7970_v43, %s6887_s21 }
 0x38c   : > { %1763 = vrot.lane.b32.xlu1 %v7991_v14, %s6887_s21 }
 0x38e   : > { %1757 = vrot.lane.b32.xlu0 %v7984_v60, %s6887_s21 }
 0x392   : > { %1761 = vrot.lane.b32.xlu0 %v7998_v33, %s6887_s21 }
 0x400   : > { %v8002_v51 = vpop.f32.mrf.mxu1 }
 0x401   : > { %10093 = vst [vmem:[#allocation31_spill] sm:$0xff] %v8002_v51 }
 0x402   : > { %v8004_v49 = vpop.f32.mrf.mxu1 }
 0x403   : > { %10094 = vst [vmem:[#allocation32_spill] sm:$0xff] %v8004_v49 }
 0x404   : > { %v8006_v17 = vpop.f32.mrf.mxu1 }
 0x405   : > { %10095 = vst [vmem:[#allocation33_spill] sm:$0xff] %v8006_v17 }
 0x406   : > { %v8010_v8 = vpop.f32.mrf.mxu1 }
 0x407   : > { %10096 = vst [vmem:[#allocation34_spill] sm:$0xff] %v8010_v8  ;;  %v6733_v8 = vld [vmem:[%s9852_s3 + $0x8] sm:$0xff] }
 0x409   : > { %v8014_v34 = vpop.f32.mrf.mxu1 }
 0x40a   : > { %10097 = vst [vmem:[#allocation35_spill] sm:$0xff] %v8014_v34 }
 0x40b   : > { %v8016_v62 = vpop.f32.mrf.mxu1 }
 0x40c   : > { %10098 = vst [vmem:[#allocation36_spill] sm:$0xff] %v8016_v62 }
 0x40d   : > { %v8018_v20 = vpop.f32.mrf.mxu1 }
 0x40e   : > { %10099 = vst [vmem:[#allocation37_spill] sm:$0xff] %v8018_v20 }
 0x40f   : > { %v8022_v30 = vpop.f32.mrf.mxu1 }
 0x410   : > { %10100 = vst [vmem:[#allocation38_spill] sm:$0xff] %v8022_v30 }
 0x411   : > { %v8026_v26 = vpop.f32.mrf.mxu1 }
 0x412   : > { %10101 = vst [vmem:[#allocation39_spill] sm:$0xff] %v8026_v26 }
 0x413   : > { %v8028_v51 = vpop.f32.mrf.mxu1 }
 0x414   : > { %10102 = vst [vmem:[#allocation40_spill] sm:$0xff] %v8028_v51 }
 0x415   : > { %v8030_v17 = vpop.f32.mrf.mxu1 }
 0x416   : > { %10103 = vst [vmem:[#allocation41_spill] sm:$0xff] %v8030_v17 }
 0x417   : > { %v8034_v49 = vpop.f32.mrf.mxu1 }
 0x418   : > { %10104 = vst [vmem:[#allocation42_spill] sm:$0xff] %v8034_v49 }
 0x419   : > { %v8038_v16 = vpop.f32.mrf.mxu1 }
 0x41a   : > { %10105 = vst [vmem:[#allocation43_spill] sm:$0xff] %v8038_v16  ;;  %v6734_v16 = vld [vmem:[%s9852_s3] sm:$0xff] }
 0x41b   : > { %v8040_v34 = vpop.f32.mrf.mxu1 }
 0x41c   : > { %10106 = vst [vmem:[#allocation44_spill] sm:$0xff] %v8040_v34 }
 0x41d   : > { %v8042_v20 = vpop.f32.mrf.mxu1 }
 0x41e   : > { %10107 = vst [vmem:[#allocation45_spill] sm:$0xff] %v8042_v20 }
 0x41f   : > { %v8046_v62 = vpop.f32.mrf.mxu1 }
 0x420   : > { %10108 = vst [vmem:[#allocation46_spill] sm:$0xff] %v8046_v62  ;;  %v5927_v30 = vpop.f32.mrf.mxu0 }
 0x421   : > { %v2127_v51 = vmul.f32 %v6733_v8, %v5927_v30  ;;  %v5895_v49 = vpop.f32.mrf.mxu1  ;;  %v6735_v30 = vld [vmem:[%s9852_s3 + $0x18] sm:$0xff] }
 0x422   : > { %v2031_v17 = vpop.f32.mrf.mxu0  ;;  %v1798_v9 = vmul.f32 %v6733_v8, %v5895_v49  ;;  %v2113_v8 = vmul.f32 %v7907_v10, %v7819_v27 }
 0x423   : > { %v2143_v18 = vadd.f32 %v2127_v51, %v2111_v22  ;;  %v2126_v20 = vmul.f32 %v6734_v16, %v2031_v17  ;;  %v1638_v15 = vpop.f32.mrf.mxu1  ;;  %v2112_v17 = vmul.f32 %v7914_v48, %v7804_v44  ;;  %v2114_v48 = vmul.f32 %v7928_v19, %v7817_v3  ;;  %v6740_v3 = vld [vmem:[%s9852_s3 + $0x30] sm:$0xff] }
 0x424   : > { %v1797_v46 = vmul.f32 %v6734_v16, %v1638_v15  ;;  %1831 = vrot.lane.b32.xlu1 %v1798_v9, %s6887_s21  ;;  %v6736_v9 = vld [vmem:[%s9852_s3 + $0x10] sm:$0xff] }
 0x425   : > { %v2142_v63 = vadd.f32 %v2126_v20, %v2110_v28  ;;  %v5898_v26 = vpop.f32.mrf.mxu1  ;;  %v6737_v28 = vld [vmem:[%s9852_s3 + $0x28] sm:$0xff] }
 0x426   : > { %v1800_v4 = vmul.f32 %v6735_v30, %v5898_v26  ;;  %1829 = vrot.lane.b32.xlu0 %v1797_v46, %s6887_s21 }
 0x427   : > { %v8060_v34 = vpack.c.bf16 %v2143_v18, %v2142_v63  ;;  %v5930_v22 = vpop.f32.mrf.mxu0  ;;  %v1648_v49 = vpop.f32.mrf.mxu1 }
 0x428   : > { %v2129_v51 = vmul.f32 %v6735_v30, %v5930_v22  ;;  %v1799_v20 = vmul.f32 %v6736_v9, %v1648_v49  ;;  %1835 = vrot.lane.b32.xlu1 %v1800_v4, %s6887_s21  ;;  %v6738_v4 = vld [vmem:[%s9852_s3 + $0x20] sm:$0xff] }
 0x429   : > { %v2041_v16 = vpop.f32.mrf.mxu0  ;;  %v5901_v18 = vpop.f32.mrf.mxu1 }
 0x42a   : > { %v2145_v26 = vadd.f32 %v2129_v51, %v2113_v8  ;;  %v2128_v46 = vmul.f32 %v6736_v9, %v2041_v16  ;;  %v1802_v27 = vmul.f32 %v6737_v28, %v5901_v18  ;;  %1833 = vrot.lane.b32.xlu0 %v1799_v20, %s6887_s21  ;;  %v2115_v8 = vmul.f32 %v7921_v54, %v7831_v35  ;;  %v6739_v20 = vld [vmem:[%s9852_s3 + $0x38] sm:$0xff] }
 0x42b   : > { %v5933_v63 = vpop.f32.mrf.mxu0  ;;  %v1658_v15 = vpop.f32.mrf.mxu1 }
 0x42c   : > { %v2144_v11 = vadd.f32 %v2128_v46, %v2112_v17  ;;  %v2131_v30 = vmul.f32 %v6737_v28, %v5933_v63  ;;  %v1801_v22 = vmul.f32 %v6738_v4, %v1658_v15  ;;  %1839 = vrot.lane.b32.xlu1 %v1802_v27, %s6887_s21  ;;  %v2117_v63 = vmul.f32 %v7935_v40, %v7843_v0 }
 0x42d   : > { %v2051_v44 = vpop.f32.mrf.mxu0  ;;  %v5904_v51 = vpop.f32.mrf.mxu1 }
 0x42e   : > { %v8086_v49 = vpack.c.bf16 %v2145_v26, %v2144_v11  ;;  %v2130_v9 = vmul.f32 %v6738_v4, %v2051_v44  ;;  %v1804_v16 = vmul.f32 %v6739_v20, %v5904_v51  ;;  %1837 = vrot.lane.b32.xlu0 %v1801_v22, %s6887_s21  ;;  %v2147_v18 = vadd.f32 %v2131_v30, %v2115_v8  ;;  %v6741_v4 = vld [vmem:[%s9852_s3 + $0x48] sm:$0xff] }
 0x42f   : > { %v5936_v17 = vpop.f32.mrf.mxu0  ;;  %v1668_v28 = vpop.f32.mrf.mxu1  ;;  %v2116_v26 = vmul.f32 %v7942_v25, %v7827_v2  ;;  %v6742_v2 = vld [vmem:[%s9852_s3 + $0x40] sm:$0xff] }
 0x430   : > { %v2146_v46 = vadd.f32 %v2130_v9, %v2114_v48  ;;  %v2133_v27 = vmul.f32 %v6739_v20, %v5936_v17  ;;  %v1803_v35 = vmul.f32 %v6740_v3, %v1668_v28  ;;  %1843 = vrot.lane.b32.xlu1 %v1804_v16, %s6887_s21  ;;  %v2118_v20 = vmul.f32 %v7956_v50, %v7839_v7  ;;  %v6743_v28 = vld [vmem:[%s9852_s3 + $0x58] sm:$0xff]  ;;  %v6744_v7 = vld [vmem:[%s9852_s3 + $0x50] sm:$0xff] }
 0x431   : > { %v2061_v19 = vpop.f32.mrf.mxu0  ;;  %v5907_v15 = vpop.f32.mrf.mxu1  ;;  %v2119_v16 = vmul.f32 %v7949_v38, %v7855_v1 }
 0x432   : > { %v8100_v11 = vpack.c.bf16 %v2147_v18, %v2146_v46  ;;  %v2132_v30 = vmul.f32 %v6740_v3, %v2061_v19  ;;  %v1806_v22 = vmul.f32 %v6741_v4, %v5907_v15  ;;  %1841 = vrot.lane.b32.xlu0 %v1803_v35, %s6887_s21  ;;  %v2149_v48 = vadd.f32 %v2133_v27, %v2117_v63 }
 0x433   : > { %v5939_v44 = vpop.f32.mrf.mxu0  ;;  %v1678_v51 = vpop.f32.mrf.mxu1  ;;  %v2120_v15 = vmul.f32 %v7970_v43, %v7851_v52  ;;  %v6746_v52 = vld [vmem:[%s9852_s3 + $0x60] sm:$0xff] }
 0x434   : > { %v2148_v8 = vadd.f32 %v2132_v30, %v2116_v26  ;;  %v2135_v9 = vmul.f32 %v6741_v4, %v5939_v44  ;;  %v1805_v0 = vmul.f32 %v6742_v2, %v1678_v51  ;;  %1847 = vrot.lane.b32.xlu1 %v1806_v22, %s6887_s21  ;;  %v2121_v30 = vmul.f32 %v7963_v12, %v7867_v24 }
 0x435   : > { %v2071_v25 = vpop.f32.mrf.mxu0  ;;  %v5910_v18 = vpop.f32.mrf.mxu1 }
 0x436   : > { %v8114_v17 = vpack.c.bf16 %v2149_v48, %v2148_v8  ;;  %v2134_v46 = vmul.f32 %v6742_v2, %v2071_v25  ;;  %v1808_v27 = vmul.f32 %v6743_v28, %v5910_v18  ;;  %1845 = vrot.lane.b32.xlu0 %v1805_v0, %s6887_s21  ;;  %v2151_v35 = vadd.f32 %v2135_v9, %v2119_v16  ;;  %v6745_v48 = vld [vmem:[%s9852_s3 + $0x68] sm:$0xff] }
 0x437   : > { %v5942_v3 = vpop.f32.mrf.mxu0  ;;  %v1688_v26 = vpop.f32.mrf.mxu1  ;;  %v2123_v16 = vmul.f32 %v7977_v36, %v7879_v5 }
 0x438   : > { %v2150_v19 = vadd.f32 %v2134_v46, %v2118_v20  ;;  %v2137_v63 = vmul.f32 %v6743_v28, %v5942_v3  ;;  %v1807_v1 = vmul.f32 %v6744_v7, %v1688_v26  ;;  %1851 = vrot.lane.b32.xlu1 %v1808_v27, %s6887_s21  ;;  %v2122_v20 = vmul.f32 %v7984_v60, %v7863_v56  ;;  %v6747_v27 = vld [vmem:[%s9852_s3 + $0x78] sm:$0xff]  ;;  %v6748_v60 = vld [vmem:[%s9852_s3 + $0x70] sm:$0xff] }
 0x439   : > { %v2081_v50 = vpop.f32.mrf.mxu0  ;;  %v5913_v22 = vpop.f32.mrf.mxu1 }
 0x43a   : > { %v2162_v4 = vpack.c.bf16 %v2151_v35, %v2150_v19  ;;  %v2136_v44 = vmul.f32 %v6744_v7, %v2081_v50  ;;  %v1810_v8 = vmul.f32 %v6745_v48, %v5913_v22  ;;  %1849 = vrot.lane.b32.xlu0 %v1807_v1, %s6887_s21  ;;  %v2153_v9 = vadd.f32 %v2137_v63, %v2121_v30 }
 0x43b   : > { %v5945_v51 = vpop.f32.mrf.mxu0  ;;  %v1698_v0 = vpop.f32.mrf.mxu1  ;;  %v2124_v1 = vmul.f32 %v7998_v33, %v7875_v41  ;;  %v2125_v50 = vmul.f32 %v7991_v14, %v7888_v58 }
 0x43c   : > { %v2152_v2 = vadd.f32 %v2136_v44, %v2120_v15  ;;  %v2139_v25 = vmul.f32 %v6745_v48, %v5945_v51  ;;  %v1809_v24 = vmul.f32 %v6746_v52, %v1698_v0  ;;  %1855 = vrot.lane.b32.xlu1 %v1810_v8, %s6887_s21  ;;  %v2227_v41 = vsel %vm10115_vm14, %v2162_v4, 0  ;;  %v1736_v58 = vpop.permute.xlu1 %1735  ;;  %vm10120_vm14 = vmmov %vm10066_vm0 }
 0x43d   : > { %v2091_v43 = vpop.f32.mrf.mxu0  ;;  %v5916_v46 = vpop.f32.mrf.mxu1 }
 0x43e   : > { %v2163_v18 = vpack.c.bf16 %v2153_v9, %v2152_v2  ;;  %v2138_v28 = vmul.f32 %v6746_v52, %v2091_v43  ;;  %v1812_v3 = vmul.f32 %v6747_v27, %v5916_v46  ;;  %1853 = vrot.lane.b32.xlu0 %v1809_v24, %s6887_s21  ;;  %v2155_v19 = vadd.f32 %v2139_v25, %v2123_v16  ;;  %v1734_v2 = vpop.permute.xlu0 %1733 }
 0x43f   : > { %v5948_v35 = vpop.f32.mrf.mxu0  ;;  %v1708_v63 = vpop.f32.mrf.mxu1 }
 0x440   : > { %v2154_v26 = vadd.f32 %v2138_v28, %v2122_v20  ;;  %v2141_v7 = vmul.f32 %v6747_v27, %v5948_v35  ;;  %v1811_v56 = vmul.f32 %v6748_v60, %v1708_v63  ;;  %1859 = vrot.lane.b32.xlu1 %v1812_v3, %s6887_s21  ;;  %v2230_v33 = vsel %vm10066_vm0, %v2163_v18, 0  ;;  %v1740_v0 = vpop.permute.xlu1 %1739 }
 0x441   : > { %v2101_v5 = vpop.f32.mrf.mxu0  ;;  %v1781_v63 = vmul.f32 %v1734_v2, %v10053_v42 }
 0x442   : > { %v2164_v15 = vpack.c.bf16 %v2155_v19, %v2154_v26  ;;  %v2140_v30 = vmul.f32 %v6748_v60, %v2101_v5  ;;  %1857 = vrot.lane.b32.xlu0 %v1811_v56, %s6887_s21  ;;  %v2157_v22 = vadd.f32 %v2141_v7, %v2125_v50  ;;  %v1738_v25 = vpop.permute.xlu0 %1737  ;;  %v1782_v19 = vmul.f32 %v1736_v58, %v10054_v32 }
 0x444   : > { %v2156_v44 = vadd.f32 %v2140_v30, %v2124_v1  ;;  %v2233_v51 = vsel %vm10112_vm2, %v2164_v15, 0  ;;  %vm10119_vm2 = vmmov %vm10066_vm0 }
 0x445   : > { %v2221_v52 = vsel %vm10119_vm2, %v8100_v11, 0  ;;  %vm10129_vm2 = vmmov %vm10066_vm0 }
 0x446   : > { %v2165_v48 = vpack.c.bf16 %v2157_v22, %v2156_v44  ;;  %v1742_v24 = vpop.permute.xlu0 %1741 }
 0x448   : > { %6277 = vmatprep.subr.msk.bf16.mxu1 %vm10109_vm4, %v2165_v48  ;;  %v2236_v8 = vsel %vm10110_vm3, %v2165_v48, 0  ;;  %vm10116_vm4 = vmmov %vm10066_vm0 }
 0x449   : > { %5950 = vmatpush3.bf16.xpose.msra.mxu1 %v2236_v8  ;;  %vm10117_vm3 = vmmov %vm10066_vm0 }
 0x44a   : > { %6278 = vmatprep.subr.msk.bf16.mxu1 %vm10111_vm11, %v2164_v15  ;;  %v2224_v9 = vsel %vm10117_vm3, %v8114_v17, 0  ;;  %vm10118_vm11 = vmmov %vm10066_vm0  ;;  %v1746_v20 = vpop.permute.xlu0 %1745 }
 0x44b   : > { %vm10124_vm3 = vmmov %vm10066_vm0 }
 0x451   : > { %5952 = vmatpush3.bf16.xpose.msra.mxu1 %v2233_v51  ;;  %v1785_v51 = vmul.f32 %v1742_v24, %v6998_v23 }
 0x452   : > { %6279 = vmatprep.subr.msk.bf16.mxu1 %vm10113_vm8, %v2163_v18  ;;  %vm10122_vm8 = vmmov %vm10066_vm0  ;;  %v2215_v18 = vsel %vm10066_vm0, %v8060_v34, 0 }
 0x459   : > { %5954 = vmatpush3.bf16.xpose.msra.mxu1 %v2230_v33 }
 0x45a   : > { %6280 = vmatprep.subr.msk.bf16.mxu1 %vm10114_vm13, %v2162_v4  ;;  %v1744_v4 = vpop.permute.xlu1 %1743  ;;  %vm10121_vm13 = vmmov %vm10066_vm0 }
 0x45b   : > { %v2218_v43 = vsel %vm10121_vm13, %v8086_v49, 0  ;;  %v1786_v22 = vmul.f32 %v1744_v4, %v7011_v29  ;;  %vm10131_vm13 = vmmov %vm10066_vm0 }
 0x461   : > { %5956 = vmatpush3.bf16.xpose.msra.mxu1 %v2227_v41 }
 0x462   : > { %6281 = vmatprep.subr.msk.bf16.mxu1 %vm10116_vm4, %v8114_v17  ;;  %v1748_v17 = vpop.permute.xlu1 %1747  ;;  %vm10123_vm4 = vmmov %vm10066_vm0 }
 0x463   : > { %v1788_v2 = vmul.f32 %v1748_v17, %v7029_v37 }
 0x466   : > { %v1752_v16 = vpop.permute.xlu1 %1751 }
 0x467   : > { %v1790_v24 = vmul.f32 %v1752_v16, %v7047_v45 }
 0x469   : > { %5958 = vmatpush3.bf16.xpose.msra.mxu1 %v2224_v9 }
 0x46a   : > { %6282 = vmatprep.subr.msk.bf16.mxu1 %vm10118_vm11, %v8100_v11  ;;  %v1750_v11 = vpop.permute.xlu0 %1749  ;;  %v1756_v46 = vpop.permute.xlu1 %1755  ;;  %vm10126_vm11 = vmmov %vm10066_vm0 }
 0x46e   : > { %v1754_v28 = vpop.permute.xlu0 %1753  ;;  %v1760_v27 = vpop.permute.xlu1 %1759 }
 0x471   : > { %5960 = vmatpush3.bf16.xpose.msra.mxu1 %v2221_v52 }
 0x472   : > { %6283 = vmatprep.subr.msk.bf16.mxu1 %vm10120_vm14, %v8086_v49  ;;  %v1758_v3 = vpop.permute.xlu0 %1757  ;;  %v8178_v35 = vpop.permute.xlu1 %1763  ;;  %vm10130_vm14 = vmmov %vm10066_vm0 }
 0x476   : > { %v8180_v49 = vpop.permute.xlu0 %1761 }
 0x479   : > { %5962 = vmatpush3.bf16.xpose.msra.mxu1 %v2218_v43  ;;  %v1787_v43 = vmul.f32 %v1746_v20, %v7016_v31  ;;  %v1792_v20 = vmul.f32 %v1756_v46, %v7065_v53 }
 0x47a   : > { %6284 = vmatprep.subr.msk.bf16.mxu1 %vm10122_vm8, %v8060_v34  ;;  %v1784_v34 = vmul.f32 %v1740_v0, %v6991_v21  ;;  %vm10132_vm8 = vmmov %vm10066_vm0 }
 0x481   : > { %5964 = vmatpush3.bf16.xpose.msra.mxu1 %v2215_v18 }
 0x482   : > { %6045 = vmatprep.subr.mxu1 %v7668_v59  ;;  %v1783_v59 = vmul.f32 %v1738_v25, %v6980_v13 }
 0x496   : > { %v1832_v26 = vpop.permute.xlu1 %1831 }
 0x497   : > { %v1878_v7 = vadd.f32 %v1832_v26, %v1782_v19 }
 0x498   : > { %v1830_v60 = vpop.permute.xlu0 %1829 }
 0x499   : > { %v1877_v56 = vadd.f32 %v1830_v60, %v1781_v63  ;;  %v1894_v1 = vmul.f32 0.17677669, %v1878_v7 }
 0x49a   : > { %v1836_v5 = vpop.permute.xlu1 %1835 }
 0x49b   : > { %v1893_v50 = vmul.f32 0.17677669, %v1877_v56  ;;  %v1880_v15 = vadd.f32 %v1836_v5, %v1784_v34  ;;  %v1789_v34 = vmul.f32 %v1750_v11, %v7034_v39  ;;  %v1794_v11 = vmul.f32 %v1760_v27, %v7085_v61 }
 0x49c   : > { %v1834_v30 = vpop.permute.xlu0 %1833  ;;  %v1795_v27 = vmul.f32 %v8180_v49, %v10001_v6  ;;  %v6750_v49 = vld [vmem:[%s6964_s6 + $0x98] ss:$12 sps:$4 sm:$0xff]  }
 0x49d   : > { %v1879_v44 = vadd.f32 %v1834_v30, %v1783_v59  ;;  %v1909_v48 = vpack.c.bf16 %v1894_v1, %v1893_v50  ;;  %v1896_v33 = vmul.f32 0.17677669, %v1880_v15  ;;  %v1791_v30 = vmul.f32 %v1754_v28, %v7052_v47 }
 0x49e   : > { %v1840_v8 = vpop.permute.xlu1 %1839  ;;  %v1796_v28 = vmul.f32 %v8178_v35, %v9999_v57 }
 0x49f   : > { %v1895_v41 = vmul.f32 0.17677669, %v1879_v44  ;;  %v1882_v58 = vadd.f32 %v1840_v8, %v1786_v22  ;;  %2174 = vrot.lane.b32.xlu0 %v1909_v48, %s6886_s10 }
 0x4a0   : > { %v1838_v9 = vpop.permute.xlu0 %1837 }
 0x4a1   : > { %v1881_v0 = vadd.f32 %v1838_v9, %v1785_v51  ;;  %v1910_v25 = vpack.c.bf16 %v1896_v33, %v1895_v41  ;;  %v1898_v18 = vmul.f32 0.17677669, %v1882_v58  ;;  %v1793_v41 = vmul.f32 %v1758_v3, %v7070_v55 }
 0x4a2   : > { %v1844_v52 = vpop.permute.xlu1 %1843 }
 0x4a3   : > { %v1897_v4 = vmul.f32 0.17677669, %v1881_v0  ;;  %v1884_v19 = vadd.f32 %v1844_v52, %v1788_v2  ;;  %2176 = vrot.lane.b32.xlu1 %v1910_v25, %s6886_s10 }
 0x4a4   : > { %v1842_v26 = vpop.permute.xlu0 %1841 }
 0x4a5   : > { %v1883_v63 = vadd.f32 %v1842_v26, %v1787_v43  ;;  %v1911_v7 = vpack.c.bf16 %v1898_v18, %v1897_v4  ;;  %v1900_v56 = vmul.f32 0.17677669, %v1884_v19 }
 0x4a6   : > { %v1848_v60 = vpop.permute.xlu1 %1847 }
 0x4a7   : > { %v1899_v17 = vmul.f32 0.17677669, %v1883_v63  ;;  %v1886_v5 = vadd.f32 %v1848_v60, %v1790_v24  ;;  %2178 = vrot.lane.b32.xlu0 %v1911_v7, %s6886_s10  ;;  %v6749_v7 = vld [vmem:[%s6964_s6 + $0xb0] ss:$12 sps:$4 sm:$0xff]   ;;  %v6751_v60 = vld [vmem:[%s6964_s6 + $0x80] ss:$12 sps:$4 sm:$0xff]  }
 0x4a8   : > { %v1846_v59 = vpop.permute.xlu0 %1845 }
 0x4a9   : > { %v1885_v1 = vadd.f32 %v1846_v59, %v1789_v34  ;;  %v1912_v50 = vpack.c.bf16 %v1900_v56, %v1899_v17  ;;  %v1902_v22 = vmul.f32 0.17677669, %v1886_v5  ;;  %v8219_v17 = vld [vmem:[%s9853_s4 + $0x18] sm:$0xff]  ;;  %v10125_v5 = vld [vmem:[#allocation4_spill] sm:$0xff] }
 0x4aa   : > { %v1852_v15 = vpop.permute.xlu1 %1851 }
 0x4ab   : > { %v1901_v16 = vmul.f32 0.17677669, %v1885_v1  ;;  %v1888_v44 = vadd.f32 %v1852_v15, %v1792_v20  ;;  %2180 = vrot.lane.b32.xlu1 %v1912_v50, %s6886_s10  ;;  %v10127_v20 = vld [vmem:[#allocation28_spill] sm:$0xff]  ;;  %v10128_v1 = vld [vmem:[#allocation29_spill] sm:$0xff] }
 0x4ac   : > { %v1850_v48 = vpop.permute.xlu0 %1849 }
 0x4ad   : > { %v1887_v8 = vadd.f32 %v1850_v48, %v1791_v30  ;;  %v1913_v51 = vpack.c.bf16 %v1902_v22, %v1901_v16  ;;  %v1904_v58 = vmul.f32 0.17677669, %v1888_v44 }
 0x4ae   : > { %v1856_v33 = vpop.permute.xlu1 %1855 }
 0x4af   : > { %v1903_v46 = vmul.f32 0.17677669, %v1887_v8  ;;  %v1890_v9 = vadd.f32 %v1856_v33, %v1794_v11  ;;  %2182 = vrot.lane.b32.xlu0 %v1913_v51, %s6886_s10 }
 0x4b0   : > { %v1854_v2 = vpop.permute.xlu0 %1853 }
 0x4b1   : > { %v1889_v0 = vadd.f32 %v1854_v2, %v1793_v41  ;;  %v1914_v25 = vpack.c.bf16 %v1904_v58, %v1903_v46  ;;  %v1906_v43 = vmul.f32 0.17677669, %v1890_v9 }
 0x4b2   : > { %v1860_v52 = vpop.permute.xlu1 %1859 }
 0x4b3   : > { %v1905_v3 = vmul.f32 0.17677669, %v1889_v0  ;;  %v1892_v18 = vadd.f32 %v1860_v52, %v1796_v28  ;;  %2184 = vrot.lane.b32.xlu1 %v1914_v25, %s6886_s10 }
 0x4b4   : > { %v1858_v4 = vpop.permute.xlu0 %1857 }
 0x4b5   : > { %v1891_v19 = vadd.f32 %v1858_v4, %v1795_v27  ;;  %v1915_v26 = vpack.c.bf16 %v1906_v43, %v1905_v3  ;;  %v1908_v24 = vmul.f32 0.17677669, %v1892_v18 }
 0x4b7   : > { %v1907_v63 = vmul.f32 0.17677669, %v1891_v19  ;;  %2186 = vrot.lane.b32.xlu0 %v1915_v26, %s6886_s10 }
 0x4b9   : > { %v1916_v35 = vpack.c.bf16 %v1908_v24, %v1907_v63 }
 0x4bb   : > { %2188 = vrot.lane.b32.xlu1 %v1916_v35, %s6886_s10  ;;  %2517 = vrot.lane.b32.xlu0 %v6749_v7, %s6886_s10 }
 0x4bf   : > { %2515 = vrot.lane.b32.xlu1 %v6750_v49, %s6886_s10  ;;  %2513 = vrot.lane.b32.xlu0 %v6751_v60, %s6886_s10 }
 0x511   : > { %v2175_v34 = vpop.permute.xlu0 %2174 }
 0x512   : > { %5965 = vmatprep.mubr.msk.bf16.mxu1 %vm10123_vm4, %v2175_v34 }
 0x515   : > { %v2177_v56 = vpop.permute.xlu1 %2176 }
 0x516   : > { %5966 = vmatmul.mubr.msk.bf16.vlgmr.msra.gmra.mxu1 %vm10124_vm3, %v2177_v56 }
 0x517   : > { %6046 = vmatpush3.msra.mxu1 %v8219_v17 }
 0x518   : > { %6047 = vmatprep.subr.mxu1 %v10125_v5 }
 0x519   : > { %v2179_v59 = vpop.permute.xlu0 %2178  ;;  %6048 = vmatpush3.msra.mxu1 %v10125_v5  ;;  %v10141_v5 = vld [vmem:[#allocation14_spill] sm:$0xff] }
 0x51a   : > { %5969 = vmatprep.mubr.msk.bf16.mxu1 %vm10126_vm11, %v2179_v59  ;;  %6049 = vmatprep.subr.mxu1 %v10127_v20  ;;  %vm10142_vm4 = vnez %v10141_v5 }
 0x51b   : > { %6050 = vmatpush3.msra.mxu1 %v10127_v20  ;;  %v10143_v20 = vld [vmem:[#allocation16_spill] sm:$0xff] }
 0x51c   : > { %6051 = vmatprep.subr.mxu1 %v10128_v1  ;;  %vm10144_vm3 = vnez %v10143_v20 }
 0x51d   : > { %v2181_v50 = vpop.permute.xlu1 %2180  ;;  %6052 = vmatpush3.msra.mxu1 %v10128_v1 }
 0x51e   : > { %5970 = vmatmul.mubr.msk.bf16.gmra.mxu1 %vm10129_vm2, %v2181_v50 }
 0x521   : > { %v2183_v15 = vpop.permute.xlu0 %2182 }
 0x522   : > { %5973 = vmatprep.mubr.msk.bf16.mxu1 %vm10130_vm14, %v2183_v15  ;;  %v10145_v15 = vld [vmem:[#allocation13_spill] sm:$0xff] }
 0x523   : > { %vm10146_vm11 = vnez %v10145_v15 }
 0x525   : > { %v2185_v30 = vpop.permute.xlu1 %2184 }
 0x526   : > { %5974 = vmatmul.mubr.msk.bf16.gmra.mxu1 %vm10131_vm13, %v2185_v30 }
 0x529   : > { %v2187_v22 = vpop.permute.xlu0 %2186 }
 0x52a   : > { %5977 = vmatprep.mubr.msk.bf16.mxu1 %vm10132_vm8, %v2187_v22  ;;  %v10147_v22 = vld [vmem:[#allocation15_spill] sm:$0xff] }
 0x52b   : > { %vm10148_vm2 = vnez %v10147_v22 }
 0x52d   : > { %v2189_v16 = vpop.permute.xlu1 %2188  ;;  %v2518_v44 = vpop.permute.xlu0 %2517 }
 0x52e   : > { %5978 = vmatmul.mubr.msk.bf16.gmra.mxu1 %vm10066_vm0, %v2189_v16  ;;  %5981 = vmatprep.subr.bf16.mxu0 %v2518_v44 }
 0x52f   : > { %5982 = vmatpush3.bf16.msra.mxu0 %v2518_v44 }
 0x531   : > { %v2516_v48 = vpop.permute.xlu1 %2515  ;;  %v2514_v11 = vpop.permute.xlu0 %2513 }
 0x532   : > { %5983 = vmatprep.subr.bf16.mxu0 %v2516_v48 }
 0x533   : > { %5984 = vmatpush3.bf16.msra.mxu0 %v2516_v48  ;;  %v10149_v48 = vld [vmem:[#allocation18_spill] sm:$0xff] }
 0x534   : > { %5985 = vmatprep.subr.bf16.mxu0 %v2514_v11  ;;  %vm10150_vm14 = vnez %v10149_v48 }
 0x537   : > { %5986 = vmatpush3.bf16.msra.mxu0 %v2514_v11 }
 0x5d6   : > { %v5967_v8 = vpop.f32.mrf.mxu1 }
 0x5d7   : > { %v2337_v33 = vsel %vm7393_vm5, %v5967_v8, -1e+30 }
 0x5d8   : > { %2355 = vmax.xlane.f32.xlu0 %v2337_v33  ;;  %v2272_v41 = vpop.f32.mrf.mxu1 }
 0x5d9   : > { %v2335_v9 = vsel %vm7400_vm7, %v2272_v41, -1e+30  ;;  %v10151_v41 = vld [vmem:[#allocation17_spill] sm:$0xff] }
 0x5da   : > { %v5968_v58 = vpop.f32.mrf.mxu1  ;;  %vm10152_vm13 = vnez %v10151_v41 }
 0x5db   : > { %v2338_v27 = vsel %vm7413_vm9, %v5968_v58, -1e+30 }
 0x5dc   : > { %2351 = vmax.xlane.f32.xlu0 %v2335_v9  ;;  %v2275_v2 = vpop.f32.mrf.mxu1 }
 0x5dd   : > { %v2336_v0 = vsel %vm7424_vm10, %v2275_v2, -1e+30  ;;  %v6753_v2 = vld [vmem:[%s6964_s6 + $0x50] ss:$12 sps:$4 sm:$0xff]  }
 0x5de   : > { %2353 = vmax.xlane.f32.xlu1 %v2336_v0  ;;  %v5971_v25 = vpop.f32.mrf.mxu1 }
 0x5df   : > { %v2341_v4 = vsel %vm7457_vm15, %v5971_v25, -1e+30  ;;  %v6754_v25 = vld [vmem:[%s6964_s6 + $0x68] ss:$12 sps:$4 sm:$0xff]  }
 0x5e0   : > { %2357 = vmax.xlane.f32.xlu0 %v2338_v27  ;;  %v2288_v43 = vpop.f32.mrf.mxu1 }
 0x5e1   : > { %v2339_v7 = vsel %vm7443_vm12, %v2288_v43, -1e+30 }
 0x5e2   : > { %v5972_v3 = vpop.f32.mrf.mxu1 }
 0x5e3   : > { %v8246_v26 = vsel %vm7482_vm6, %v5972_v3, -1e+30  ;;  %v10153_v3 = vld [vmem:[#allocation20_spill] sm:$0xff] }
 0x5e4   : > { %2363 = vmax.xlane.f32.xlu0 %v2341_v4  ;;  %2365 = vmax.xlane.f32.xlu1 %v8246_v26  ;;  %v2291_v24 = vpop.f32.mrf.mxu1  ;;  %vm10154_vm8 = vnez %v10153_v3 }
 0x5e5   : > { %v2340_v60 = vsel %vm7464_vm1, %v2291_v24, -1e+30 }
 0x5e6   : > { %v5975_v63 = vpop.f32.mrf.mxu1 }
 0x5e7   : > { %v8255_v59 = vsel %vm10142_vm4, %v5975_v63, -1e+30 }
 0x5e8   : > { %2359 = vmax.xlane.f32.xlu0 %v2339_v7  ;;  %2361 = vmax.xlane.f32.xlu1 %v2340_v60  ;;  %v2304_v34 = vpop.f32.mrf.mxu1 }
 0x5e9   : > { %v8265_v30 = vsel %vm10146_vm11, %v2304_v34, -1e+30  ;;  %v10155_v34 = vld [vmem:[#allocation19_spill] sm:$0xff] }
 0x5ea   : > { %v5976_v56 = vpop.f32.mrf.mxu1  ;;  %vm10156_vm0 = vnez %v10155_v34 }
 0x5eb   : > { %v8259_v1 = vsel %vm10144_vm3, %v5976_v56, -1e+30 }
 0x5ec   : > { %2371 = vmax.xlane.f32.xlu0 %v8255_v59  ;;  %2373 = vmax.xlane.f32.xlu1 %v8259_v1  ;;  %v2307_v50 = vpop.f32.mrf.mxu1 }
 0x5ed   : > { %v8269_v16 = vsel %vm10148_vm2, %v2307_v50, -1e+30  ;;  %v6755_v50 = vld [vmem:[%s6964_s6 + $0x38] ss:$12 sps:$4 sm:$0xff]  }
 0x5ee   : > { %v5979_v44 = vpop.f32.mrf.mxu1 }
 0x5ef   : > { %v8275_v11 = vsel %vm10150_vm14, %v5979_v44, -1e+30 }
 0x5f0   : > { %2367 = vmax.xlane.f32.xlu0 %v8265_v30  ;;  %2369 = vmax.xlane.f32.xlu1 %v8269_v16  ;;  %v2320_v8 = vpop.f32.mrf.mxu1 }
 0x5f1   : > { %v8280_v58 = vsel %vm10152_vm13, %v2320_v8, -1e+30 }
 0x5f2   : > { %v5980_v43 = vpop.f32.mrf.mxu1 }
 0x5f3   : > { %v8289_v24 = vsel %vm10154_vm8, %v5980_v43, -1e+30 }
 0x5f4   : > { %2379 = vmax.xlane.f32.xlu0 %v8275_v11  ;;  %v2323_v63 = vpop.f32.mrf.mxu1 }
 0x5f5   : > { %v8294_v56 = vsel %vm10156_vm0, %v2323_v63, -1e+30  ;;  %vm10166_vm0 = vcmask 261120  }
 0x5f6   : > { %vm10167_vm8 = vmmov %vm10166_vm0 }
 0x5f7   : > { %vm10168_vm13 = vmmov %vm10166_vm0 }
 0x5f8   : > { %2375 = vmax.xlane.f32.xlu0 %v8280_v58  ;;  %vm10170_vm14 = vmmov %vm10166_vm0 }
 0x5f9   : > { %vm10184_vm2 = vmmov %vm10166_vm0 }
 0x5fa   : > { %vm10188_vm11 = vmmov %vm10166_vm0 }
 0x5fb   : > { %vm10189_vm3 = vmmov %vm10166_vm0 }
 0x5fc   : > { %vm10214_vm4 = vmmov %vm10166_vm0 }
 0x601   : > { %2509 = vrot.lane.b32.xlu1 %v6753_v2, %s6886_s10 }
 0x60e   : > { %2511 = vrot.lane.b32.xlu0 %v6754_v25, %s6886_s10 }
 0x625   : > { %2381 = vmax.xlane.f32.xlu1 %v8289_v24 }
 0x629   : > { %2377 = vmax.xlane.f32.xlu1 %v8294_v56 }
 0x63a   : > { %2507 = vrot.lane.b32.xlu1 %v6755_v50, %s6886_s10 }
 0x661   : > { %v2356_v44 = vpop.xlane.xlu0 %2355 }
 0x662   : > { %v2385_v8 = vsub.f32 %v2337_v33, %v2356_v44 }
 0x664   : > { %v2403_v2 = vmul.f32 1.442695, %v2385_v8 }
 0x665   : > { %v2352_v25 = vpop.xlane.xlu0 %2351 }
 0x666   : > { %6506 = vpow2.f32 %v2403_v2  ;;  %v2383_v62 = vsub.f32 %v2335_v9, %v2352_v25 }
 0x667   : > { %v2354_v43 = vpop.xlane.xlu1 %2353 }
 0x668   : > { %v2399_v3 = vmul.f32 1.442695, %v2383_v62  ;;  %v2384_v48 = vsub.f32 %v2336_v0, %v2354_v43 }
 0x669   : > { %v2358_v41 = vpop.xlane.xlu0 %2357 }
 0x66a   : > { %6508 = vpow2.f32 %v2399_v3  ;;  %v2386_v22 = vsub.f32 %v2338_v27, %v2358_v41  ;;  %v2401_v20 = vmul.f32 1.442695, %v2384_v48 }
 0x66c   : > { %v2405_v34 = vmul.f32 1.442695, %v2386_v22 }
 0x66d   : > { %v2366_v63 = vpop.xlane.xlu1 %2365  ;;  %v2364_v15 = vpop.xlane.xlu0 %2363 }
 0x66e   : > { %6510 = vpow2.f32 %v2405_v34  ;;  %v2389_v5 = vsub.f32 %v2341_v4, %v2364_v15  ;;  %v2390_v62 = vsub.f32 %v8246_v26, %v2366_v63 }
 0x66f   : > { %6512 = vpow2.f32 %v2401_v20 }
 0x670   : > { %v2411_v49 = vmul.f32 1.442695, %v2389_v5  ;;  %v2413_v15 = vmul.f32 1.442695, %v2390_v62 }
 0x671   : > { %v2362_v50 = vpop.xlane.xlu1 %2361  ;;  %v2360_v35 = vpop.xlane.xlu0 %2359 }
 0x672   : > { %v2388_v33 = vsub.f32 %v2340_v60, %v2362_v50  ;;  %v2387_v44 = vsub.f32 %v2339_v7, %v2360_v35  ;;  %6514 = vpow2.f32 %v2411_v49 }
 0x673   : > { %v8299_v8 = vpop.eup %6506 }
 0x674   : > { %v2409_v9 = vmul.f32 1.442695, %v2388_v33  ;;  %v2407_v0 = vmul.f32 1.442695, %v2387_v44  ;;  %2435 = vadd.xlane.f32.xlu1 %v8299_v8 }
 0x675   : > { %v2372_v27 = vpop.xlane.xlu0 %2371  ;;  %v2374_v22 = vpop.xlane.xlu1 %2373 }
 0x676   : > { %6516 = vpow2.f32 %v2409_v9  ;;  %v2393_v4 = vsub.f32 %v8255_v59, %v2372_v27  ;;  %v2394_v60 = vsub.f32 %v8259_v1, %v2374_v22 }
 0x677   : > { %v8304_v5 = vpop.eup %6508  ;;  %6518 = vpow2.f32 %v2407_v0 }
 0x678   : > { %2431 = vadd.xlane.f32.xlu1 %v8304_v5  ;;  %v2419_v7 = vmul.f32 1.442695, %v2393_v4  ;;  %6520 = vpow2.f32 %v2413_v15  ;;  %v2421_v34 = vmul.f32 1.442695, %v2394_v60  ;;  %v6756_v15 = vld [vmem:[%s6964_s6 + $0x8] ss:$12 sps:$4 sm:$0xff]  }
 0x679   : > { %v2368_v35 = vpop.xlane.xlu0 %2367  ;;  %v2370_v20 = vpop.xlane.xlu1 %2369  ;;  %v10158_v60 = vld [vmem:[#allocation22_spill] sm:$0xff] }
 0x67a   : > { %v2391_v26 = vsub.f32 %v8265_v30, %v2368_v35  ;;  %6522 = vpow2.f32 %v2419_v7  ;;  %v2392_v2 = vsub.f32 %v8269_v16, %v2370_v20  ;;  %v10157_v35 = vld [vmem:[#allocation21_spill] sm:$0xff]  ;;  %v6757_v7 = vld [vmem:[%s6964_s6 + $0x20] ss:$12 sps:$4 sm:$0xff]  }
 0x67b   : > { %v8308_v49 = vpop.eup %6510 }
 0x67c   : > { %v2415_v48 = vmul.f32 1.442695, %v2391_v26  ;;  %2437 = vadd.xlane.f32.xlu1 %v8308_v49  ;;  %v8313_v3 = vpop.eup %6512 }
 0x67d   : > { %v2380_v59 = vpop.xlane.xlu0 %2379  ;;  %v2510_v44 = vpop.permute.xlu1 %2509 }
 0x67e   : > { %v2397_v41 = vsub.f32 %v8275_v11, %v2380_v59  ;;  %6524 = vpow2.f32 %v2415_v48  ;;  %v2417_v11 = vmul.f32 1.442695, %v2392_v2  ;;  %v10159_v48 = vld [vmem:[#allocation24_spill] sm:$0xff] }
 0x67f   : > { %v8316_v30 = vpop.eup %6514 }
 0x680   : > { %v2427_v25 = vmul.f32 1.442695, %v2397_v41  ;;  %2433 = vadd.xlane.f32.xlu1 %v8313_v3  ;;  %2443 = vadd.xlane.f32.xlu0 %v8316_v30  ;;  %v10160_v41 = vld [vmem:[#allocation26_spill] sm:$0xff] }
 0x681   : > { %v2376_v1 = vpop.xlane.xlu0 %2375 }
 0x682   : > { %6526 = vpow2.f32 %v2427_v25  ;;  %v2395_v43 = vsub.f32 %v8280_v58, %v2376_v1  ;;  %v6758_v1 = vld [vmem:[%s6964_s6] sm:$0xff] }
 0x683   : > { %v8321_v63 = vpop.eup %6516  ;;  %6528 = vpow2.f32 %v2421_v34 }
 0x684   : > { %v8323_v50 = vpop.eup %6518  ;;  %v2423_v33 = vmul.f32 1.442695, %v2395_v43  ;;  %2441 = vadd.xlane.f32.xlu1 %v8321_v63 }
 0x685   : > { %2439 = vadd.xlane.f32.xlu0 %v8323_v50  ;;  %v2512_v16 = vpop.permute.xlu0 %2511  ;;  %v8327_v62 = vpop.eup %6520 }
 0x686   : > { %6530 = vpow2.f32 %v2423_v33  ;;  %5987 = vmatprep.subr.bf16.mxu0 %v2512_v16  ;;  %v6760_v33 = vld [vmem:[%s6964_s6 + $0x3c] sm:$0xff] }
 0x687   : > { %6532 = vpow2.f32 %v2417_v11  ;;  %5988 = vmatpush3.bf16.msra.mxu0 %v2512_v16  ;;  %v8330_v58 = vpop.eup %6522  ;;  %v10161_v11 = vld [vmem:[#allocation27_spill] sm:$0xff]  ;;  %v6761_v16 = vld [vmem:[%s6964_s6 + $0x54] sm:$0xff] }
 0x688   : > { %5989 = vmatprep.subr.bf16.mxu0 %v2510_v44 }
 0x689   : > { %2445 = vadd.xlane.f32.xlu0 %v8327_v62 }
 0x68b   : > { %5990 = vmatpush3.bf16.msra.mxu0 %v2510_v44  ;;  %v8332_v9 = vpop.eup %6524 }
 0x68c   : > { %2447 = vadd.xlane.f32.xlu1 %v8332_v9 }
 0x68d   : > { %2451 = vadd.xlane.f32.xlu0 %v8330_v58 }
 0x68f   : > { %v8336_v0 = vpop.eup %6526 }
 0x690   : > { %v8338_v27 = vpop.eup %6528  ;;  %2459 = vadd.xlane.f32.xlu1 %v8336_v0 }
 0x691   : > { %2453 = vadd.xlane.f32.xlu0 %v8338_v27 }
 0x693   : > { %v8342_v22 = vpop.eup %6530 }
 0x694   : > { %v8344_v4 = vpop.eup %6532  ;;  %2455 = vadd.xlane.f32.xlu1 %v8342_v22 }
 0x695   : > { %2449 = vadd.xlane.f32.xlu0 %v8344_v4 }
 0x6a5   : > { %2503 = vrot.lane.b32.xlu1 %v6756_v15, %s6886_s10  ;;  %v6762_v15 = vld [vmem:[%s6964_s6 + $0x6c] sm:$0xff] }
 0x6a9   : > { %6360 = vrot.lane.b32.xlu1 %v10157_v35, %s6888_s26 }
 0x6ab   : > { %2505 = vrot.lane.b32.xlu0 %v6757_v7, %s6886_s10  ;;  %v6763_v7 = vld [vmem:[%s6964_s6 + $0x84] sm:$0xff] }
 0x6ad   : > { %6365 = vrot.lane.b32.xlu1 %v10158_v60, %s6888_s26 }
 0x6ae   : > { %v2382_v26 = vpop.xlane.xlu1 %2381 }
 0x6af   : > { %v2398_v2 = vsub.f32 %v8289_v24, %v2382_v26  ;;  %v6764_v26 = vld [vmem:[%s6964_s6 + $0x9c] sm:$0xff] }
 0x6b1   : > { %6370 = vrot.lane.b32.xlu1 %v10159_v48, %s6888_s26  ;;  %v2429_v43 = vmul.f32 1.442695, %v2398_v2  ;;  %v10164_v2 = vld [vmem:[#allocation23_spill] sm:$0xff] }
 0x6b2   : > { %v2378_v20 = vpop.xlane.xlu1 %2377 }
 0x6b3   : > { %v2396_v59 = vsub.f32 %v8294_v56, %v2378_v20  ;;  %v6759_v56 = vld [vmem:[%s6964_s6 + $0x24] sm:$0xff]  ;;  %v6765_v20 = vld [vmem:[%s6964_s6 + $0xb4] sm:$0xff] }
 0x6b5   : > { %6380 = vrot.lane.b32.xlu1 %v10160_v41, %s6888_s26  ;;  %v2425_v25 = vmul.f32 1.442695, %v2396_v59  ;;  %v10162_v59 = vld [vmem:[#allocation30_spill] sm:$0xff] }
 0x6b6   : > { %v2508_v34 = vpop.permute.xlu1 %2507 }
 0x6b7   : > { %5991 = vmatprep.subr.bf16.mxu0 %v2508_v34  ;;  %6534 = vpow2.f32 %v2425_v25  ;;  %v10165_v25 = vld [vmem:[#allocation25_spill] sm:$0xff] }
 0x6b8   : > { %5992 = vmatpush3.bf16.msra.mxu0 %v2508_v34  ;;  %6536 = vpow2.f32 %v2429_v43  ;;  %v10163_v34 = vld [vmem:[#allocation2_spill] sm:$0xff] }
 0x6b9   : > { %2632 = vrot.lane.b32.xlu1 %v6758_v1, %s6888_s26  ;;  %v6770_v43 = vld [vmem:[%s6964_s6 + $0x60] sm:$0xff] }
 0x6bd   : > { %6390 = vrot.lane.b32.xlu1 %v10161_v11, %s6888_s26 }
 0x6c1   : > { %2638 = vrot.lane.b32.xlu1 %v6759_v56, %s6888_s26  ;;  %v6771_v56 = vld [vmem:[%s6964_s6 + $0x78] sm:$0xff] }
 0x6c4   : > { %v8370_v24 = vpop.eup %6534 }
 0x6c5   : > { %2642 = vrot.lane.b32.xlu1 %v6760_v33, %s6888_s26  ;;  %v8375_v44 = vpop.eup %6536 }
 0x6c9   : > { %2646 = vrot.lane.b32.xlu1 %v6761_v16, %s6888_s26 }
 0x6ca   : > { %2457 = vadd.xlane.f32.xlu0 %v8370_v24 }
 0x6cd   : > { %2650 = vrot.lane.b32.xlu1 %v6762_v15, %s6888_s26  ;;  %v6773_v15 = vld [vmem:[%s6964_s6 + $0xa8] sm:$0xff] }
 0x6ce   : > { %2461 = vadd.xlane.f32.xlu0 %v8375_v44 }
 0x6d1   : > { %2654 = vrot.lane.b32.xlu1 %v6763_v7, %s6888_s26 }
 0x6d5   : > { %2658 = vrot.lane.b32.xlu1 %v6764_v26, %s6888_s26  ;;  %v8427_v26 = vld [vmem:[%s9851_s2] sm:$0xff] }
 0x6d9   : > { %2662 = vrot.lane.b32.xlu1 %v6765_v20, %s6888_s26 }
 0x6dd   : > { %2923 = vrot.lane.b32.xlu1 %v10162_v59, %s6888_s26 }
 0x6e1   : > { %2927 = vrot.lane.b32.xlu1 %v7907_v10, %s6888_s26  ;;  %v6766_v10 = vld [vmem:[%s6964_s6 + $0xc] sm:$0xff] }
 0x6e4   : > { %6355 = vrot.lane.b32.xlu0 %v10163_v34, %s6888_s26 }
 0x6e5   : > { %2931 = vrot.lane.b32.xlu1 %v7921_v54, %s6888_s26  ;;  %v6767_v54 = vld [vmem:[%s6964_s6 + $0x18] sm:$0xff] }
 0x6e8   : > { %6375 = vrot.lane.b32.xlu0 %v10164_v2, %s6888_s26  ;;  %v8481_v2 = vld [vmem:[%s9851_s2 + $0x60] sm:$0xff] }
 0x6e9   : > { %2935 = vrot.lane.b32.xlu1 %v7935_v40, %s6888_s26  ;;  %v6768_v40 = vld [vmem:[%s6964_s6 + $0x30] sm:$0xff] }
 0x6ec   : > { %6385 = vrot.lane.b32.xlu0 %v10165_v25, %s6888_s26 }
 0x6ed   : > { %2939 = vrot.lane.b32.xlu1 %v7949_v38, %s6888_s26  ;;  %v6769_v38 = vld [vmem:[%s6964_s6 + $0x48] sm:$0xff] }
 0x6f0   : > { %2634 = vrot.lane.b32.xlu0 %v6766_v10, %s6888_s26  ;;  %v8434_v10 = vld [vmem:[%s9851_s2 + $0x10] sm:$0xff] }
 0x6f1   : > { %2943 = vrot.lane.b32.xlu1 %v7963_v12, %s6888_s26 }
 0x6f4   : > { %2636 = vrot.lane.b32.xlu0 %v6767_v54, %s6888_s26 }
 0x6f5   : > { %2947 = vrot.lane.b32.xlu1 %v7977_v36, %s6888_s26  ;;  %v6772_v36 = vld [vmem:[%s6964_s6 + $0x90] sm:$0xff] }
 0x6f8   : > { %2640 = vrot.lane.b32.xlu0 %v6768_v40, %s6888_s26 }
 0x6f9   : > { %2951 = vrot.lane.b32.xlu1 %v7991_v14, %s6888_s26 }
 0x6fc   : > { %2644 = vrot.lane.b32.xlu0 %v6769_v38, %s6888_s26 }
 0x6fd   : > { %v2436_v1 = vpop.xlane.xlu1 %2435 }
 0x700   : > { %2648 = vrot.lane.b32.xlu0 %v6770_v43, %s6888_s26 }
 0x701   : > { %v2432_v12 = vpop.xlane.xlu1 %2431 }
 0x702   : > { %6538 = vrcp.f32 %v2432_v12 }
 0x704   : > { %2652 = vrot.lane.b32.xlu0 %v6771_v56, %s6888_s26 }
 0x705   : > { %v2438_v33 = vpop.xlane.xlu1 %2437 }
 0x708   : > { %2656 = vrot.lane.b32.xlu0 %v6772_v36, %s6888_s26 }
 0x709   : > { %v2434_v16 = vpop.xlane.xlu1 %2433  ;;  %v2444_v14 = vpop.xlane.xlu0 %2443 }
 0x70a   : > { %6540 = vrcp.f32 %v2434_v16 }
 0x70b   : > { %6542 = vrcp.f32 %v2438_v33  ;;  %v8443_v33 = vld [vmem:[%s9851_s2 + $0x20] sm:$0xff] }
 0x70c   : > { %2660 = vrot.lane.b32.xlu0 %v6773_v15, %s6888_s26 }
 0x70d   : > { %v2442_v20 = vpop.xlane.xlu1 %2441 }
 0x70e   : > { %v2440_v7 = vpop.xlane.xlu0 %2439  ;;  %6544 = vrcp.f32 %v2442_v20 }
 0x70f   : > { %v6539_v54 = vpop.eup %6538  ;;  %6546 = vrcp.f32 %v2440_v7  ;;  %v8461_v7 = vld [vmem:[%s9851_s2 + $0x40] sm:$0xff] }
 0x710   : > { %2921 = vrot.lane.b32.xlu0 %v8427_v26, %s6888_s26  ;;  %6548 = vrcp.f32 %v2436_v1  ;;  %v2479_v12 = vmul.f32 %v6539_v54, %v8304_v5  ;;  %v8452_v1 = vld [vmem:[%s9851_s2 + $0x30] sm:$0xff] }
 0x712   : > { %v2446_v59 = vpop.xlane.xlu0 %2445 }
 0x713   : > { %6550 = vrcp.f32 %v2446_v59  ;;  %v8468_v59 = vld [vmem:[%s9851_s2 + $0x50] sm:$0xff] }
 0x714   : > { %2925 = vrot.lane.b32.xlu0 %v8434_v10, %s6888_s26  ;;  %6552 = vrcp.f32 %v2444_v14 }
 0x715   : > { %v2448_v40 = vpop.xlane.xlu1 %2447 }
 0x716   : > { %v2452_v38 = vpop.xlane.xlu0 %2451  ;;  %6554 = vrcp.f32 %v2448_v40 }
 0x717   : > { %v6541_v43 = vpop.eup %6540 }
 0x718   : > { %v2480_v56 = vmul.f32 %v6541_v43, %v8313_v3  ;;  %2929 = vrot.lane.b32.xlu0 %v8443_v33, %s6888_s26  ;;  %v6543_v20 = vpop.eup %6542 }
 0x719   : > { %v8447_v36 = vpop.xlane.xlu1 %2459  ;;  %v2482_v40 = vmul.f32 %v6543_v20, %v8308_v49 }
 0x71a   : > { %v2454_v16 = vpop.xlane.xlu0 %2453  ;;  %v2495_v15 = vpack.c.bf16 %v2480_v56, %v2479_v12 }
 0x71b   : > { %v6545_v54 = vpop.eup %6544 }
 0x71c   : > { %5997 = vmatprep.mubr.bf16.mxu0 %v2495_v15  ;;  %2933 = vrot.lane.b32.xlu0 %v8452_v1, %s6888_s26  ;;  %v6547_v56 = vpop.eup %6546 }
 0x71d   : > { %v8456_v5 = vpop.xlane.xlu1 %2455  ;;  %v6549_v14 = vpop.eup %6548  ;;  %v2483_v15 = vmul.f32 %v6547_v56, %v8323_v50  ;;  %v8499_v56 = vld [vmem:[%s9851_s2 + $0x70] sm:$0xff] }
 0x71e   : > { %v2450_v3 = vpop.xlane.xlu0 %2449 }
 0x71f   : > { %6556 = vrcp.f32 %v2450_v3  ;;  %v2484_v3 = vmul.f32 %v6545_v54, %v8321_v63 }
 0x720   : > { %2937 = vrot.lane.b32.xlu0 %v8461_v7, %s6888_s26  ;;  %6558 = vrcp.f32 %v2454_v16  ;;  %v6551_v49 = vpop.eup %6550 }
 0x721   : > { %v2504_v12 = vpop.permute.xlu1 %2503  ;;  %6560 = vrcp.f32 %v2452_v38  ;;  %v2497_v50 = vpack.c.bf16 %v2484_v3, %v2483_v15  ;;  %v6553_v20 = vpop.eup %6552  ;;  %v2486_v54 = vmul.f32 %v6551_v49, %v8327_v62 }
 0x722   : > { %v2506_v43 = vpop.permute.xlu0 %2505  ;;  %6562 = vrcp.f32 %v8456_v5 }
 0x723   : > { %5993 = vmatprep.subr.bf16.mxu0 %v2506_v43  ;;  %v6555_v38 = vpop.eup %6554 }
 0x724   : > { %5994 = vmatpush3.bf16.msra.mxu0 %v2506_v43  ;;  %2941 = vrot.lane.b32.xlu0 %v8468_v59, %s6888_s26  ;;  %v2481_v43 = vmul.f32 %v6549_v14, %v8299_v8  ;;  %v2485_v14 = vmul.f32 %v6553_v20, %v8316_v30  ;;  %v2487_v15 = vmul.f32 %v6555_v38, %v8332_v9 }
 0x725   : > { %5995 = vmatprep.subr.bf16.mxu0 %v2504_v12  ;;  %v8475_v25 = vpop.permute.xlu1 %6360 }
 0x726   : > { %v2496_v16 = vpack.c.bf16 %v2482_v40, %v2481_v43  ;;  %v8511_v40 = vld [vmem:[%s9853_s4 + $0x8] sm:$0xff]  ;;  %v2498_v3 = vpack.c.bf16 %v2486_v54, %v2485_v14 }
 0x728   : > { %5996 = vmatpush3.bf16.msra.mxu0 %v2504_v12  ;;  %2945 = vrot.lane.b32.xlu0 %v8481_v2, %s6888_s26  ;;  %v8493_v12 = vld [vmem:[%s9853_s4 + $0x10] sm:$0xff] }
 0x729   : > { %6013 = vmatprep.subr.mxu0 %v8219_v17  ;;  %v8486_v63 = vpop.permute.xlu1 %6365 }
 0x72b   : > { %5998 = vmatmul.mubr.bf16.vlgmr.msra.gmra.mxu0 %v2496_v16 }
 0x72c   : > { %6001 = vmatprep.mubr.bf16.mxu0 %v2497_v50  ;;  %6014 = vmatpush3.msra.mxu0 %v8219_v17  ;;  %v6557_v8 = vpop.eup %6556 }
 0x72d   : > { %6015 = vmatprep.subr.mxu0 %v8493_v12  ;;  %2949 = vrot.lane.b32.xlu0 %v8499_v56, %s6888_s26  ;;  %v2488_v17 = vmul.f32 %v6557_v8, %v8344_v4  ;;  %v8505_v62 = vpop.permute.xlu1 %6370  ;;  %v8519_v4 = vld [vmem:[%s9853_s4] sm:$0xff]  ;;  %v6559_v30 = vpop.eup %6558 }
 0x72e   : > { %6016 = vmatpush3.msra.mxu0 %v8493_v12  ;;  %v6561_v49 = vpop.eup %6560  ;;  %v2490_v9 = vmul.f32 %v6559_v30, %v8338_v27 }
 0x72f   : > { %6017 = vmatprep.subr.mxu0 %v8511_v40  ;;  %v2499_v43 = vpack.c.bf16 %v2488_v17, %v2487_v15  ;;  %v2489_v20 = vmul.f32 %v6561_v49, %v8330_v58 }
 0x730   : > { %6018 = vmatpush3.msra.mxu0 %v8511_v40 }
 0x731   : > { %6019 = vmatprep.subr.mxu0 %v8519_v4  ;;  %v8522_v16 = vpop.permute.xlu1 %6380  ;;  %v2500_v8 = vpack.c.bf16 %v2490_v9, %v2489_v20 }
 0x732   : > { %6020 = vmatpush3.msra.mxu0 %v8519_v4 }
 0x733   : > { %6002 = vmatmul.mubr.bf16.gmra.mxu0 %v2498_v3  ;;  %v6563_v3 = vpop.eup %6562 }
 0x734   : > { %6005 = vmatprep.mubr.bf16.mxu0 %v2499_v43  ;;  %v2491_v9 = vmul.f32 %v6563_v3, %v8342_v22 }
 0x735   : > { %v2633_v50 = vpop.permute.xlu1 %2632 }
 0x736   : > { %v2664_v38 = vrot.slane %v2633_v50, 4 }
 0x738   : > { %v8527_v54 = vunpack.c.l.bf16 %v2664_v38 }
 0x739   : > { %v8532_v14 = vpop.permute.xlu1 %6390 }
 0x73a   : > { %6053 = vmatprep.mubr.msk.f32.mxu1 %vm10166_vm0, %v8527_v54 }
 0x73b   : > { %6006 = vmatmul.mubr.bf16.gmra.mxu0 %v2500_v8 }
 0x73d   : > { %v2639_v15 = vpop.permute.xlu1 %2638 }
 0x73e   : > { %v2667_v60 = vrot.slane %v2639_v15, 4 }
 0x741   : > { %v2643_v43 = vpop.permute.xlu1 %2642 }
 0x753   : > { %v2458_v17 = vpop.xlane.xlu0 %2457 }
 0x754   : > { %6564 = vrcp.f32 %v2458_v17 }
 0x755   : > { %6566 = vrcp.f32 %v8447_v36 }
 0x757   : > { %v2462_v27 = vpop.xlane.xlu0 %2461 }
 0x758   : > { %6568 = vrcp.f32 %v2462_v27  ;;  %v2647_v27 = vpop.permute.xlu1 %2646 }
 0x75b   : > { %v6356_v58 = vpop.permute.xlu0 %6355 }
 0x75c   : > { %v6357_v34 = vunpack.i.l.bf16 %v6356_v58  ;;  %v2651_v3 = vpop.permute.xlu1 %2650 }
 0x75f   : > { %v8535_v30 = vpop.permute.xlu0 %6375 }
 0x761   : > { %v6565_v49 = vpop.eup %6564 }
 0x762   : > { %v2492_v50 = vmul.f32 %v6565_v49, %v8370_v24  ;;  %v6567_v5 = vpop.eup %6566  ;;  %v6358_v49 = vunpack.i.h.bf16 %v6356_v58  ;;  %v2655_v58 = vpop.permute.xlu1 %2654 }
 0x763   : > { %v8539_v20 = vpop.permute.xlu0 %6385  ;;  %v2493_v36 = vmul.f32 %v6567_v5, %v8336_v0  ;;  %v8548_v0 = vunpack.c.l.bf16 %v2667_v60  ;;  %v6363_v60 = vunpack.i.h.bf16 %v8475_v25 }
 0x764   : > { %v2501_v38 = vpack.c.bf16 %v2492_v50, %v2491_v9 }
 0x765   : > { %v6569_v8 = vpop.eup %6568 }
 0x766   : > { %6009 = vmatprep.mubr.bf16.mxu0 %v2501_v38  ;;  %v2494_v17 = vmul.f32 %v6569_v8, %v8375_v44  ;;  %v2669_v44 = vrot.slane %v2643_v43, 4  ;;  %v6367_v43 = vunpack.i.l.bf16 %v8486_v63 }
 0x767   : > { %v2635_v11 = vpop.permute.xlu0 %2634 }
 0x768   : > { %v2665_v41 = vrot.slane %v2635_v11, 4  ;;  %v2502_v48 = vpack.c.bf16 %v2494_v17, %v2493_v36  ;;  %v6362_v11 = vunpack.i.l.bf16 %v8475_v25  ;;  %v2673_v25 = vrot.slane %v2651_v3, 4 }
 0x769   : > { %v6368_v36 = vunpack.i.h.bf16 %v8486_v63  ;;  %v2675_v63 = vrot.slane %v2655_v58, 4  ;;  %v6373_v3 = vunpack.i.h.bf16 %v8505_v62 }
 0x76a   : > { %v8543_v35 = vunpack.c.l.bf16 %v2665_v41  ;;  %6010 = vmatmul.mubr.bf16.gmra.mxu0 %v2502_v48  ;;  %v8555_v48 = vunpack.c.l.bf16 %v2669_v44  ;;  %v2659_v44 = vpop.permute.xlu1 %2658 }
 0x76b   : > { %v2637_v22 = vpop.permute.xlu0 %2636  ;;  %6021 = vmatprep.mubr.msk.f32.mxu0 %vm10166_vm0, %v6357_v34  ;;  %v2671_v34 = vrot.slane %v2647_v27, 4  ;;  %v6372_v27 = vunpack.i.l.bf16 %v8505_v62  ;;  %v2677_v58 = vrot.slane %v2659_v44, 4  ;;  %v6378_v62 = vunpack.i.h.bf16 %v8535_v30 }
 0x76c   : > { %v2666_v24 = vrot.slane %v2637_v22, 4  ;;  %6054 = vmatmul.mubr.msk.f32.vlgmr.msra.gmra.mxu1 %vm10167_vm8, %v8543_v35  ;;  %vm10169_vm8 = vmmov %vm10166_vm0  ;;  %v6387_v44 = vunpack.i.l.bf16 %v8539_v20 }
 0x76d   : > { %v8567_v8 = vunpack.c.l.bf16 %v2671_v34 }
 0x76e   : > { %v8550_v9 = vunpack.c.l.bf16 %v2666_v24 }
 0x76f   : > { %v2641_v15 = vpop.permute.xlu0 %2640 }
 0x770   : > { %v2668_v41 = vrot.slane %v2641_v15, 4  ;;  %6056 = vmatprep.mubr.msk.f32.mxu1 %vm10168_vm13, %v8550_v9  ;;  %vm10171_vm13 = vmmov %vm10166_vm0  ;;  %v6377_v15 = vunpack.i.l.bf16 %v8535_v30 }
 0x771   : > { %6057 = vmatmul.mubr.msk.f32.gmra.mxu1 %vm10166_vm0, %v8548_v0 }
 0x772   : > { %v8560_v50 = vunpack.c.l.bf16 %v2668_v41  ;;  %6022 = vmatmul.mubr.msk.f32.vlgmr.msra.gmra.mxu0 %vm10169_vm8, %v6358_v49  ;;  %vm10172_vm8 = vmmov %vm10166_vm0  ;;  %v8579_v49 = vunpack.c.l.bf16 %v2673_v25 }
 0x773   : > { %v2645_v5 = vpop.permute.xlu0 %2644  ;;  %6024 = vmatprep.mubr.msk.f32.mxu0 %vm10170_vm14, %v6362_v11  ;;  %vm10173_vm14 = vmmov %vm10166_vm0 }
 0x774   : > { %v2670_v38 = vrot.slane %v2645_v5, 4  ;;  %6059 = vmatprep.mubr.msk.f32.mxu1 %vm10171_vm13, %v8560_v50  ;;  %vm10174_vm13 = vmmov %vm10166_vm0  ;;  %v2663_v5 = vpop.permute.xlu1 %2662 }
 0x775   : > { %6060 = vmatmul.mubr.msk.f32.gmra.mxu1 %vm10166_vm0, %v8555_v48  ;;  %v2679_v30 = vrot.slane %v2663_v5, 4 }
 0x776   : > { %v8572_v17 = vunpack.c.l.bf16 %v2670_v38  ;;  %6025 = vmatmul.mubr.msk.f32.gmra.mxu0 %vm10172_vm8, %v6363_v60  ;;  %vm10175_vm8 = vmmov %vm10166_vm0  ;;  %v8591_v60 = vunpack.c.l.bf16 %v2675_v63  ;;  %v6382_v38 = vunpack.i.l.bf16 %v8522_v16 }
 0x777   : > { %v2649_v22 = vpop.permute.xlu0 %2648  ;;  %6027 = vmatprep.mubr.msk.f32.mxu0 %vm10173_vm14, %v6367_v43  ;;  %vm10176_vm14 = vmmov %vm10166_vm0 }
 0x778   : > { %v2672_v24 = vrot.slane %v2649_v22, 4  ;;  %6062 = vmatprep.mubr.msk.f32.mxu1 %vm10174_vm13, %v8572_v17  ;;  %vm10177_vm13 = vmmov %vm10166_vm0  ;;  %v6383_v22 = vunpack.i.h.bf16 %v8522_v16  ;;  %v6388_v16 = vunpack.i.h.bf16 %v8539_v20 }
 0x779   : > { %6063 = vmatmul.mubr.msk.f32.gmra.mxu1 %vm10166_vm0, %v8567_v8 }
 0x77a   : > { %v8584_v11 = vunpack.c.l.bf16 %v2672_v24  ;;  %6028 = vmatmul.mubr.msk.f32.gmra.mxu0 %vm10175_vm8, %v6368_v36  ;;  %vm10178_vm8 = vmmov %vm10166_vm0 }
 0x77b   : > { %v2653_v41 = vpop.permute.xlu0 %2652  ;;  %6030 = vmatprep.mubr.msk.f32.mxu0 %vm10176_vm14, %v6372_v27  ;;  %vm10179_vm14 = vmmov %vm10166_vm0  ;;  %v8603_v27 = vunpack.c.l.bf16 %v2677_v58  ;;  %v6393_v58 = vunpack.i.h.bf16 %v8532_v14 }
 0x77c   : > { %v2674_v34 = vrot.slane %v2653_v41, 4  ;;  %6065 = vmatprep.mubr.msk.f32.mxu1 %vm10177_vm13, %v8584_v11  ;;  %vm10180_vm13 = vmmov %vm10166_vm0 }
 0x77d   : > { %6066 = vmatmul.mubr.msk.f32.gmra.mxu1 %vm10166_vm0, %v8579_v49 }
 0x77e   : > { %v8596_v43 = vunpack.c.l.bf16 %v2674_v34  ;;  %6031 = vmatmul.mubr.msk.f32.gmra.mxu0 %vm10178_vm8, %v6373_v3  ;;  %vm10181_vm8 = vmmov %vm10166_vm0  ;;  %v6392_v34 = vunpack.i.l.bf16 %v8532_v14  ;;  %v6786_v14 = vld [vmem:[%s9852_s3 + $0x8] sm:$0xff] }
 0x77f   : > { %v2657_v25 = vpop.permute.xlu0 %2656  ;;  %6033 = vmatprep.mubr.msk.f32.mxu0 %vm10179_vm14, %v6377_v15  ;;  %vm10182_vm14 = vmmov %vm10166_vm0  ;;  %v8615_v15 = vunpack.c.l.bf16 %v2679_v30 }
 0x780   : > { %v2676_v36 = vrot.slane %v2657_v25, 4  ;;  %6068 = vmatprep.mubr.msk.f32.mxu1 %vm10180_vm13, %v8596_v43  ;;  %vm10183_vm13 = vmmov %vm10166_vm0 }
 0x781   : > { %6069 = vmatmul.mubr.msk.f32.gmra.mxu1 %vm10166_vm0, %v8591_v60 }
 0x782   : > { %v8608_v24 = vunpack.c.l.bf16 %v2676_v36  ;;  %6034 = vmatmul.mubr.msk.f32.gmra.mxu0 %vm10181_vm8, %v6378_v62  ;;  %vm10185_vm8 = vmmov %vm10166_vm0 }
 0x783   : > { %v2661_v63 = vpop.permute.xlu0 %2660  ;;  %6036 = vmatprep.mubr.msk.f32.mxu0 %vm10182_vm14, %v6382_v38  ;;  %vm10186_vm14 = vmmov %vm10166_vm0 }
 0x784   : > { %v2678_v3 = vrot.slane %v2661_v63, 4  ;;  %6071 = vmatprep.mubr.msk.f32.mxu1 %vm10183_vm13, %v8608_v24  ;;  %vm10187_vm13 = vmmov %vm10166_vm0 }
 0x785   : > { %6072 = vmatmul.mubr.msk.f32.gmra.mxu1 %vm10166_vm0, %v8603_v27 }
 0x786   : > { %v8620_v41 = vunpack.c.l.bf16 %v2678_v3  ;;  %6037 = vmatmul.mubr.msk.f32.gmra.mxu0 %vm10184_vm2, %v6383_v22  ;;  %v8676_v3 = vld [vmem:[%s9851_s2 + $0x8] sm:$0xff]  ;;  %vm10210_vm2 = vmmov %vm10166_vm0 }
 0x787   : > { %6039 = vmatprep.mubr.msk.f32.mxu0 %vm10185_vm8, %v6387_v44  ;;  %10204 = vst [vmem:[#allocation51_spill] sm:$0xff] %v8676_v3  ;;  %vm10211_vm8 = vmmov %vm10166_vm0 }
 0x788   : > { %6074 = vmatprep.mubr.msk.f32.mxu1 %vm10186_vm14, %v8620_v41  ;;  %vm10212_vm14 = vmmov %vm10166_vm0 }
 0x789   : > { %6075 = vmatmul.mubr.msk.f32.gmra.mxu1 %vm10187_vm13, %v8615_v15  ;;  %vm10213_vm13 = vmmov %vm10166_vm0 }
 0x78a   : > { %6040 = vmatmul.mubr.msk.f32.gmra.mxu0 %vm10188_vm11, %v6388_v16  ;;  %vm10209_vm11 = vmmov %vm10166_vm0 }
 0x78b   : > { %6042 = vmatprep.mubr.msk.f32.mxu0 %vm10166_vm0, %v6392_v34 }
 0x78e   : > { %6043 = vmatmul.mubr.msk.f32.gmra.mxu0 %vm10189_vm3, %v6393_v58  ;;  %vm10208_vm3 = vmmov %vm10166_vm0 }
 0x7eb   : > { %v8633_v20 = vpop.f32.mrf.mxu0 }
 0x7ec   : > { %10190 = vst [vmem:[#allocation4_spill] sm:$0xff] %v8633_v20 }
 0x7ed   : > { %v8635_v62 = vpop.f32.mrf.mxu0 }
 0x7ee   : > { %10191 = vst [vmem:[#allocation28_spill] sm:$0xff] %v8635_v62 }
 0x7ef   : > { %v8637_v5 = vpop.f32.mrf.mxu0 }
 0x7f0   : > { %10192 = vst [vmem:[#allocation29_spill] sm:$0xff] %v8637_v5 }
 0x7f1   : > { %v8641_v25 = vpop.f32.mrf.mxu0 }
 0x7f2   : > { %10193 = vst [vmem:[#allocation7_spill] sm:$0xff] %v8641_v25 }
 0x7f3   : > { %v8645_v36 = vpop.f32.mrf.mxu0 }
 0x7f4   : > { %10194 = vst [vmem:[#allocation6_spill] sm:$0xff] %v8645_v36 }
 0x7f5   : > { %v8647_v30 = vpop.f32.mrf.mxu0 }
 0x7f6   : > { %10195 = vst [vmem:[#allocation5_spill] sm:$0xff] %v8647_v30 }
 0x7f7   : > { %v8649_v22 = vpop.f32.mrf.mxu0 }
 0x7f8   : > { %10196 = vst [vmem:[#allocation9_spill] sm:$0xff] %v8649_v22  ;;  %v3299_v22 = vmul.f32 %v8676_v3, %v8543_v35 }
 0x7f9   : > { %v8653_v63 = vpop.f32.mrf.mxu0 }
 0x7fa   : > { %10197 = vst [vmem:[#allocation10_spill] sm:$0xff] %v8653_v63  ;;  %v6787_v63 = vld [vmem:[%s9852_s3] sm:$0xff] }
 0x7fb   : > { %v8657_v16 = vpop.f32.mrf.mxu0 }
 0x7fc   : > { %10198 = vst [vmem:[#allocation12_spill] sm:$0xff] %v8657_v16 }
 0x7fd   : > { %v8659_v34 = vpop.f32.mrf.mxu0 }
 0x7fe   : > { %10199 = vst [vmem:[#allocation30_spill] sm:$0xff] %v8659_v34  ;;  %v3298_v34 = vmul.f32 %v8427_v26, %v8527_v54  ;;  %v8699_v26 = vld [vmem:[%s9851_s2 + $0x18] sm:$0xff] }
 0x7ff   : > { %v8661_v58 = vpop.f32.mrf.mxu0  ;;  %10207 = vst [vmem:[#allocation54_spill] sm:$0xff] %v8699_v26  ;;  %v3301_v54 = vmul.f32 %v8699_v26, %v8548_v0 }
 0x800   : > { %10200 = vst [vmem:[#allocation47_spill] sm:$0xff] %v8661_v58 }
 0x801   : > { %v8665_v38 = vpop.f32.mrf.mxu0 }
 0x802   : > { %10201 = vst [vmem:[#allocation48_spill] sm:$0xff] %v8665_v38 }
 0x82a   : > { %v8669_v44 = vpop.f32.mrf.mxu0 }
 0x82b   : > { %10202 = vst [vmem:[#allocation49_spill] sm:$0xff] %v8669_v44 }
 0x82c   : > { %v8671_v25 = vpop.f32.mrf.mxu0  ;;  %v6055_v36 = vpop.f32.mrf.mxu1 }
 0x82d   : > { %10203 = vst [vmem:[#allocation50_spill] sm:$0xff] %v8671_v25  ;;  %v3315_v16 = vmul.f32 %v6786_v14, %v6055_v36  ;;  %v3300_v36 = vmul.f32 %v8434_v10, %v8550_v9  ;;  %v3302_v9 = vmul.f32 %v8443_v33, %v8560_v50 }
 0x82e   : > { %v8683_v58 = vpop.f32.mrf.mxu0  ;;  %v3219_v62 = vpop.f32.mrf.mxu1 }
 0x82f   : > { %10205 = vst [vmem:[#allocation52_spill] sm:$0xff] %v8683_v58  ;;  %v3331_v38 = vadd.f32 %v3315_v16, %v3299_v22  ;;  %v3314_v35 = vmul.f32 %v6787_v63, %v3219_v62  ;;  %v6789_v22 = vld [vmem:[%s9852_s3 + $0x18] sm:$0xff] }
 0x830   : > { %v8692_v20 = vpop.f32.mrf.mxu0 }
 0x831   : > { %10206 = vst [vmem:[#allocation53_spill] sm:$0xff] %v8692_v20  ;;  %v3330_v5 = vadd.f32 %v3314_v35, %v3298_v34  ;;  %v6058_v3 = vpop.f32.mrf.mxu1  ;;  %v6790_v20 = vld [vmem:[%s9852_s3 + $0x10] sm:$0xff] }
 0x832   : > { %v3317_v62 = vmul.f32 %v6789_v22, %v6058_v3  ;;  %v6023_v16 = vpop.f32.mrf.mxu0 }
 0x833   : > { %v8706_v30 = vpack.c.bf16 %v3331_v38, %v3330_v5  ;;  %v2986_v34 = vmul.f32 %v6786_v14, %v6023_v16  ;;  %v3229_v35 = vpop.f32.mrf.mxu1  ;;  %v6791_v5 = vld [vmem:[%s9852_s3 + $0x28] sm:$0xff] }
 0x834   : > { %v3333_v25 = vadd.f32 %v3317_v62, %v3301_v54  ;;  %v3316_v44 = vmul.f32 %v6790_v20, %v3229_v35  ;;  %v2842_v0 = vpop.f32.mrf.mxu0 }
 0x835   : > { %v2985_v58 = vmul.f32 %v6787_v63, %v2842_v0  ;;  %v6061_v26 = vpop.f32.mrf.mxu1  ;;  %3019 = vrot.lane.b32.xlu1 %v2986_v34, %s6888_s26  ;;  %v8723_v63 = vld [vmem:[%s9851_s2 + $0x28] sm:$0xff]  ;;  %v6794_v34 = vld [vmem:[%s9852_s3 + $0x38] sm:$0xff] }
 0x836   : > { %v3332_v3 = vadd.f32 %v3316_v44, %v3300_v36  ;;  %v3319_v38 = vmul.f32 %v6791_v5, %v6061_v26  ;;  %v6026_v14 = vpop.f32.mrf.mxu0  ;;  %v3303_v44 = vmul.f32 %v8723_v63, %v8555_v48  ;;  %v6793_v26 = vld [vmem:[%s9852_s3 + $0x20] sm:$0xff] }
 0x837   : > { %v2988_v16 = vmul.f32 %v6789_v22, %v6026_v14  ;;  %v3239_v10 = vpop.f32.mrf.mxu1  ;;  %3017 = vrot.lane.b32.xlu0 %v2985_v58, %s6888_s26 }
 0x838   : > { %v8727_v36 = vpack.c.bf16 %v3333_v25, %v3332_v3  ;;  %v3318_v54 = vmul.f32 %v6793_v26, %v3239_v10  ;;  %v2852_v22 = vpop.f32.mrf.mxu0  ;;  %v3335_v33 = vadd.f32 %v3319_v38, %v3303_v44  ;;  %v3304_v3 = vmul.f32 %v8452_v1, %v8572_v17 }
 0x839   : > { %v2987_v58 = vmul.f32 %v6790_v20, %v2852_v22  ;;  %v6064_v62 = vpop.f32.mrf.mxu1  ;;  %3023 = vrot.lane.b32.xlu1 %v2988_v16, %s6888_s26  ;;  %v8742_v20 = vld [vmem:[%s9851_s2 + $0x38] sm:$0xff] }
 0x83a   : > { %v3334_v50 = vadd.f32 %v3318_v54, %v3302_v9  ;;  %v3321_v35 = vmul.f32 %v6794_v34, %v6064_v62  ;;  %v6029_v48 = vpop.f32.mrf.mxu0  ;;  %v3305_v38 = vmul.f32 %v8742_v20, %v8567_v8  ;;  %v6797_v54 = vld [vmem:[%s9852_s3 + $0x48] sm:$0xff] }
 0x83b   : > { %v2990_v25 = vmul.f32 %v6791_v5, %v6029_v48  ;;  %v3249_v0 = vpop.f32.mrf.mxu1  ;;  %3021 = vrot.lane.b32.xlu0 %v2987_v58, %s6888_s26  ;;  %v6796_v5 = vld [vmem:[%s9852_s3 + $0x30] sm:$0xff] }
 0x83c   : > { %v8746_v14 = vpack.c.bf16 %v3335_v33, %v3334_v50  ;;  %v3320_v16 = vmul.f32 %v6796_v5, %v3249_v0  ;;  %v2862_v10 = vpop.f32.mrf.mxu0  ;;  %v3337_v1 = vadd.f32 %v3321_v35, %v3305_v38  ;;  %v3306_v33 = vmul.f32 %v8461_v7, %v8584_v11  ;;  %v6800_v38 = vld [vmem:[%s9852_s3 + $0x58] sm:$0xff] }
 0x83d   : > { %v2989_v9 = vmul.f32 %v6793_v26, %v2862_v10  ;;  %v6067_v44 = vpop.f32.mrf.mxu1  ;;  %3027 = vrot.lane.b32.xlu1 %v2990_v25, %s6888_s26  ;;  %v8761_v26 = vld [vmem:[%s9851_s2 + $0x48] sm:$0xff] }
 0x83e   : > { %v3336_v17 = vadd.f32 %v3320_v16, %v3304_v3  ;;  %v3323_v22 = vmul.f32 %v6797_v54, %v6067_v44  ;;  %v6032_v8 = vpop.f32.mrf.mxu0  ;;  %v3307_v50 = vmul.f32 %v8761_v26, %v8579_v49  ;;  %v3308_v44 = vmul.f32 %v8468_v59, %v8596_v43 }
 0x83f   : > { %v2992_v58 = vmul.f32 %v6794_v34, %v6032_v8  ;;  %v3259_v62 = vpop.f32.mrf.mxu1  ;;  %3025 = vrot.lane.b32.xlu0 %v2989_v9, %s6888_s26  ;;  %v6799_v34 = vld [vmem:[%s9852_s3 + $0x40] sm:$0xff] }
 0x840   : > { %v8765_v35 = vpack.c.bf16 %v3337_v1, %v3336_v17  ;;  %v3322_v48 = vmul.f32 %v6799_v34, %v3259_v62  ;;  %v2872_v25 = vpop.f32.mrf.mxu0  ;;  %v3339_v7 = vadd.f32 %v3323_v22, %v3307_v50  ;;  %v6802_v22 = vld [vmem:[%s9852_s3 + $0x50] sm:$0xff] }
 0x841   : > { %v2991_v0 = vmul.f32 %v6796_v5, %v2872_v25  ;;  %v6070_v3 = vpop.f32.mrf.mxu1  ;;  %3031 = vrot.lane.b32.xlu1 %v2992_v58, %s6888_s26  ;;  %v8780_v5 = vld [vmem:[%s9851_s2 + $0x58] sm:$0xff] }
 0x842   : > { %v3338_v11 = vadd.f32 %v3322_v48, %v3306_v33  ;;  %v3325_v16 = vmul.f32 %v6800_v38, %v6070_v3  ;;  %v6035_v49 = vpop.f32.mrf.mxu0  ;;  %v3309_v1 = vmul.f32 %v8780_v5, %v8591_v60  ;;  %v6803_v33 = vld [vmem:[%s9852_s3 + $0x68] sm:$0xff] }
 0x843   : > { %v2994_v10 = vmul.f32 %v6797_v54, %v6035_v49  ;;  %v3269_v9 = vpop.f32.mrf.mxu1  ;;  %3029 = vrot.lane.b32.xlu0 %v2991_v0, %s6888_s26  ;;  %v3310_v0 = vmul.f32 %v8481_v2, %v8608_v24 }
 0x844   : > { %v3350_v17 = vpack.c.bf16 %v3339_v7, %v3338_v11  ;;  %v3324_v54 = vmul.f32 %v6802_v22, %v3269_v9  ;;  %v2882_v8 = vpop.f32.mrf.mxu0  ;;  %v3341_v59 = vadd.f32 %v3325_v16, %v3309_v1  ;;  %v6805_v11 = vld [vmem:[%s9852_s3 + $0x60] sm:$0xff]  ;;  %v6806_v9 = vld [vmem:[%s9852_s3 + $0x78] sm:$0xff] }
 0x845   : > { %v2993_v58 = vmul.f32 %v6799_v34, %v2882_v8  ;;  %v6073_v62 = vpop.f32.mrf.mxu1  ;;  %3035 = vrot.lane.b32.xlu1 %v2994_v10, %s6888_s26  ;;  %v8797_v34 = vld [vmem:[%s9851_s2 + $0x68] sm:$0xff]  ;;  %v3312_v8 = vmul.f32 %v8499_v56, %v8620_v41 }
 0x846   : > { %v3340_v43 = vadd.f32 %v3324_v54, %v3308_v44  ;;  %v3327_v50 = vmul.f32 %v6803_v33, %v6073_v62  ;;  %v6038_v48 = vpop.f32.mrf.mxu0  ;;  %v3311_v3 = vmul.f32 %v8797_v34, %v8603_v27 }
 0x847   : > { %v2996_v60 = vmul.f32 %v6800_v38, %v6038_v48  ;;  %v3279_v25 = vpop.f32.mrf.mxu1  ;;  %3033 = vrot.lane.b32.xlu0 %v2993_v58, %s6888_s26 }
 0x848   : > { %v3351_v7 = vpack.c.bf16 %v3341_v59, %v3340_v43  ;;  %v3326_v38 = vmul.f32 %v6805_v11, %v3279_v25  ;;  %v2892_v16 = vpop.f32.mrf.mxu0  ;;  %v3343_v2 = vadd.f32 %v3327_v50, %v3311_v3  ;;  %v6808_v59 = vld [vmem:[%s9852_s3 + $0x70] sm:$0xff] }
 0x849   : > { %v2995_v49 = vmul.f32 %v6802_v22, %v2892_v16  ;;  %v6076_v10 = vpop.f32.mrf.mxu1  ;;  %3039 = vrot.lane.b32.xlu1 %v2996_v60, %s6888_s26  ;;  %v8814_v22 = vld [vmem:[%s9851_s2 + $0x78] sm:$0xff]  ;;  %v3415_v16 = vsel %vm10214_vm4, %v3350_v17, 0  ;;  %vm10220_vm4 = vmmov %vm10166_vm0 }
 0x84a   : > { %v3342_v24 = vadd.f32 %v3326_v38, %v3310_v0  ;;  %v3329_v44 = vmul.f32 %v6806_v9, %v6076_v10  ;;  %v6041_v1 = vpop.f32.mrf.mxu0  ;;  %v3313_v58 = vmul.f32 %v8814_v22, %v8615_v15  ;;  %v3418_v38 = vsel %vm10213_vm13, %v3351_v7, 0  ;;  %v2924_v10 = vpop.permute.xlu1 %2923  ;;  %vm10221_vm13 = vmmov %vm10166_vm0 }
 0x84b   : > { %v2998_v27 = vmul.f32 %v6803_v33, %v6041_v1  ;;  %v3289_v54 = vpop.f32.mrf.mxu1  ;;  %3037 = vrot.lane.b32.xlu0 %v2995_v49, %s6888_s26 }
 0x84c   : > { %v3352_v62 = vpack.c.bf16 %v3343_v2, %v3342_v24  ;;  %v3328_v43 = vmul.f32 %v6808_v59, %v3289_v54  ;;  %v2902_v33 = vpop.f32.mrf.mxu0  ;;  %v3345_v48 = vadd.f32 %v3329_v44, %v3313_v58  ;;  %v2922_v2 = vpop.permute.xlu0 %2921  ;;  %v8852_v54 = vld [vmem:[%s9853_s4 + $0x18] sm:$0xff] }
 0x84d   : > { %v2997_v50 = vmul.f32 %v6805_v11, %v2902_v33  ;;  %3043 = vrot.lane.b32.xlu1 %v2998_v27, %s6888_s26  ;;  %v3403_v27 = vsel %vm10166_vm0, %v8706_v30, 0 }
 0x84e   : > { %v3344_v56 = vadd.f32 %v3328_v43, %v3312_v8  ;;  %v6044_v41 = vpop.f32.mrf.mxu0  ;;  %v3421_v11 = vsel %vm10211_vm8, %v3352_v62, 0  ;;  %vm10218_vm8 = vmmov %vm10166_vm0 }
 0x84f   : > { %v3000_v60 = vmul.f32 %v6806_v9, %v6044_v41  ;;  %3041 = vrot.lane.b32.xlu0 %v2997_v50, %s6888_s26  ;;  %v3406_v9 = vsel %vm10220_vm4, %v8727_v36, 0  ;;  %vm10227_vm4 = vmmov %vm10166_vm0 }
 0x850   : > { %v3353_v25 = vpack.c.bf16 %v3345_v48, %v3344_v56  ;;  %v2912_v0 = vpop.f32.mrf.mxu0  ;;  %v2926_v24 = vpop.permute.xlu0 %2925  ;;  %v2969_v56 = vmul.f32 %v2922_v2, %v10053_v42 }
 0x851   : > { %v2999_v3 = vmul.f32 %v6808_v59, %v2912_v0  ;;  %3047 = vrot.lane.b32.xlu1 %v3000_v60, %s6888_s26 }
 0x852   : > { %6285 = vmatprep.subr.msk.bf16.mxu0 %vm10208_vm3, %v3353_v25  ;;  %v3424_v15 = vsel %vm10209_vm11, %v3353_v25, 0  ;;  %vm10215_vm3 = vmmov %vm10166_vm0 }
 0x853   : > { %6078 = vmatpush3.bf16.xpose.msra.mxu0 %v3424_v15  ;;  %3045 = vrot.lane.b32.xlu0 %v2999_v3, %s6888_s26  ;;  %vm10216_vm11 = vmmov %vm10166_vm0  ;;  %v2971_v15 = vmul.f32 %v2926_v24, %v6980_v13 }
 0x854   : > { %6286 = vmatprep.subr.msk.bf16.mxu0 %vm10210_vm2, %v3352_v62  ;;  %v3412_v49 = vsel %vm10216_vm11, %v8765_v35, 0  ;;  %vm10217_vm2 = vmmov %vm10166_vm0  ;;  %v2930_v44 = vpop.permute.xlu0 %2929 }
 0x855   : > { %vm10223_vm11 = vmmov %vm10166_vm0 }
 0x85b   : > { %6080 = vmatpush3.bf16.xpose.msra.mxu0 %v3421_v11 }
 0x85c   : > { %6287 = vmatprep.subr.msk.bf16.mxu0 %vm10212_vm14, %v3351_v7  ;;  %v3409_v7 = vsel %vm10218_vm8, %v8746_v14, 0  ;;  %vm10219_vm14 = vmmov %vm10166_vm0 }
 0x85d   : > { %vm10225_vm8 = vmmov %vm10166_vm0 }
 0x863   : > { %6082 = vmatpush3.bf16.xpose.msra.mxu0 %v3418_v38 }
 0x864   : > { %6288 = vmatprep.subr.msk.bf16.mxu0 %vm10166_vm0, %v3350_v17  ;;  %v2928_v17 = vpop.permute.xlu1 %2927 }
 0x865   : > { %v2972_v25 = vmul.f32 %v2928_v17, %v6991_v21 }
 0x86b   : > { %6084 = vmatpush3.bf16.xpose.msra.mxu0 %v3415_v16 }
 0x86c   : > { %6289 = vmatprep.subr.msk.bf16.mxu0 %vm10215_vm3, %v8765_v35  ;;  %v2932_v35 = vpop.permute.xlu1 %2931  ;;  %vm10222_vm3 = vmmov %vm10166_vm0 }
 0x870   : > { %v2936_v1 = vpop.permute.xlu1 %2935 }
 0x873   : > { %6086 = vmatpush3.bf16.xpose.msra.mxu0 %v3412_v49 }
 0x874   : > { %6290 = vmatprep.subr.msk.bf16.mxu0 %vm10217_vm2, %v8746_v14  ;;  %v2934_v14 = vpop.permute.xlu0 %2933  ;;  %vm10224_vm2 = vmmov %vm10166_vm0 }
 0x878   : > { %v2938_v8 = vpop.permute.xlu0 %2937 }
 0x87b   : > { %6088 = vmatpush3.bf16.xpose.msra.mxu0 %v3409_v7  ;;  %v2974_v7 = vmul.f32 %v2932_v35, %v7011_v29 }
 0x87c   : > { %6291 = vmatprep.subr.msk.bf16.mxu0 %vm10219_vm14, %v8727_v36  ;;  %v2940_v36 = vpop.permute.xlu1 %2939  ;;  %v2942_v62 = vpop.permute.xlu0 %2941  ;;  %vm10226_vm14 = vmmov %vm10166_vm0 }
 0x880   : > { %v2944_v58 = vpop.permute.xlu1 %2943  ;;  %v2946_v43 = vpop.permute.xlu0 %2945 }
 0x883   : > { %6090 = vmatpush3.bf16.xpose.msra.mxu0 %v3406_v9 }
 0x884   : > { %6292 = vmatprep.subr.msk.bf16.mxu0 %vm10221_vm13, %v8706_v30  ;;  %v2948_v59 = vpop.permute.xlu1 %2947  ;;  %v8857_v50 = vpop.permute.xlu0 %2949  ;;  %v2970_v30 = vmul.f32 %v2924_v10, %v10054_v32  ;;  %v2973_v32 = vmul.f32 %v2930_v44, %v6998_v23  ;;  %v2978_v44 = vmul.f32 %v2940_v36, %v7047_v45  ;;  %vm10228_vm13 = vmmov %vm10166_vm0 }
 0x888   : > { %v8855_v33 = vpop.permute.xlu1 %2951 }
 0x88b   : > { %6092 = vmatpush3.bf16.xpose.msra.mxu0 %v3403_v27 }
 0x88c   : > { %6173 = vmatprep.subr.mxu0 %v8852_v54 }
 0x8a7   : > { %v3020_v48 = vpop.permute.xlu1 %3019 }
 0x8a8   : > { %v3066_v41 = vadd.f32 %v3020_v48, %v2970_v30 }
 0x8a9   : > { %v3018_v60 = vpop.permute.xlu0 %3017 }
 0x8aa   : > { %v3065_v0 = vadd.f32 %v3018_v60, %v2969_v56  ;;  %v3082_v11 = vmul.f32 0.17677669, %v3066_v41  ;;  %v2976_v56 = vmul.f32 %v2936_v1, %v7029_v37 }
 0x8ab   : > { %v3024_v3 = vpop.permute.xlu1 %3023 }
 0x8ac   : > { %v3081_v38 = vmul.f32 0.17677669, %v3065_v0  ;;  %v3068_v16 = vadd.f32 %v3024_v3, %v2972_v25  ;;  %v2975_v25 = vmul.f32 %v2934_v14, %v7016_v31  ;;  %v2980_v14 = vmul.f32 %v2944_v58, %v7065_v53 }
 0x8ad   : > { %v3022_v49 = vpop.permute.xlu0 %3021 }
 0x8ae   : > { %v3097_v9 = vpack.c.bf16 %v3082_v11, %v3081_v38  ;;  %v3067_v27 = vadd.f32 %v3022_v49, %v2971_v15  ;;  %v3084_v2 = vmul.f32 0.17677669, %v3068_v16  ;;  %v2977_v49 = vmul.f32 %v2938_v8, %v7034_v39 }
 0x8af   : > { %v3028_v10 = vpop.permute.xlu1 %3027  ;;  %v2982_v8 = vmul.f32 %v2948_v59, %v7085_v61  ;;  %v2983_v59 = vmul.f32 %v8857_v50, %v10001_v6  ;;  %v6811_v50 = vld [vmem:[%s6964_s6 + $0x98] ss:$12 sps:$4 sm:$0xff]  }
 0x8b0   : > { %v3083_v30 = vmul.f32 0.17677669, %v3067_v27  ;;  %v3070_v48 = vadd.f32 %v3028_v10, %v2974_v7  ;;  %3362 = vrot.lane.b32.xlu0 %v3097_v9, %s6888_s26 }
 0x8b1   : > { %v3026_v17 = vpop.permute.xlu0 %3025 }
 0x8b2   : > { %v3098_v24 = vpack.c.bf16 %v3084_v2, %v3083_v30  ;;  %v3069_v41 = vadd.f32 %v3026_v17, %v2973_v32  ;;  %v3086_v0 = vmul.f32 0.17677669, %v3070_v48  ;;  %v2979_v30 = vmul.f32 %v2942_v62, %v7052_v47 }
 0x8b3   : > { %v3032_v60 = vpop.permute.xlu1 %3031  ;;  %v2984_v62 = vmul.f32 %v8855_v33, %v9999_v57 }
 0x8b4   : > { %v3085_v35 = vmul.f32 0.17677669, %v3069_v41  ;;  %v3072_v3 = vadd.f32 %v3032_v60, %v2976_v56  ;;  %3364 = vrot.lane.b32.xlu1 %v3098_v24, %s6888_s26 }
 0x8b5   : > { %v3030_v15 = vpop.permute.xlu0 %3029 }
 0x8b6   : > { %v3099_v11 = vpack.c.bf16 %v3086_v0, %v3085_v35  ;;  %v3071_v38 = vadd.f32 %v3030_v15, %v2975_v25  ;;  %v3088_v7 = vmul.f32 0.17677669, %v3072_v3  ;;  %v2981_v25 = vmul.f32 %v2946_v43, %v7070_v55 }
 0x8b7   : > { %v3036_v16 = vpop.permute.xlu1 %3035 }
 0x8b8   : > { %v3087_v1 = vmul.f32 0.17677669, %v3071_v38  ;;  %v3074_v9 = vadd.f32 %v3036_v16, %v2978_v44  ;;  %3366 = vrot.lane.b32.xlu0 %v3099_v11, %s6888_s26 }
 0x8b9   : > { %v3034_v32 = vpop.permute.xlu0 %3033 }
 0x8ba   : > { %v3100_v27 = vpack.c.bf16 %v3088_v7, %v3087_v1  ;;  %v3073_v10 = vadd.f32 %v3034_v32, %v2977_v49  ;;  %v3090_v48 = vmul.f32 0.17677669, %v3074_v9 }
 0x8bb   : > { %v3040_v2 = vpop.permute.xlu1 %3039 }
 0x8bc   : > { %v3089_v36 = vmul.f32 0.17677669, %v3073_v10  ;;  %v3076_v17 = vadd.f32 %v3040_v2, %v2980_v14  ;;  %3368 = vrot.lane.b32.xlu1 %v3100_v27, %s6888_s26  ;;  %v6810_v14 = vld [vmem:[%s6964_s6 + $0xb0] ss:$12 sps:$4 sm:$0xff]   ;;  %v6812_v27 = vld [vmem:[%s6964_s6 + $0x80] ss:$12 sps:$4 sm:$0xff]  }
 0x8bd   : > { %v3038_v56 = vpop.permute.xlu0 %3037 }
 0x8be   : > { %v3101_v24 = vpack.c.bf16 %v3090_v48, %v3089_v36  ;;  %v3075_v41 = vadd.f32 %v3038_v56, %v2979_v30  ;;  %v3092_v0 = vmul.f32 0.17677669, %v3076_v17 }
 0x8bf   : > { %v3044_v60 = vpop.permute.xlu1 %3043 }
 0x8c0   : > { %v3091_v58 = vmul.f32 0.17677669, %v3075_v41  ;;  %v3078_v35 = vadd.f32 %v3044_v60, %v2982_v8  ;;  %3370 = vrot.lane.b32.xlu0 %v3101_v24, %s6888_s26 }
 0x8c1   : > { %v3042_v3 = vpop.permute.xlu0 %3041 }
 0x8c2   : > { %v3102_v15 = vpack.c.bf16 %v3092_v0, %v3091_v58  ;;  %v3077_v44 = vadd.f32 %v3042_v3, %v2981_v25  ;;  %v3094_v38 = vmul.f32 0.17677669, %v3078_v35 }
 0x8c3   : > { %v3048_v11 = vpop.permute.xlu1 %3047 }
 0x8c4   : > { %v3093_v43 = vmul.f32 0.17677669, %v3077_v44  ;;  %v3080_v16 = vadd.f32 %v3048_v11, %v2984_v62  ;;  %3372 = vrot.lane.b32.xlu1 %v3102_v15, %s6888_s26 }
 0x8c5   : > { %v3046_v49 = vpop.permute.xlu0 %3045 }
 0x8c6   : > { %v3103_v7 = vpack.c.bf16 %v3094_v38, %v3093_v43  ;;  %v3079_v1 = vadd.f32 %v3046_v49, %v2983_v59  ;;  %v3096_v9 = vmul.f32 0.17677669, %v3080_v16 }
 0x8c8   : > { %v3095_v32 = vmul.f32 0.17677669, %v3079_v1  ;;  %3374 = vrot.lane.b32.xlu0 %v3103_v7, %s6888_s26  ;;  %v10321_v7 = vld [vmem:[#allocation13_spill] sm:$0xff] }
 0x8ca   : > { %v3104_v33 = vpack.c.bf16 %v3096_v9, %v3095_v32 }
 0x8cc   : > { %3376 = vrot.lane.b32.xlu1 %v3104_v33, %s6888_s26  ;;  %3705 = vrot.lane.b32.xlu0 %v6810_v14, %s6888_s26  ;;  %v10231_v33 = vld [vmem:[#allocation14_spill] sm:$0xff] }
 0x8d0   : > { %3703 = vrot.lane.b32.xlu1 %v6811_v50, %s6888_s26  ;;  %3701 = vrot.lane.b32.xlu0 %v6812_v27, %s6888_s26  ;;  %v10233_v50 = vld [vmem:[#allocation16_spill] sm:$0xff] }
 0x922   : > { %v3363_v10 = vpop.permute.xlu0 %3362 }
 0x923   : > { %6093 = vmatprep.mubr.msk.bf16.mxu0 %vm10222_vm3, %v3363_v10  ;;  %vm10232_vm3 = vnez %v10231_v33 }
 0x926   : > { %v3365_v2 = vpop.permute.xlu1 %3364 }
 0x927   : > { %6094 = vmatmul.mubr.msk.bf16.vlgmr.msra.gmra.mxu0 %vm10223_vm11, %v3365_v2  ;;  %vm10234_vm11 = vnez %v10233_v50  ;;  %v10235_v2 = vld [vmem:[#allocation13_spill] sm:$0xff] }
 0x928   : > { %6174 = vmatpush3.msra.mxu0 %v8852_v54 }
 0x929   : > { %6175 = vmatprep.subr.mxu0 %v8493_v12 }
 0x92a   : > { %v3367_v30 = vpop.permute.xlu0 %3366  ;;  %6176 = vmatpush3.msra.mxu0 %v8493_v12 }
 0x92b   : > { %6097 = vmatprep.mubr.msk.bf16.mxu0 %vm10224_vm2, %v3367_v30  ;;  %6177 = vmatprep.subr.mxu0 %v8511_v40  ;;  %vm10236_vm2 = vnez %v10235_v2 }
 0x92c   : > { %6178 = vmatpush3.msra.mxu0 %v8511_v40 }
 0x92d   : > { %6179 = vmatprep.subr.mxu0 %v8519_v4 }
 0x92e   : > { %v3369_v48 = vpop.permute.xlu1 %3368  ;;  %6180 = vmatpush3.msra.mxu0 %v8519_v4 }
 0x92f   : > { %6098 = vmatmul.mubr.msk.bf16.gmra.mxu0 %vm10225_vm8, %v3369_v48  ;;  %v10237_v48 = vld [vmem:[#allocation15_spill] sm:$0xff] }
 0x930   : > { %vm10238_vm8 = vnez %v10237_v48 }
 0x932   : > { %v3371_v36 = vpop.permute.xlu0 %3370 }
 0x933   : > { %6101 = vmatprep.mubr.msk.bf16.mxu0 %vm10226_vm14, %v3371_v36 }
 0x936   : > { %v3373_v17 = vpop.permute.xlu1 %3372 }
 0x937   : > { %6102 = vmatmul.mubr.msk.bf16.gmra.mxu0 %vm10227_vm4, %v3373_v17 }
 0x93a   : > { %v3375_v12 = vpop.permute.xlu0 %3374 }
 0x93b   : > { %6105 = vmatprep.mubr.msk.bf16.mxu0 %vm10228_vm13, %v3375_v12  ;;  %v10239_v12 = vld [vmem:[#allocation18_spill] sm:$0xff] }
 0x93c   : > { %vm10240_vm14 = vnez %v10239_v12 }
 0x93e   : > { %v3377_v56 = vpop.permute.xlu1 %3376  ;;  %v3706_v40 = vpop.permute.xlu0 %3705 }
 0x93f   : > { %6106 = vmatmul.mubr.msk.bf16.gmra.mxu0 %vm10166_vm0, %v3377_v56  ;;  %6109 = vmatprep.subr.bf16.mxu1 %v3706_v40 }
 0x940   : > { %6110 = vmatpush3.bf16.msra.mxu1 %v3706_v40 }
 0x942   : > { %v3704_v8 = vpop.permute.xlu1 %3703  ;;  %v3702_v4 = vpop.permute.xlu0 %3701 }
 0x943   : > { %6111 = vmatprep.subr.bf16.mxu1 %v3704_v8 }
 0x944   : > { %6112 = vmatpush3.bf16.msra.mxu1 %v3704_v8  ;;  %v10241_v8 = vld [vmem:[#allocation17_spill] sm:$0xff] }
 0x945   : > { %6113 = vmatprep.subr.bf16.mxu1 %v3702_v4  ;;  %vm10242_vm4 = vnez %v10241_v8 }
 0x948   : > { %6114 = vmatpush3.bf16.msra.mxu1 %v3702_v4 }
 0x9e7   : > { %v6095_v24 = vpop.f32.mrf.mxu0 }
 0x9e8   : > { %v3525_v41 = vsel %vm7393_vm5, %v6095_v24, -1e+30  ;;  %v6813_v24 = vld [vmem:[%s6964_s6 + $0x50] ss:$12 sps:$4 sm:$0xff]  }
 0x9e9   : > { %3543 = vmax.xlane.f32.xlu0 %v3525_v41  ;;  %v3460_v60 = vpop.f32.mrf.mxu0 }
 0x9ea   : > { %v3523_v0 = vsel %vm7400_vm7, %v3460_v60, -1e+30  ;;  %v6814_v60 = vld [vmem:[%s6964_s6 + $0x68] ss:$12 sps:$4 sm:$0xff]  }
 0x9eb   : > { %v6096_v25 = vpop.f32.mrf.mxu0 }
 0x9ec   : > { %v3526_v62 = vsel %vm7413_vm9, %v6096_v25, -1e+30 }
 0x9ed   : > { %3539 = vmax.xlane.f32.xlu0 %v3523_v0  ;;  %v3463_v58 = vpop.f32.mrf.mxu0 }
 0x9ee   : > { %v3524_v35 = vsel %vm7424_vm10, %v3463_v58, -1e+30  ;;  %v10243_v58 = vld [vmem:[#allocation20_spill] sm:$0xff] }
 0x9ef   : > { %3541 = vmax.xlane.f32.xlu1 %v3524_v35  ;;  %v6099_v3 = vpop.f32.mrf.mxu0  ;;  %vm10244_vm13 = vnez %v10243_v58 }
 0x9f0   : > { %v3529_v11 = vsel %vm7457_vm15, %v6099_v3, -1e+30 }
 0x9f1   : > { %3545 = vmax.xlane.f32.xlu0 %v3526_v62  ;;  %v3476_v15 = vpop.f32.mrf.mxu0 }
 0x9f2   : > { %v3527_v49 = vsel %vm7443_vm12, %v3476_v15, -1e+30 }
 0x9f3   : > { %v6100_v44 = vpop.f32.mrf.mxu0 }
 0x9f4   : > { %v8918_v59 = vsel %vm7482_vm6, %v6100_v44, -1e+30  ;;  %v10245_v44 = vld [vmem:[#allocation19_spill] sm:$0xff] }
 0x9f5   : > { %3551 = vmax.xlane.f32.xlu0 %v3529_v11  ;;  %3553 = vmax.xlane.f32.xlu1 %v8918_v59  ;;  %v3479_v38 = vpop.f32.mrf.mxu0  ;;  %vm10246_vm0 = vnez %v10245_v44 }
 0x9f6   : > { %v3528_v1 = vsel %vm7464_vm1, %v3479_v38, -1e+30 }
 0x9f7   : > { %v6103_v43 = vpop.f32.mrf.mxu0 }
 0x9f8   : > { %v8927_v14 = vsel %vm10232_vm3, %v6103_v43, -1e+30  ;;  %v6815_v43 = vld [vmem:[%s6964_s6 + $0x38] ss:$12 sps:$4 sm:$0xff]  }
 0x9f9   : > { %3547 = vmax.xlane.f32.xlu0 %v3527_v49  ;;  %3549 = vmax.xlane.f32.xlu1 %v3528_v1  ;;  %v3492_v9 = vpop.f32.mrf.mxu0 }
 0x9fa   : > { %v8937_v30 = vsel %vm10236_vm2, %v3492_v9, -1e+30 }
 0x9fb   : > { %v6104_v32 = vpop.f32.mrf.mxu0 }
 0x9fc   : > { %v8931_v27 = vsel %vm10234_vm11, %v6104_v32, -1e+30 }
 0x9fd   : > { %3559 = vmax.xlane.f32.xlu0 %v8927_v14  ;;  %3561 = vmax.xlane.f32.xlu1 %v8931_v27  ;;  %v3495_v10 = vpop.f32.mrf.mxu0 }
 0x9fe   : > { %v8941_v36 = vsel %vm10238_vm8, %v3495_v10, -1e+30 }
 0x9ff   : > { %v6107_v17 = vpop.f32.mrf.mxu0 }
 0xa00   : > { %v8947_v56 = vsel %vm10240_vm14, %v6107_v17, -1e+30 }
 0xa01   : > { %3555 = vmax.xlane.f32.xlu0 %v8937_v30  ;;  %3557 = vmax.xlane.f32.xlu1 %v8941_v36  ;;  %v3508_v40 = vpop.f32.mrf.mxu0 }
 0xa02   : > { %v8952_v4 = vsel %vm10242_vm4, %v3508_v40, -1e+30 }
 0xa03   : > { %v6108_v25 = vpop.f32.mrf.mxu0 }
 0xa04   : > { %v8961_v3 = vsel %vm10244_vm13, %v6108_v25, -1e+30 }
 0xa05   : > { %3567 = vmax.xlane.f32.xlu0 %v8947_v56  ;;  %v3511_v15 = vpop.f32.mrf.mxu0 }
 0xa06   : > { %v8966_v38 = vsel %vm10246_vm0, %v3511_v15, -1e+30  ;;  %vm10257_vm0 = vcmask 261120  }
 0xa07   : > { %vm10258_vm13 = vmmov %vm10257_vm0 }
 0xa08   : > { %vm10259_vm4 = vmmov %vm10257_vm0 }
 0xa09   : > { %3563 = vmax.xlane.f32.xlu0 %v8952_v4  ;;  %vm10261_vm14 = vmmov %vm10257_vm0 }
 0xa0a   : > { %vm10275_vm8 = vmmov %vm10257_vm0 }
 0xa0b   : > { %vm10279_vm2 = vmmov %vm10257_vm0 }
 0xa0c   : > { %vm10280_vm11 = vmmov %vm10257_vm0 }
 0xa0d   : > { %vm10301_vm3 = vmmov %vm10257_vm0 }
 0xa12   : > { %3697 = vrot.lane.b32.xlu1 %v6813_v24, %s6888_s26 }
 0xa1f   : > { %3699 = vrot.lane.b32.xlu0 %v6814_v60, %s6888_s26 }
 0xa36   : > { %3569 = vmax.xlane.f32.xlu1 %v8961_v3 }
 0xa3a   : > { %3565 = vmax.xlane.f32.xlu1 %v8966_v38 }
 0xa4b   : > { %3695 = vrot.lane.b32.xlu1 %v6815_v43, %s6888_s26 }
 0xa72   : > { %v3544_v9 = vpop.xlane.xlu0 %3543 }
 0xa73   : > { %v3573_v32 = vsub.f32 %v3525_v41, %v3544_v9 }
 0xa75   : > { %v3591_v10 = vmul.f32 1.442695, %v3573_v32 }
 0xa76   : > { %v3540_v17 = vpop.xlane.xlu0 %3539 }
 0xa77   : > { %6570 = vpow2.f32 %v3591_v10  ;;  %v3571_v40 = vsub.f32 %v3523_v0, %v3540_v17 }
 0xa78   : > { %v3542_v24 = vpop.xlane.xlu1 %3541 }
 0xa79   : > { %v3587_v60 = vmul.f32 1.442695, %v3571_v40  ;;  %v3572_v58 = vsub.f32 %v3524_v35, %v3542_v24 }
 0xa7a   : > { %v3546_v25 = vpop.xlane.xlu0 %3545 }
 0xa7b   : > { %6572 = vpow2.f32 %v3587_v60  ;;  %v3574_v8 = vsub.f32 %v3526_v62, %v3546_v25  ;;  %v3589_v48 = vmul.f32 1.442695, %v3572_v58 }
 0xa7d   : > { %v3593_v44 = vmul.f32 1.442695, %v3574_v8 }
 0xa7e   : > { %v3554_v15 = vpop.xlane.xlu1 %3553  ;;  %v3552_v12 = vpop.xlane.xlu0 %3551 }
 0xa7f   : > { %6574 = vpow2.f32 %v3593_v44  ;;  %v3577_v2 = vsub.f32 %v3529_v11, %v3552_v12  ;;  %v3578_v0 = vsub.f32 %v8918_v59, %v3554_v15 }
 0xa80   : > { %6576 = vpow2.f32 %v3589_v48 }
 0xa81   : > { %v3599_v50 = vmul.f32 1.442695, %v3577_v2  ;;  %v3601_v12 = vmul.f32 1.442695, %v3578_v0 }
 0xa82   : > { %v3550_v43 = vpop.xlane.xlu1 %3549  ;;  %v3548_v33 = vpop.xlane.xlu0 %3547 }
 0xa83   : > { %v3576_v41 = vsub.f32 %v3528_v1, %v3550_v43  ;;  %v3575_v9 = vsub.f32 %v3527_v49, %v3548_v33  ;;  %6578 = vpow2.f32 %v3599_v50 }
 0xa84   : > { %v8971_v32 = vpop.eup %6570 }
 0xa85   : > { %v3597_v10 = vmul.f32 1.442695, %v3576_v41  ;;  %v3595_v35 = vmul.f32 1.442695, %v3575_v9  ;;  %3623 = vadd.xlane.f32.xlu1 %v8971_v32 }
 0xa86   : > { %v3560_v62 = vpop.xlane.xlu0 %3559  ;;  %v3562_v8 = vpop.xlane.xlu1 %3561 }
 0xa87   : > { %6580 = vpow2.f32 %v3597_v10  ;;  %v3581_v11 = vsub.f32 %v8927_v14, %v3560_v62  ;;  %v3582_v50 = vsub.f32 %v8931_v27, %v3562_v8 }
 0xa88   : > { %v8976_v2 = vpop.eup %6572  ;;  %6582 = vpow2.f32 %v3595_v35 }
 0xa89   : > { %3619 = vadd.xlane.f32.xlu1 %v8976_v2  ;;  %v3607_v1 = vmul.f32 1.442695, %v3581_v11  ;;  %6584 = vpow2.f32 %v3601_v12  ;;  %v3609_v40 = vmul.f32 1.442695, %v3582_v50  ;;  %v6816_v12 = vld [vmem:[%s6964_s6 + $0x8] ss:$12 sps:$4 sm:$0xff]  }
 0xa8a   : > { %v3556_v49 = vpop.xlane.xlu0 %3555  ;;  %v3558_v48 = vpop.xlane.xlu1 %3557  ;;  %v10248_v50 = vld [vmem:[#allocation22_spill] sm:$0xff] }
 0xa8b   : > { %v3579_v59 = vsub.f32 %v8937_v30, %v3556_v49  ;;  %6586 = vpow2.f32 %v3607_v1  ;;  %v3580_v24 = vsub.f32 %v8941_v36, %v3558_v48  ;;  %v10247_v49 = vld [vmem:[#allocation21_spill] sm:$0xff]  ;;  %v6817_v1 = vld [vmem:[%s6964_s6 + $0x20] ss:$12 sps:$4 sm:$0xff]  }
 0xa8c   : > { %v8980_v33 = vpop.eup %6574 }
 0xa8d   : > { %v3603_v58 = vmul.f32 1.442695, %v3579_v59  ;;  %3625 = vadd.xlane.f32.xlu1 %v8980_v33  ;;  %v8985_v17 = vpop.eup %6576 }
 0xa8e   : > { %v3568_v14 = vpop.xlane.xlu0 %3567  ;;  %v3698_v9 = vpop.permute.xlu1 %3697 }
 0xa8f   : > { %v3585_v44 = vsub.f32 %v8947_v56, %v3568_v14  ;;  %6588 = vpow2.f32 %v3603_v58  ;;  %v3605_v56 = vmul.f32 1.442695, %v3580_v24  ;;  %v10249_v58 = vld [vmem:[#allocation24_spill] sm:$0xff] }
 0xa90   : > { %v8988_v30 = vpop.eup %6578 }
 0xa91   : > { %v3615_v60 = vmul.f32 1.442695, %v3585_v44  ;;  %3621 = vadd.xlane.f32.xlu1 %v8985_v17  ;;  %3631 = vadd.xlane.f32.xlu0 %v8988_v30  ;;  %v10250_v44 = vld [vmem:[#allocation26_spill] sm:$0xff] }
 0xa92   : > { %v3564_v27 = vpop.xlane.xlu0 %3563 }
 0xa93   : > { %6590 = vpow2.f32 %v3615_v60  ;;  %v3583_v25 = vsub.f32 %v8952_v4, %v3564_v27  ;;  %v6818_v27 = vld [vmem:[%s6964_s6] sm:$0xff] }
 0xa94   : > { %v8993_v15 = vpop.eup %6580  ;;  %6592 = vpow2.f32 %v3609_v40 }
 0xa95   : > { %v8995_v43 = vpop.eup %6582  ;;  %v3611_v41 = vmul.f32 1.442695, %v3583_v25  ;;  %3629 = vadd.xlane.f32.xlu1 %v8993_v15 }
 0xa96   : > { %3627 = vadd.xlane.f32.xlu0 %v8995_v43  ;;  %v3700_v36 = vpop.permute.xlu0 %3699  ;;  %v8999_v0 = vpop.eup %6584 }
 0xa97   : > { %6594 = vpow2.f32 %v3611_v41  ;;  %6115 = vmatprep.subr.bf16.mxu1 %v3700_v36  ;;  %v6820_v41 = vld [vmem:[%s6964_s6 + $0x3c] sm:$0xff] }
 0xa98   : > { %6596 = vpow2.f32 %v3605_v56  ;;  %6116 = vmatpush3.bf16.msra.mxu1 %v3700_v36  ;;  %v9002_v4 = vpop.eup %6586  ;;  %v10251_v56 = vld [vmem:[#allocation27_spill] sm:$0xff]  ;;  %v6821_v36 = vld [vmem:[%s6964_s6 + $0x54] sm:$0xff] }
 0xa99   : > { %6117 = vmatprep.subr.bf16.mxu1 %v3698_v9 }
 0xa9a   : > { %3633 = vadd.xlane.f32.xlu0 %v8999_v0 }
 0xa9c   : > { %6118 = vmatpush3.bf16.msra.mxu1 %v3698_v9  ;;  %v9004_v10 = vpop.eup %6588 }
 0xa9d   : > { %3635 = vadd.xlane.f32.xlu1 %v9004_v10 }
 0xa9e   : > { %3639 = vadd.xlane.f32.xlu0 %v9002_v4 }
 0xaa0   : > { %v9008_v35 = vpop.eup %6590 }
 0xaa1   : > { %v9010_v62 = vpop.eup %6592  ;;  %3647 = vadd.xlane.f32.xlu1 %v9008_v35 }
 0xaa2   : > { %3641 = vadd.xlane.f32.xlu0 %v9010_v62 }
 0xaa4   : > { %v9014_v8 = vpop.eup %6594 }
 0xaa5   : > { %v9016_v11 = vpop.eup %6596  ;;  %3643 = vadd.xlane.f32.xlu1 %v9014_v8 }
 0xaa6   : > { %3637 = vadd.xlane.f32.xlu0 %v9016_v11 }
 0xab6   : > { %3691 = vrot.lane.b32.xlu1 %v6816_v12, %s6888_s26  ;;  %v6822_v12 = vld [vmem:[%s6964_s6 + $0x6c] sm:$0xff] }
 0xaba   : > { %6400 = vrot.lane.b32.xlu1 %v10247_v49, %s6887_s21  ;;  %v6823_v49 = vld [vmem:[%s6964_s6 + $0x84] sm:$0xff] }
 0xabc   : > { %3693 = vrot.lane.b32.xlu0 %v6817_v1, %s6888_s26  ;;  %v6824_v1 = vld [vmem:[%s6964_s6 + $0x9c] sm:$0xff] }
 0xabe   : > { %6405 = vrot.lane.b32.xlu1 %v10248_v50, %s6887_s21  ;;  %v10252_v50 = vld [vmem:[#allocation51_spill] sm:$0xff] }
 0xabf   : > { %v3570_v59 = vpop.xlane.xlu1 %3569 }
 0xac0   : > { %v3586_v24 = vsub.f32 %v8961_v3, %v3570_v59  ;;  %v6825_v59 = vld [vmem:[%s6964_s6 + $0xb4] sm:$0xff] }
 0xac2   : > { %6410 = vrot.lane.b32.xlu1 %v10249_v58, %s6887_s21  ;;  %v3617_v25 = vmul.f32 1.442695, %v3586_v24  ;;  %v10254_v58 = vld [vmem:[#allocation2_spill] sm:$0xff] }
 0xac3   : > { %v3566_v48 = vpop.xlane.xlu1 %3565 }
 0xac4   : > { %v3584_v14 = vsub.f32 %v8966_v38, %v3566_v48  ;;  %v6819_v38 = vld [vmem:[%s6964_s6 + $0x24] sm:$0xff] }
 0xac5   : > { %v10253_v48 = vld [vmem:[#allocation54_spill] sm:$0xff] }
 0xac6   : > { %6420 = vrot.lane.b32.xlu1 %v10250_v44, %s6887_s21  ;;  %v3613_v60 = vmul.f32 1.442695, %v3584_v14  ;;  %v10255_v14 = vld [vmem:[#allocation23_spill] sm:$0xff]  ;;  %v10256_v44 = vld [vmem:[#allocation25_spill] sm:$0xff] }
 0xac7   : > { %v3696_v40 = vpop.permute.xlu1 %3695 }
 0xac8   : > { %6119 = vmatprep.subr.bf16.mxu1 %v3696_v40  ;;  %6598 = vpow2.f32 %v3613_v60  ;;  %v6830_v60 = vld [vmem:[%s6964_s6 + $0x60] sm:$0xff] }
 0xac9   : > { %6120 = vmatpush3.bf16.msra.mxu1 %v3696_v40  ;;  %6600 = vpow2.f32 %v3617_v25  ;;  %v6826_v40 = vld [vmem:[%s6964_s6 + $0xc] sm:$0xff] }
 0xaca   : > { %3820 = vrot.lane.b32.xlu1 %v6818_v27, %s6887_s21  ;;  %v6831_v27 = vld [vmem:[%s6964_s6 + $0x78] sm:$0xff] }
 0xace   : > { %6430 = vrot.lane.b32.xlu1 %v10251_v56, %s6887_s21 }
 0xad2   : > { %3826 = vrot.lane.b32.xlu1 %v6819_v38, %s6887_s21  ;;  %v6833_v38 = vld [vmem:[%s6964_s6 + $0xa8] sm:$0xff] }
 0xad5   : > { %v9042_v3 = vpop.eup %6598 }
 0xad6   : > { %3830 = vrot.lane.b32.xlu1 %v6820_v41, %s6887_s21  ;;  %v9047_v9 = vpop.eup %6600 }
 0xada   : > { %3834 = vrot.lane.b32.xlu1 %v6821_v36, %s6887_s21  ;;  %v9099_v36 = vld [vmem:[%s9851_s2] sm:$0xff] }
 0xadb   : > { %3645 = vadd.xlane.f32.xlu0 %v9042_v3 }
 0xade   : > { %3838 = vrot.lane.b32.xlu1 %v6822_v12, %s6887_s21 }
 0xadf   : > { %3649 = vadd.xlane.f32.xlu0 %v9047_v9 }
 0xae2   : > { %3842 = vrot.lane.b32.xlu1 %v6823_v49, %s6887_s21 }
 0xae6   : > { %3846 = vrot.lane.b32.xlu1 %v6824_v1, %s6887_s21  ;;  %v9106_v1 = vld [vmem:[%s9851_s2 + $0x10] sm:$0xff] }
 0xaea   : > { %3850 = vrot.lane.b32.xlu1 %v6825_v59, %s6887_s21 }
 0xaee   : > { %4111 = vrot.lane.b32.xlu1 %v10252_v50, %s6886_s10 }
 0xaf2   : > { %4115 = vrot.lane.b32.xlu1 %v10253_v48, %s6886_s10 }
 0xaf5   : > { %6395 = vrot.lane.b32.xlu0 %v10254_v58, %s6887_s21 }
 0xaf6   : > { %4119 = vrot.lane.b32.xlu1 %v8723_v63, %s6886_s10  ;;  %v6827_v63 = vld [vmem:[%s6964_s6 + $0x18] sm:$0xff] }
 0xaf9   : > { %6415 = vrot.lane.b32.xlu0 %v10255_v14, %s6887_s21 }
 0xafa   : > { %4123 = vrot.lane.b32.xlu1 %v8742_v20, %s6886_s10  ;;  %v6828_v20 = vld [vmem:[%s6964_s6 + $0x30] sm:$0xff] }
 0xafd   : > { %6425 = vrot.lane.b32.xlu0 %v10256_v44, %s6887_s21 }
 0xafe   : > { %4127 = vrot.lane.b32.xlu1 %v8761_v26, %s6886_s10  ;;  %v6829_v26 = vld [vmem:[%s6964_s6 + $0x48] sm:$0xff] }
 0xb01   : > { %3822 = vrot.lane.b32.xlu0 %v6826_v40, %s6887_s21  ;;  %v9115_v40 = vld [vmem:[%s9851_s2 + $0x20] sm:$0xff] }
 0xb02   : > { %4131 = vrot.lane.b32.xlu1 %v8780_v5, %s6886_s10 }
 0xb05   : > { %3824 = vrot.lane.b32.xlu0 %v6827_v63, %s6887_s21 }
 0xb06   : > { %4135 = vrot.lane.b32.xlu1 %v8797_v34, %s6886_s10  ;;  %v6832_v34 = vld [vmem:[%s6964_s6 + $0x90] sm:$0xff] }
 0xb09   : > { %3828 = vrot.lane.b32.xlu0 %v6828_v20, %s6887_s21 }
 0xb0a   : > { %4139 = vrot.lane.b32.xlu1 %v8814_v22, %s6886_s10 }
 0xb0d   : > { %3832 = vrot.lane.b32.xlu0 %v6829_v26, %s6887_s21 }
 0xb0e   : > { %v3624_v24 = vpop.xlane.xlu1 %3623 }
 0xb11   : > { %3836 = vrot.lane.b32.xlu0 %v6830_v60, %s6887_s21  ;;  %v9133_v60 = vld [vmem:[%s9851_s2 + $0x40] sm:$0xff] }
 0xb12   : > { %v3620_v5 = vpop.xlane.xlu1 %3619 }
 0xb13   : > { %6602 = vrcp.f32 %v3620_v5 }
 0xb15   : > { %3840 = vrot.lane.b32.xlu0 %v6831_v27, %s6887_s21 }
 0xb16   : > { %v3626_v25 = vpop.xlane.xlu1 %3625 }
 0xb19   : > { %3844 = vrot.lane.b32.xlu0 %v6832_v34, %s6887_s21 }
 0xb1a   : > { %v3622_v56 = vpop.xlane.xlu1 %3621  ;;  %v3632_v22 = vpop.xlane.xlu0 %3631 }
 0xb1b   : > { %6604 = vrcp.f32 %v3622_v56 }
 0xb1c   : > { %6606 = vrcp.f32 %v3626_v25 }
 0xb1d   : > { %3848 = vrot.lane.b32.xlu0 %v6833_v38, %s6887_s21  ;;  %v9140_v38 = vld [vmem:[%s9851_s2 + $0x50] sm:$0xff] }
 0xb1e   : > { %v3630_v12 = vpop.xlane.xlu1 %3629 }
 0xb1f   : > { %v3628_v41 = vpop.xlane.xlu0 %3627  ;;  %6608 = vrcp.f32 %v3630_v12 }
 0xb20   : > { %v6603_v59 = vpop.eup %6602  ;;  %6610 = vrcp.f32 %v3628_v41 }
 0xb21   : > { %4109 = vrot.lane.b32.xlu0 %v9099_v36, %s6886_s10  ;;  %6612 = vrcp.f32 %v3624_v24  ;;  %v3667_v14 = vmul.f32 %v6603_v59, %v8976_v2  ;;  %v9124_v24 = vld [vmem:[%s9851_s2 + $0x30] sm:$0xff] }
 0xb23   : > { %v3634_v49 = vpop.xlane.xlu0 %3633 }
 0xb24   : > { %6614 = vrcp.f32 %v3634_v49 }
 0xb25   : > { %4113 = vrot.lane.b32.xlu0 %v9106_v1, %s6886_s10  ;;  %6616 = vrcp.f32 %v3632_v22 }
 0xb26   : > { %v3636_v50 = vpop.xlane.xlu1 %3635 }
 0xb27   : > { %v3640_v48 = vpop.xlane.xlu0 %3639  ;;  %6618 = vrcp.f32 %v3636_v50 }
 0xb28   : > { %v6605_v58 = vpop.eup %6604 }
 0xb29   : > { %v3668_v44 = vmul.f32 %v6605_v58, %v8985_v17  ;;  %4117 = vrot.lane.b32.xlu0 %v9115_v40, %s6886_s10  ;;  %v6607_v5 = vpop.eup %6606  ;;  %v9153_v58 = vld [vmem:[%s9851_s2 + $0x60] sm:$0xff] }
 0xb2a   : > { %v9119_v63 = vpop.xlane.xlu1 %3647  ;;  %v3670_v41 = vmul.f32 %v6607_v5, %v8980_v33 }
 0xb2b   : > { %v3642_v20 = vpop.xlane.xlu0 %3641  ;;  %v3683_v26 = vpack.c.bf16 %v3668_v44, %v3667_v14 }
 0xb2c   : > { %v6609_v27 = vpop.eup %6608 }
 0xb2d   : > { %6125 = vmatprep.mubr.bf16.mxu1 %v3683_v26  ;;  %4121 = vrot.lane.b32.xlu0 %v9124_v24, %s6886_s10  ;;  %v6611_v56 = vpop.eup %6610  ;;  %v3672_v49 = vmul.f32 %v6609_v27, %v8993_v15  ;;  %v6841_v26 = vld [vmem:[%s9853_s4 + $0x10] sm:$0xff]  ;;  %v6843_v27 = vld [vmem:[%s9853_s4 + $0x8] sm:$0xff] }
 0xb2e   : > { %v9128_v2 = vpop.xlane.xlu1 %3643  ;;  %v6613_v22 = vpop.eup %6612  ;;  %v3671_v12 = vmul.f32 %v6611_v56, %v8995_v43  ;;  %v6844_v56 = vld [vmem:[%s9853_s4] sm:$0xff] }
 0xb2f   : > { %v3638_v17 = vpop.xlane.xlu0 %3637  ;;  %v3669_v50 = vmul.f32 %v6613_v22, %v8971_v32 }
 0xb30   : > { %6620 = vrcp.f32 %v3638_v17  ;;  %v3685_v43 = vpack.c.bf16 %v3672_v49, %v3671_v12  ;;  %v9168_v17 = vld [vmem:[%s9851_s2 + $0x70] sm:$0xff] }
 0xb31   : > { %4125 = vrot.lane.b32.xlu0 %v9133_v60, %s6886_s10  ;;  %6622 = vrcp.f32 %v3642_v20  ;;  %v3684_v14 = vpack.c.bf16 %v3670_v41, %v3669_v50  ;;  %v6615_v33 = vpop.eup %6614 }
 0xb32   : > { %v3692_v34 = vpop.permute.xlu1 %3691  ;;  %6624 = vrcp.f32 %v3640_v48  ;;  %v6617_v44 = vpop.eup %6616  ;;  %v3674_v20 = vmul.f32 %v6615_v33, %v8999_v0 }
 0xb33   : > { %v3694_v25 = vpop.permute.xlu0 %3693  ;;  %v3673_v0 = vmul.f32 %v6617_v44, %v8988_v30  ;;  %6626 = vrcp.f32 %v9128_v2 }
 0xb34   : > { %6121 = vmatprep.subr.bf16.mxu1 %v3694_v25  ;;  %v6619_v48 = vpop.eup %6618 }
 0xb35   : > { %6122 = vmatpush3.bf16.msra.mxu1 %v3694_v25  ;;  %4129 = vrot.lane.b32.xlu0 %v9140_v38, %s6886_s10  ;;  %v3675_v25 = vmul.f32 %v6619_v48, %v9004_v10 }
 0xb36   : > { %6123 = vmatprep.subr.bf16.mxu1 %v3692_v34  ;;  %v9147_v59 = vpop.permute.xlu1 %6400 }
 0xb39   : > { %6124 = vmatpush3.bf16.msra.mxu1 %v3692_v34  ;;  %4133 = vrot.lane.b32.xlu0 %v9153_v58, %s6886_s10  ;;  %v3686_v34 = vpack.c.bf16 %v3674_v20, %v3673_v0 }
 0xb3a   : > { %6141 = vmatprep.subr.mxu1 %v8852_v54  ;;  %v9158_v15 = vpop.permute.xlu1 %6405 }
 0xb3c   : > { %6126 = vmatmul.mubr.bf16.vlgmr.msra.gmra.mxu1 %v3684_v14 }
 0xb3d   : > { %6129 = vmatprep.mubr.bf16.mxu1 %v3685_v43  ;;  %6142 = vmatpush3.msra.mxu1 %v8852_v54  ;;  %v6621_v32 = vpop.eup %6620 }
 0xb3e   : > { %6143 = vmatprep.subr.mxu1 %v6841_v26  ;;  %4137 = vrot.lane.b32.xlu0 %v9168_v17, %s6886_s10  ;;  %v3676_v5 = vmul.f32 %v6621_v32, %v9016_v11  ;;  %v9173_v54 = vpop.permute.xlu1 %6410  ;;  %v6623_v11 = vpop.eup %6622 }
 0xb3f   : > { %6144 = vmatpush3.msra.mxu1 %v6841_v26  ;;  %v6625_v30 = vpop.eup %6624  ;;  %v3678_v12 = vmul.f32 %v6623_v11, %v9010_v62 }
 0xb40   : > { %6145 = vmatprep.subr.mxu1 %v6843_v27  ;;  %v3687_v22 = vpack.c.bf16 %v3676_v5, %v3675_v25  ;;  %v3677_v10 = vmul.f32 %v6625_v30, %v9002_v4  ;;  %v6627_v32 = vpop.eup %6626 }
 0xb41   : > { %6146 = vmatpush3.msra.mxu1 %v6843_v27  ;;  %v3679_v0 = vmul.f32 %v6627_v32, %v9014_v8 }
 0xb42   : > { %6147 = vmatprep.subr.mxu1 %v6844_v56  ;;  %v9183_v41 = vpop.permute.xlu1 %6420  ;;  %v3688_v14 = vpack.c.bf16 %v3678_v12, %v3677_v10 }
 0xb43   : > { %6148 = vmatpush3.msra.mxu1 %v6844_v56 }
 0xb44   : > { %6130 = vmatmul.mubr.bf16.gmra.mxu1 %v3686_v34 }
 0xb45   : > { %6133 = vmatprep.mubr.bf16.mxu1 %v3687_v22 }
 0xb46   : > { %v3821_v49 = vpop.permute.xlu1 %3820 }
 0xb47   : > { %v3852_v50 = vrot.slane %v3821_v49, 4 }
 0xb49   : > { %v9187_v33 = vunpack.c.l.bf16 %v3852_v50 }
 0xb4a   : > { %v9192_v44 = vpop.permute.xlu1 %6430 }
 0xb4b   : > { %6181 = vmatprep.mubr.msk.f32.mxu0 %vm10257_vm0, %v9187_v33 }
 0xb4c   : > { %6134 = vmatmul.mubr.bf16.gmra.mxu1 %v3688_v14 }
 0xb4e   : > { %v3827_v48 = vpop.permute.xlu1 %3826 }
 0xb4f   : > { %v3855_v50 = vrot.slane %v3827_v48, 4 }
 0xb52   : > { %v3831_v26 = vpop.permute.xlu1 %3830 }
 0xb56   : > { %v3835_v22 = vpop.permute.xlu1 %3834 }
 0xb64   : > { %v3646_v43 = vpop.xlane.xlu0 %3645 }
 0xb65   : > { %6628 = vrcp.f32 %v3646_v43  ;;  %v3839_v43 = vpop.permute.xlu1 %3838 }
 0xb66   : > { %6630 = vrcp.f32 %v9119_v63 }
 0xb68   : > { %v3650_v62 = vpop.xlane.xlu0 %3649 }
 0xb69   : > { %6632 = vrcp.f32 %v3650_v62 }
 0xb6c   : > { %v6396_v4 = vpop.permute.xlu0 %6395 }
 0xb6d   : > { %v6397_v30 = vunpack.i.l.bf16 %v6396_v4  ;;  %v6398_v62 = vunpack.i.h.bf16 %v6396_v4  ;;  %v3843_v4 = vpop.permute.xlu1 %3842 }
 0xb70   : > { %v9195_v20 = vpop.permute.xlu0 %6415 }
 0xb72   : > { %v6629_v5 = vpop.eup %6628 }
 0xb73   : > { %v3680_v27 = vmul.f32 %v6629_v5, %v9042_v3  ;;  %v6631_v2 = vpop.eup %6630  ;;  %v6402_v5 = vunpack.i.l.bf16 %v9147_v59 }
 0xb74   : > { %v9199_v25 = vpop.permute.xlu0 %6425  ;;  %v3681_v63 = vmul.f32 %v6631_v2, %v9008_v35  ;;  %v9208_v35 = vunpack.c.l.bf16 %v3855_v50  ;;  %v3859_v2 = vrot.slane %v3835_v22, 4  ;;  %v6408_v22 = vunpack.i.h.bf16 %v9158_v15 }
 0xb75   : > { %v3689_v34 = vpack.c.bf16 %v3680_v27, %v3679_v0 }
 0xb76   : > { %v6633_v56 = vpop.eup %6632 }
 0xb77   : > { %6137 = vmatprep.mubr.bf16.mxu1 %v3689_v34  ;;  %v3682_v11 = vmul.f32 %v6633_v56, %v9047_v9  ;;  %v3857_v9 = vrot.slane %v3831_v26, 4  ;;  %v6403_v34 = vunpack.i.h.bf16 %v9147_v59  ;;  %v6407_v26 = vunpack.i.l.bf16 %v9158_v15 }
 0xb78   : > { %v3823_v12 = vpop.permute.xlu0 %3822  ;;  %v3861_v59 = vrot.slane %v3839_v43, 4  ;;  %v3863_v15 = vrot.slane %v3843_v4, 4  ;;  %v6413_v43 = vunpack.i.h.bf16 %v9173_v54 }
 0xb79   : > { %v3853_v49 = vrot.slane %v3823_v12, 4  ;;  %v3690_v10 = vpack.c.bf16 %v3682_v11, %v3681_v63  ;;  %v9215_v27 = vunpack.c.l.bf16 %v3857_v9 }
 0xb7b   : > { %v9203_v14 = vunpack.c.l.bf16 %v3853_v49  ;;  %6138 = vmatmul.mubr.bf16.gmra.mxu1 %v3690_v10  ;;  %v6412_v49 = vunpack.i.l.bf16 %v9173_v54  ;;  %v6418_v54 = vunpack.i.h.bf16 %v9195_v20 }
 0xb7c   : > { %v3825_v8 = vpop.permute.xlu0 %3824  ;;  %6149 = vmatprep.mubr.msk.f32.mxu1 %vm10257_vm0, %v6397_v30  ;;  %v9227_v30 = vunpack.c.l.bf16 %v3859_v2 }
 0xb7d   : > { %v3854_v3 = vrot.slane %v3825_v8, 4  ;;  %6182 = vmatmul.mubr.msk.f32.vlgmr.msra.gmra.mxu0 %vm10258_vm13, %v9203_v14  ;;  %vm10260_vm13 = vmmov %vm10257_vm0  ;;  %v3847_v8 = vpop.permute.xlu1 %3846 }
 0xb7e   : > { %v3865_v2 = vrot.slane %v3847_v8, 4 }
 0xb7f   : > { %v9210_v32 = vunpack.c.l.bf16 %v3854_v3  ;;  %v9239_v3 = vunpack.c.l.bf16 %v3861_v59 }
 0xb80   : > { %v3829_v48 = vpop.permute.xlu0 %3828  ;;  %v9263_v59 = vunpack.c.l.bf16 %v3865_v2 }
 0xb81   : > { %v3856_v0 = vrot.slane %v3829_v48, 4  ;;  %6184 = vmatprep.mubr.msk.f32.mxu0 %vm10259_vm4, %v9210_v32  ;;  %vm10262_vm4 = vmmov %vm10257_vm0  ;;  %v3851_v4 = vpop.permute.xlu1 %3850 }
 0xb82   : > { %6185 = vmatmul.mubr.msk.f32.gmra.mxu0 %vm10257_vm0, %v9208_v35 }
 0xb83   : > { %v9220_v56 = vunpack.c.l.bf16 %v3856_v0  ;;  %6150 = vmatmul.mubr.msk.f32.vlgmr.msra.gmra.mxu1 %vm10260_vm13, %v6398_v62  ;;  %vm10263_vm13 = vmmov %vm10257_vm0  ;;  %v6417_v62 = vunpack.i.l.bf16 %v9195_v20  ;;  %v9251_v0 = vunpack.c.l.bf16 %v3863_v15  ;;  %v3867_v20 = vrot.slane %v3851_v4, 4 }
 0xb84   : > { %v3833_v63 = vpop.permute.xlu0 %3832  ;;  %6152 = vmatprep.mubr.msk.f32.mxu1 %vm10261_vm14, %v6402_v5  ;;  %vm10264_vm14 = vmmov %vm10257_vm0 }
 0xb85   : > { %v3858_v11 = vrot.slane %v3833_v63, 4  ;;  %6187 = vmatprep.mubr.msk.f32.mxu0 %vm10262_vm4, %v9220_v56  ;;  %vm10265_vm4 = vmmov %vm10257_vm0  ;;  %v9275_v15 = vunpack.c.l.bf16 %v3867_v20 }
 0xb86   : > { %6188 = vmatmul.mubr.msk.f32.gmra.mxu0 %vm10257_vm0, %v9215_v27 }
 0xb87   : > { %v9232_v12 = vunpack.c.l.bf16 %v3858_v11  ;;  %6153 = vmatmul.mubr.msk.f32.gmra.mxu1 %vm10263_vm13, %v6403_v34  ;;  %vm10266_vm13 = vmmov %vm10257_vm0 }
 0xb88   : > { %v3837_v10 = vpop.permute.xlu0 %3836  ;;  %6155 = vmatprep.mubr.msk.f32.mxu1 %vm10264_vm14, %v6407_v26  ;;  %vm10267_vm14 = vmmov %vm10257_vm0  ;;  %v6422_v26 = vunpack.i.l.bf16 %v9183_v41 }
 0xb89   : > { %v3860_v50 = vrot.slane %v3837_v10, 4  ;;  %6190 = vmatprep.mubr.msk.f32.mxu0 %vm10265_vm4, %v9232_v12  ;;  %vm10268_vm4 = vmmov %vm10257_vm0  ;;  %v6427_v10 = vunpack.i.l.bf16 %v9199_v25 }
 0xb8a   : > { %6191 = vmatmul.mubr.msk.f32.gmra.mxu0 %vm10257_vm0, %v9227_v30 }
 0xb8b   : > { %v9244_v9 = vunpack.c.l.bf16 %v3860_v50  ;;  %6156 = vmatmul.mubr.msk.f32.gmra.mxu1 %vm10266_vm13, %v6408_v22  ;;  %vm10269_vm13 = vmmov %vm10257_vm0  ;;  %v6423_v22 = vunpack.i.h.bf16 %v9183_v41  ;;  %v6428_v41 = vunpack.i.h.bf16 %v9199_v25 }
 0xb8c   : > { %v3841_v5 = vpop.permute.xlu0 %3840  ;;  %6158 = vmatprep.mubr.msk.f32.mxu1 %vm10267_vm14, %v6412_v49  ;;  %vm10270_vm14 = vmmov %vm10257_vm0 }
 0xb8d   : > { %v3862_v48 = vrot.slane %v3841_v5, 4  ;;  %6193 = vmatprep.mubr.msk.f32.mxu0 %vm10268_vm4, %v9244_v9  ;;  %vm10271_vm4 = vmmov %vm10257_vm0  ;;  %v6433_v5 = vunpack.i.h.bf16 %v9192_v44 }
 0xb8e   : > { %6194 = vmatmul.mubr.msk.f32.gmra.mxu0 %vm10257_vm0, %v9239_v3 }
 0xb8f   : > { %v9256_v34 = vunpack.c.l.bf16 %v3862_v48  ;;  %6159 = vmatmul.mubr.msk.f32.gmra.mxu1 %vm10269_vm13, %v6413_v43  ;;  %vm10272_vm13 = vmmov %vm10257_vm0 }
 0xb90   : > { %v3845_v63 = vpop.permute.xlu0 %3844  ;;  %6161 = vmatprep.mubr.msk.f32.mxu1 %vm10270_vm14, %v6417_v62  ;;  %vm10273_vm14 = vmmov %vm10257_vm0  ;;  %v6432_v62 = vunpack.i.l.bf16 %v9192_v44  ;;  %v4486_v44 = vmul.f32 %v9099_v36, %v9187_v33  ;;  %v6848_v36 = vld [vmem:[%s9851_s2 + $0x18] sm:$0xff] }
 0xb91   : > { %v3864_v11 = vrot.slane %v3845_v63, 4  ;;  %6196 = vmatprep.mubr.msk.f32.mxu0 %vm10271_vm4, %v9256_v34  ;;  %vm10274_vm4 = vmmov %vm10257_vm0  ;;  %v4489_v33 = vmul.f32 %v6848_v36, %v9208_v35 }
 0xb92   : > { %6197 = vmatmul.mubr.msk.f32.gmra.mxu0 %vm10257_vm0, %v9251_v0 }
 0xb93   : > { %v9268_v49 = vunpack.c.l.bf16 %v3864_v11  ;;  %6162 = vmatmul.mubr.msk.f32.gmra.mxu1 %vm10272_vm13, %v6418_v54  ;;  %vm10276_vm13 = vmmov %vm10257_vm0 }
 0xb94   : > { %v3849_v50 = vpop.permute.xlu0 %3848  ;;  %6164 = vmatprep.mubr.msk.f32.mxu1 %vm10273_vm14, %v6422_v26  ;;  %vm10277_vm14 = vmmov %vm10257_vm0 }
 0xb95   : > { %v3866_v8 = vrot.slane %v3849_v50, 4  ;;  %6199 = vmatprep.mubr.msk.f32.mxu0 %vm10274_vm4, %v9268_v49  ;;  %vm10278_vm4 = vmmov %vm10257_vm0 }
 0xb96   : > { %6200 = vmatmul.mubr.msk.f32.gmra.mxu0 %vm10257_vm0, %v9263_v59 }
 0xb97   : > { %v9280_v43 = vunpack.c.l.bf16 %v3866_v8  ;;  %6165 = vmatmul.mubr.msk.f32.gmra.mxu1 %vm10275_vm8, %v6423_v22  ;;  %vm10297_vm8 = vmmov %vm10257_vm0 }
 0xb98   : > { %6167 = vmatprep.mubr.msk.f32.mxu1 %vm10276_vm13, %v6427_v10  ;;  %v6845_v10 = vld [vmem:[%s9851_s2 + $0x8] sm:$0xff]  ;;  %vm10298_vm13 = vmmov %vm10257_vm0 }
 0xb99   : > { %6202 = vmatprep.mubr.msk.f32.mxu0 %vm10277_vm14, %v9280_v43  ;;  %vm10299_vm14 = vmmov %vm10257_vm0 }
 0xb9a   : > { %6203 = vmatmul.mubr.msk.f32.gmra.mxu0 %vm10278_vm4, %v9275_v15  ;;  %vm10300_vm4 = vmmov %vm10257_vm0 }
 0xb9b   : > { %6168 = vmatmul.mubr.msk.f32.gmra.mxu1 %vm10279_vm2, %v6428_v41  ;;  %vm10296_vm2 = vmmov %vm10257_vm0 }
 0xb9c   : > { %6170 = vmatprep.mubr.msk.f32.mxu1 %vm10257_vm0, %v6432_v62  ;;  %v6846_v62 = vld [vmem:[%s9852_s3 + $0x8] sm:$0xff] }
 0xb9f   : > { %6171 = vmatmul.mubr.msk.f32.gmra.mxu1 %vm10280_vm11, %v6433_v5  ;;  %vm10295_vm11 = vmmov %vm10257_vm0 }
 0xbfc   : > { %v9293_v25 = vpop.f32.mrf.mxu1 }
 0xbfe   : > { %v9295_v48 = vpop.f32.mrf.mxu1 }
 0xbff   : > { %10281 = vst [vmem:[#allocation8_spill] sm:$0xff] %v9295_v48 }
 0xc00   : > { %v9297_v2 = vpop.f32.mrf.mxu1 }
 0xc02   : > { %v9301_v4 = vpop.f32.mrf.mxu1 }
 0xc03   : > { %10282 = vst [vmem:[#allocation11_spill] sm:$0xff] %v9301_v4 }
 0xc04   : > { %v9305_v26 = vpop.f32.mrf.mxu1 }
 0xc05   : > { %10283 = vst [vmem:[#allocation21_spill] sm:$0xff] %v9305_v26 }
 0xc06   : > { %v9307_v63 = vpop.f32.mrf.mxu1 }
 0xc07   : > { %10284 = vst [vmem:[#allocation22_spill] sm:$0xff] %v9307_v63  ;;  %v4487_v63 = vmul.f32 %v6845_v10, %v9203_v14 }
 0xc08   : > { %v9309_v11 = vpop.f32.mrf.mxu1 }
 0xc09   : > { %10285 = vst [vmem:[#allocation24_spill] sm:$0xff] %v9309_v11 }
 0xc0a   : > { %v9313_v22 = vpop.f32.mrf.mxu1 }
 0xc0b   : > { %10286 = vst [vmem:[#allocation26_spill] sm:$0xff] %v9313_v22 }
 0xc0c   : > { %v9317_v50 = vpop.f32.mrf.mxu1 }
 0xc0d   : > { %10287 = vst [vmem:[#allocation27_spill] sm:$0xff] %v9317_v50 }
 0xc0e   : > { %v9319_v8 = vpop.f32.mrf.mxu1 }
 0xc0f   : > { %10288 = vst [vmem:[#allocation51_spill] sm:$0xff] %v9319_v8 }
 0xc10   : > { %v9321_v41 = vpop.f32.mrf.mxu1 }
 0xc11   : > { %10289 = vst [vmem:[#allocation54_spill] sm:$0xff] %v9321_v41  ;;  %v6847_v41 = vld [vmem:[%s9852_s3] sm:$0xff] }
 0xc12   : > { %v9325_v5 = vpop.f32.mrf.mxu1 }
 0xc13   : > { %10290 = vst [vmem:[#allocation2_spill] sm:$0xff] %v9325_v5 }
 0xc3b   : > { %v9329_v20 = vpop.f32.mrf.mxu1 }
 0xc3c   : > { %10291 = vst [vmem:[#allocation23_spill] sm:$0xff] %v9329_v20 }
 0xc3d   : > { %v9331_v54 = vpop.f32.mrf.mxu1  ;;  %v6183_v48 = vpop.f32.mrf.mxu0 }
 0xc3e   : > { %10292 = vst [vmem:[#allocation25_spill] sm:$0xff] %v9331_v54  ;;  %v4503_v22 = vmul.f32 %v6846_v62, %v6183_v48  ;;  %v6850_v54 = vld [vmem:[%s9852_s3 + $0x10] sm:$0xff] }
 0xc3f   : > { %v9340_v4 = vpop.f32.mrf.mxu1  ;;  %v4407_v50 = vpop.f32.mrf.mxu0 }
 0xc40   : > { %10293 = vst [vmem:[#allocation55_spill] sm:$0xff] %v9340_v4  ;;  %v4519_v8 = vadd.f32 %v4503_v22, %v4487_v63  ;;  %v4502_v14 = vmul.f32 %v6847_v41, %v4407_v50  ;;  %v6849_v63 = vld [vmem:[%s9852_s3 + $0x18] sm:$0xff] }
 0xc41   : > { %v9349_v10 = vpop.f32.mrf.mxu1 }
 0xc42   : > { %10294 = vst [vmem:[#allocation56_spill] sm:$0xff] %v9349_v10  ;;  %v4518_v26 = vadd.f32 %v4502_v14, %v4486_v44  ;;  %v6186_v11 = vpop.f32.mrf.mxu0  ;;  %v4488_v14 = vmul.f32 %v9106_v1, %v9210_v32  ;;  %v4490_v32 = vmul.f32 %v9115_v40, %v9220_v56  ;;  %v6854_v56 = vld [vmem:[%s9852_s3 + $0x38] sm:$0xff] }
 0xc43   : > { %v4505_v22 = vmul.f32 %v6849_v63, %v6186_v11  ;;  %v6151_v5 = vpop.f32.mrf.mxu1 }
 0xc44   : > { %v9360_v50 = vpack.c.bf16 %v4519_v8, %v4518_v26  ;;  %v4174_v20 = vmul.f32 %v6846_v62, %v6151_v5  ;;  %v4417_v44 = vpop.f32.mrf.mxu0  ;;  %v6851_v26 = vld [vmem:[%s9852_s3 + $0x28] sm:$0xff] }
 0xc45   : > { %v4521_v48 = vadd.f32 %v4505_v22, %v4489_v33  ;;  %v4504_v10 = vmul.f32 %v6850_v54, %v4417_v44  ;;  %v4030_v35 = vpop.f32.mrf.mxu1 }
 0xc46   : > { %v4173_v36 = vmul.f32 %v6847_v41, %v4030_v35  ;;  %v6189_v4 = vpop.f32.mrf.mxu0  ;;  %4207 = vrot.lane.b32.xlu1 %v4174_v20, %s6886_s10  ;;  %v6852_v41 = vld [vmem:[%s9851_s2 + $0x28] sm:$0xff] }
 0xc47   : > { %v4520_v11 = vadd.f32 %v4504_v10, %v4488_v14  ;;  %v4507_v8 = vmul.f32 %v6851_v26, %v6189_v4  ;;  %v6154_v62 = vpop.f32.mrf.mxu1  ;;  %v4491_v20 = vmul.f32 %v6852_v41, %v9215_v27  ;;  %v6853_v4 = vld [vmem:[%s9852_s3 + $0x20] sm:$0xff] }
 0xc48   : > { %v4176_v5 = vmul.f32 %v6849_v63, %v6154_v62  ;;  %v4427_v1 = vpop.f32.mrf.mxu0  ;;  %4205 = vrot.lane.b32.xlu0 %v4173_v36, %s6886_s10 }
 0xc49   : > { %v9378_v10 = vpack.c.bf16 %v4521_v48, %v4520_v11  ;;  %v4506_v33 = vmul.f32 %v6853_v4, %v4427_v1  ;;  %v4040_v63 = vpop.f32.mrf.mxu1  ;;  %v4523_v14 = vadd.f32 %v4507_v8, %v4491_v20  ;;  %v4492_v11 = vmul.f32 %v9124_v24, %v9232_v12  ;;  %v6857_v12 = vld [vmem:[%s9852_s3 + $0x48] sm:$0xff] }
 0xc4a   : > { %v4175_v22 = vmul.f32 %v6850_v54, %v4040_v63  ;;  %v6192_v44 = vpop.f32.mrf.mxu0  ;;  %4211 = vrot.lane.b32.xlu1 %v4176_v5, %s6886_s10  ;;  %v6855_v54 = vld [vmem:[%s9851_s2 + $0x38] sm:$0xff]  ;;  %v6856_v5 = vld [vmem:[%s9852_s3 + $0x30] sm:$0xff] }
 0xc4b   : > { %v4522_v40 = vadd.f32 %v4506_v33, %v4490_v32  ;;  %v4509_v35 = vmul.f32 %v6854_v56, %v6192_v44  ;;  %v6157_v27 = vpop.f32.mrf.mxu1  ;;  %v4493_v8 = vmul.f32 %v6855_v54, %v9227_v30  ;;  %v4494_v44 = vmul.f32 %v9133_v60, %v9244_v9  ;;  %v6860_v9 = vld [vmem:[%s9852_s3 + $0x58] sm:$0xff] }
 0xc4c   : > { %v4178_v48 = vmul.f32 %v6851_v26, %v6157_v27  ;;  %v4437_v36 = vpop.f32.mrf.mxu0  ;;  %4209 = vrot.lane.b32.xlu0 %v4175_v22, %s6886_s10 }
 0xc4d   : > { %v9394_v62 = vpack.c.bf16 %v4523_v14, %v4522_v40  ;;  %v4508_v1 = vmul.f32 %v6856_v5, %v4437_v36  ;;  %v4050_v26 = vpop.f32.mrf.mxu1  ;;  %v4525_v20 = vadd.f32 %v4509_v35, %v4493_v8  ;;  %v6859_v35 = vld [vmem:[%s9852_s3 + $0x40] sm:$0xff] }
 0xc4e   : > { %v4177_v32 = vmul.f32 %v6853_v4, %v4050_v26  ;;  %v6195_v41 = vpop.f32.mrf.mxu0  ;;  %4215 = vrot.lane.b32.xlu1 %v4178_v48, %s6886_s10  ;;  %v6858_v4 = vld [vmem:[%s9851_s2 + $0x48] sm:$0xff]  ;;  %v4496_v26 = vmul.f32 %v9140_v38, %v9256_v34 }
 0xc4f   : > { %v4524_v24 = vadd.f32 %v4508_v1, %v4492_v11  ;;  %v4511_v33 = vmul.f32 %v6857_v12, %v6195_v41  ;;  %v6160_v30 = vpop.f32.mrf.mxu1  ;;  %v4495_v14 = vmul.f32 %v6858_v4, %v9239_v3  ;;  %v6863_v38 = vld [vmem:[%s9852_s3 + $0x68] sm:$0xff] }
 0xc50   : > { %v4180_v63 = vmul.f32 %v6854_v56, %v6160_v30  ;;  %v4447_v22 = vpop.f32.mrf.mxu0  ;;  %4213 = vrot.lane.b32.xlu0 %v4177_v32, %s6886_s10 }
 0xc51   : > { %v9410_v40 = vpack.c.bf16 %v4525_v20, %v4524_v24  ;;  %v4510_v27 = vmul.f32 %v6859_v35, %v4447_v22  ;;  %v4060_v56 = vpop.f32.mrf.mxu1  ;;  %v4527_v11 = vadd.f32 %v4511_v33, %v4495_v14  ;;  %v6862_v20 = vld [vmem:[%s9852_s3 + $0x50] sm:$0xff]  ;;  %v4498_v14 = vmul.f32 %v9153_v58, %v9268_v49  ;;  %v6866_v58 = vld [vmem:[%s9852_s3 + $0x78] sm:$0xff] }
 0xc52   : > { %v4179_v48 = vmul.f32 %v6856_v5, %v4060_v56  ;;  %v6198_v36 = vpop.f32.mrf.mxu0  ;;  %4219 = vrot.lane.b32.xlu1 %v4180_v63, %s6886_s10  ;;  %v6861_v5 = vld [vmem:[%s9851_s2 + $0x58] sm:$0xff] }
 0xc53   : > { %v4526_v60 = vadd.f32 %v4510_v27, %v4494_v44  ;;  %v4513_v54 = vmul.f32 %v6860_v9, %v6198_v36  ;;  %v6163_v3 = vpop.f32.mrf.mxu1  ;;  %v4497_v32 = vmul.f32 %v6861_v5, %v9251_v0  ;;  %v6867_v5 = vld [vmem:[%s9851_s2 + $0x78] sm:$0xff] }
 0xc54   : > { %v4182_v8 = vmul.f32 %v6857_v12, %v6163_v3  ;;  %v4457_v1 = vpop.f32.mrf.mxu0  ;;  %4217 = vrot.lane.b32.xlu0 %v4179_v48, %s6886_s10  ;;  %v6865_v48 = vld [vmem:[%s9852_s3 + $0x60] sm:$0xff] }
 0xc55   : > { %v4538_v41 = vpack.c.bf16 %v4527_v11, %v4526_v60  ;;  %v4512_v24 = vmul.f32 %v6862_v20, %v4457_v1  ;;  %v4070_v33 = vpop.f32.mrf.mxu1  ;;  %v4529_v63 = vadd.f32 %v4513_v54, %v4497_v32  ;;  %v4501_v32 = vmul.f32 %v6867_v5, %v9275_v15  ;;  %v10309_v5 = vld [vmem:[#allocation3_spill] sm:$0xff] }
 0xc56   : > { %v4181_v12 = vmul.f32 %v6859_v35, %v4070_v33  ;;  %v6201_v30 = vpop.f32.mrf.mxu0  ;;  %4223 = vrot.lane.b32.xlu1 %v4182_v8, %s6886_s10  ;;  %v6864_v35 = vld [vmem:[%s9851_s2 + $0x68] sm:$0xff] }
 0xc57   : > { %v4528_v22 = vadd.f32 %v4512_v24, %v4496_v26  ;;  %v4515_v34 = vmul.f32 %v6863_v38, %v6201_v30  ;;  %v6166_v44 = vpop.f32.mrf.mxu1  ;;  %v4499_v27 = vmul.f32 %v6864_v35, %v9263_v59  ;;  %v4500_v26 = vmul.f32 %v9168_v17, %v9280_v43  ;;  %v6868_v24 = vld [vmem:[%s9852_s3 + $0x70] sm:$0xff] }
 0xc58   : > { %v4184_v0 = vmul.f32 %v6860_v9, %v6166_v44  ;;  %v4467_v4 = vpop.f32.mrf.mxu0  ;;  %4221 = vrot.lane.b32.xlu0 %v4181_v12, %s6886_s10 }
 0xc59   : > { %v4539_v56 = vpack.c.bf16 %v4529_v63, %v4528_v22  ;;  %v4514_v36 = vmul.f32 %v6865_v48, %v4467_v4  ;;  %v4080_v11 = vpop.f32.mrf.mxu1  ;;  %v4531_v54 = vadd.f32 %v4515_v34, %v4499_v27  ;;  %v4112_v27 = vpop.permute.xlu1 %4111 }
 0xc5a   : > { %v4183_v60 = vmul.f32 %v6862_v20, %v4080_v11  ;;  %v6204_v9 = vpop.f32.mrf.mxu0  ;;  %4227 = vrot.lane.b32.xlu1 %v4184_v0, %s6886_s10 }
 0xc5b   : > { %v4530_v3 = vadd.f32 %v4514_v36, %v4498_v14  ;;  %v4517_v49 = vmul.f32 %v6866_v58, %v6204_v9  ;;  %v6169_v8 = vpop.f32.mrf.mxu1  ;;  %v4606_v4 = vsel %vm10300_vm4, %v4539_v56, 0  ;;  %v4603_v14 = vsel %vm10301_vm3, %v4538_v41, 0  ;;  %vm10307_vm3 = vmmov %vm10257_vm0 }
 0xc5c   : > { %v4186_v59 = vmul.f32 %v6863_v38, %v6169_v8  ;;  %v4477_v1 = vpop.f32.mrf.mxu0  ;;  %4225 = vrot.lane.b32.xlu0 %v4183_v60, %s6886_s10  ;;  %v4594_v11 = vsel %vm10307_vm3, %v9378_v10, 0  ;;  %vm10308_vm4 = vmmov %vm10257_vm0 }
 0xc5d   : > { %v4540_v20 = vpack.c.bf16 %v4531_v54, %v4530_v3  ;;  %v4516_v33 = vmul.f32 %v6868_v24, %v4477_v1  ;;  %v4090_v12 = vpop.f32.mrf.mxu1  ;;  %v4533_v63 = vadd.f32 %v4517_v49, %v4501_v32  ;;  %v4591_v54 = vsel %vm10257_vm0, %v9360_v50, 0  ;;  %vm10315_vm3 = vmmov %vm10257_vm0 }
 0xc5e   : > { %v4185_v30 = vmul.f32 %v6865_v48, %v4090_v12  ;;  %4231 = vrot.lane.b32.xlu1 %v4186_v59, %s6886_s10  ;;  %v4110_v48 = vpop.permute.xlu0 %4109  ;;  %v4158_v32 = vmul.f32 %v4112_v27, %v10309_v5 }
 0xc5f   : > { %v4532_v22 = vadd.f32 %v4516_v33, %v4500_v26  ;;  %v6172_v38 = vpop.f32.mrf.mxu1  ;;  %v4609_v0 = vsel %vm10298_vm13, %v4540_v20, 0  ;;  %vm10305_vm13 = vmmov %vm10257_vm0 }
 0xc60   : > { %v4188_v17 = vmul.f32 %v6866_v58, %v6172_v38  ;;  %4229 = vrot.lane.b32.xlu0 %v4185_v30, %s6886_s10 }
 0xc61   : > { %v4541_v43 = vpack.c.bf16 %v4533_v63, %v4532_v22  ;;  %v4100_v34 = vpop.f32.mrf.mxu1 }
 0xc62   : > { %v4187_v44 = vmul.f32 %v6868_v24, %v4100_v34  ;;  %4235 = vrot.lane.b32.xlu1 %v4188_v17, %s6886_s10  ;;  %v4114_v36 = vpop.permute.xlu0 %4113  ;;  %v4157_v24 = vmul.f32 %v4110_v48, %v10053_v42 }
 0xc63   : > { %6293 = vmatprep.subr.msk.bf16.mxu1 %vm10295_vm11, %v4541_v43  ;;  %v4612_v15 = vsel %vm10296_vm2, %v4541_v43, 0  ;;  %vm10302_vm11 = vmmov %vm10257_vm0  ;;  %v4159_v22 = vmul.f32 %v4114_v36, %v6980_v13 }
 0xc64   : > { %6206 = vmatpush3.bf16.xpose.msra.mxu1 %v4612_v15  ;;  %4233 = vrot.lane.b32.xlu0 %v4187_v44, %s6886_s10  ;;  %vm10303_vm2 = vmmov %vm10257_vm0 }
 0xc65   : > { %6294 = vmatprep.subr.msk.bf16.mxu1 %vm10297_vm8, %v4540_v20  ;;  %v4600_v35 = vsel %vm10303_vm2, %v9410_v40, 0  ;;  %vm10304_vm8 = vmmov %vm10257_vm0 }
 0xc66   : > { %v4118_v60 = vpop.permute.xlu0 %4117  ;;  %vm10311_vm2 = vmmov %vm10257_vm0 }
 0xc6c   : > { %6208 = vmatpush3.bf16.xpose.msra.mxu1 %v4609_v0 }
 0xc6d   : > { %6295 = vmatprep.subr.msk.bf16.mxu1 %vm10299_vm14, %v4539_v56  ;;  %v4597_v56 = vsel %vm10305_vm13, %v9394_v62, 0  ;;  %vm10306_vm14 = vmmov %vm10257_vm0 }
 0xc6e   : > { %vm10313_vm13 = vmmov %vm10257_vm0 }
 0xc74   : > { %6210 = vmatpush3.bf16.xpose.msra.mxu1 %v4606_v4 }
 0xc75   : > { %6296 = vmatprep.subr.msk.bf16.mxu1 %vm10257_vm0, %v4538_v41  ;;  %v4116_v41 = vpop.permute.xlu1 %4115 }
 0xc7c   : > { %6212 = vmatpush3.bf16.xpose.msra.mxu1 %v4603_v14  ;;  %v4161_v14 = vmul.f32 %v4118_v60, %v6998_v23 }
 0xc7d   : > { %6297 = vmatprep.subr.msk.bf16.mxu1 %vm10302_vm11, %v9410_v40  ;;  %v4120_v40 = vpop.permute.xlu1 %4119  ;;  %vm10310_vm11 = vmmov %vm10257_vm0 }
 0xc7e   : > { %v4162_v44 = vmul.f32 %v4120_v40, %v7011_v29 }
 0xc81   : > { %v4124_v9 = vpop.permute.xlu1 %4123 }
 0xc82   : > { %v4164_v48 = vmul.f32 %v4124_v9, %v7029_v37 }
 0xc84   : > { %6214 = vmatpush3.bf16.xpose.msra.mxu1 %v4600_v35 }
 0xc85   : > { %6298 = vmatprep.subr.msk.bf16.mxu1 %vm10304_vm8, %v9394_v62  ;;  %v4122_v62 = vpop.permute.xlu0 %4121  ;;  %v4128_v3 = vpop.permute.xlu1 %4127  ;;  %vm10312_vm8 = vmmov %vm10257_vm0 }
 0xc86   : > { %v4163_v36 = vmul.f32 %v4122_v62, %v7016_v31  ;;  %v4166_v23 = vmul.f32 %v4128_v3, %v7047_v45 }
 0xc89   : > { %v4126_v58 = vpop.permute.xlu0 %4125  ;;  %v4132_v49 = vpop.permute.xlu1 %4131 }
 0xc8a   : > { %v4168_v31 = vmul.f32 %v4132_v49, %v7065_v53 }
 0xc8c   : > { %6216 = vmatpush3.bf16.xpose.msra.mxu1 %v4597_v56 }
 0xc8d   : > { %6299 = vmatprep.subr.msk.bf16.mxu1 %vm10306_vm14, %v9378_v10  ;;  %v4130_v8 = vpop.permute.xlu0 %4129  ;;  %v4136_v59 = vpop.permute.xlu1 %4135  ;;  %vm10314_vm14 = vmmov %vm10257_vm0 }
 0xc91   : > { %v4134_v1 = vpop.permute.xlu0 %4133  ;;  %v9485_v26 = vpop.permute.xlu1 %4139 }
 0xc94   : > { %6218 = vmatpush3.bf16.xpose.msra.mxu1 %v4594_v11 }
 0xc95   : > { %6300 = vmatprep.subr.msk.bf16.mxu1 %vm10308_vm4, %v9360_v50  ;;  %v9487_v10 = vpop.permute.xlu0 %4137  ;;  %v4160_v50 = vmul.f32 %v4116_v41, %v6991_v21  ;;  %vm10316_vm4 = vmmov %vm10257_vm0 }
 0xc9c   : > { %6220 = vmatpush3.bf16.xpose.msra.mxu1 %v4591_v54 }
 0xcb8   : > { %v4208_v20 = vpop.permute.xlu1 %4207 }
 0xcb9   : > { %v4254_v33 = vadd.f32 %v4208_v20, %v4158_v32  ;;  %v4165_v20 = vmul.f32 %v4126_v58, %v7034_v39  ;;  %v4170_v39 = vmul.f32 %v4136_v59, %v7085_v61  ;;  %v4171_v61 = vmul.f32 %v9487_v10, %v10001_v6  ;;  %v6870_v6 = vld [vmem:[%s6964_s6 + $0x98] ss:$12 sps:$4 sm:$0xff]   ;;  %v6871_v10 = vld [vmem:[%s6964_s6 + $0x80] ss:$12 sps:$4 sm:$0xff]  }
 0xcba   : > { %v4206_v12 = vpop.permute.xlu0 %4205 }
 0xcbb   : > { %v4253_v30 = vadd.f32 %v4206_v12, %v4157_v24  ;;  %v4270_v38 = vmul.f32 0.17677669, %v4254_v33 }
 0xcbc   : > { %v4212_v63 = vpop.permute.xlu1 %4211 }
 0xcbd   : > { %v4269_v17 = vmul.f32 0.17677669, %v4253_v30  ;;  %v4256_v43 = vadd.f32 %v4212_v63, %v4160_v50  ;;  %v4167_v30 = vmul.f32 %v4130_v8, %v7052_v47  ;;  %v4172_v47 = vmul.f32 %v9485_v26, %v9999_v57  ;;  %v6869_v26 = vld [vmem:[%s6964_s6 + $0xb0] ss:$12 sps:$4 sm:$0xff]  }
 0xcbe   : > { %v4210_v34 = vpop.permute.xlu0 %4209 }
 0xcbf   : > { %v4285_v15 = vpack.c.bf16 %v4270_v38, %v4269_v17  ;;  %v4255_v0 = vadd.f32 %v4210_v34, %v4159_v22  ;;  %v4272_v42 = vmul.f32 0.17677669, %v4256_v43  ;;  %v4169_v43 = vmul.f32 %v4134_v1, %v7070_v55 }
 0xcc0   : > { %v4216_v4 = vpop.permute.xlu1 %4215 }
 0xcc1   : > { %v4271_v35 = vmul.f32 0.17677669, %v4255_v0  ;;  %v4258_v27 = vadd.f32 %v4216_v4, %v4162_v44  ;;  %4550 = vrot.lane.b32.xlu0 %v4285_v15, %s6887_s21 }
 0xcc2   : > { %v4214_v21 = vpop.permute.xlu0 %4213 }
 0xcc3   : > { %v4286_v13 = vpack.c.bf16 %v4272_v42, %v4271_v35  ;;  %v4257_v56 = vadd.f32 %v4214_v21, %v4161_v14  ;;  %v4274_v11 = vmul.f32 0.17677669, %v4258_v27 }
 0xcc4   : > { %v4220_v41 = vpop.permute.xlu1 %4219 }
 0xcc5   : > { %v4273_v29 = vmul.f32 0.17677669, %v4257_v56  ;;  %v4260_v40 = vadd.f32 %v4220_v41, %v4164_v48  ;;  %4552 = vrot.lane.b32.xlu1 %v4286_v13, %s6887_s21 }
 0xcc6   : > { %v4218_v54 = vpop.permute.xlu0 %4217 }
 0xcc7   : > { %v4287_v60 = vpack.c.bf16 %v4274_v11, %v4273_v29  ;;  %v4259_v5 = vadd.f32 %v4218_v54, %v4163_v36  ;;  %v4276_v24 = vmul.f32 0.17677669, %v4260_v40 }
 0xcc8   : > { %v4224_v32 = vpop.permute.xlu1 %4223 }
 0xcc9   : > { %v4275_v37 = vmul.f32 0.17677669, %v4259_v5  ;;  %v4262_v9 = vadd.f32 %v4224_v32, %v4166_v23  ;;  %4554 = vrot.lane.b32.xlu0 %v4287_v60, %s6887_s21 }
 0xcca   : > { %v4222_v33 = vpop.permute.xlu0 %4221 }
 0xccb   : > { %v4288_v62 = vpack.c.bf16 %v4276_v24, %v4275_v37  ;;  %v4261_v12 = vadd.f32 %v4222_v33, %v4165_v20  ;;  %v4278_v63 = vmul.f32 0.17677669, %v4262_v9 }
 0xccc   : > { %v4228_v50 = vpop.permute.xlu1 %4227 }
 0xccd   : > { %v4277_v45 = vmul.f32 0.17677669, %v4261_v12  ;;  %v4264_v3 = vadd.f32 %v4228_v50, %v4168_v31  ;;  %4556 = vrot.lane.b32.xlu1 %v4288_v62, %s6887_s21 }
 0xcce   : > { %v4226_v22 = vpop.permute.xlu0 %4225 }
 0xccf   : > { %v4289_v58 = vpack.c.bf16 %v4278_v63, %v4277_v45  ;;  %v4263_v38 = vadd.f32 %v4226_v22, %v4167_v30  ;;  %v4280_v34 = vmul.f32 0.17677669, %v4264_v3  ;;  %v10317_v45 = vld [vmem:[#allocation14_spill] sm:$0xff]  ;;  %v10319_v3 = vld [vmem:[#allocation16_spill] sm:$0xff] }
 0xcd0   : > { %v4232_v17 = vpop.permute.xlu1 %4231 }
 0xcd1   : > { %v4279_v53 = vmul.f32 0.17677669, %v4263_v38  ;;  %v4266_v49 = vadd.f32 %v4232_v17, %v4170_v39  ;;  %4558 = vrot.lane.b32.xlu0 %v4289_v58, %s6887_s21  ;;  %v10323_v58 = vld [vmem:[#allocation15_spill] sm:$0xff] }
 0xcd2   : > { %v4230_v44 = vpop.permute.xlu0 %4229 }
 0xcd3   : > { %v4290_v8 = vpack.c.bf16 %v4280_v34, %v4279_v53  ;;  %v4265_v15 = vadd.f32 %v4230_v44, %v4169_v43  ;;  %v4282_v59 = vmul.f32 0.17677669, %v4266_v49  ;;  %v10325_v43 = vld [vmem:[#allocation18_spill] sm:$0xff]  ;;  %v10327_v49 = vld [vmem:[#allocation17_spill] sm:$0xff] }
 0xcd4   : > { %v4236_v0 = vpop.permute.xlu1 %4235 }
 0xcd5   : > { %v4281_v55 = vmul.f32 0.17677669, %v4265_v15  ;;  %v4268_v1 = vadd.f32 %v4236_v0, %v4172_v47  ;;  %4560 = vrot.lane.b32.xlu1 %v4290_v8, %s6887_s21  ;;  %v6872_v47 = vld [vmem:[%s6964_s6 + $0x50] ss:$12 sps:$4 sm:$0xff]   ;;  %v6873_v8 = vld [vmem:[%s6964_s6 + $0x68] ss:$12 sps:$4 sm:$0xff]  }
 0xcd6   : > { %v4234_v4 = vpop.permute.xlu0 %4233  ;;  %v10329_v0 = vld [vmem:[#allocation20_spill] sm:$0xff] }
 0xcd7   : > { %v4291_v14 = vpack.c.bf16 %v4282_v59, %v4281_v55  ;;  %v4267_v42 = vadd.f32 %v4234_v4, %v4171_v61  ;;  %v4284_v35 = vmul.f32 0.17677669, %v4268_v1  ;;  %v10331_v55 = vld [vmem:[#allocation19_spill] sm:$0xff]  ;;  %v6874_v4 = vld [vmem:[%s6964_s6 + $0x38] ss:$12 sps:$4 sm:$0xff]  }
 0xcd9   : > { %v4283_v27 = vmul.f32 0.17677669, %v4267_v42  ;;  %4562 = vrot.lane.b32.xlu0 %v4291_v14, %s6887_s21 }
 0xcdb   : > { %v4292_v57 = vpack.c.bf16 %v4284_v35, %v4283_v27 }
 0xcdd   : > { %4564 = vrot.lane.b32.xlu1 %v4292_v57, %s6887_s21  ;;  %4893 = vrot.lane.b32.xlu0 %v6869_v26, %s6887_s21 }
 0xce1   : > { %4891 = vrot.lane.b32.xlu1 %v6870_v6, %s6887_s21  ;;  %4889 = vrot.lane.b32.xlu0 %v6871_v10, %s6887_s21 }
 0xd33   : > { %v4551_v21 = vpop.permute.xlu0 %4550 }
 0xd34   : > { %6221 = vmatprep.mubr.msk.bf16.mxu1 %vm10310_vm11, %v4551_v21  ;;  %vm10382_vm11 = vmmov %vm10257_vm0 }
 0xd37   : > { %v4553_v48 = vpop.permute.xlu1 %4552 }
 0xd38   : > { %6222 = vmatmul.mubr.msk.bf16.vlgmr.msra.gmra.mxu1 %vm10311_vm2, %v4553_v48  ;;  %vm5104_vm2 = vcmask 523264  }
 0xd3b   : > { %v4555_v13 = vpop.permute.xlu0 %4554 }
 0xd3c   : > { %6225 = vmatprep.mubr.msk.bf16.mxu1 %vm10312_vm8, %v4555_v13  ;;  %vm10386_vm8 = vmmov %vm10257_vm0 }
 0xd3f   : > { %v4557_v56 = vpop.permute.xlu1 %4556 }
 0xd40   : > { %6226 = vmatmul.mubr.msk.bf16.gmra.mxu1 %vm10313_vm13, %v4557_v56  ;;  %vm5121_vm13 = vcmask 785408  }
 0xd43   : > { %v4559_v41 = vpop.permute.xlu0 %4558 }
 0xd44   : > { %6229 = vmatprep.mubr.msk.bf16.mxu1 %vm10314_vm14, %v4559_v41  ;;  %vm10390_vm14 = vmmov %vm10257_vm0 }
 0xd47   : > { %v4561_v36 = vpop.permute.xlu1 %4560 }
 0xd48   : > { %6230 = vmatmul.mubr.msk.bf16.gmra.mxu1 %vm10315_vm3, %v4561_v36  ;;  %vm10394_vm3 = vmmov %vm10257_vm0 }
 0xd4b   : > { %v4563_v11 = vpop.permute.xlu0 %4562 }
 0xd4c   : > { %6233 = vmatprep.mubr.msk.bf16.mxu1 %vm10316_vm4, %v4563_v11  ;;  %vm10398_vm4 = vmmov %vm10257_vm0 }
 0xd4f   : > { %v4565_v29 = vpop.permute.xlu1 %4564  ;;  %v4894_v40 = vpop.permute.xlu0 %4893 }
 0xd50   : > { %6234 = vmatmul.mubr.msk.bf16.gmra.mxu1 %vm10257_vm0, %v4565_v29  ;;  %6237 = vmatprep.subr.bf16.mxu0 %v4894_v40 }
 0xd51   : > { %6238 = vmatpush3.bf16.msra.mxu0 %v4894_v40 }
 0xd53   : > { %v4892_v54 = vpop.permute.xlu1 %4891  ;;  %v4890_v23 = vpop.permute.xlu0 %4889 }
 0xd54   : > { %6239 = vmatprep.subr.bf16.mxu0 %v4892_v54 }
 0xd55   : > { %6240 = vmatpush3.bf16.msra.mxu0 %v4892_v54 }
 0xd56   : > { %6241 = vmatprep.subr.bf16.mxu0 %v4890_v23 }
 0xd59   : > { %6242 = vmatpush3.bf16.msra.mxu0 %v4890_v23 }
 0xdf8   : > { %v6223_v60 = vpop.f32.mrf.mxu1 }
 0xdf9   : > { %v4713_v5 = vsel %vm7393_vm5, %v6223_v60, -1e+30  ;;  %vm10318_vm5 = vnez %v10317_v45 }
 0xdfa   : > { %4731 = vmax.xlane.f32.xlu0 %v4713_v5  ;;  %v4648_v32 = vpop.f32.mrf.mxu1 }
 0xdfb   : > { %v4711_v24 = vsel %vm7400_vm7, %v4648_v32, -1e+30  ;;  %vm10320_vm7 = vnez %v10319_v3 }
 0xdfc   : > { %v6224_v20 = vpop.f32.mrf.mxu1 }
 0xdfd   : > { %v4714_v31 = vsel %vm7413_vm9, %v6224_v20, -1e+30  ;;  %vm10322_vm9 = vnez %v10321_v7 }
 0xdfe   : > { %4727 = vmax.xlane.f32.xlu0 %v4711_v24  ;;  %v4651_v37 = vpop.f32.mrf.mxu1 }
 0xdff   : > { %v4712_v9 = vsel %vm7424_vm10, %v4651_v37, -1e+30  ;;  %vm10324_vm10 = vnez %v10323_v58 }
 0xe00   : > { %4729 = vmax.xlane.f32.xlu1 %v4712_v9  ;;  %v6227_v33 = vpop.f32.mrf.mxu1 }
 0xe01   : > { %v4717_v12 = vsel %vm7457_vm15, %v6227_v33, -1e+30  ;;  %vm10328_vm15 = vnez %v10327_v49 }
 0xe02   : > { %4733 = vmax.xlane.f32.xlu0 %v4714_v31  ;;  %v4664_v62 = vpop.f32.mrf.mxu1 }
 0xe03   : > { %v4715_v30 = vsel %vm7443_vm12, %v4664_v62, -1e+30  ;;  %vm10326_vm12 = vnez %v10325_v43 }
 0xe04   : > { %v6228_v51 = vpop.f32.mrf.mxu1 }
 0xe05   : > { %v9541_v46 = vsel %vm7482_vm6, %v6228_v51, -1e+30  ;;  %vm10332_vm6 = vnez %v10331_v55  ;;  %v6875_v55 = vld [vmem:[%s6964_s6 + $0x8] ss:$12 sps:$4 sm:$0xff]  }
 0xe06   : > { %4739 = vmax.xlane.f32.xlu0 %v4717_v12  ;;  %4741 = vmax.xlane.f32.xlu1 %v9541_v46  ;;  %v4667_v28 = vpop.f32.mrf.mxu1 }
 0xe07   : > { %v4716_v52 = vsel %vm7464_vm1, %v4667_v28, -1e+30  ;;  %vm10330_vm1 = vnez %v10329_v0 }
 0xe08   : > { %v6231_v50 = vpop.f32.mrf.mxu1 }
 0xe09   : > { %v9550_v19 = vsel %vm10318_vm5, %v6231_v50, -1e+30  ;;  %vm10405_vm5 = vmmov %vm10257_vm0 }
 0xe0a   : > { %4735 = vmax.xlane.f32.xlu0 %v4715_v30  ;;  %4737 = vmax.xlane.f32.xlu1 %v4716_v52  ;;  %v4680_v63 = vpop.f32.mrf.mxu1 }
 0xe0b   : > { %v9560_v39 = vsel %vm10322_vm9, %v4680_v63, -1e+30 }
 0xe0c   : > { %v6232_v18 = vpop.f32.mrf.mxu1 }
 0xe0d   : > { %v9554_v22 = vsel %vm10320_vm7, %v6232_v18, -1e+30  ;;  %vm10409_vm7 = vmmov %vm10257_vm0 }
 0xe0e   : > { %4747 = vmax.xlane.f32.xlu0 %v9550_v19  ;;  %4749 = vmax.xlane.f32.xlu1 %v9554_v22  ;;  %v4683_v16 = vpop.f32.mrf.mxu1 }
 0xe0f   : > { %v9564_v38 = vsel %vm10324_vm10, %v4683_v16, -1e+30 }
 0xe10   : > { %v6235_v17 = vpop.f32.mrf.mxu1 }
 0xe11   : > { %v9570_v34 = vsel %vm10326_vm12, %v6235_v17, -1e+30 }
 0xe12   : > { %4743 = vmax.xlane.f32.xlu0 %v9560_v39  ;;  %4745 = vmax.xlane.f32.xlu1 %v9564_v38  ;;  %v4696_v53 = vpop.f32.mrf.mxu1 }
 0xe13   : > { %v9575_v44 = vsel %vm10328_vm15, %v4696_v53, -1e+30 }
 0xe14   : > { %v6236_v15 = vpop.f32.mrf.mxu1 }
 0xe15   : > { %v9584_v61 = vsel %vm10330_vm1, %v6236_v15, -1e+30 }
 0xe16   : > { %4755 = vmax.xlane.f32.xlu0 %v9570_v34  ;;  %v4699_v59 = vpop.f32.mrf.mxu1 }
 0xe17   : > { %v9589_v1 = vsel %vm10332_vm6, %v4699_v59, -1e+30 }
 0xe1a   : > { %4751 = vmax.xlane.f32.xlu0 %v9575_v44 }
 0xe23   : > { %4885 = vrot.lane.b32.xlu1 %v6872_v47, %s6887_s21 }
 0xe30   : > { %4887 = vrot.lane.b32.xlu0 %v6873_v8, %s6887_s21 }
 0xe47   : > { %4757 = vmax.xlane.f32.xlu1 %v9584_v61 }
 0xe4b   : > { %4753 = vmax.xlane.f32.xlu1 %v9589_v1 }
 0xe5c   : > { %4883 = vrot.lane.b32.xlu1 %v6874_v4, %s6887_s21  ;;  %v10333_v4 = vld [vmem:[#allocation29_spill] sm:$0xff] }
 0xe83   : > { %v4732_v14 = vpop.xlane.xlu0 %4731 }
 0xe84   : > { %v4761_v42 = vsub.f32 %v4713_v5, %v4732_v14  ;;  %v10334_v14 = vld [vmem:[#allocation4_spill] sm:$0xff] }
 0xe86   : > { %v4779_v35 = vmul.f32 1.442695, %v4761_v42  ;;  %v10335_v42 = vpack.c.bf16 %v10333_v4, %v10334_v14  ;;  %v10373_v4 = vld [vmem:[#allocation2_spill] sm:$0xff]  ;;  %v10374_v14 = vld [vmem:[#allocation51_spill] sm:$0xff] }
 0xe87   : > { %v4728_v27 = vpop.xlane.xlu0 %4727 }
 0xe88   : > { %6634 = vpow2.f32 %v4779_v35  ;;  %v4759_v57 = vsub.f32 %v4711_v24, %v4728_v27  ;;  %v6876_v35 = vld [vmem:[%s6964_s6 + $0x20] ss:$12 sps:$4 sm:$0xff]   ;;  %s5468_s6 = sshll.u32 %s10411_s19, 6 }
 0xe89   : > { %v4730_v26 = vpop.xlane.xlu1 %4729  ;;  %v10336_v27 = vld [vmem:[#allocation10_spill] sm:$0xff]  ;;  %s9790_s19 = scalar_lea.vmem %s9854_s5, %s5468_s6 }
 0xe8a   : > { %v4775_v6 = vmul.f32 1.442695, %v4759_v57  ;;  %v4760_v21 = vsub.f32 %v4712_v9, %v4730_v26  ;;  %v10337_v57 = vld [vmem:[#allocation5_spill] sm:$0xff] }
 0xe8b   : > { %v4734_v10 = vpop.xlane.xlu0 %4733  ;;  %v10338_v26 = vpack.c.bf16 %v10336_v27, %v10337_v57  ;;  %v10377_v27 = vld [vmem:[#allocation25_spill] sm:$0xff] }
 0xe8c   : > { %6636 = vpow2.f32 %v4775_v6  ;;  %v4762_v48 = vsub.f32 %v4714_v31, %v4734_v10  ;;  %v4777_v36 = vmul.f32 1.442695, %v4760_v21  ;;  %v10339_v10 = vld [vmem:[#allocation9_spill] sm:$0xff]  ;;  %v10340_v21 = vld [vmem:[#allocation6_spill] sm:$0xff] }
 0xe8e   : > { %v4781_v13 = vmul.f32 1.442695, %v4762_v48  ;;  %v10341_v48 = vpack.c.bf16 %v10339_v10, %v10340_v21 }
 0xe8f   : > { %v4742_v56 = vpop.xlane.xlu1 %4741  ;;  %v4740_v41 = vpop.xlane.xlu0 %4739 }
 0xe90   : > { %6638 = vpow2.f32 %v4781_v13  ;;  %v4765_v11 = vsub.f32 %v4717_v12, %v4740_v41  ;;  %v4766_v32 = vsub.f32 %v9541_v46, %v4742_v56  ;;  %v10342_v41 = vld [vmem:[#allocation47_spill] sm:$0xff] }
 0xe91   : > { %6640 = vpow2.f32 %v4777_v36  ;;  %v10343_v36 = vld [vmem:[#allocation12_spill] sm:$0xff] }
 0xe92   : > { %v4787_v29 = vmul.f32 1.442695, %v4765_v11  ;;  %v4789_v62 = vmul.f32 1.442695, %v4766_v32  ;;  %v10344_v11 = vpack.c.bf16 %v10342_v41, %v10343_v36 }
 0xe93   : > { %v4738_v40 = vpop.xlane.xlu1 %4737  ;;  %v4736_v54 = vpop.xlane.xlu0 %4735 }
 0xe94   : > { %v4764_v23 = vsub.f32 %v4716_v52, %v4738_v40  ;;  %v4763_v60 = vsub.f32 %v4715_v30, %v4736_v54  ;;  %6642 = vpow2.f32 %v4787_v29 }
 0xe95   : > { %v9594_v5 = vpop.eup %6634 }
 0xe96   : > { %v4785_v20 = vmul.f32 1.442695, %v4764_v23  ;;  %v4783_v24 = vmul.f32 1.442695, %v4763_v60  ;;  %4811 = vadd.xlane.f32.xlu1 %v9594_v5  ;;  %v10345_v23 = vld [vmem:[#allocation52_spill] sm:$0xff]  ;;  %v10346_v60 = vld [vmem:[#allocation49_spill] sm:$0xff] }
 0xe97   : > { %v4748_v37 = vpop.xlane.xlu0 %4747  ;;  %v4750_v9 = vpop.xlane.xlu1 %4749  ;;  %v10347_v32 = vpack.c.bf16 %v10345_v23, %v10346_v60 }
 0xe98   : > { %6644 = vpow2.f32 %v4785_v20  ;;  %v4769_v33 = vsub.f32 %v9550_v19, %v4748_v37  ;;  %v4770_v50 = vsub.f32 %v9554_v22, %v4750_v9  ;;  %v10350_v37 = vld [vmem:[#allocation21_spill] sm:$0xff] }
 0xe99   : > { %v9599_v31 = vpop.eup %6636  ;;  %6646 = vpow2.f32 %v4783_v24  ;;  %v10349_v24 = vld [vmem:[#allocation24_spill] sm:$0xff] }
 0xe9a   : > { %4807 = vadd.xlane.f32.xlu1 %v9599_v31  ;;  %v4795_v12 = vmul.f32 1.442695, %v4769_v33  ;;  %6648 = vpow2.f32 %v4789_v62  ;;  %v4797_v19 = vmul.f32 1.442695, %v4770_v50  ;;  %v10351_v9 = vpack.c.bf16 %v10349_v24, %v10350_v37  ;;  %v10353_v33 = vld [vmem:[#allocation27_spill] sm:$0xff] }
 0xe9b   : > { %v4744_v51 = vpop.xlane.xlu0 %4743  ;;  %v4746_v30 = vpop.xlane.xlu1 %4745  ;;  %v10358_v50 = vld [vmem:[#allocation7_spill] sm:$0xff] }
 0xe9c   : > { %v4767_v46 = vsub.f32 %v9560_v39, %v4744_v51  ;;  %6650 = vpow2.f32 %v4795_v12  ;;  %v4768_v3 = vsub.f32 %v9564_v38, %v4746_v30  ;;  %v10355_v12 = vld [vmem:[#allocation55_spill] sm:$0xff]  ;;  %v10359_v30 = vld [vmem:[#allocation28_spill] sm:$0xff] }
 0xe9d   : > { %v9603_v28 = vpop.eup %6638 }
 0xe9e   : > { %v4791_v52 = vmul.f32 1.442695, %v4767_v46  ;;  %4813 = vadd.xlane.f32.xlu1 %v9603_v28  ;;  %v9608_v45 = vpop.eup %6640  ;;  %v4793_v17 = vmul.f32 1.442695, %v4768_v3  ;;  %v10356_v46 = vld [vmem:[#allocation23_spill] sm:$0xff]  ;;  %v10364_v3 = vld [vmem:[#allocation53_spill] sm:$0xff] }
 0xe9f   : > { %v4756_v63 = vpop.xlane.xlu0 %4755  ;;  %v4886_v53 = vpop.permute.xlu1 %4885 }
 0xea0   : > { %v4773_v18 = vsub.f32 %v9570_v34, %v4756_v63  ;;  %6652 = vpow2.f32 %v4791_v52  ;;  %v10360_v52 = vpack.c.bf16 %v10358_v50, %v10359_v30  ;;  %v10361_v63 = vld [vmem:[#allocation48_spill] sm:$0xff] }
 0xea1   : > { %v9611_v16 = vpop.eup %6642 }
 0xea2   : > { %v4803_v7 = vmul.f32 1.442695, %v4773_v18  ;;  %4809 = vadd.xlane.f32.xlu1 %v9608_v45  ;;  %4819 = vadd.xlane.f32.xlu0 %v9611_v16  ;;  %v10362_v18 = vld [vmem:[#allocation30_spill] sm:$0xff] }
 0xea3   : > { %v4752_v22 = vpop.xlane.xlu0 %4751 }
 0xea4   : > { %6654 = vpow2.f32 %v4803_v7  ;;  %v4771_v39 = vsub.f32 %v9575_v44, %v4752_v22  ;;  %v10365_v7 = vld [vmem:[#allocation50_spill] sm:$0xff] }
 0xea5   : > { %v9616_v58 = vpop.eup %6644  ;;  %6656 = vpow2.f32 %v4797_v19  ;;  %v10363_v19 = vpack.c.bf16 %v10361_v63, %v10362_v18  ;;  %v10366_v22 = vpack.c.bf16 %v10364_v3, %v10365_v7 }
 0xea6   : > { %v9618_v43 = vpop.eup %6646  ;;  %v4799_v34 = vmul.f32 1.442695, %v4771_v39  ;;  %4817 = vadd.xlane.f32.xlu1 %v9616_v58  ;;  %v10367_v39 = vld [vmem:[#allocation11_spill] sm:$0xff] }
 0xea7   : > { %4815 = vadd.xlane.f32.xlu0 %v9618_v43  ;;  %v4888_v38 = vpop.permute.xlu0 %4887  ;;  %v9622_v49 = vpop.eup %6648 }
 0xea8   : > { %6658 = vpow2.f32 %v4799_v34  ;;  %6243 = vmatprep.subr.bf16.mxu0 %v4888_v38 }
 0xea9   : > { %6660 = vpow2.f32 %v4793_v17  ;;  %6244 = vmatpush3.bf16.msra.mxu0 %v4888_v38  ;;  %v9625_v44 = vpop.eup %6650  ;;  %v10368_v17 = vld [vmem:[#allocation8_spill] sm:$0xff]  ;;  %v10370_v38 = vld [vmem:[#allocation26_spill] sm:$0xff] }
 0xeaa   : > { %6245 = vmatprep.subr.bf16.mxu0 %v4886_v53  ;;  %v10369_v34 = vpack.c.bf16 %v10367_v39, %v10368_v17 }
 0xeab   : > { %4821 = vadd.xlane.f32.xlu0 %v9622_v49 }
 0xead   : > { %6246 = vmatpush3.bf16.msra.mxu0 %v4886_v53  ;;  %v9627_v47 = vpop.eup %6652  ;;  %v10371_v53 = vld [vmem:[#allocation22_spill] sm:$0xff] }
 0xeae   : > { %4823 = vadd.xlane.f32.xlu1 %v9627_v47 }
 0xeaf   : > { %4827 = vadd.xlane.f32.xlu0 %v9625_v44 }
 0xeb1   : > { %v9631_v8 = vpop.eup %6654 }
 0xeb2   : > { %v9633_v15 = vpop.eup %6656  ;;  %4835 = vadd.xlane.f32.xlu1 %v9631_v8 }
 0xeb3   : > { %4829 = vadd.xlane.f32.xlu0 %v9633_v15 }
 0xeb5   : > { %v9637_v0 = vpop.eup %6658 }
 0xeb6   : > { %v9639_v59 = vpop.eup %6660  ;;  %4831 = vadd.xlane.f32.xlu1 %v9637_v0 }
 0xeb7   : > { %4825 = vadd.xlane.f32.xlu0 %v9639_v59 }
 0xec7   : > { %4879 = vrot.lane.b32.xlu1 %v6875_v55, %s6887_s21  ;;  %v10372_v55 = vpack.c.bf16 %v10370_v38, %v10371_v53 }
 0xecb   : > { %5018 = vrot.lane.b32.xlu1 %v10335_v42, %s6887_s21  ;;  %v10375_v42 = vpack.c.bf16 %v10373_v4, %v10374_v14  ;;  %v10380_v14 = vld [vmem:[#allocation43_spill] sm:$0xff] }
 0xecd   : > { %4881 = vrot.lane.b32.xlu0 %v6876_v35, %s6887_s21  ;;  %v10376_v35 = vld [vmem:[#allocation56_spill] sm:$0xff] }
 0xece   : > { %v10378_v57 = vpack.c.bf16 %v10376_v35, %v10377_v27 }
 0xecf   : > { %5020 = vrot.lane.b32.xlu1 %v10338_v26, %s6887_s21 }
 0xed0   : > { %v4758_v6 = vpop.xlane.xlu1 %4757 }
 0xed1   : > { %v4774_v40 = vsub.f32 %v9584_v61, %v4758_v6  ;;  %v10352_v61 = vld [vmem:[#allocation54_spill] sm:$0xff] }
 0xed2   : > { %v10354_v62 = vpack.c.bf16 %v10352_v61, %v10353_v33 }
 0xed3   : > { %5022 = vrot.lane.b32.xlu1 %v10341_v48, %s6887_s21  ;;  %v4805_v20 = vmul.f32 1.442695, %v4774_v40 }
 0xed4   : > { %v4754_v13 = vpop.xlane.xlu1 %4753 }
 0xed5   : > { %v4772_v56 = vsub.f32 %v9589_v1, %v4754_v13  ;;  %v10348_v1 = vpack.c.bf16 %v9297_v2, %v9293_v25  ;;  %v10357_v25 = vpack.c.bf16 %v10355_v12, %v10356_v46 }
 0xed7   : > { %5026 = vrot.lane.b32.xlu1 %v10344_v11, %s6887_s21  ;;  %v4801_v54 = vmul.f32 1.442695, %v4772_v56 }
 0xed8   : > { %v4884_v29 = vpop.permute.xlu1 %4883 }
 0xed9   : > { %6247 = vmatprep.subr.bf16.mxu0 %v4884_v29  ;;  %6662 = vpow2.f32 %v4801_v54 }
 0xeda   : > { %6248 = vmatpush3.bf16.msra.mxu0 %v4884_v29  ;;  %6664 = vpow2.f32 %v4805_v20 }
 0xedb   : > { %5030 = vrot.lane.b32.xlu1 %v10347_v32, %s6887_s21 }
 0xedf   : > { %5042 = vrot.lane.b32.xlu1 %v10348_v1, %s6888_s26 }
 0xee3   : > { %5046 = vrot.lane.b32.xlu1 %v10351_v9, %s6888_s26 }
 0xee6   : > { %v9681_v51 = vpop.eup %6662 }
 0xee7   : > { %5050 = vrot.lane.b32.xlu1 %v10354_v62, %s6888_s26  ;;  %v9688_v2 = vpop.eup %6664 }
 0xeeb   : > { %5054 = vrot.lane.b32.xlu1 %v10357_v25, %s6888_s26 }
 0xeec   : > { %4833 = vadd.xlane.f32.xlu0 %v9681_v51 }
 0xef0   : > { %4837 = vadd.xlane.f32.xlu0 %v9688_v2 }
 0xf06   : > { %5016 = vrot.lane.b32.xlu0 %v10360_v52, %s6887_s21 }
 0xf0a   : > { %5024 = vrot.lane.b32.xlu0 %v10363_v19, %s6887_s21 }
 0xf0e   : > { %5028 = vrot.lane.b32.xlu0 %v10366_v22, %s6887_s21 }
 0xf12   : > { %5040 = vrot.lane.b32.xlu0 %v10369_v34, %s6888_s26 }
 0xf16   : > { %5044 = vrot.lane.b32.xlu0 %v10372_v55, %s6888_s26 }
 0xf1a   : > { %5048 = vrot.lane.b32.xlu0 %v10375_v42, %s6888_s26 }
 0xf1e   : > { %5052 = vrot.lane.b32.xlu0 %v10378_v57, %s6888_s26 }
 0xf1f   : > { %v4812_v26 = vpop.xlane.xlu1 %4811 }
 0xf23   : > { %v4808_v6 = vpop.xlane.xlu1 %4807 }
 0xf24   : > { %6666 = vrcp.f32 %v4808_v6 }
 0xf27   : > { %v4814_v10 = vpop.xlane.xlu1 %4813 }
 0xf2b   : > { %v4810_v21 = vpop.xlane.xlu1 %4809  ;;  %v4820_v48 = vpop.xlane.xlu0 %4819 }
 0xf2c   : > { %6668 = vrcp.f32 %v4810_v21 }
 0xf2d   : > { %6670 = vrcp.f32 %v4814_v10 }
 0xf2f   : > { %v4818_v56 = vpop.xlane.xlu1 %4817 }
 0xf30   : > { %v4816_v13 = vpop.xlane.xlu0 %4815  ;;  %6672 = vrcp.f32 %v4818_v56 }
 0xf31   : > { %v6667_v36 = vpop.eup %6666  ;;  %6674 = vrcp.f32 %v4816_v13 }
 0xf32   : > { %6676 = vrcp.f32 %v4812_v26  ;;  %v4855_v54 = vmul.f32 %v6667_v36, %v9599_v31 }
 0xf34   : > { %v4822_v41 = vpop.xlane.xlu0 %4821 }
 0xf35   : > { %6678 = vrcp.f32 %v4822_v41 }
 0xf36   : > { %6680 = vrcp.f32 %v4820_v48 }
 0xf37   : > { %v4824_v11 = vpop.xlane.xlu1 %4823 }
 0xf38   : > { %v4828_v29 = vpop.xlane.xlu0 %4827  ;;  %6682 = vrcp.f32 %v4824_v11 }
 0xf39   : > { %v6669_v40 = vpop.eup %6668 }
 0xf3a   : > { %v4856_v23 = vmul.f32 %v6669_v40, %v9608_v45  ;;  %v6671_v37 = vpop.eup %6670  ;;  %v10384_v40 = vld [vmem:[#allocation44_spill] sm:$0xff] }
 0xf3b   : > { %v4836_v60 = vpop.xlane.xlu1 %4835  ;;  %v4858_v31 = vmul.f32 %v6671_v37, %v9603_v28 }
 0xf3c   : > { %v4830_v32 = vpop.xlane.xlu0 %4829  ;;  %v4871_v20 = vpack.c.bf16 %v4856_v23, %v4855_v54 }
 0xf3d   : > { %v6673_v9 = vpop.eup %6672 }
 0xf3e   : > { %6253 = vmatprep.mubr.bf16.mxu0 %v4871_v20  ;;  %v6675_v62 = vpop.eup %6674  ;;  %v4860_v25 = vmul.f32 %v6673_v9, %v9616_v58 }
 0xf3f   : > { %v4832_v1 = vpop.xlane.xlu1 %4831  ;;  %v6677_v12 = vpop.eup %6676  ;;  %v4859_v46 = vmul.f32 %v6675_v62, %v9618_v43 }
 0xf40   : > { %v4826_v24 = vpop.xlane.xlu0 %4825  ;;  %v4857_v50 = vmul.f32 %v6677_v12, %v9594_v5 }
 0xf41   : > { %6684 = vrcp.f32 %v4826_v24  ;;  %v4873_v18 = vpack.c.bf16 %v4860_v25, %v4859_v46 }
 0xf42   : > { %6686 = vrcp.f32 %v4830_v32  ;;  %v4872_v30 = vpack.c.bf16 %v4858_v31, %v4857_v50  ;;  %v6679_v52 = vpop.eup %6678 }
 0xf43   : > { %v4880_v61 = vpop.permute.xlu1 %4879  ;;  %6688 = vrcp.f32 %v4828_v29  ;;  %v6681_v19 = vpop.eup %6680  ;;  %v4862_v7 = vmul.f32 %v6679_v52, %v9622_v49  ;;  %v10379_v49 = vld [vmem:[#allocation45_spill] sm:$0xff]  ;;  %v10383_v29 = vld [vmem:[#allocation46_spill] sm:$0xff] }
 0xf44   : > { %v4882_v33 = vpop.permute.xlu0 %4881  ;;  %v4861_v5 = vmul.f32 %v6681_v19, %v9611_v16  ;;  %v10381_v42 = vpack.c.bf16 %v10379_v49, %v10380_v14  ;;  %6690 = vrcp.f32 %v4832_v1  ;;  %v10385_v54 = vpack.c.bf16 %v10383_v29, %v10384_v40  ;;  %v10388_v49 = vld [vmem:[#allocation31_spill] sm:$0xff] }
 0xf45   : > { %6249 = vmatprep.subr.bf16.mxu0 %v4882_v33  ;;  %v6683_v28 = vpop.eup %6682  ;;  %v10396_v29 = vld [vmem:[#allocation35_spill] sm:$0xff] }
 0xf46   : > { %6250 = vmatpush3.bf16.msra.mxu0 %v4882_v33  ;;  %v4863_v43 = vmul.f32 %v6683_v28, %v9627_v47  ;;  %v4874_v39 = vpack.c.bf16 %v4862_v7, %v4861_v5 }
 0xf47   : > { %6251 = vmatprep.subr.bf16.mxu0 %v4880_v61  ;;  %v9722_v45 = vpop.permute.xlu1 %5018 }
 0xf4a   : > { %6252 = vmatpush3.bf16.msra.mxu0 %v4880_v61 }
 0xf4b   : > { %v9727_v63 = vpop.permute.xlu1 %5020 }
 0xf4d   : > { %6254 = vmatmul.mubr.bf16.vlgmr.msra.gmra.mxu0 %v4872_v30 }
 0xf4e   : > { %6257 = vmatprep.mubr.bf16.mxu0 %v4873_v18  ;;  %v6685_v3 = vpop.eup %6684 }
 0xf4f   : > { %v9730_v22 = vpop.permute.xlu1 %5022  ;;  %v4864_v58 = vmul.f32 %v6685_v3, %v9639_v59  ;;  %v6687_v17 = vpop.eup %6686 }
 0xf50   : > { %v6689_v53 = vpop.eup %6688  ;;  %v4866_v55 = vmul.f32 %v6687_v17, %v9633_v15 }
 0xf51   : > { %v4875_v38 = vpack.c.bf16 %v4864_v58, %v4863_v43  ;;  %v4865_v16 = vmul.f32 %v6689_v53, %v9625_v44  ;;  %v6691_v21 = vpop.eup %6690 }
 0xf52   : > { %v4867_v56 = vmul.f32 %v6691_v21, %v9637_v0 }
 0xf53   : > { %v9735_v34 = vpop.permute.xlu1 %5026  ;;  %v4876_v35 = vpack.c.bf16 %v4866_v55, %v4865_v16 }
 0xf55   : > { %6258 = vmatmul.mubr.bf16.gmra.mxu0 %v4874_v39 }
 0xf56   : > { %6261 = vmatprep.mubr.bf16.mxu0 %v4875_v38 }
 0xf57   : > { %v5031_v4 = vpop.permute.xlu1 %5030 }
 0xf58   : > { %v5103_v59 = vsel %vm10382_vm11, %v10381_v42, %v5031_v4  ;;  %v10387_v4 = vld [vmem:[#allocation33_spill] sm:$0xff] }
 0xf59   : > { %v10389_v14 = vpack.c.bf16 %v10387_v4, %v10388_v49 }
 0xf5b   : > { %v9743_v47 = vpop.permute.xlu1 %5042  ;;  %v5085_v42 = vsel %vm10390_vm14, %v10389_v14, %v9722_v45 }
 0xf5d   : > { %6262 = vmatmul.mubr.bf16.gmra.mxu0 %v4876_v35  ;;  %v10391_v35 = vld [vmem:[#allocation34_spill] sm:$0xff] }
 0xf5f   : > { %v9745_v27 = vpop.permute.xlu1 %5046 }
 0xf63   : > { %v9747_v57 = vpop.permute.xlu1 %5050 }
 0xf67   : > { %v5055_v26 = vpop.permute.xlu1 %5054 }
 0xf68   : > { %v9750_v15 = vsel %vm5104_vm2, %v5103_v59, %v5055_v26  ;;  %v5108_v59 = vsel %vm5104_vm2, %v5085_v42, %v9743_v47  ;;  %v10392_v26 = vld [vmem:[#allocation32_spill] sm:$0xff] }
 0xf75   : > { %v4834_v6 = vpop.xlane.xlu0 %4833 }
 0xf76   : > { %6692 = vrcp.f32 %v4834_v6  ;;  %v10393_v6 = vpack.c.bf16 %v10391_v35, %v10392_v26 }
 0xf77   : > { %6694 = vrcp.f32 %v4836_v60 }
 0xf79   : > { %v4838_v10 = vpop.xlane.xlu0 %4837 }
 0xf7a   : > { %6696 = vrcp.f32 %v4838_v10 }
 0xf7d   : > { %v5017_v44 = vpop.permute.xlu0 %5016 }
 0xf7e   : > { %v5082_v10 = vsel %vm10394_vm3, %v10393_v6, %v5017_v44 }
 0xf81   : > { %v9752_v48 = vpop.permute.xlu0 %5024 }
 0xf83   : > { %v6693_v13 = vpop.eup %6692 }
 0xf84   : > { %v4868_v41 = vmul.f32 %v6693_v13, %v9681_v51  ;;  %v6695_v36 = vpop.eup %6694 }
 0xf85   : > { %v5029_v11 = vpop.permute.xlu0 %5028  ;;  %v4869_v20 = vmul.f32 %v6695_v36, %v9631_v8 }
 0xf86   : > { %v5100_v23 = vsel %vm10386_vm8, %v10385_v54, %v5029_v11  ;;  %v4877_v32 = vpack.c.bf16 %v4868_v41, %v4867_v56  ;;  %v10395_v11 = vld [vmem:[#allocation37_spill] sm:$0xff] }
 0xf87   : > { %v6697_v60 = vpop.eup %6696  ;;  %v10397_v40 = vpack.c.bf16 %v10395_v11, %v10396_v29 }
 0xf88   : > { %6265 = vmatprep.mubr.bf16.mxu0 %v4877_v32  ;;  %v4870_v1 = vmul.f32 %v6697_v60, %v9688_v2  ;;  %v10399_v60 = vld [vmem:[#allocation38_spill] sm:$0xff] }
 0xf89   : > { %v5041_v24 = vpop.permute.xlu0 %5040  ;;  %v5091_v54 = vsel %vm10398_vm4, %v10397_v40, %v9730_v22 }
 0xf8a   : > { %v4878_v37 = vpack.c.bf16 %v4870_v1, %v4869_v20  ;;  %v5106_v21 = vsel %vm5104_vm2, %v5082_v10, %v5041_v24  ;;  %v10400_v20 = vld [vmem:[#allocation36_spill] sm:$0xff] }
 0xf8b   : > { %v10401_v1 = vpack.c.bf16 %v10399_v60, %v10400_v20 }
 0xf8c   : > { %6266 = vmatmul.mubr.bf16.gmra.mxu0 %v4878_v37 }
 0xf8d   : > { %v5045_v0 = vpop.permute.xlu0 %5044  ;;  %v5088_v24 = vsel %vm10257_vm0, %v10401_v1, %v9727_v63  ;;  %v10402_v63 = vld [vmem:[#allocation41_spill] sm:$0xff] }
 0xf91   : > { %v9762_v9 = vpop.permute.xlu0 %5048 }
 0xf95   : > { %v5053_v51 = vpop.permute.xlu0 %5052 }
 0xf96   : > { %v9765_v61 = vsel %vm5104_vm2, %v5100_v23, %v5053_v51  ;;  %v5112_v23 = vsel %vm5104_vm2, %v5091_v54, %v9745_v27  ;;  %v5110_v51 = vsel %vm5104_vm2, %v5088_v24, %v5045_v0 }
0x100d   : > { %v6255_v33 = vpop.f32.mrf.mxu0 }
0x100f   : > { %v4937_v62 = vpop.f32.mrf.mxu0 }
0x1011   : > { %v6256_v12 = vpop.f32.mrf.mxu0 }
0x1012   : > { %v5001_v31 = vpack.c.bf16 %v6256_v12, %v6255_v33 }
0x1013   : > { %v4940_v46 = vpop.f32.mrf.mxu0 }
0x1014   : > { %v5000_v25 = vpack.c.bf16 %v4940_v46, %v4937_v62  ;;  %5066 = vrot.lane.b32.xlu1 %v5001_v31, %s6886_s10  ;;  %v10403_v46 = vld [vmem:[#allocation39_spill] sm:$0xff] }
0x1015   : > { %v6259_v8 = vpop.f32.mrf.mxu0 }
0x1016   : > { %5064 = vrot.lane.b32.xlu0 %v5000_v25, %s6886_s10  ;;  %v10404_v25 = vpack.c.bf16 %v10402_v63, %v10403_v46 }
0x1017   : > { %v4953_v2 = vpop.f32.mrf.mxu0 }
0x1018   : > { %v5097_v0 = vsel %vm10405_vm5, %v10404_v25, %v9735_v34 }
0x1019   : > { %v6260_v50 = vpop.f32.mrf.mxu0 }
0x101a   : > { %v5003_v30 = vpack.c.bf16 %v6260_v50, %v6259_v8  ;;  %v5116_v8 = vsel %vm5104_vm2, %v5097_v0, %v9747_v57  ;;  %v10406_v50 = vld [vmem:[#allocation42_spill] sm:$0xff] }
0x101b   : > { %v4956_v52 = vpop.f32.mrf.mxu0 }
0x101c   : > { %v5002_v18 = vpack.c.bf16 %v4956_v52, %v4953_v2  ;;  %5070 = vrot.lane.b32.xlu1 %v5003_v30, %s6886_s10  ;;  %v10407_v30 = vld [vmem:[#allocation40_spill] sm:$0xff] }
0x101d   : > { %v6263_v19 = vpop.f32.mrf.mxu0  ;;  %v10408_v52 = vpack.c.bf16 %v10406_v50, %v10407_v30 }
0x101e   : > { %5068 = vrot.lane.b32.xlu0 %v5002_v18, %s6886_s10 }
0x101f   : > { %v4969_v28 = vpop.f32.mrf.mxu0  ;;  %v5094_v18 = vsel %vm10409_vm7, %v10408_v52, %v9752_v48 }
0x1021   : > { %v6264_v3 = vpop.f32.mrf.mxu0 }
0x1022   : > { %v5005_v7 = vpack.c.bf16 %v6264_v3, %v6263_v19 }
0x1023   : > { %v4972_v58 = vpop.f32.mrf.mxu0 }
0x1024   : > { %v5004_v5 = vpack.c.bf16 %v4972_v58, %v4969_v28  ;;  %5074 = vrot.lane.b32.xlu1 %v5005_v7, %s6886_s10  ;;  %v5114_v28 = vsel %vm5104_vm2, %v5094_v18, %v9762_v9 }
0x1026   : > { %5072 = vrot.lane.b32.xlu0 %v5004_v5, %s6886_s10 }
0x104c   : > { %v6267_v43 = vpop.f32.mrf.mxu0 }
0x104e   : > { %v4985_v39 = vpop.f32.mrf.mxu0 }
0x1050   : > { %v6268_v17 = vpop.f32.mrf.mxu0 }
0x1051   : > { %v5007_v38 = vpack.c.bf16 %v6268_v17, %v6267_v43 }
0x1052   : > { %v4988_v53 = vpop.f32.mrf.mxu0 }
0x1053   : > { %v5006_v55 = vpack.c.bf16 %v4988_v53, %v4985_v39  ;;  %5078 = vrot.lane.b32.xlu1 %v5007_v38, %s6886_s10 }
0x1055   : > { %5076 = vrot.lane.b32.xlu0 %v5006_v55, %s6886_s10 }
0x1086   : > { %v5067_v16 = vpop.permute.xlu1 %5066 }
0x1087   : > { %v5125_v45 = vsel %vm5121_vm13, %v5108_v59, %v5067_v16 }
0x1088   : > { %v5452_v47 = vcombine.low %v5125_v45, %v5125_v45  ;;  %v5453_v13 = vcombine.high %v5125_v45, %v5125_v45  ;;  %v5065_v56 = vpop.permute.xlu0 %5064 }
0x1089   : > { %v5123_v41 = vsel %vm5121_vm13, %v5106_v21, %v5065_v56 }
0x108a   : > { %5196 = vst [vmem:[%s9790_s19 + $0x8] sm:$0xf] %v5452_v47  ;;  %5197 = vst [vmem:[%s9790_s19 + $0xc] sm:$0xf] %v5453_v13  ;;  %v5450_v44 = vcombine.low %v5123_v41, %v5123_v41  ;;  %v5451_v36 = vcombine.high %v5123_v41, %v5123_v41 }
0x108c   : > { %5194 = vst [vmem:[%s9790_s19] sm:$0xf] %v5450_v44  ;;  %5195 = vst [vmem:[%s9790_s19 + $0x4] sm:$0xf] %v5451_v36 }
0x108e   : > { %v5071_v32 = vpop.permute.xlu1 %5070 }
0x108f   : > { %v5129_v37 = vsel %vm5121_vm13, %v5112_v23, %v5071_v32 }
0x1090   : > { %v5456_v33 = vcombine.low %v5129_v37, %v5129_v37  ;;  %v5457_v62 = vcombine.high %v5129_v37, %v5129_v37  ;;  %v5069_v12 = vpop.permute.xlu0 %5068 }
0x1091   : > { %v5127_v31 = vsel %vm5121_vm13, %v5110_v51, %v5069_v12 }
0x1092   : > { %5200 = vst [vmem:[%s9790_s19 + $0x18] sm:$0xf] %v5456_v33  ;;  %5201 = vst [vmem:[%s9790_s19 + $0x1c] sm:$0xf] %v5457_v62  ;;  %v5454_v22 = vcombine.low %v5127_v31, %v5127_v31  ;;  %v5455_v27 = vcombine.high %v5127_v31, %v5127_v31 }
0x1094   : > { %5198 = vst [vmem:[%s9790_s19 + $0x10] sm:$0xf] %v5454_v22  ;;  %5199 = vst [vmem:[%s9790_s19 + $0x14] sm:$0xf] %v5455_v27 }
0x1096   : > { %v5075_v2 = vpop.permute.xlu1 %5074 }
0x1097   : > { %v5133_v19 = vsel %vm5121_vm13, %v5116_v8, %v5075_v2 }
0x1098   : > { %v5460_v3 = vcombine.low %v5133_v19, %v5133_v19  ;;  %v5461_v7 = vcombine.high %v5133_v19, %v5133_v19  ;;  %v5073_v34 = vpop.permute.xlu0 %5072 }
0x1099   : > { %v5131_v58 = vsel %vm5121_vm13, %v5114_v28, %v5073_v34 }
0x109a   : > { %5204 = vst [vmem:[%s9790_s19 + $0x28] sm:$0xf] %v5460_v3  ;;  %5205 = vst [vmem:[%s9790_s19 + $0x2c] sm:$0xf] %v5461_v7  ;;  %v5458_v57 = vcombine.low %v5131_v58, %v5131_v58  ;;  %v5459_v5 = vcombine.high %v5131_v58, %v5131_v58 }
0x109c   : > { %5202 = vst [vmem:[%s9790_s19 + $0x20] sm:$0xf] %v5458_v57  ;;  %5203 = vst [vmem:[%s9790_s19 + $0x24] sm:$0xf] %v5459_v5 }
0x10c5   : > { %v5079_v48 = vpop.permute.xlu1 %5078 }
0x10c6   : > { %v5137_v43 = vsel %vm5121_vm13, %v9750_v15, %v5079_v48 }
0x10c7   : > { %v5464_v9 = vcombine.low %v5137_v43, %v5137_v43  ;;  %v5465_v39 = vcombine.high %v5137_v43, %v5137_v43  ;;  %v5077_v17 = vpop.permute.xlu0 %5076 }
0x10c8   : > { %v5135_v38 = vsel %vm5121_vm13, %v9765_v61, %v5077_v17 }
0x10c9   : > { %5208 = vst [vmem:[%s9790_s19 + $0x38] sm:$0xf] %v5464_v9  ;;  %5209 = vst [vmem:[%s9790_s19 + $0x3c] sm:$0xf] %v5465_v39  ;;  %v5462_v53 = vcombine.low %v5135_v38, %v5135_v38  ;;  %v5463_v55 = vcombine.high %v5135_v38, %v5135_v38 }
0x10cb   : > { %5206 = vst [vmem:[%s9790_s19 + $0x30] sm:$0xf] %v5462_v53  ;;  %5207 = vst [vmem:[%s9790_s19 + $0x34] sm:$0xf] %v5463_v55 }
0x10cc PF: > { %s15_s18 = sadd.s32 1, %s6883_s18  }
0x10cd   : > { %p12_p4 = scmp.ge.s32.totalorder %s15_s18, 4  }
0x10cf   :  { %14 = sbr.rel (!%p12_p4) target bundleno = 1 (0x1), region = 73 }

// kernel: gptj_training_step.18
= control target key start
LH: loop header
LB: loop body
LE: loop exit
PB: predicated region body
PF: predicated region fallthrough
CT: control target
= control target key end

     0   :  { %s2469_s12 = smov 0   ;;  %s2471_s13 = smov 0   ;;  %s3188_s0 = inlined_call_operand.vmem [shape: bf16[256,128], index: 0, kind: input, shape index: {}]   ;;  %s3189_s1 = inlined_call_operand.vmem [shape: bf16[128,512], index: 1, kind: input, shape index: {}]   ;;  %s3190_s2 = inlined_call_operand.vmem [shape: f32[1,512], index: 2, kind: input, shape index: {}]   ;;  %s3191_s3 = inlined_call_operand.vmem [shape: bf16[256,512], index: 3, kind: output, shape index: {}]  }
   0x1   :  { %s2473_s14 = smov 0  }
   0x2 LB: > { %s32_s15 = sadd.s32 1, %s2442_s13  ;;  %p2102_p0 = scmp.ge.s32.totalorder %s2446_s14, 1  ;;  %s2446_s14 = sphi %s2473_s14, %s13_s14   ;;  %s2442_s13 = sphi %s2471_s13, %s3193_s13   ;;  %s2438_s12 = sphi %s2469_s12, %s3192_s12  }
   0x3   : > { %p34_p1 = scmp.ge.s32.totalorder %s32_s15, 2  ;;  %p193_p2 = scmp.lt.s32.totalorder %s2446_s14, 3 }
   0x5   : > { %s3195_s15 = smov (%p34_p1, %s32_s15), 0  ;;  %p194_p3 = pnand %p2102_p0, %p193_p2 }
   0x6   : > { %s2103_s7 = sshll.u32 (!%p194_p3), %s2438_s12, 4 }
   0x7   : > { %197 = sbr.rel (%p194_p3) target bundleno = 429 (0x1ad), region = 32  ;;  %p240_p4 = scmp.lt.s32.totalorder (!%p194_p3), %s2103_s7, 31 }
   0xc   : > { %v2240_v0 = vld [vmem:[%s3189_s1 + $0xe4] ss:$16 sps:$4 sm:$0xff]   ;;  %v2242_v1 = vld [vmem:[%s3189_s1 + $0xec] ss:$16 sps:$4 sm:$0xff]   ;;  %v2448_v2 = vmov 0   ;;  %s3197_s7 = smov (!%p240_p4, %s2103_s7), 31  ;;  %v1089_v41 = vlaneseq }
   0xd   : > { %698 = vmatprep.mubr.bf16.mxu0 %v2448_v2  ;;  %811 = vmatprep.mubr.bf16.mxu1 %v2448_v2  ;;  %v2244_v3 = vld [vmem:[%s3189_s1 + $0xe0] ss:$16 sps:$4 sm:$0xff]   ;;  %v2245_v4 = vld [vmem:[%s3189_s1 + $0xe8] ss:$16 sps:$4 sm:$0xff]   ;;  %v2246_v5 = vld [vmem:[%s3189_s1 + $0xc4] ss:$16 sps:$4 sm:$0xff]  }
   0xe   : > { %666 = vmatprep.subr.bf16.mxu0 %v2240_v0  ;;  %779 = vmatprep.subr.bf16.mxu1 %v2242_v1  ;;  %v2248_v6 = vld [vmem:[%s3189_s1 + $0xcc] ss:$16 sps:$4 sm:$0xff]   ;;  %v2250_v7 = vld [vmem:[%s3189_s1 + $0xc0] ss:$16 sps:$4 sm:$0xff]   ;;  %v2251_v8 = vld [vmem:[%s3189_s1 + $0xc8] ss:$16 sps:$4 sm:$0xff]  }
   0xf   : > { %667 = vmatpush1.bf16.msra.mxu0 %v2244_v3  ;;  %780 = vmatpush1.bf16.msra.mxu1 %v2245_v4  ;;  %v2252_v9 = vld [vmem:[%s3189_s1 + $0xa4] ss:$16 sps:$4 sm:$0xff]   ;;  %v2254_v10 = vld [vmem:[%s3189_s1 + $0xac] ss:$16 sps:$4 sm:$0xff]   ;;  %v2256_v11 = vld [vmem:[%s3189_s1 + $0xa0] ss:$16 sps:$4 sm:$0xff]  }
  0x10   : > { %668 = vmatprep.subr.bf16.mxu0 %v2246_v5  ;;  %781 = vmatprep.subr.bf16.mxu1 %v2248_v6  ;;  %v2257_v12 = vld [vmem:[%s3189_s1 + $0xa8] ss:$16 sps:$4 sm:$0xff]   ;;  %v2258_v13 = vld [vmem:[%s3189_s1 + $0x84] ss:$16 sps:$4 sm:$0xff]   ;;  %v2260_v14 = vld [vmem:[%s3189_s1 + $0x8c] ss:$16 sps:$4 sm:$0xff]  }
  0x11   : > { %v2262_v15 = vld [vmem:[%s3189_s1 + $0x80] ss:$16 sps:$4 sm:$0xff]   ;;  %v2263_v16 = vld [vmem:[%s3189_s1 + $0x88] ss:$16 sps:$4 sm:$0xff]   ;;  %v2264_v17 = vld [vmem:[%s3189_s1 + $0x64] ss:$16 sps:$4 sm:$0xff]  }
  0x12   : > { %v2266_v18 = vld [vmem:[%s3189_s1 + $0x6c] ss:$16 sps:$4 sm:$0xff]   ;;  %v2268_v19 = vld [vmem:[%s3189_s1 + $0x60] ss:$16 sps:$4 sm:$0xff]   ;;  %v2269_v20 = vld [vmem:[%s3189_s1 + $0x68] ss:$16 sps:$4 sm:$0xff]  }
  0x13   : > { %669 = vmatpush1.bf16.msra.mxu0 %v2250_v7  ;;  %782 = vmatpush1.bf16.msra.mxu1 %v2251_v8  ;;  %v2270_v21 = vld [vmem:[%s3189_s1 + $0x44] ss:$16 sps:$4 sm:$0xff]   ;;  %v2272_v22 = vld [vmem:[%s3189_s1 + $0x4c] ss:$16 sps:$4 sm:$0xff]   ;;  %s2104_s11 = sshll.u32 %s3197_s7, 2  ;;  %v1090_v42 = vshrl.u32 %v1089_v41, 7 }
  0x14   : > { %670 = vmatprep.subr.bf16.mxu0 %v2252_v9  ;;  %783 = vmatprep.subr.bf16.mxu1 %v2254_v10  ;;  %v2274_v23 = vld [vmem:[%s3189_s1 + $0x40] ss:$16 sps:$4 sm:$0xff]   ;;  %v2275_v24 = vld [vmem:[%s3189_s1 + $0x48] ss:$16 sps:$4 sm:$0xff]   ;;  %v2276_v25 = vld [vmem:[%s3189_s1 + $0x24] ss:$16 sps:$4 sm:$0xff]   ;;  %s2573_s23 = scalar_lea.vmem %s3188_s0, %s2104_s11 }
  0x15   : > { %v2278_v26 = vld [vmem:[%s3189_s1 + $0x2c] ss:$16 sps:$4 sm:$0xff]   ;;  %v2280_v27 = vld [vmem:[%s3189_s1 + $0x20] ss:$16 sps:$4 sm:$0xff]   ;;  %v2281_v28 = vld [vmem:[%s3189_s1 + $0x28] ss:$16 sps:$4 sm:$0xff]  }
  0x16   : > { %v2282_v29 = vld [vmem:[%s3189_s1 + $0x4] ss:$16 sps:$4 sm:$0xff]   ;;  %v2284_v30 = vld [vmem:[%s3189_s1 + $0xc] ss:$16 sps:$4 sm:$0xff]   ;;  %v2286_v31 = vld [vmem:[%s3189_s1] ss:$16 sps:$4 sm:$0xff]  }
  0x17   : > { %671 = vmatpush1.bf16.msra.mxu0 %v2256_v11  ;;  %784 = vmatpush1.bf16.msra.mxu1 %v2257_v12  ;;  %v2287_v32 = vld [vmem:[%s3189_s1 + $0x8] ss:$16 sps:$4 sm:$0xff]   ;;  %v2288_v33 = vld [vmem:[%s2573_s23] sm:$0xff]   ;;  %v2290_v35 = vld [vmem:[%s2573_s23 + $0x10] sm:$0xff]   ;;  %v1091_v43 = vsub.s32 0, %v1090_v42  ;;  %v1099_v44 = vsub.s32 2, %v1090_v42 }
  0x18   : > { %672 = vmatprep.subr.bf16.mxu0 %v2258_v13  ;;  %785 = vmatprep.subr.bf16.mxu1 %v2260_v14  ;;  %v2289_v34 = vld [vmem:[%s2573_s23 + $0x8] sm:$0xff]   ;;  %v2291_v36 = vld [vmem:[%s2573_s23 + $0x18] sm:$0xff]   ;;  %v2292_v37 = vld [vmem:[%s2573_s23 + $0x20] sm:$0xff]   ;;  %v1095_v46 = vsub.s32 1, %v1090_v42  ;;  %v1103_v47 = vsub.s32 3, %v1090_v42  ;;  %s2182_s18 = sshll.u32 %s3197_s7, 4 }
  0x19   : > { %v2293_v38 = vld [vmem:[%s2573_s23 + $0x28] sm:$0xff]   ;;  %v2294_v39 = vld [vmem:[%s2573_s23 + $0x30] sm:$0xff]   ;;  %v2295_v40 = vld [vmem:[%s2573_s23 + $0x38] sm:$0xff]   ;;  %s2750_s12 = scalar_lea.vmem %s3191_s3, %s2182_s18 }
  0x1a   : > { %v1087_v45 = vld [vmem:[%s3190_s2] sm:$0xf] }
  0x1b   : > { %673 = vmatpush1.bf16.msra.mxu0 %v2262_v15  ;;  %786 = vmatpush1.bf16.msra.mxu1 %v2263_v16  ;;  %v2621_v48 = vrot.slane %v1087_v45, %v1091_v43  ;;  %v2623_v49 = vrot.slane %v1087_v45, %v1099_v44  ;;  %v2625_v50 = vrot.slane %v1087_v45, %v1095_v46 }
  0x1c   : > { %674 = vmatprep.subr.bf16.mxu0 %v2264_v17  ;;  %787 = vmatprep.subr.bf16.mxu1 %v2266_v18  ;;  %v2627_v51 = vrot.slane %v1087_v45, %v1103_v47 }
  0x1f   : > { %675 = vmatpush1.bf16.msra.mxu0 %v2268_v19  ;;  %788 = vmatpush1.bf16.msra.mxu1 %v2269_v20 }
  0x20   : > { %676 = vmatprep.subr.bf16.mxu0 %v2270_v21  ;;  %789 = vmatprep.subr.bf16.mxu1 %v2272_v22 }
  0x23   : > { %677 = vmatpush1.bf16.msra.mxu0 %v2274_v23  ;;  %790 = vmatpush1.bf16.msra.mxu1 %v2275_v24 }
  0x24   : > { %678 = vmatprep.subr.bf16.mxu0 %v2276_v25  ;;  %791 = vmatprep.subr.bf16.mxu1 %v2278_v26 }
  0x27   : > { %679 = vmatpush1.bf16.msra.mxu0 %v2280_v27  ;;  %792 = vmatpush1.bf16.msra.mxu1 %v2281_v28 }
  0x28   : > { %680 = vmatprep.subr.bf16.mxu0 %v2282_v29  ;;  %793 = vmatprep.subr.bf16.mxu1 %v2284_v30 }
  0x2b   : > { %681 = vmatpush1.bf16.msra.mxu0 %v2286_v31  ;;  %794 = vmatpush1.bf16.msra.mxu1 %v2287_v32 }
  0x2e   : > { %699 = vmatmul.mubr.bf16.vlgmr.msra.gmra.mxu0 %v2288_v33  ;;  %812 = vmatmul.mubr.bf16.vlgmr.msra.gmra.mxu1 %v2288_v33 }
  0x2f   : > { %708 = vmatprep.mubr.bf16.mxu0 %v2448_v2  ;;  %821 = vmatprep.mubr.bf16.mxu1 %v2448_v2 }
  0x36   : > { %709 = vmatmul.mubr.bf16.gmra.mxu0 %v2289_v34  ;;  %822 = vmatmul.mubr.bf16.gmra.mxu1 %v2289_v34 }
  0x37   : > { %718 = vmatprep.mubr.bf16.mxu0 %v2448_v2  ;;  %831 = vmatprep.mubr.bf16.mxu1 %v2448_v2 }
  0x3e   : > { %719 = vmatmul.mubr.bf16.gmra.mxu0 %v2290_v35  ;;  %832 = vmatmul.mubr.bf16.gmra.mxu1 %v2290_v35 }
  0x3f   : > { %728 = vmatprep.mubr.bf16.mxu0 %v2448_v2  ;;  %841 = vmatprep.mubr.bf16.mxu1 %v2448_v2 }
  0x46   : > { %729 = vmatmul.mubr.bf16.gmra.mxu0 %v2291_v36  ;;  %842 = vmatmul.mubr.bf16.gmra.mxu1 %v2291_v36 }
  0x47   : > { %738 = vmatprep.mubr.bf16.mxu0 %v2448_v2  ;;  %851 = vmatprep.mubr.bf16.mxu1 %v2448_v2 }
  0x4e   : > { %739 = vmatmul.mubr.bf16.gmra.mxu0 %v2292_v37  ;;  %852 = vmatmul.mubr.bf16.gmra.mxu1 %v2292_v37 }
  0x4f   : > { %748 = vmatprep.mubr.bf16.mxu0 %v2448_v2  ;;  %861 = vmatprep.mubr.bf16.mxu1 %v2448_v2 }
  0x56   : > { %749 = vmatmul.mubr.bf16.gmra.mxu0 %v2293_v38  ;;  %862 = vmatmul.mubr.bf16.gmra.mxu1 %v2293_v38 }
  0x57   : > { %758 = vmatprep.mubr.bf16.mxu0 %v2448_v2  ;;  %871 = vmatprep.mubr.bf16.mxu1 %v2448_v2 }
  0x5e   : > { %759 = vmatmul.mubr.bf16.gmra.mxu0 %v2294_v39  ;;  %872 = vmatmul.mubr.bf16.gmra.mxu1 %v2294_v39 }
  0x5f   : > { %768 = vmatprep.mubr.bf16.mxu0 %v2448_v2  ;;  %881 = vmatprep.mubr.bf16.mxu1 %v2448_v2 }
  0x66   : > { %769 = vmatmul.mubr.bf16.gmra.mxu0 %v2295_v40  ;;  %882 = vmatmul.mubr.bf16.gmra.mxu1 %v2295_v40 }
  0xee   : > { %v700_v52 = vpop.f32.mrf.mxu0  ;;  %v813_v53 = vpop.f32.mrf.mxu1 }
  0xef   : > { %v2630_v54 = vadd.f32 %v2621_v48, %v700_v52  ;;  %v2633_v55 = vadd.f32 %v2623_v49, %v813_v53 }
  0xf0   : > { %v702_v56 = vpop.f32.mrf.mxu0  ;;  %v815_v57 = vpop.f32.mrf.mxu1 }
  0xf1   : > { %v1173_v58 = vmul.f32 %v2630_v54, %v2630_v54  ;;  %v1175_v59 = vmul.f32 %v2633_v55, %v2633_v55  ;;  %v2640_v60 = vadd.f32 %v2625_v50, %v702_v56  ;;  %v2643_v61 = vadd.f32 %v2627_v51, %v815_v57 }
  0xf2   : > { %v704_v62 = vpop.f32.mrf.mxu0  ;;  %v817_v63 = vpop.f32.mrf.mxu1 }
  0xf3   : > { %v1237_v0 = vmul.f32 %v1173_v58, %v2630_v54  ;;  %v1239_v1 = vmul.f32 %v1175_v59, %v2633_v55  ;;  %v1174_v2 = vmul.f32 %v2640_v60, %v2640_v60  ;;  %v1176_v3 = vmul.f32 %v2643_v61, %v2643_v61 }
  0xf4   : > { %v2652_v4 = vadd.f32 %v2621_v48, %v704_v62  ;;  %v2655_v5 = vadd.f32 %v2623_v49, %v817_v63  ;;  %v706_v6 = vpop.f32.mrf.mxu0  ;;  %v819_v7 = vpop.f32.mrf.mxu1 }
  0xf5   : > { %v1301_v8 = vmul.f32 0.044715, %v1237_v0  ;;  %v1303_v9 = vmul.f32 0.044715, %v1239_v1  ;;  %v1238_v10 = vmul.f32 %v1174_v2, %v2640_v60  ;;  %v1240_v11 = vmul.f32 %v1176_v3, %v2643_v61 }
  0xf6   : > { %v1177_v12 = vmul.f32 %v2652_v4, %v2652_v4  ;;  %v1179_v13 = vmul.f32 %v2655_v5, %v2655_v5  ;;  %v2664_v14 = vadd.f32 %v2625_v50, %v706_v6  ;;  %v2667_v15 = vadd.f32 %v2627_v51, %v819_v7  ;;  %v710_v16 = vpop.f32.mrf.mxu0  ;;  %v823_v17 = vpop.f32.mrf.mxu1 }
  0xf7   : > { %v1365_v18 = vadd.f32 %v1301_v8, %v2630_v54  ;;  %v1367_v19 = vadd.f32 %v1303_v9, %v2633_v55  ;;  %v1302_v20 = vmul.f32 0.044715, %v1238_v10  ;;  %v1304_v21 = vmul.f32 0.044715, %v1240_v11 }
  0xf8   : > { %v1241_v22 = vmul.f32 %v1177_v12, %v2652_v4  ;;  %v1243_v23 = vmul.f32 %v1179_v13, %v2655_v5  ;;  %v1178_v24 = vmul.f32 %v2664_v14, %v2664_v14  ;;  %v1180_v25 = vmul.f32 %v2667_v15, %v2667_v15  ;;  %v712_v30 = vpop.f32.mrf.mxu0  ;;  %v825_v35 = vpop.f32.mrf.mxu1 }
  0xf9   : > { %v1429_v26 = vmul.f32 0.7978846, %v1365_v18  ;;  %v1431_v27 = vmul.f32 0.7978846, %v1367_v19  ;;  %v1366_v28 = vadd.f32 %v1302_v20, %v2640_v60  ;;  %v1368_v29 = vadd.f32 %v1304_v21, %v2643_v61 }
  0xfa   : > { %v1305_v31 = vmul.f32 0.044715, %v1241_v22  ;;  %v1307_v32 = vmul.f32 0.044715, %v1243_v23  ;;  %v1242_v33 = vmul.f32 %v1178_v24, %v2664_v14  ;;  %v1244_v34 = vmul.f32 %v1180_v25, %v2667_v15  ;;  %v714_v45 = vpop.f32.mrf.mxu0  ;;  %v827_v53 = vpop.f32.mrf.mxu1 }
  0xfb   : > { %2296 = vtanh.f32 %v1429_v26  ;;  %v1430_v36 = vmul.f32 0.7978846, %v1366_v28  ;;  %v1432_v37 = vmul.f32 0.7978846, %v1368_v29  ;;  %v2682_v38 = vadd.f32 %v2621_v48, %v710_v16 }
  0xfc   : > { %2298 = vtanh.f32 %v1431_v27  ;;  %v1369_v39 = vadd.f32 %v1305_v31, %v2652_v4  ;;  %v1371_v40 = vadd.f32 %v1307_v32, %v2655_v5  ;;  %v1306_v41 = vmul.f32 0.044715, %v1242_v33  ;;  %v716_v6 = vpop.f32.mrf.mxu0  ;;  %v829_v10 = vpop.f32.mrf.mxu1 }
  0xfd   : > { %2300 = vtanh.f32 %v1430_v36  ;;  %v1308_v42 = vmul.f32 0.044715, %v1244_v34  ;;  %v1181_v43 = vmul.f32 %v2682_v38, %v2682_v38  ;;  %v2689_v44 = vadd.f32 %v2623_v49, %v823_v17 }
  0xfe   : > { %2302 = vtanh.f32 %v1432_v37  ;;  %v1433_v46 = vmul.f32 0.7978846, %v1369_v39  ;;  %v1435_v47 = vmul.f32 0.7978846, %v1371_v40  ;;  %v1370_v52 = vadd.f32 %v1306_v41, %v2664_v14  ;;  %v720_v31 = vpop.f32.mrf.mxu0 }
  0xff   : > { %v1372_v56 = vadd.f32 %v1308_v42, %v2667_v15  ;;  %v1245_v57 = vmul.f32 %v1181_v43, %v2682_v38  ;;  %v1183_v58 = vmul.f32 %v2689_v44, %v2689_v44  ;;  %v2697_v59 = vadd.f32 %v2625_v50, %v712_v30 }
 0x100   : > { %2304 = vtanh.f32 %v1433_v46  ;;  %v1434_v62 = vmul.f32 0.7978846, %v1370_v52  ;;  %v2700_v63 = vadd.f32 %v2627_v51, %v825_v35  ;;  %v2703_v0 = vadd.f32 %v2621_v48, %v714_v45 }
 0x101   : > { %2306 = vtanh.f32 %v1435_v47  ;;  %v1436_v1 = vmul.f32 0.7978846, %v1372_v56  ;;  %v1309_v2 = vmul.f32 0.044715, %v1245_v57  ;;  %v1247_v3 = vmul.f32 %v1183_v58, %v2689_v44 }
 0x102   : > { %2308 = vtanh.f32 %v1434_v62  ;;  %v1182_v7 = vmul.f32 %v2697_v59, %v2697_v59  ;;  %v1184_v8 = vmul.f32 %v2700_v63, %v2700_v63  ;;  %v1185_v9 = vmul.f32 %v2703_v0, %v2703_v0 }
 0x103   : > { %2310 = vtanh.f32 %v1436_v1  ;;  %v1373_v11 = vadd.f32 %v1309_v2, %v2682_v38  ;;  %v1311_v12 = vmul.f32 0.044715, %v1247_v3  ;;  %v2714_v13 = vadd.f32 %v2623_v49, %v827_v53 }
 0x104   : > { %v1246_v16 = vmul.f32 %v1182_v7, %v2697_v59  ;;  %v1248_v17 = vmul.f32 %v1184_v8, %v2700_v63  ;;  %v1249_v18 = vmul.f32 %v1185_v9, %v2703_v0  ;;  %v2720_v19 = vadd.f32 %v2625_v50, %v716_v6 }
 0x105   : > { %v1437_v20 = vmul.f32 0.7978846, %v1373_v11  ;;  %v1375_v21 = vadd.f32 %v1311_v12, %v2689_v44  ;;  %v1187_v22 = vmul.f32 %v2714_v13, %v2714_v13  ;;  %v2726_v23 = vadd.f32 %v2627_v51, %v829_v10 }
 0x106   : > { %v1310_v24 = vmul.f32 0.044715, %v1246_v16  ;;  %v1312_v25 = vmul.f32 0.044715, %v1248_v17  ;;  %v1313_v26 = vmul.f32 0.044715, %v1249_v18  ;;  %v1186_v27 = vmul.f32 %v2720_v19, %v2720_v19  ;;  %v833_v16 = vpop.f32.mrf.mxu1 }
 0x107   : > { %2312 = vtanh.f32 %v1437_v20  ;;  %v1439_v28 = vmul.f32 0.7978846, %v1375_v21  ;;  %v1251_v29 = vmul.f32 %v1187_v22, %v2714_v13  ;;  %v1188_v30 = vmul.f32 %v2726_v23, %v2726_v23 }
 0x108   : > { %v2297_v32 = vpop.eup %2296  ;;  %v1374_v33 = vadd.f32 %v1310_v24, %v2697_v59  ;;  %v1376_v34 = vadd.f32 %v1312_v25, %v2700_v63  ;;  %v1377_v35 = vadd.f32 %v1313_v26, %v2703_v0  ;;  %v1250_v36 = vmul.f32 %v1186_v27, %v2720_v19 }
 0x109   : > { %v2299_v37 = vpop.eup %2298  ;;  %v1557_v39 = vadd.f32 1.0, %v2297_v32  ;;  %2314 = vtanh.f32 %v1439_v28  ;;  %v1315_v40 = vmul.f32 0.044715, %v1251_v29  ;;  %v1252_v41 = vmul.f32 %v1188_v30, %v2726_v23  ;;  %v722_v29 = vpop.f32.mrf.mxu0 }
 0x10a   : > { %v2301_v42 = vpop.eup %2300  ;;  %v1559_v43 = vadd.f32 1.0, %v2299_v37  ;;  %v1438_v45 = vmul.f32 0.7978846, %v1374_v33  ;;  %v1440_v46 = vmul.f32 0.7978846, %v1376_v34  ;;  %v2739_v47 = vadd.f32 %v2621_v48, %v720_v31  ;;  %v835_v34 = vpop.f32.mrf.mxu1 }
 0x10b   : > { %v2303_v52 = vpop.eup %2302  ;;  %v1621_v53 = vmul.f32 0.5, %v1557_v39  ;;  %v1558_v56 = vadd.f32 1.0, %v2301_v42  ;;  %v1441_v57 = vmul.f32 0.7978846, %v1377_v35  ;;  %v1379_v58 = vadd.f32 %v1315_v40, %v2714_v13 }
 0x10c   : > { %v1623_v62 = vmul.f32 0.5, %v1559_v43  ;;  %v1560_v1 = vadd.f32 1.0, %v2303_v52  ;;  %2316 = vtanh.f32 %v1438_v45  ;;  %v1314_v2 = vmul.f32 0.044715, %v1250_v36 }
 0x10d   : > { %v2305_v3 = vpop.eup %2304  ;;  %v1685_v6 = vmul.f32 %v1621_v53, %v2630_v54  ;;  %v1622_v7 = vmul.f32 0.5, %v1558_v56  ;;  %2318 = vtanh.f32 %v1440_v46  ;;  %v1443_v8 = vmul.f32 0.7978846, %v1379_v58  ;;  %v724_v46 = vpop.f32.mrf.mxu0 }
 0x10e   : > { %v2307_v9 = vpop.eup %2306  ;;  %v1687_v10 = vmul.f32 %v1623_v62, %v2633_v55  ;;  %v1624_v11 = vmul.f32 0.5, %v1560_v1  ;;  %v1561_v12 = vadd.f32 1.0, %v2305_v3  ;;  %2320 = vtanh.f32 %v1441_v57  ;;  %v837_v57 = vpop.f32.mrf.mxu1 }
 0x10f   : > { %v2309_v17 = vpop.eup %2308  ;;  %v1686_v18 = vmul.f32 %v1622_v7, %v2640_v60  ;;  %v1563_v20 = vadd.f32 1.0, %v2307_v9  ;;  %2322 = vtanh.f32 %v1443_v8  ;;  %v1378_v21 = vadd.f32 %v1314_v2, %v2720_v19 }
 0x110   : > { %v2311_v22 = vpop.eup %2310  ;;  %v1688_v54 = vmul.f32 %v1624_v11, %v2643_v61  ;;  %v1625_v55 = vmul.f32 0.5, %v1561_v12  ;;  %v1562_v24 = vadd.f32 1.0, %v2309_v17  ;;  %v1316_v25 = vmul.f32 0.044715, %v1252_v41 }
 0x111   : > { %v2183_v26 = vpack.c.bf16 %v1686_v18, %v1685_v6  ;;  %v1627_v27 = vmul.f32 0.5, %v1563_v20  ;;  %v1564_v60 = vadd.f32 1.0, %v2311_v22  ;;  %v1442_v28 = vmul.f32 0.7978846, %v1378_v21 }
 0x112   : > { %v2184_v30 = vpack.c.bf16 %v1688_v54, %v1687_v10  ;;  %v1689_v31 = vmul.f32 %v1625_v55, %v2652_v4  ;;  %v1626_v32 = vmul.f32 0.5, %v1562_v24  ;;  %v1380_v33 = vadd.f32 %v1316_v25, %v2726_v23 }
 0x113   : > { %1941 = vst [vmem:[%s2750_s12] sm:$0xff] %v2183_v26  ;;  %v1691_v35 = vmul.f32 %v1627_v27, %v2655_v5  ;;  %v1628_v61 = vmul.f32 0.5, %v1564_v60  ;;  %2324 = vtanh.f32 %v1442_v28  ;;  %v1189_v36 = vmul.f32 %v2739_v47, %v2739_v47 }
 0x114   : > { %v2313_v37 = vpop.eup %2312  ;;  %1942 = vst [vmem:[%s2750_s12 + $0x8] sm:$0xff] %v2184_v30  ;;  %v1690_v39 = vmul.f32 %v1626_v32, %v2664_v14  ;;  %v1444_v40 = vmul.f32 0.7978846, %v1380_v33  ;;  %v2762_v41 = vadd.f32 %v2623_v49, %v833_v16  ;;  %v2765_v4 = vadd.f32 %v2625_v50, %v722_v29  ;;  %v726_v29 = vpop.f32.mrf.mxu0 }
 0x115   : > { %v1692_v42 = vmul.f32 %v1628_v61, %v2667_v15  ;;  %v1565_v5 = vadd.f32 1.0, %v2313_v37  ;;  %v1253_v43 = vmul.f32 %v1189_v36, %v2739_v47  ;;  %v2770_v45 = vadd.f32 %v2627_v51, %v835_v34  ;;  %v839_v30 = vpop.f32.mrf.mxu1 }
 0x116   : > { %v2315_v52 = vpop.eup %2314  ;;  %v2185_v14 = vpack.c.bf16 %v1690_v39, %v1689_v31  ;;  %2326 = vtanh.f32 %v1444_v40  ;;  %v1191_v53 = vmul.f32 %v2762_v41, %v2762_v41  ;;  %v1190_v56 = vmul.f32 %v2765_v4, %v2765_v4 }
 0x117   : > { %v2186_v58 = vpack.c.bf16 %v1692_v42, %v1691_v35  ;;  %v1629_v15 = vmul.f32 0.5, %v1565_v5  ;;  %v1567_v62 = vadd.f32 1.0, %v2315_v52  ;;  %v1317_v1 = vmul.f32 0.044715, %v1253_v43  ;;  %v843_v52 = vpop.f32.mrf.mxu1 }
 0x118   : > { %1943 = vst [vmem:[%s2750_s12 + $0x10] sm:$0xff] %v2185_v14  ;;  %v1255_v2 = vmul.f32 %v1191_v53, %v2762_v41  ;;  %v1254_v3 = vmul.f32 %v1190_v56, %v2765_v4  ;;  %v1192_v6 = vmul.f32 %v2770_v45, %v2770_v45  ;;  %v2782_v7 = vadd.f32 %v2621_v48, %v724_v46  ;;  %v730_v46 = vpop.f32.mrf.mxu0 }
 0x119   : > { %v2317_v8 = vpop.eup %2316  ;;  %1944 = vst [vmem:[%s2750_s12 + $0x18] sm:$0xff] %v2186_v58  ;;  %v1693_v9 = vmul.f32 %v1629_v15, %v2682_v38  ;;  %v1631_v10 = vmul.f32 0.5, %v1567_v62  ;;  %v1381_v11 = vadd.f32 %v1317_v1, %v2739_v47  ;;  %v2788_v12 = vadd.f32 %v2623_v49, %v837_v57 }
 0x11a   : > { %v2319_v16 = vpop.eup %2318  ;;  %v1566_v17 = vadd.f32 1.0, %v2317_v8  ;;  %v1319_v18 = vmul.f32 0.044715, %v1255_v2  ;;  %v1318_v20 = vmul.f32 0.044715, %v1254_v3  ;;  %v1256_v21 = vmul.f32 %v1192_v6, %v2770_v45 }
 0x11b   : > { %v2321_v22 = vpop.eup %2320  ;;  %v1695_v54 = vmul.f32 %v1631_v10, %v2689_v44  ;;  %v1568_v55 = vadd.f32 1.0, %v2319_v16  ;;  %v1445_v24 = vmul.f32 0.7978846, %v1381_v11  ;;  %v1193_v38 = vmul.f32 %v2782_v7, %v2782_v7 }
 0x11c   : > { %v2323_v25 = vpop.eup %2322  ;;  %v1630_v26 = vmul.f32 0.5, %v1566_v17  ;;  %v1569_v27 = vadd.f32 1.0, %v2321_v22  ;;  %v1383_v60 = vadd.f32 %v1319_v18, %v2762_v41  ;;  %v1382_v28 = vadd.f32 %v1318_v20, %v2765_v4  ;;  %v732_v17 = vpop.f32.mrf.mxu0 }
 0x11d   : > { %v1632_v31 = vmul.f32 0.5, %v1568_v55  ;;  %v1571_v32 = vadd.f32 1.0, %v2323_v25  ;;  %2328 = vtanh.f32 %v1445_v24  ;;  %v1320_v33 = vmul.f32 0.044715, %v1256_v21 }
 0x11e   : > { %v1694_v44 = vmul.f32 %v1630_v26, %v2697_v59  ;;  %v1633_v34 = vmul.f32 0.5, %v1569_v27  ;;  %v1447_v35 = vmul.f32 0.7978846, %v1383_v60  ;;  %v1446_v61 = vmul.f32 0.7978846, %v1382_v28 }
 0x11f   : > { %v1696_v36 = vmul.f32 %v1632_v31, %v2700_v63  ;;  %v1635_v37 = vmul.f32 0.5, %v1571_v32  ;;  %v1384_v39 = vadd.f32 %v1320_v33, %v2770_v45  ;;  %v1257_v40 = vmul.f32 %v1193_v38, %v2782_v7  ;;  %v734_v31 = vpop.f32.mrf.mxu0 }
 0x120   : > { %v2325_v42 = vpop.eup %2324  ;;  %v2187_v5 = vpack.c.bf16 %v1694_v44, %v1693_v9  ;;  %v1697_v43 = vmul.f32 %v1633_v34, %v2703_v0  ;;  %2330 = vtanh.f32 %v1447_v35  ;;  %v1195_v59 = vmul.f32 %v2788_v12, %v2788_v12 }
 0x121   : > { %v2188_v14 = vpack.c.bf16 %v1696_v36, %v1695_v54  ;;  %v1699_v53 = vmul.f32 %v1635_v37, %v2714_v13  ;;  %v1570_v63 = vadd.f32 1.0, %v2325_v42  ;;  %2332 = vtanh.f32 %v1446_v61  ;;  %v845_v54 = vpop.f32.mrf.mxu1 }
 0x122   : > { %1945 = vst [vmem:[%s2750_s12 + $0x20] sm:$0xff] %v2187_v5  ;;  %v1448_v56 = vmul.f32 0.7978846, %v1384_v39  ;;  %v1321_v57 = vmul.f32 0.044715, %v1257_v40  ;;  %v1259_v58 = vmul.f32 %v1195_v59, %v2788_v12  ;;  %v2807_v15 = vadd.f32 %v2625_v50, %v726_v29 }
 0x123   : > { %v2327_v0 = vpop.eup %2326  ;;  %1946 = vst [vmem:[%s2750_s12 + $0x28] sm:$0xff] %v2188_v14  ;;  %v1634_v62 = vmul.f32 0.5, %v1570_v63  ;;  %v2811_v1 = vadd.f32 %v2627_v51, %v839_v30  ;;  %v2814_v2 = vadd.f32 %v2621_v48, %v730_v46  ;;  %v2817_v13 = vadd.f32 %v2623_v49, %v843_v52 }
 0x124   : > { %v1572_v3 = vadd.f32 1.0, %v2327_v0  ;;  %2334 = vtanh.f32 %v1448_v56  ;;  %v1385_v6 = vadd.f32 %v1321_v57, %v2782_v7  ;;  %v1323_v8 = vmul.f32 0.044715, %v1259_v58 }
 0x125   : > { %v1698_v9 = vmul.f32 %v1634_v62, %v2720_v19  ;;  %v1194_v10 = vmul.f32 %v2807_v15, %v2807_v15  ;;  %v1196_v11 = vmul.f32 %v2811_v1, %v2811_v1  ;;  %v1197_v16 = vmul.f32 %v2814_v2, %v2814_v2 }
 0x126   : > { %v1636_v18 = vmul.f32 0.5, %v1572_v3  ;;  %v1449_v20 = vmul.f32 0.7978846, %v1385_v6  ;;  %v1387_v21 = vadd.f32 %v1323_v8, %v2788_v12  ;;  %v1199_v22 = vmul.f32 %v2817_v13, %v2817_v13 }
 0x127   : > { %v2189_v19 = vpack.c.bf16 %v1698_v9, %v1697_v43  ;;  %v1258_v55 = vmul.f32 %v1194_v10, %v2807_v15  ;;  %v1260_v24 = vmul.f32 %v1196_v11, %v2811_v1  ;;  %v1261_v38 = vmul.f32 %v1197_v16, %v2814_v2  ;;  %v736_v10 = vpop.f32.mrf.mxu0 }
 0x128   : > { %v1700_v25 = vmul.f32 %v1636_v18, %v2726_v23  ;;  %2336 = vtanh.f32 %v1449_v20  ;;  %v1451_v26 = vmul.f32 0.7978846, %v1387_v21  ;;  %v1263_v27 = vmul.f32 %v1199_v22, %v2817_v13  ;;  %v847_v23 = vpop.f32.mrf.mxu1 }
 0x129   : > { %1947 = vst [vmem:[%s2750_s12 + $0x30] sm:$0xff] %v2189_v19  ;;  %v1322_v60 = vmul.f32 0.044715, %v1258_v55  ;;  %v1324_v28 = vmul.f32 0.044715, %v1260_v24  ;;  %v2837_v30 = vadd.f32 %v2625_v50, %v732_v17  ;;  %v2840_v34 = vadd.f32 %v2627_v51, %v845_v54 }
 0x12a   : > { %v1325_v29 = vmul.f32 0.044715, %v1261_v38  ;;  %v2329_v32 = vpop.eup %2328  ;;  %v2190_v33 = vpack.c.bf16 %v1700_v25, %v1699_v53  ;;  %2338 = vtanh.f32 %v1451_v26  ;;  %v1327_v44 = vmul.f32 0.044715, %v1263_v27  ;;  %v849_v20 = vpop.f32.mrf.mxu1 }
 0x12b   : > { %v1573_v35 = vadd.f32 1.0, %v2329_v32  ;;  %v1386_v61 = vadd.f32 %v1322_v60, %v2807_v15  ;;  %v1388_v36 = vadd.f32 %v1324_v28, %v2811_v1  ;;  %v1198_v40 = vmul.f32 %v2837_v30, %v2837_v30  ;;  %v740_v27 = vpop.f32.mrf.mxu0 }
 0x12c   : > { %v1389_v37 = vadd.f32 %v1325_v29, %v2814_v2  ;;  %1948 = vst [vmem:[%s2750_s12 + $0x38] sm:$0xff] %v2190_v33  ;;  %v1391_v39 = vadd.f32 %v1327_v44, %v2817_v13  ;;  %v1200_v42 = vmul.f32 %v2840_v34, %v2840_v34  ;;  %v2852_v5 = vadd.f32 %v2621_v48, %v734_v31 }
 0x12d   : > { %v2331_v43 = vpop.eup %2330  ;;  %v1637_v59 = vmul.f32 0.5, %v1573_v35  ;;  %v1450_v46 = vmul.f32 0.7978846, %v1386_v61  ;;  %v1452_v52 = vmul.f32 0.7978846, %v1388_v36  ;;  %v2855_v14 = vadd.f32 %v2623_v49, %v847_v23 }
 0x12e   : > { %v2333_v53 = vpop.eup %2332  ;;  %v1575_v63 = vadd.f32 1.0, %v2331_v43  ;;  %v1453_v56 = vmul.f32 0.7978846, %v1389_v37  ;;  %v1455_v57 = vmul.f32 0.7978846, %v1391_v39  ;;  %v1262_v58 = vmul.f32 %v1198_v40, %v2837_v30  ;;  %v853_v37 = vpop.f32.mrf.mxu1 }
 0x12f   : > { %v1701_v0 = vmul.f32 %v1637_v59, %v2739_v47  ;;  %v1574_v62 = vadd.f32 1.0, %v2333_v53  ;;  %2340 = vtanh.f32 %v1450_v46  ;;  %v1264_v3 = vmul.f32 %v1200_v42, %v2840_v34  ;;  %v742_v43 = vpop.f32.mrf.mxu0 }
 0x130   : > { %v1639_v6 = vmul.f32 0.5, %v1575_v63  ;;  %2342 = vtanh.f32 %v1452_v52  ;;  %v1326_v8 = vmul.f32 0.044715, %v1262_v58  ;;  %v1201_v9 = vmul.f32 %v2852_v5, %v2852_v5 }
 0x131   : > { %v2335_v11 = vpop.eup %2334  ;;  %v1638_v16 = vmul.f32 0.5, %v1574_v62  ;;  %2344 = vtanh.f32 %v1453_v56  ;;  %v1328_v17 = vmul.f32 0.044715, %v1264_v3  ;;  %v1203_v18 = vmul.f32 %v2855_v14, %v2855_v14 }
 0x132   : > { %v1703_v47 = vmul.f32 %v1639_v6, %v2762_v41  ;;  %v1576_v21 = vadd.f32 1.0, %v2335_v11  ;;  %2346 = vtanh.f32 %v1455_v57  ;;  %v1390_v22 = vadd.f32 %v1326_v8, %v2837_v30  ;;  %v855_v6 = vpop.f32.mrf.mxu1 }
 0x133   : > { %v1702_v54 = vmul.f32 %v1638_v16, %v2765_v4  ;;  %v1392_v19 = vadd.f32 %v1328_v17, %v2840_v34  ;;  %v1265_v55 = vmul.f32 %v1201_v9, %v2852_v5  ;;  %v1267_v24 = vmul.f32 %v1203_v18, %v2855_v14 }
 0x134   : > { %v1640_v38 = vmul.f32 0.5, %v1576_v21  ;;  %v1454_v25 = vmul.f32 0.7978846, %v1390_v22  ;;  %v2871_v26 = vadd.f32 %v2625_v50, %v736_v10  ;;  %v2874_v41 = vadd.f32 %v2627_v51, %v849_v20 }
 0x135   : > { %v2337_v60 = vpop.eup %2336  ;;  %v2191_v28 = vpack.c.bf16 %v1702_v54, %v1701_v0  ;;  %v1456_v29 = vmul.f32 0.7978846, %v1392_v19  ;;  %v1329_v4 = vmul.f32 0.044715, %v1265_v55  ;;  %v1331_v31 = vmul.f32 0.044715, %v1267_v24 }
 0x136   : > { %v1704_v32 = vmul.f32 %v1640_v38, %v2770_v45  ;;  %v1577_v33 = vadd.f32 1.0, %v2337_v60  ;;  %2348 = vtanh.f32 %v1454_v25  ;;  %v1202_v44 = vmul.f32 %v2871_v26, %v2871_v26 }
 0x137   : > { %v2339_v23 = vpop.eup %2338  ;;  %1949 = vst [vmem:[%s2750_s12 + $0x40] sm:$0xff] %v2191_v28  ;;  %2350 = vtanh.f32 %v1456_v29  ;;  %v1393_v35 = vadd.f32 %v1329_v4, %v2852_v5  ;;  %v1395_v61 = vadd.f32 %v1331_v31, %v2855_v14  ;;  %v1204_v36 = vmul.f32 %v2874_v41, %v2874_v41  ;;  %v744_v29 = vpop.f32.mrf.mxu0 }
 0x138   : > { %v2192_v39 = vpack.c.bf16 %v1704_v32, %v1703_v47  ;;  %v1641_v40 = vmul.f32 0.5, %v1577_v33  ;;  %v1579_v45 = vadd.f32 1.0, %v2339_v23  ;;  %v1266_v42 = vmul.f32 %v1202_v44, %v2871_v26  ;;  %v857_v33 = vpop.f32.mrf.mxu1 }
 0x139   : > { %v1457_v59 = vmul.f32 0.7978846, %v1393_v35  ;;  %v1459_v46 = vmul.f32 0.7978846, %v1395_v61  ;;  %v1268_v52 = vmul.f32 %v1204_v36, %v2874_v41  ;;  %v2887_v53 = vadd.f32 %v2621_v48, %v740_v27 }
 0x13a   : > { %1950 = vst [vmem:[%s2750_s12 + $0x48] sm:$0xff] %v2192_v39  ;;  %v1705_v63 = vmul.f32 %v1641_v40, %v2782_v7  ;;  %v1643_v56 = vmul.f32 0.5, %v1579_v45  ;;  %v1330_v57 = vmul.f32 0.044715, %v1266_v42  ;;  %v2892_v58 = vadd.f32 %v2623_v49, %v853_v37 }
 0x13b   : > { %2352 = vtanh.f32 %v1457_v59  ;;  %v1332_v0 = vmul.f32 0.044715, %v1268_v52  ;;  %v1205_v62 = vmul.f32 %v2887_v53, %v2887_v53  ;;  %v2897_v3 = vadd.f32 %v2625_v50, %v742_v43 }
 0x13c   : > { %v2341_v8 = vpop.eup %2340  ;;  %v1707_v9 = vmul.f32 %v1643_v56, %v2788_v12  ;;  %2354 = vtanh.f32 %v1459_v46  ;;  %v1394_v7 = vadd.f32 %v1330_v57, %v2871_v26  ;;  %v1207_v10 = vmul.f32 %v2892_v58, %v2892_v58  ;;  %v746_v46 = vpop.f32.mrf.mxu0 }
 0x13d   : > { %v2343_v11 = vpop.eup %2342  ;;  %v1578_v16 = vadd.f32 1.0, %v2341_v8  ;;  %v1396_v17 = vadd.f32 %v1332_v0, %v2874_v41  ;;  %v1269_v18 = vmul.f32 %v1205_v62, %v2887_v53  ;;  %v1206_v20 = vmul.f32 %v2897_v3, %v2897_v3  ;;  %v859_v57 = vpop.f32.mrf.mxu1 }
 0x13e   : > { %v2345_v47 = vpop.eup %2344  ;;  %v1580_v21 = vadd.f32 1.0, %v2343_v11  ;;  %v1458_v22 = vmul.f32 0.7978846, %v1394_v7  ;;  %v1271_v12 = vmul.f32 %v1207_v10, %v2892_v58  ;;  %v2909_v54 = vadd.f32 %v2627_v51, %v855_v6 }
 0x13f   : > { %v2347_v19 = vpop.eup %2346  ;;  %v1642_v55 = vmul.f32 0.5, %v1578_v16  ;;  %v1581_v24 = vadd.f32 1.0, %v2345_v47  ;;  %v1460_v38 = vmul.f32 0.7978846, %v1396_v17  ;;  %v1333_v25 = vmul.f32 0.044715, %v1269_v18 }
 0x140   : > { %v1644_v27 = vmul.f32 0.5, %v1580_v21  ;;  %v1583_v60 = vadd.f32 1.0, %v2347_v19  ;;  %2356 = vtanh.f32 %v1458_v22  ;;  %v1335_v28 = vmul.f32 0.044715, %v1271_v12 }
 0x141   : > { %v1706_v4 = vmul.f32 %v1642_v55, %v2807_v15  ;;  %v1645_v31 = vmul.f32 0.5, %v1581_v24  ;;  %2358 = vtanh.f32 %v1460_v38  ;;  %v1397_v32 = vadd.f32 %v1333_v25, %v2887_v53  ;;  %v750_v24 = vpop.f32.mrf.mxu0 }
 0x142   : > { %v1708_v44 = vmul.f32 %v1644_v27, %v2811_v1  ;;  %v1647_v23 = vmul.f32 0.5, %v1583_v60  ;;  %v1399_v35 = vadd.f32 %v1335_v28, %v2892_v58  ;;  %v1270_v61 = vmul.f32 %v1206_v20, %v2897_v3 }
 0x143   : > { %v2349_v36 = vpop.eup %2348  ;;  %v2193_v37 = vpack.c.bf16 %v1706_v4, %v1705_v63  ;;  %v1709_v39 = vmul.f32 %v1645_v31, %v2814_v2  ;;  %v1461_v40 = vmul.f32 0.7978846, %v1397_v32  ;;  %v1208_v15 = vmul.f32 %v2909_v54, %v2909_v54 }
 0x144   : > { %v2351_v45 = vpop.eup %2350  ;;  %v2194_v42 = vpack.c.bf16 %v1708_v44, %v1707_v9  ;;  %v1711_v43 = vmul.f32 %v1647_v23, %v2817_v13  ;;  %v1582_v59 = vadd.f32 1.0, %v2349_v36  ;;  %v1463_v1 = vmul.f32 0.7978846, %v1399_v35  ;;  %v863_v44 = vpop.f32.mrf.mxu1 }
 0x145   : > { %1951 = vst [vmem:[%s2750_s12 + $0x50] sm:$0xff] %v2193_v37  ;;  %v1584_v52 = vadd.f32 1.0, %v2351_v45  ;;  %2360 = vtanh.f32 %v1461_v40  ;;  %v1334_v56 = vmul.f32 0.044715, %v1270_v61  ;;  %v1272_v63 = vmul.f32 %v1208_v15, %v2909_v54  ;;  %v752_v45 = vpop.f32.mrf.mxu0 }
 0x146   : > { %1952 = vst [vmem:[%s2750_s12 + $0x58] sm:$0xff] %v2194_v42  ;;  %v1646_v2 = vmul.f32 0.5, %v1582_v59  ;;  %2362 = vtanh.f32 %v1463_v1  ;;  %v2924_v0 = vadd.f32 %v2621_v48, %v744_v29  ;;  %v2927_v62 = vadd.f32 %v2623_v49, %v857_v33 }
 0x147   : > { %v1648_v13 = vmul.f32 0.5, %v1584_v52  ;;  %v1398_v6 = vadd.f32 %v1334_v56, %v2897_v3  ;;  %v1336_v8 = vmul.f32 0.044715, %v1272_v63  ;;  %v2931_v9 = vadd.f32 %v2625_v50, %v746_v46 }
 0x148   : > { %v2353_v7 = vpop.eup %2352  ;;  %v1710_v10 = vmul.f32 %v1646_v2, %v2837_v30  ;;  %v1209_v11 = vmul.f32 %v2924_v0, %v2924_v0  ;;  %v1211_v16 = vmul.f32 %v2927_v62, %v2927_v62  ;;  %v2939_v17 = vadd.f32 %v2627_v51, %v859_v57 }
 0x149   : > { %v2355_v18 = vpop.eup %2354  ;;  %v1712_v20 = vmul.f32 %v1648_v13, %v2840_v34  ;;  %v1585_v47 = vadd.f32 1.0, %v2353_v7  ;;  %v1462_v21 = vmul.f32 0.7978846, %v1398_v6  ;;  %v1400_v22 = vadd.f32 %v1336_v8, %v2909_v54 }
 0x14a   : > { %v2195_v12 = vpack.c.bf16 %v1710_v10, %v1709_v39  ;;  %v1587_v30 = vadd.f32 1.0, %v2355_v18  ;;  %v1273_v19 = vmul.f32 %v1209_v11, %v2924_v0  ;;  %v1275_v55 = vmul.f32 %v1211_v16, %v2927_v62  ;;  %v865_v11 = vpop.f32.mrf.mxu1  ;;  %v754_v16 = vpop.f32.mrf.mxu0 }
 0x14b   : > { %v2196_v38 = vpack.c.bf16 %v1712_v20, %v1711_v43  ;;  %v1649_v25 = vmul.f32 0.5, %v1585_v47  ;;  %2364 = vtanh.f32 %v1462_v21  ;;  %v1464_v27 = vmul.f32 0.7978846, %v1400_v22 }
 0x14c   : > { %1953 = vst [vmem:[%s2750_s12 + $0x60] sm:$0xff] %v2195_v12  ;;  %v1651_v60 = vmul.f32 0.5, %v1587_v30  ;;  %v1337_v28 = vmul.f32 0.044715, %v1273_v19  ;;  %v1339_v34 = vmul.f32 0.044715, %v1275_v55  ;;  %v1210_v29 = vmul.f32 %v2931_v9, %v2931_v9 }
 0x14d   : > { %v2357_v4 = vpop.eup %2356  ;;  %1954 = vst [vmem:[%s2750_s12 + $0x68] sm:$0xff] %v2196_v38  ;;  %v1713_v31 = vmul.f32 %v1649_v25, %v2852_v5  ;;  %2366 = vtanh.f32 %v1464_v27  ;;  %v1212_v32 = vmul.f32 %v2939_v17, %v2939_v17  ;;  %v2953_v33 = vadd.f32 %v2621_v48, %v750_v24 }
 0x14e   : > { %v2359_v23 = vpop.eup %2358  ;;  %v1715_v35 = vmul.f32 %v1651_v60, %v2855_v14  ;;  %v1586_v61 = vadd.f32 1.0, %v2357_v4  ;;  %v1401_v36 = vadd.f32 %v1337_v28, %v2924_v0  ;;  %v1403_v37 = vadd.f32 %v1339_v34, %v2927_v62  ;;  %v867_v60 = vpop.f32.mrf.mxu1 }
 0x14f   : > { %v1588_v39 = vadd.f32 1.0, %v2359_v23  ;;  %v1274_v40 = vmul.f32 %v1210_v29, %v2931_v9  ;;  %v1276_v5 = vmul.f32 %v1212_v32, %v2939_v17  ;;  %v1213_v15 = vmul.f32 %v2953_v33, %v2953_v33  ;;  %v756_v28 = vpop.f32.mrf.mxu0 }
 0x150   : > { %v1650_v42 = vmul.f32 0.5, %v1586_v61  ;;  %v1465_v43 = vmul.f32 0.7978846, %v1401_v36  ;;  %v1467_v59 = vmul.f32 0.7978846, %v1403_v37  ;;  %v2963_v1 = vadd.f32 %v2623_v49, %v863_v44 }
 0x151   : > { %v1652_v14 = vmul.f32 0.5, %v1588_v39  ;;  %v1338_v46 = vmul.f32 0.044715, %v1274_v40  ;;  %v1340_v52 = vmul.f32 0.044715, %v1276_v5  ;;  %v1277_v56 = vmul.f32 %v1213_v15, %v2953_v33 }
 0x152   : > { %v2361_v63 = vpop.eup %2360  ;;  %v1714_v57 = vmul.f32 %v1650_v42, %v2871_v26  ;;  %2368 = vtanh.f32 %v1465_v43  ;;  %v1215_v2 = vmul.f32 %v2963_v1, %v2963_v1  ;;  %v2970_v13 = vadd.f32 %v2625_v50, %v752_v45 }
 0x153   : > { %v2363_v6 = vpop.eup %2362  ;;  %v1716_v8 = vmul.f32 %v1652_v14, %v2874_v41  ;;  %v1589_v7 = vadd.f32 1.0, %v2361_v63  ;;  %2370 = vtanh.f32 %v1467_v59  ;;  %v1402_v10 = vadd.f32 %v1338_v46, %v2931_v9  ;;  %v869_v59 = vpop.f32.mrf.mxu1 }
 0x154   : > { %v2197_v18 = vpack.c.bf16 %v1714_v57, %v1713_v31  ;;  %v1591_v26 = vadd.f32 1.0, %v2363_v6  ;;  %v1404_v20 = vadd.f32 %v1340_v52, %v2939_v17  ;;  %v1341_v47 = vmul.f32 0.044715, %v1277_v56 }
 0x155   : > { %v2198_v21 = vpack.c.bf16 %v1716_v8, %v1715_v35  ;;  %v1653_v22 = vmul.f32 0.5, %v1589_v7  ;;  %v1466_v12 = vmul.f32 0.7978846, %v1402_v10  ;;  %v1279_v30 = vmul.f32 %v1215_v2, %v2963_v1 }
 0x156   : > { %1955 = vst [vmem:[%s2750_s12 + $0x70] sm:$0xff] %v2197_v18  ;;  %v1655_v19 = vmul.f32 0.5, %v1591_v26  ;;  %v1468_v41 = vmul.f32 0.7978846, %v1404_v20  ;;  %v1405_v55 = vadd.f32 %v1341_v47, %v2953_v33  ;;  %v1214_v24 = vmul.f32 %v2970_v13, %v2970_v13  ;;  %v760_v20 = vpop.f32.mrf.mxu0 }
 0x157   : > { %1956 = vst [vmem:[%s2750_s12 + $0x78] sm:$0xff] %v2198_v21  ;;  %v1717_v38 = vmul.f32 %v1653_v22, %v2887_v53  ;;  %2372 = vtanh.f32 %v1466_v12  ;;  %v1343_v25 = vmul.f32 0.044715, %v1279_v30  ;;  %v2983_v27 = vadd.f32 %v2627_v51, %v865_v11 }
 0x158   : > { %v2365_v34 = vpop.eup %2364  ;;  %v1719_v29 = vmul.f32 %v1655_v19, %v2892_v58  ;;  %2374 = vtanh.f32 %v1468_v41  ;;  %v1469_v4 = vmul.f32 0.7978846, %v1405_v55  ;;  %v1278_v31 = vmul.f32 %v1214_v24, %v2970_v13 }
 0x159   : > { %v1590_v32 = vadd.f32 1.0, %v2365_v34  ;;  %v1407_v44 = vadd.f32 %v1343_v25, %v2963_v1  ;;  %v1216_v53 = vmul.f32 %v2983_v27, %v2983_v27  ;;  %v2991_v23 = vadd.f32 %v2621_v48, %v754_v16  ;;  %v873_v25 = vpop.f32.mrf.mxu1 }
 0x15a   : > { %v2367_v35 = vpop.eup %2366  ;;  %2376 = vtanh.f32 %v1469_v4  ;;  %v1342_v61 = vmul.f32 0.044715, %v1278_v31  ;;  %v2994_v36 = vadd.f32 %v2623_v49, %v867_v60  ;;  %v2997_v58 = vadd.f32 %v2625_v50, %v756_v28  ;;  %v762_v31 = vpop.f32.mrf.mxu0 }
 0x15b   : > { %v1654_v37 = vmul.f32 0.5, %v1590_v32  ;;  %v1592_v39 = vadd.f32 1.0, %v2367_v35  ;;  %v1471_v40 = vmul.f32 0.7978846, %v1407_v44  ;;  %v1280_v5 = vmul.f32 %v1216_v53, %v2983_v27 }
 0x15c   : > { %v1406_v15 = vadd.f32 %v1342_v61, %v2970_v13  ;;  %v1217_v45 = vmul.f32 %v2991_v23, %v2991_v23  ;;  %v1219_v42 = vmul.f32 %v2994_v36, %v2994_v36  ;;  %v1218_v43 = vmul.f32 %v2997_v58, %v2997_v58 }
 0x15d   : > { %v1718_v14 = vmul.f32 %v1654_v37, %v2897_v3  ;;  %v1656_v46 = vmul.f32 0.5, %v1592_v39  ;;  %2378 = vtanh.f32 %v1471_v40  ;;  %v1344_v52 = vmul.f32 0.044715, %v1280_v5 }
 0x15e   : > { %v1470_v56 = vmul.f32 0.7978846, %v1406_v15  ;;  %v1281_v63 = vmul.f32 %v1217_v45, %v2991_v23  ;;  %v1283_v57 = vmul.f32 %v1219_v42, %v2994_v36  ;;  %v1282_v2 = vmul.f32 %v1218_v43, %v2997_v58 }
 0x15f   : > { %v2369_v6 = vpop.eup %2368  ;;  %v2199_v8 = vpack.c.bf16 %v1718_v14, %v1717_v38  ;;  %v1720_v7 = vmul.f32 %v1656_v46, %v2909_v54  ;;  %v1408_v10 = vadd.f32 %v1344_v52, %v2983_v27  ;;  %v3014_v11 = vadd.f32 %v2627_v51, %v869_v59 }
 0x160   : > { %v2371_v3 = vpop.eup %2370  ;;  %v1593_v16 = vadd.f32 1.0, %v2369_v6  ;;  %2380 = vtanh.f32 %v1470_v56  ;;  %v1345_v18 = vmul.f32 0.044715, %v1281_v63  ;;  %v1347_v26 = vmul.f32 0.044715, %v1283_v57 }
 0x161   : > { %1957 = vst [vmem:[%s2750_s12 + $0x80] sm:$0xff] %v2199_v8  ;;  %v2200_v47 = vpack.c.bf16 %v1720_v7, %v1719_v29  ;;  %v1595_v21 = vadd.f32 1.0, %v2371_v3  ;;  %v1472_v22 = vmul.f32 0.7978846, %v1408_v10  ;;  %v1346_v12 = vmul.f32 0.044715, %v1282_v2  ;;  %v764_v7 = vpop.f32.mrf.mxu0 }
 0x162   : > { %v1657_v30 = vmul.f32 0.5, %v1593_v16  ;;  %v1409_v54 = vadd.f32 %v1345_v18, %v2991_v23  ;;  %v1411_v19 = vadd.f32 %v1347_v26, %v2994_v36  ;;  %v1220_v41 = vmul.f32 %v3014_v11, %v3014_v11 }
 0x163   : > { %1958 = vst [vmem:[%s2750_s12 + $0x88] sm:$0xff] %v2200_v47  ;;  %v1659_v55 = vmul.f32 0.5, %v1595_v21  ;;  %2382 = vtanh.f32 %v1472_v22  ;;  %v1410_v24 = vadd.f32 %v1346_v12, %v2997_v58  ;;  %v3024_v38 = vadd.f32 %v2621_v48, %v760_v20 }
 0x164   : > { %v2373_v60 = vpop.eup %2372  ;;  %v1721_v28 = vmul.f32 %v1657_v30, %v2924_v0  ;;  %v1473_v34 = vmul.f32 0.7978846, %v1409_v54  ;;  %v1475_v29 = vmul.f32 0.7978846, %v1411_v19  ;;  %v1284_v4 = vmul.f32 %v1220_v41, %v3014_v11 }
 0x165   : > { %v2375_v32 = vpop.eup %2374  ;;  %v1723_v44 = vmul.f32 %v1659_v55, %v2927_v62  ;;  %v1594_v53 = vadd.f32 1.0, %v2373_v60  ;;  %v1474_v35 = vmul.f32 0.7978846, %v1410_v24  ;;  %v1221_v61 = vmul.f32 %v3024_v38, %v3024_v38  ;;  %v875_v62 = vpop.f32.mrf.mxu1 }
 0x166   : > { %v1596_v37 = vadd.f32 1.0, %v2375_v32  ;;  %2384 = vtanh.f32 %v1473_v34  ;;  %v1348_v39 = vmul.f32 0.044715, %v1284_v4  ;;  %v3032_v40 = vadd.f32 %v2623_v49, %v873_v25 }
 0x167   : > { %v2377_v0 = vpop.eup %2376  ;;  %v1658_v5 = vmul.f32 0.5, %v1594_v53  ;;  %2386 = vtanh.f32 %v1475_v29  ;;  %v1285_v15 = vmul.f32 %v1221_v61, %v3024_v38  ;;  %v3036_v45 = vadd.f32 %v2625_v50, %v762_v31  ;;  %v877_v18 = vpop.f32.mrf.mxu1 }
 0x168   : > { %v1660_v42 = vmul.f32 0.5, %v1596_v37  ;;  %v1597_v43 = vadd.f32 1.0, %v2377_v0  ;;  %2388 = vtanh.f32 %v1474_v35  ;;  %v1412_v59 = vadd.f32 %v1348_v39, %v3014_v11 }
 0x169   : > { %v1722_v14 = vmul.f32 %v1658_v5, %v2931_v9  ;;  %v1349_v46 = vmul.f32 0.044715, %v1285_v15  ;;  %v1223_v52 = vmul.f32 %v3032_v40, %v3032_v40  ;;  %v1222_v56 = vmul.f32 %v3036_v45, %v3036_v45 }
 0x16a   : > { %v2379_v63 = vpop.eup %2378  ;;  %v1724_v57 = vmul.f32 %v1660_v42, %v2939_v17  ;;  %v1661_v2 = vmul.f32 0.5, %v1597_v43  ;;  %v1476_v6 = vmul.f32 0.7978846, %v1412_v59  ;;  %v3046_v8 = vadd.f32 %v2627_v51, %v875_v62  ;;  %v879_v42 = vpop.f32.mrf.mxu1 }
 0x16b   : > { %v2201_v10 = vpack.c.bf16 %v1722_v14, %v1721_v28  ;;  %v1599_v9 = vadd.f32 1.0, %v2379_v63  ;;  %v1413_v3 = vadd.f32 %v1349_v46, %v3024_v38  ;;  %v1287_v16 = vmul.f32 %v1223_v52, %v3032_v40 }
 0x16c   : > { %v2202_v26 = vpack.c.bf16 %v1724_v57, %v1723_v44  ;;  %v1725_v20 = vmul.f32 %v1661_v2, %v2953_v33  ;;  %2390 = vtanh.f32 %v1476_v6  ;;  %v1286_v17 = vmul.f32 %v1222_v56, %v3036_v45  ;;  %v766_v33 = vpop.f32.mrf.mxu0 }
 0x16d   : > { %v2381_v47 = vpop.eup %2380  ;;  %1959 = vst [vmem:[%s2750_s12 + $0x90] sm:$0xff] %v2201_v10  ;;  %v1663_v21 = vmul.f32 0.5, %v1599_v9  ;;  %v1477_v22 = vmul.f32 0.7978846, %v1413_v3  ;;  %v1351_v12 = vmul.f32 0.044715, %v1287_v16  ;;  %v1224_v30 = vmul.f32 %v3046_v8, %v3046_v8 }
 0x16e   : > { %1960 = vst [vmem:[%s2750_s12 + $0x98] sm:$0xff] %v2202_v26  ;;  %v1598_v54 = vadd.f32 1.0, %v2381_v47  ;;  %v1350_v19 = vmul.f32 0.044715, %v1286_v17  ;;  %v3057_v41 = vadd.f32 %v2621_v48, %v764_v7  ;;  %v3060_v55 = vadd.f32 %v2623_v49, %v877_v18  ;;  %v770_v2 = vpop.f32.mrf.mxu0  ;;  %v883_v26 = vpop.f32.mrf.mxu1 }
 0x16f   : > { %v1727_v24 = vmul.f32 %v1663_v21, %v2963_v1  ;;  %2392 = vtanh.f32 %v1477_v22  ;;  %v1415_v25 = vadd.f32 %v1351_v12, %v3032_v40  ;;  %v1288_v60 = vmul.f32 %v1224_v30, %v3046_v8 }
 0x170   : > { %v2383_v28 = vpop.eup %2382  ;;  %v1662_v34 = vmul.f32 0.5, %v1598_v54  ;;  %v1414_v29 = vadd.f32 %v1350_v19, %v3036_v45  ;;  %v1225_v4 = vmul.f32 %v3057_v41, %v3057_v41  ;;  %v1227_v31 = vmul.f32 %v3060_v55, %v3060_v55  ;;  %v772_v19 = vpop.f32.mrf.mxu0 }
 0x171   : > { %v1600_v32 = vadd.f32 1.0, %v2383_v28  ;;  %v1479_v44 = vmul.f32 0.7978846, %v1415_v25  ;;  %v1352_v53 = vmul.f32 0.044715, %v1288_v60  ;;  %v3071_v1 = vadd.f32 %v2625_v50, %v766_v33  ;;  %v885_v28 = vpop.f32.mrf.mxu1 }
 0x172   : > { %v1726_v35 = vmul.f32 %v1662_v34, %v2970_v13  ;;  %v1478_v61 = vmul.f32 0.7978846, %v1414_v29  ;;  %v1289_v37 = vmul.f32 %v1225_v4, %v3057_v41  ;;  %v1291_v39 = vmul.f32 %v1227_v31, %v3060_v55 }
 0x173   : > { %v2385_v0 = vpop.eup %2384  ;;  %v1664_v5 = vmul.f32 0.5, %v1600_v32  ;;  %2394 = vtanh.f32 %v1479_v44  ;;  %v1416_v15 = vadd.f32 %v1352_v53, %v3046_v8  ;;  %v1226_v62 = vmul.f32 %v3071_v1, %v3071_v1 }
 0x174   : > { %v2387_v43 = vpop.eup %2386  ;;  %v2203_v59 = vpack.c.bf16 %v1726_v35, %v1725_v20  ;;  %v1601_v14 = vadd.f32 1.0, %v2385_v0  ;;  %2396 = vtanh.f32 %v1478_v61  ;;  %v1353_v13 = vmul.f32 0.044715, %v1289_v37  ;;  %v774_v61 = vpop.f32.mrf.mxu0 }
 0x175   : > { %v2389_v46 = vpop.eup %2388  ;;  %v1728_v52 = vmul.f32 %v1664_v5, %v2983_v27  ;;  %v1603_v56 = vadd.f32 1.0, %v2387_v43  ;;  %v1480_v63 = vmul.f32 0.7978846, %v1416_v15  ;;  %v1355_v57 = vmul.f32 0.044715, %v1291_v39 }
 0x176   : > { %1961 = vst [vmem:[%s2750_s12 + $0xa0] sm:$0xff] %v2203_v59  ;;  %v1665_v6 = vmul.f32 0.5, %v1601_v14  ;;  %v1602_v7 = vadd.f32 1.0, %v2389_v46  ;;  %v1417_v10 = vadd.f32 %v1353_v13, %v3057_v41  ;;  %v1290_v9 = vmul.f32 %v1226_v62, %v3071_v1 }
 0x177   : > { %v2204_v3 = vpack.c.bf16 %v1728_v52, %v1727_v24  ;;  %v1667_v16 = vmul.f32 0.5, %v1603_v56  ;;  %2398 = vtanh.f32 %v1480_v63  ;;  %v1419_v18 = vadd.f32 %v1355_v57, %v3060_v55 }
 0x178   : > { %v1729_v27 = vmul.f32 %v1665_v6, %v2991_v23  ;;  %v1666_v20 = vmul.f32 0.5, %v1602_v7  ;;  %v1481_v17 = vmul.f32 0.7978846, %v1417_v10  ;;  %v1354_v47 = vmul.f32 0.044715, %v1290_v9 }
 0x179   : > { %v2391_v21 = vpop.eup %2390  ;;  %1962 = vst [vmem:[%s2750_s12 + $0xa8] sm:$0xff] %v2204_v3  ;;  %v1731_v22 = vmul.f32 %v1667_v16, %v2994_v36  ;;  %v1483_v12 = vmul.f32 0.7978846, %v1419_v18  ;;  %v3088_v30 = vadd.f32 %v2627_v51, %v879_v42  ;;  %v3091_v54 = vadd.f32 %v2621_v48, %v770_v2 }
 0x17a   : > { %v1730_v33 = vmul.f32 %v1666_v20, %v2997_v58  ;;  %v1604_v24 = vadd.f32 1.0, %v2391_v21  ;;  %2400 = vtanh.f32 %v1481_v17  ;;  %v1418_v23 = vadd.f32 %v1354_v47, %v3071_v1  ;;  %v887_v17 = vpop.f32.mrf.mxu1 }
 0x17b   : > { %2402 = vtanh.f32 %v1483_v12  ;;  %v1228_v25 = vmul.f32 %v3088_v30, %v3088_v30  ;;  %v1229_v36 = vmul.f32 %v3091_v54, %v3091_v54  ;;  %v3100_v60 = vadd.f32 %v2623_v49, %v883_v26  ;;  %v776_v12 = vpop.f32.mrf.mxu0 }
 0x17c   : > { %v2393_v34 = vpop.eup %2392  ;;  %v2205_v29 = vpack.c.bf16 %v1730_v33, %v1729_v27  ;;  %v1668_v4 = vmul.f32 0.5, %v1604_v24  ;;  %v1482_v58 = vmul.f32 0.7978846, %v1418_v23  ;;  %v3103_v31 = vadd.f32 %v2625_v50, %v772_v19 }
 0x17d   : > { %v1605_v32 = vadd.f32 1.0, %v2393_v34  ;;  %v1292_v44 = vmul.f32 %v1228_v25, %v3088_v30  ;;  %v1293_v53 = vmul.f32 %v1229_v36, %v3091_v54  ;;  %v1231_v35 = vmul.f32 %v3100_v60, %v3100_v60 }
 0x17e   : > { %1963 = vst [vmem:[%s2750_s12 + $0xb0] sm:$0xff] %v2205_v29  ;;  %v1732_v37 = vmul.f32 %v1668_v4, %v3014_v11  ;;  %2404 = vtanh.f32 %v1482_v58  ;;  %v1230_v39 = vmul.f32 %v3103_v31, %v3103_v31  ;;  %v3114_v0 = vadd.f32 %v2627_v51, %v885_v28 }
 0x17f   : > { %v1669_v5 = vmul.f32 0.5, %v1605_v32  ;;  %v1356_v15 = vmul.f32 0.044715, %v1292_v44  ;;  %v1357_v62 = vmul.f32 0.044715, %v1293_v53  ;;  %v1295_v42 = vmul.f32 %v1231_v35, %v3100_v60 }
 0x180   : > { %v2395_v43 = vpop.eup %2394  ;;  %v2206_v59 = vpack.c.bf16 %v1732_v37, %v1731_v22  ;;  %v1294_v14 = vmul.f32 %v1230_v39, %v3103_v31  ;;  %v1232_v11 = vmul.f32 %v3114_v0, %v3114_v0  ;;  %v3121_v13 = vadd.f32 %v2621_v48, %v774_v61 }
 0x181   : > { %v2397_v46 = vpop.eup %2396  ;;  %v1607_v52 = vadd.f32 1.0, %v2395_v43  ;;  %v1420_v56 = vadd.f32 %v1356_v15, %v3088_v30  ;;  %v1421_v63 = vadd.f32 %v1357_v62, %v3091_v54  ;;  %v1359_v2 = vmul.f32 0.044715, %v1295_v42 }
 0x182   : > { %1964 = vst [vmem:[%s2750_s12 + $0xb8] sm:$0xff] %v2206_v59  ;;  %v1606_v57 = vadd.f32 1.0, %v2397_v46  ;;  %v1358_v6 = vmul.f32 0.044715, %v1294_v14  ;;  %v1296_v7 = vmul.f32 %v1232_v11, %v3114_v0  ;;  %v1733_v10 = vmul.f32 %v1669_v5, %v3024_v38 }
 0x183   : > { %v1484_v9 = vmul.f32 0.7978846, %v1420_v56  ;;  %v1485_v3 = vmul.f32 0.7978846, %v1421_v63  ;;  %v1233_v48 = vmul.f32 %v3121_v13, %v3121_v13  ;;  %v1423_v26 = vadd.f32 %v1359_v2, %v3100_v60 }
 0x184   : > { %v2399_v16 = vpop.eup %2398  ;;  %v1670_v18 = vmul.f32 0.5, %v1606_v57  ;;  %v1422_v27 = vadd.f32 %v1358_v6, %v3103_v31  ;;  %v1360_v20 = vmul.f32 0.044715, %v1296_v7  ;;  %v1671_v47 = vmul.f32 0.5, %v1607_v52 }
 0x185   : > { %v1608_v21 = vadd.f32 1.0, %v2399_v16  ;;  %2406 = vtanh.f32 %v1484_v9  ;;  %v1297_v22 = vmul.f32 %v1233_v48, %v3121_v13  ;;  %v1487_v19 = vmul.f32 0.7978846, %v1423_v26 }
 0x186   : > { %v1734_v38 = vmul.f32 %v1670_v18, %v3036_v45  ;;  %2408 = vtanh.f32 %v1485_v3  ;;  %v1486_v33 = vmul.f32 0.7978846, %v1422_v27  ;;  %v1424_v25 = vadd.f32 %v1360_v20, %v3114_v0  ;;  %v889_v45 = vpop.f32.mrf.mxu1 }
 0x187   : > { %v2401_v24 = vpop.eup %2400  ;;  %v1672_v23 = vmul.f32 0.5, %v1608_v21  ;;  %v1361_v36 = vmul.f32 0.044715, %v1297_v22  ;;  %v3136_v28 = vadd.f32 %v2623_v49, %v887_v17  ;;  %2410 = vtanh.f32 %v1487_v19 }
 0x188   : > { %v2403_v34 = vpop.eup %2402  ;;  %v2207_v29 = vpack.c.bf16 %v1734_v38, %v1733_v10  ;;  %v1609_v4 = vadd.f32 1.0, %v2401_v24  ;;  %v3139_v58 = vadd.f32 %v2625_v50, %v776_v12  ;;  %v1735_v32 = vmul.f32 %v1671_v47, %v3032_v40 }
 0x189   : > { %v1736_v44 = vmul.f32 %v1672_v23, %v3046_v8  ;;  %2412 = vtanh.f32 %v1486_v33  ;;  %v1488_v53 = vmul.f32 0.7978846, %v1424_v25  ;;  %v1425_v35 = vadd.f32 %v1361_v36, %v3121_v13 }
 0x18a   : > { %1965 = vst [vmem:[%s2750_s12 + $0xc0] sm:$0xff] %v2207_v29  ;;  %v1235_v49 = vmul.f32 %v3136_v28, %v3136_v28  ;;  %v1234_v61 = vmul.f32 %v3139_v58, %v3139_v58  ;;  %v3150_v39 = vadd.f32 %v2627_v51, %v889_v45  ;;  %v1673_v40 = vmul.f32 0.5, %v1609_v4 }
 0x18b   : > { %v2405_v37 = vpop.eup %2404  ;;  %v2208_v50 = vpack.c.bf16 %v1736_v44, %v1735_v32  ;;  %2414 = vtanh.f32 %v1488_v53  ;;  %v1489_v8 = vmul.f32 0.7978846, %v1425_v35  ;;  %v1611_v43 = vadd.f32 1.0, %v2403_v34 }
 0x18c   : > { %v1610_v5 = vadd.f32 1.0, %v2405_v37  ;;  %v1299_v15 = vmul.f32 %v1235_v49, %v3136_v28  ;;  %v1298_v62 = vmul.f32 %v1234_v61, %v3139_v58  ;;  %v1236_v42 = vmul.f32 %v3150_v39, %v3150_v39 }
 0x18d   : > { %1966 = vst [vmem:[%s2750_s12 + $0xc8] sm:$0xff] %v2208_v50  ;;  %2416 = vtanh.f32 %v1489_v8  ;;  %v1737_v46 = vmul.f32 %v1673_v40, %v3057_v41  ;;  %v1675_v6 = vmul.f32 0.5, %v1611_v43 }
 0x18e   : > { %v1674_v59 = vmul.f32 0.5, %v1610_v5  ;;  %v1363_v14 = vmul.f32 0.044715, %v1299_v15  ;;  %v1362_v11 = vmul.f32 0.044715, %v1298_v62  ;;  %v1300_v51 = vmul.f32 %v1236_v42, %v3150_v39 }
 0x18f   : > { %v1739_v20 = vmul.f32 %v1675_v6, %v3060_v55 }
 0x190   : > { %v1738_v52 = vmul.f32 %v1674_v59, %v3071_v1  ;;  %v1427_v56 = vadd.f32 %v1363_v14, %v3136_v28  ;;  %v1426_v63 = vadd.f32 %v1362_v11, %v3139_v58  ;;  %v1364_v57 = vmul.f32 0.044715, %v1300_v51 }
 0x192   : > { %v2407_v2 = vpop.eup %2406  ;;  %v2209_v7 = vpack.c.bf16 %v1738_v52, %v1737_v46  ;;  %v1491_v10 = vmul.f32 0.7978846, %v1427_v56  ;;  %v1490_v48 = vmul.f32 0.7978846, %v1426_v63  ;;  %v1428_v16 = vadd.f32 %v1364_v57, %v3150_v39 }
 0x193   : > { %v2409_v9 = vpop.eup %2408  ;;  %v1612_v3 = vadd.f32 1.0, %v2407_v2 }
 0x194   : > { %1967 = vst [vmem:[%s2750_s12 + $0xd0] sm:$0xff] %v2209_v7  ;;  %v1613_v18 = vadd.f32 1.0, %v2409_v9  ;;  %2418 = vtanh.f32 %v1491_v10  ;;  %v2411_v41 = vpop.eup %2410  ;;  %v1492_v26 = vmul.f32 0.7978846, %v1428_v16 }
 0x195   : > { %v1676_v1 = vmul.f32 0.5, %v1612_v3  ;;  %2420 = vtanh.f32 %v1490_v48  ;;  %v1615_v17 = vadd.f32 1.0, %v2411_v41 }
 0x196   : > { %v2413_v27 = vpop.eup %2412  ;;  %v1677_v21 = vmul.f32 0.5, %v1613_v18  ;;  %2422 = vtanh.f32 %v1492_v26 }
 0x197   : > { %v1740_v47 = vmul.f32 %v1676_v1, %v3088_v30  ;;  %v1614_v22 = vadd.f32 1.0, %v2413_v27  ;;  %v1679_v19 = vmul.f32 0.5, %v1615_v17 }
 0x198   : > { %v2415_v12 = vpop.eup %2414  ;;  %v1741_v23 = vmul.f32 %v1677_v21, %v3091_v54 }
 0x199   : > { %v2210_v38 = vpack.c.bf16 %v1740_v47, %v1739_v20  ;;  %v1678_v33 = vmul.f32 0.5, %v1614_v22  ;;  %v1616_v24 = vadd.f32 1.0, %v2415_v12  ;;  %v1743_v34 = vmul.f32 %v1679_v19, %v3100_v60 }
 0x19a   : > { %v2417_v55 = vpop.eup %2416 }
 0x19b   : > { %1968 = vst [vmem:[%s2750_s12 + $0xd8] sm:$0xff] %v2210_v38  ;;  %v1742_v25 = vmul.f32 %v1678_v33, %v3103_v31  ;;  %v1680_v36 = vmul.f32 0.5, %v1616_v24  ;;  %v1617_v45 = vadd.f32 1.0, %v2417_v55 }
 0x19d   : > { %v2211_v30 = vpack.c.bf16 %v1742_v25, %v1741_v23  ;;  %v1744_v29 = vmul.f32 %v1680_v36, %v3114_v0  ;;  %v1681_v35 = vmul.f32 0.5, %v1617_v45 }
 0x19f   : > { %1969 = vst [vmem:[%s2750_s12 + $0xe0] sm:$0xff] %v2211_v30  ;;  %v2212_v4 = vpack.c.bf16 %v1744_v29, %v1743_v34  ;;  %v1745_v60 = vmul.f32 %v1681_v35, %v3121_v13 }
 0x1a1   : > { %v2419_v32 = vpop.eup %2418  ;;  %1970 = vst [vmem:[%s2750_s12 + $0xe8] sm:$0xff] %v2212_v4 }
 0x1a2   : > { %v2421_v44 = vpop.eup %2420  ;;  %v1619_v53 = vadd.f32 1.0, %v2419_v32 }
 0x1a3   : > { %v1618_v54 = vadd.f32 1.0, %v2421_v44  ;;  %v2423_v49 = vpop.eup %2422 }
 0x1a4   : > { %v1683_v31 = vmul.f32 0.5, %v1619_v53  ;;  %v1620_v37 = vadd.f32 1.0, %v2423_v49 }
 0x1a5   : > { %v1682_v61 = vmul.f32 0.5, %v1618_v54 }
 0x1a6   : > { %v1684_v0 = vmul.f32 0.5, %v1620_v37  ;;  %v1747_v40 = vmul.f32 %v1683_v31, %v3136_v28 }
 0x1a7   : > { %v1746_v50 = vmul.f32 %v1682_v61, %v3139_v58 }
 0x1a8   : > { %v1748_v8 = vmul.f32 %v1684_v0, %v3150_v39 }
 0x1a9   : > { %v2213_v5 = vpack.c.bf16 %v1746_v50, %v1745_v60 }
 0x1aa   : > { %v2214_v15 = vpack.c.bf16 %v1748_v8, %v1747_v40 }
 0x1ab   : > { %1971 = vst [vmem:[%s2750_s12 + $0xf0] sm:$0xff] %v2213_v5 }
 0x1ac   : > { %1972 = vst [vmem:[%s2750_s12 + $0xf8] sm:$0xff] %v2214_v15 }
 0x1ad PF: > { %s13_s14 = sadd.s32 1, %s2446_s14   ;;  %s3192_s12 = smov %s2442_s13 }
 0x1ae   : > { %p10_p5 = scmp.ge.s32.totalorder %s13_s14, 4   ;;  %s3193_s13 = smov %s3195_s15 }
 0x1b0   :  { %12 = sbr.rel (!%p10_p5) target bundleno = 2 (0x2), region = 76 }

// kernel: gptj_training_step.27
= control target key start
LH: loop header
LB: loop body
LE: loop exit
PB: predicated region body
PF: predicated region fallthrough
CT: control target
= control target key end

     0   :  { %s2503_s15 = smov 0   ;;  %s2505_s16 = smov 0   ;;  %s3603_s0 = inlined_call_operand.vmem [shape: bf16[256,128], index: 0, kind: input, shape index: {}]   ;;  %s3604_s1 = inlined_call_operand.vmem [shape: bf16[512,128], index: 1, kind: input, shape index: {}]   ;;  %s3605_s2 = inlined_call_operand.vmem [shape: s32[256,1], index: 2, kind: input, shape index: {}]   ;;  %s3606_s3 = inlined_call_operand.vmem [shape: f32[256,1], index: 3, kind: input, shape index: {}]   ;;  %s3607_s4 = inlined_call_operand.vmem [shape: f32[256,1], index: 4, kind: output, shape index: {}]  }
   0x1   :  { %s2507_s17 = smov 0  }
   0x2 LB: > { %s26_s18 = sadd.s32 1, %s2469_s16  ;;  %p2075_p0 = scmp.ge.s32.totalorder %s2473_s17, 1  ;;  %s2473_s17 = sphi %s2507_s17, %s14_s17   ;;  %s2469_s16 = sphi %s2505_s16, %s3828_s16   ;;  %s2465_s15 = sphi %s2503_s15, %s3827_s15  }
   0x3   : > { %p28_p1 = scmp.ge.s32.totalorder %s26_s18, 2  ;;  %p208_p2 = scmp.lt.s32.totalorder %s2473_s17, 3 }
   0x5   : > { %s3830_s18 = smov (%p28_p1, %s26_s18), 0  ;;  %p209_p3 = pnand %p2075_p0, %p208_p2 }
   0x7   : > { %212 = sbr.rel (%p209_p3) target bundleno = 826 (0x33a), region = 36 }
   0xc   : > { %v2219_v0 = vld [vmem:[%s3604_s1 + $0x78] sm:$0xff]   ;;  %v2475_v4 = vmov 0   ;;  %v2223_v5 = vld [vmem:[%s3604_s1 + $0x70] sm:$0xff]   ;;  %v2227_v9 = vld [vmem:[%s3604_s1 + $0x68] sm:$0xff]   ;;  %s2076_s19 = sshll.u32 %s2465_s15, 4  ;;  %vm284_vm0 = vcmask 7168  }
   0xd   : > { %v2220_v1 = vld [vmem:[%s3604_s1 + $0xf8] sm:$0xff]   ;;  %2126 = vmatprep.subr.bf16.mxu0 %v2219_v0  ;;  %2217 = vset.pattern.permute.xlu0 %v2475_v4  ;;  %v2224_v6 = vld [vmem:[%s3604_s1 + $0xf0] sm:$0xff]   ;;  %v2228_v10 = vld [vmem:[%s3604_s1 + $0xe8] sm:$0xff]   ;;  %p250_p4 = scmp.lt.s32.totalorder %s2076_s19, 31  ;;  %v2476_v43 = vmov -1e+30  }
   0xe   : > { %v2221_v2 = vld [vmem:[%s3604_s1 + $0x38] sm:$0xff]   ;;  %2158 = vmatprep.subr.bf16.mxu1 %v2220_v1  ;;  %2218 = vset.pattern.permute.xlu1 %v2475_v4  ;;  %v2225_v7 = vld [vmem:[%s3604_s1 + $0x30] sm:$0xff]   ;;  %v2229_v11 = vld [vmem:[%s3604_s1 + $0x28] sm:$0xff]   ;;  %285 = vst.msk [vmem:[#allocation2] sm:$0xff] %vm284_vm0, %v2476_v43 }
   0xf   : > { %v2222_v3 = vld [vmem:[%s3604_s1 + $0xb8] sm:$0xff]   ;;  %2127 = vmatpush3.bf16.xpose.msra.mxu0 %v2221_v2  ;;  %v2226_v8 = vld [vmem:[%s3604_s1 + $0xb0] sm:$0xff]   ;;  %v2230_v12 = vld [vmem:[%s3604_s1 + $0xa8] sm:$0xff]   ;;  %s3832_s19 = smov (!%p250_p4, %s2076_s19), 31  ;;  %286 = vst.msk [vmem:[#allocation2 + $0x8] sm:$0xff] %vm284_vm0, %v2476_v43 }
  0x10   : > { %2159 = vmatpush3.bf16.xpose.msra.mxu1 %v2222_v3  ;;  %2128 = vmatprep.subr.bf16.mxu0 %v2223_v5  ;;  %v2231_v13 = vld [vmem:[%s3604_s1 + $0x60] sm:$0xff]   ;;  %v2235_v17 = vld [vmem:[%s3604_s1 + $0x58] sm:$0xff]   ;;  %s2077_s7 = sshll.u32 %s3832_s19, 2  ;;  %v2239_v22 = vld [vmem:[%s3604_s1 + $0x50] sm:$0xff]   ;;  %s2596_s24 = sshll.u32 %s3832_s19, 3  ;;  %287 = vst.msk [vmem:[#allocation2 + $0x10] sm:$0xff] %vm284_vm0, %v2476_v43 }
  0x11   : > { %2160 = vmatprep.subr.bf16.mxu1 %v2224_v6  ;;  %v2232_v14 = vld [vmem:[%s3604_s1 + $0xe0] sm:$0xff]   ;;  %v2236_v18 = vld [vmem:[%s3604_s1 + $0xd8] sm:$0xff]   ;;  %s2581_s10 = scalar_lea.vmem %s3603_s0, %s2077_s7  ;;  %v2240_v23 = vld [vmem:[%s3604_s1 + $0xd0] sm:$0xff]   ;;  %s2602_s15 = scalar_lea.vmem %s3605_s2, %s2596_s24  ;;  %288 = vst.msk [vmem:[#allocation2 + $0x18] sm:$0xff] %vm284_vm0, %v2476_v43 }
  0x12   : > { %v2233_v15 = vld [vmem:[%s3604_s1 + $0x20] sm:$0xff]   ;;  %v2237_v19 = vld [vmem:[%s3604_s1 + $0x18] sm:$0xff]   ;;  %v2241_v24 = vld [vmem:[%s3604_s1 + $0x10] sm:$0xff]   ;;  %289 = vst.msk [vmem:[#allocation2 + $0x20] sm:$0xff] %vm284_vm0, %v2476_v43  ;;  %s3484_s27 = scalar_lea.vmem %s3606_s3, %s2596_s24  ;;  %s3497_s19 = scalar_lea.vmem %s3607_s4, %s2596_s24 }
  0x13   : > { %v2234_v16 = vld [vmem:[%s3604_s1 + $0xa0] sm:$0xff]   ;;  %v2238_v20 = vld [vmem:[%s3604_s1 + $0x98] sm:$0xff]   ;;  %v2242_v26 = vld [vmem:[%s3604_s1 + $0x90] sm:$0xff]   ;;  %290 = vst.msk [vmem:[#allocation2 + $0x28] sm:$0xff] %vm284_vm0, %v2476_v43 }
  0x14   : > { %v2251_v21 = vld [vmem:[%s2581_s10] sm:$0xff]   ;;  %v2243_v27 = vld [vmem:[%s3604_s1 + $0x48] sm:$0xff]   ;;  %v2253_v37 = vld [vmem:[%s2581_s10 + $0x10] sm:$0xff]   ;;  %291 = vst.msk [vmem:[#allocation2 + $0x30] sm:$0xff] %vm284_vm0, %v2476_v43 }
  0x15   : > { %2142 = vmatprep.mubr.bf16.mxu0 %v2251_v21  ;;  %2174 = vmatprep.mubr.bf16.mxu1 %v2251_v21  ;;  %v879_v25 = vld [vmem:[%s2602_s15] sm:$0xff]  ;;  %v2244_v28 = vld [vmem:[%s3604_s1 + $0xc8] sm:$0xff]   ;;  %v2254_v38 = vld [vmem:[%s2581_s10 + $0x18] sm:$0xff]   ;;  %292 = vst.msk [vmem:[#allocation2 + $0x38] sm:$0xff] %vm284_vm0, %v2476_v43 }
  0x16   : > { %923 = vperm.xlu0 %2217, %v879_v25   ;;  %v880_v29 = vld [vmem:[%s2602_s15 + $0x8] sm:$0xff]  ;;  %v2247_v32 = vld [vmem:[%s3604_s1 + $0x40] sm:$0xff]   ;;  %v2257_v41 = vld [vmem:[%s2581_s10 + $0x30] sm:$0xff]   ;;  %293 = vst.msk [vmem:[#allocation2 + $0x40] sm:$0xff] %vm284_vm0, %v2476_v43 }
  0x17   : > { %2129 = vmatpush3.bf16.xpose.msra.mxu0 %v2225_v7  ;;  %v2245_v30 = vld [vmem:[%s3604_s1 + $0x8] sm:$0xff]   ;;  %v2248_v33 = vld [vmem:[%s3604_s1 + $0xc0] sm:$0xff]   ;;  %v2258_v42 = vld [vmem:[%s2581_s10 + $0x38] sm:$0xff]   ;;  %294 = vst.msk [vmem:[#allocation2 + $0x48] sm:$0xff] %vm284_vm0, %v2476_v43 }
  0x18   : > { %2161 = vmatpush3.bf16.xpose.msra.mxu1 %v2226_v8  ;;  %2130 = vmatprep.subr.bf16.mxu0 %v2227_v9  ;;  %v2246_v31 = vld [vmem:[%s3604_s1 + $0x88] sm:$0xff]   ;;  %v2249_v34 = vld [vmem:[%s3604_s1] sm:$0xff]   ;;  %295 = vst.msk [vmem:[#allocation2 + $0x50] sm:$0xff] %vm284_vm0, %v2476_v43  ;;  %296 = vst.msk [vmem:[#allocation2 + $0x58] sm:$0xff] %vm284_vm0, %v2476_v43 }
  0x19   : > { %2162 = vmatprep.subr.bf16.mxu1 %v2228_v10  ;;  %v2250_v35 = vld [vmem:[%s3604_s1 + $0x80] sm:$0xff]   ;;  %v2252_v36 = vld [vmem:[%s2581_s10 + $0x8] sm:$0xff]   ;;  %297 = vst.msk [vmem:[#allocation2 + $0x60] sm:$0xff] %vm284_vm0, %v2476_v43  ;;  %298 = vst.msk [vmem:[#allocation2 + $0x68] sm:$0xff] %vm284_vm0, %v2476_v43 }
  0x1a   : > { %926 = vperm.xlu0 %2217, %v880_v29   ;;  %v2255_v39 = vld [vmem:[%s2581_s10 + $0x20] sm:$0xff]   ;;  %v2256_v40 = vld [vmem:[%s2581_s10 + $0x28] sm:$0xff]   ;;  %299 = vst.msk [vmem:[#allocation2 + $0x70] sm:$0xff] %vm284_vm0, %v2476_v43  ;;  %300 = vst.msk [vmem:[#allocation2 + $0x78] sm:$0xff] %vm284_vm0, %v2476_v43 }
  0x1f   : > { %2131 = vmatpush3.bf16.xpose.msra.mxu0 %v2229_v11 }
  0x20   : > { %2163 = vmatpush3.bf16.xpose.msra.mxu1 %v2230_v12  ;;  %2132 = vmatprep.subr.bf16.mxu0 %v2231_v13 }
  0x21   : > { %2164 = vmatprep.subr.bf16.mxu1 %v2232_v14 }
  0x27   : > { %2133 = vmatpush3.bf16.xpose.msra.mxu0 %v2233_v15 }
  0x28   : > { %2165 = vmatpush3.bf16.xpose.msra.mxu1 %v2234_v16  ;;  %2134 = vmatprep.subr.bf16.mxu0 %v2235_v17 }
  0x29   : > { %2166 = vmatprep.subr.bf16.mxu1 %v2236_v18 }
  0x2f   : > { %2135 = vmatpush3.bf16.xpose.msra.mxu0 %v2237_v19 }
  0x30   : > { %2167 = vmatpush3.bf16.xpose.msra.mxu1 %v2238_v20  ;;  %2136 = vmatprep.subr.bf16.mxu0 %v2239_v22 }
  0x31   : > { %2168 = vmatprep.subr.bf16.mxu1 %v2240_v23 }
  0x37   : > { %2137 = vmatpush3.bf16.xpose.msra.mxu0 %v2241_v24 }
  0x38   : > { %2169 = vmatpush3.bf16.xpose.msra.mxu1 %v2242_v26  ;;  %2138 = vmatprep.subr.bf16.mxu0 %v2243_v27 }
  0x39   : > { %2170 = vmatprep.subr.bf16.mxu1 %v2244_v28 }
  0x3f   : > { %2139 = vmatpush3.bf16.xpose.msra.mxu0 %v2245_v30 }
  0x40   : > { %2171 = vmatpush3.bf16.xpose.msra.mxu1 %v2246_v31  ;;  %2140 = vmatprep.subr.bf16.mxu0 %v2247_v32 }
  0x41   : > { %2172 = vmatprep.subr.bf16.mxu1 %v2248_v33 }
  0x47   : > { %2141 = vmatpush3.bf16.xpose.msra.mxu0 %v2249_v34 }
  0x48   : > { %2173 = vmatpush3.bf16.xpose.msra.mxu1 %v2250_v35 }
  0x4e   : > { %2143 = vmatmul.mubr.bf16.vlgmr.msra.gmra.mxu0 %v2251_v21 }
  0x4f   : > { %2175 = vmatmul.mubr.bf16.vlgmr.msra.gmra.mxu1 %v2251_v21  ;;  %2144 = vmatprep.mubr.bf16.mxu0 %v2252_v36 }
  0x50   : > { %2176 = vmatprep.mubr.bf16.mxu1 %v2252_v36 }
  0x56   : > { %2145 = vmatmul.mubr.bf16.gmra.mxu0 %v2252_v36 }
  0x57   : > { %2177 = vmatmul.mubr.bf16.gmra.mxu1 %v2252_v36  ;;  %2146 = vmatprep.mubr.bf16.mxu0 %v2253_v37 }
  0x58   : > { %2178 = vmatprep.mubr.bf16.mxu1 %v2253_v37 }
  0x5e   : > { %2147 = vmatmul.mubr.bf16.gmra.mxu0 %v2253_v37 }
  0x5f   : > { %2179 = vmatmul.mubr.bf16.gmra.mxu1 %v2253_v37  ;;  %2148 = vmatprep.mubr.bf16.mxu0 %v2254_v38 }
  0x60   : > { %2180 = vmatprep.mubr.bf16.mxu1 %v2254_v38 }
  0x66   : > { %2149 = vmatmul.mubr.bf16.gmra.mxu0 %v2254_v38 }
  0x67   : > { %2181 = vmatmul.mubr.bf16.gmra.mxu1 %v2254_v38  ;;  %2150 = vmatprep.mubr.bf16.mxu0 %v2255_v39 }
  0x68   : > { %2182 = vmatprep.mubr.bf16.mxu1 %v2255_v39 }
  0x6e   : > { %2151 = vmatmul.mubr.bf16.gmra.mxu0 %v2255_v39 }
  0x6f   : > { %2183 = vmatmul.mubr.bf16.gmra.mxu1 %v2255_v39  ;;  %2152 = vmatprep.mubr.bf16.mxu0 %v2256_v40 }
  0x70   : > { %2184 = vmatprep.mubr.bf16.mxu1 %v2256_v40 }
  0x76   : > { %2153 = vmatmul.mubr.bf16.gmra.mxu0 %v2256_v40 }
  0x77   : > { %2185 = vmatmul.mubr.bf16.gmra.mxu1 %v2256_v40  ;;  %2154 = vmatprep.mubr.bf16.mxu0 %v2257_v41 }
  0x78   : > { %2186 = vmatprep.mubr.bf16.mxu1 %v2257_v41 }
  0x7e   : > { %2155 = vmatmul.mubr.bf16.gmra.mxu0 %v2257_v41 }
  0x7f   : > { %2187 = vmatmul.mubr.bf16.gmra.mxu1 %v2257_v41  ;;  %2156 = vmatprep.mubr.bf16.mxu0 %v2258_v42 }
  0x80   : > { %2188 = vmatprep.mubr.bf16.mxu1 %v2258_v42 }
  0x86   : > { %2157 = vmatmul.mubr.bf16.gmra.mxu0 %v2258_v42 }
  0x87   : > { %2189 = vmatmul.mubr.bf16.gmra.mxu1 %v2258_v42 }
 0x10e   : > { %v2659_v44 = vpop.f32.mrf.mxu0 }
 0x10f   : > { %v2661_v45 = vpop.f32.mrf.mxu1 }
 0x110   : > { %v2663_v46 = vpop.f32.mrf.mxu0 }
 0x111   : > { %v1227_v47 = vmax.f32 %v2659_v44, %v2663_v46  ;;  %v2667_v48 = vpop.f32.mrf.mxu1 }
 0x112   : > { %v2669_v49 = vpop.f32.mrf.mxu0 }
 0x113   : > { %v2671_v50 = vpop.f32.mrf.mxu1  ;;  %v1228_v51 = vmax.f32 %v1227_v47, %v2661_v45 }
 0x114   : > { %v2674_v52 = vpop.f32.mrf.mxu0 }
 0x115   : > { %v1232_v53 = vmax.f32 %v2669_v49, %v2674_v52  ;;  %v2678_v54 = vpop.f32.mrf.mxu1  ;;  %v1229_v55 = vmax.f32 %v1228_v51, %v2667_v48 }
 0x116   : > { %v2681_v56 = vpop.f32.mrf.mxu0 }
 0x117   : > { %v2683_v57 = vpop.f32.mrf.mxu1  ;;  %1230 = vmax.xlane.f32.xlu1 %v1229_v55  ;;  %v1233_v58 = vmax.f32 %v1232_v53, %v2671_v50 }
 0x118   : > { %v2686_v59 = vpop.f32.mrf.mxu0 }
 0x119   : > { %v1237_v60 = vmax.f32 %v2681_v56, %v2686_v59  ;;  %v2690_v61 = vpop.f32.mrf.mxu1  ;;  %v1234_v62 = vmax.f32 %v1233_v58, %v2678_v54 }
 0x11a   : > { %v2693_v63 = vpop.f32.mrf.mxu0 }
 0x11b   : > { %v2695_v0 = vpop.f32.mrf.mxu1  ;;  %1235 = vmax.xlane.f32.xlu0 %v1234_v62  ;;  %v1238_v1 = vmax.f32 %v1237_v60, %v2683_v57 }
 0x11c   : > { %v2698_v2 = vpop.f32.mrf.mxu0 }
 0x11d   : > { %v1242_v3 = vmax.f32 %v2693_v63, %v2698_v2  ;;  %v2702_v4 = vpop.f32.mrf.mxu1  ;;  %v1239_v5 = vmax.f32 %v1238_v1, %v2690_v61 }
 0x11e   : > { %v2705_v6 = vpop.f32.mrf.mxu0 }
 0x11f   : > { %v2707_v7 = vpop.f32.mrf.mxu1  ;;  %1240 = vmax.xlane.f32.xlu0 %v1239_v5  ;;  %v1243_v8 = vmax.f32 %v1242_v3, %v2695_v0 }
 0x120   : > { %v2710_v9 = vpop.f32.mrf.mxu0 }
 0x121   : > { %v1247_v10 = vmax.f32 %v2705_v6, %v2710_v9  ;;  %v2714_v11 = vpop.f32.mrf.mxu1  ;;  %v1244_v12 = vmax.f32 %v1243_v8, %v2702_v4 }
 0x122   : > { %v2717_v13 = vpop.f32.mrf.mxu0 }
 0x123   : > { %v2719_v14 = vpop.f32.mrf.mxu1  ;;  %1245 = vmax.xlane.f32.xlu1 %v1244_v12  ;;  %v1248_v15 = vmax.f32 %v1247_v10, %v2707_v7 }
 0x124   : > { %v2722_v16 = vpop.f32.mrf.mxu0 }
 0x125   : > { %v1252_v17 = vmax.f32 %v2717_v13, %v2722_v16  ;;  %v2726_v18 = vpop.f32.mrf.mxu1  ;;  %v1249_v19 = vmax.f32 %v1248_v15, %v2714_v11 }
 0x126   : > { %v2729_v20 = vpop.f32.mrf.mxu0 }
 0x127   : > { %v2731_v21 = vpop.f32.mrf.mxu1  ;;  %1250 = vmax.xlane.f32.xlu0 %v1249_v19  ;;  %v1253_v22 = vmax.f32 %v1252_v17, %v2719_v14 }
 0x128   : > { %v2734_v23 = vpop.f32.mrf.mxu0 }
 0x129   : > { %v1257_v24 = vmax.f32 %v2729_v20, %v2734_v23  ;;  %v2738_v25 = vpop.f32.mrf.mxu1  ;;  %v1254_v26 = vmax.f32 %v1253_v22, %v2726_v18 }
 0x12a   : > { %v2741_v27 = vpop.f32.mrf.mxu0 }
 0x12b   : > { %3687 = vst [vmem:[#allocation5_spill] sm:$0xff] %v2741_v27  ;;  %v2743_v28 = vpop.f32.mrf.mxu1  ;;  %1255 = vmax.xlane.f32.xlu1 %v1254_v26  ;;  %v1258_v29 = vmax.f32 %v1257_v24, %v2731_v21 }
 0x12c   : > { %3688 = vst [vmem:[#allocation6_spill] sm:$0xff] %v2743_v28  ;;  %v2746_v30 = vpop.f32.mrf.mxu0 }
 0x12d   : > { %3689 = vst [vmem:[#allocation7_spill] sm:$0xff] %v2746_v30  ;;  %v1262_v31 = vmax.f32 %v2741_v27, %v2746_v30  ;;  %v2750_v32 = vpop.f32.mrf.mxu1  ;;  %v1259_v33 = vmax.f32 %v1258_v29, %v2738_v25 }
 0x12e   : > { %3690 = vst [vmem:[#allocation8_spill] sm:$0xff] %v2750_v32  ;;  %v2753_v34 = vpop.f32.mrf.mxu0 }
 0x12f   : > { %v2755_v35 = vpop.f32.mrf.mxu1  ;;  %1260 = vmax.xlane.f32.xlu0 %v1259_v33  ;;  %v1263_v36 = vmax.f32 %v1262_v31, %v2743_v28 }
 0x130   : > { %v2758_v37 = vpop.f32.mrf.mxu0 }
 0x131   : > { %v1267_v38 = vmax.f32 %v2753_v34, %v2758_v37  ;;  %v2762_v39 = vpop.f32.mrf.mxu1  ;;  %v1264_v40 = vmax.f32 %v1263_v36, %v2750_v32 }
 0x132   : > { %v2765_v41 = vpop.f32.mrf.mxu0 }
 0x133   : > { %3691 = vst [vmem:[#allocation9_spill] sm:$0xff] %v2765_v41  ;;  %v2767_v42 = vpop.f32.mrf.mxu1  ;;  %1265 = vmax.xlane.f32.xlu1 %v1264_v40  ;;  %v1268_v43 = vmax.f32 %v1267_v38, %v2755_v35 }
 0x134   : > { %3692 = vst [vmem:[#allocation10_spill] sm:$0xff] %v2767_v42  ;;  %v2770_v47 = vpop.f32.mrf.mxu0 }
 0x135   : > { %3693 = vst [vmem:[#allocation11_spill] sm:$0xff] %v2770_v47  ;;  %v1272_v51 = vmax.f32 %v2765_v41, %v2770_v47  ;;  %v2774_v53 = vpop.f32.mrf.mxu1  ;;  %v1269_v55 = vmax.f32 %v1268_v43, %v2762_v39 }
 0x136   : > { %3694 = vst [vmem:[#allocation12_spill] sm:$0xff] %v2774_v53  ;;  %v2777_v58 = vpop.f32.mrf.mxu0 }
 0x137   : > { %v2779_v60 = vpop.f32.mrf.mxu1  ;;  %1270 = vmax.xlane.f32.xlu0 %v1269_v55  ;;  %v1273_v62 = vmax.f32 %v1272_v51, %v2767_v42 }
 0x138   : > { %v2782_v1 = vpop.f32.mrf.mxu0 }
 0x139   : > { %v1277_v3 = vmax.f32 %v2777_v58, %v2782_v1  ;;  %v2786_v5 = vpop.f32.mrf.mxu1  ;;  %v1274_v8 = vmax.f32 %v1273_v62, %v2774_v53  ;;  %v2477_v62 = vmov 0.0  }
 0x13a   : > { %v2789_v10 = vpop.f32.mrf.mxu0  ;;  %318 = vst.msk [vmem:[#allocation4 + $0x8] sm:$0xff] %vm284_vm0, %v2477_v62  ;;  %301 = vst.msk [vmem:[#allocation3] sm:$0xff] %vm284_vm0, %v2477_v62 }
 0x13b   : > { %3695 = vst [vmem:[#allocation13_spill] sm:$0xff] %v2789_v10  ;;  %v2791_v12 = vpop.f32.mrf.mxu1  ;;  %1275 = vmax.xlane.f32.xlu1 %v1274_v8  ;;  %v1278_v15 = vmax.f32 %v1277_v3, %v2779_v60  ;;  %302 = vst.msk [vmem:[#allocation3 + $0x8] sm:$0xff] %vm284_vm0, %v2477_v62 }
 0x13c   : > { %3696 = vst [vmem:[#allocation14_spill] sm:$0xff] %v2791_v12  ;;  %v2794_v17 = vpop.f32.mrf.mxu0  ;;  %303 = vst.msk [vmem:[#allocation3 + $0x10] sm:$0xff] %vm284_vm0, %v2477_v62 }
 0x13d   : > { %3697 = vst [vmem:[#allocation15_spill] sm:$0xff] %v2794_v17  ;;  %v1282_v19 = vmax.f32 %v2789_v10, %v2794_v17  ;;  %v2798_v22 = vpop.f32.mrf.mxu1  ;;  %v1279_v24 = vmax.f32 %v1278_v15, %v2786_v5  ;;  %304 = vst.msk [vmem:[#allocation3 + $0x18] sm:$0xff] %vm284_vm0, %v2477_v62 }
 0x13e   : > { %3698 = vst [vmem:[#allocation16_spill] sm:$0xff] %v2798_v22  ;;  %v2801_v26 = vpop.f32.mrf.mxu0  ;;  %305 = vst.msk [vmem:[#allocation3 + $0x20] sm:$0xff] %vm284_vm0, %v2477_v62 }
 0x13f   : > { %v2803_v29 = vpop.f32.mrf.mxu1  ;;  %1280 = vmax.xlane.f32.xlu0 %v1279_v24  ;;  %v1283_v31 = vmax.f32 %v1282_v19, %v2791_v12  ;;  %306 = vst.msk [vmem:[#allocation3 + $0x28] sm:$0xff] %vm284_vm0, %v2477_v62  ;;  %307 = vst.msk [vmem:[#allocation3 + $0x30] sm:$0xff] %vm284_vm0, %v2477_v62 }
 0x140   : > { %v2806_v33 = vpop.f32.mrf.mxu0  ;;  %308 = vst.msk [vmem:[#allocation3 + $0x38] sm:$0xff] %vm284_vm0, %v2477_v62  ;;  %309 = vst.msk [vmem:[#allocation3 + $0x40] sm:$0xff] %vm284_vm0, %v2477_v62 }
 0x141   : > { %v1287_v36 = vmax.f32 %v2801_v26, %v2806_v33  ;;  %v2810_v38 = vpop.f32.mrf.mxu1  ;;  %v1284_v40 = vmax.f32 %v1283_v31, %v2798_v22  ;;  %310 = vst.msk [vmem:[#allocation3 + $0x48] sm:$0xff] %vm284_vm0, %v2477_v62  ;;  %311 = vst.msk [vmem:[#allocation3 + $0x50] sm:$0xff] %vm284_vm0, %v2477_v62 }
 0x142   : > { %3699 = vst [vmem:[#allocation17_spill] sm:$0xff] %v2810_v38  ;;  %v2813_v43 = vpop.f32.mrf.mxu0  ;;  %312 = vst.msk [vmem:[#allocation3 + $0x58] sm:$0xff] %vm284_vm0, %v2477_v62 }
 0x143   : > { %3700 = vst [vmem:[#allocation18_spill] sm:$0xff] %v2813_v43  ;;  %v2815_v51 = vpop.f32.mrf.mxu1  ;;  %1285 = vmax.xlane.f32.xlu1 %v1284_v40  ;;  %v1288_v55 = vmax.f32 %v1287_v36, %v2803_v29  ;;  %313 = vst.msk [vmem:[#allocation3 + $0x60] sm:$0xff] %vm284_vm0, %v2477_v62 }
 0x144   : > { %3701 = vst [vmem:[#allocation19_spill] sm:$0xff] %v2815_v51  ;;  %314 = vst.msk [vmem:[#allocation3 + $0x68] sm:$0xff] %vm284_vm0, %v2477_v62  ;;  %v2850_v3 = vpop.f32.mrf.mxu0 }
 0x145   : > { %315 = vst.msk [vmem:[#allocation3 + $0x70] sm:$0xff] %vm284_vm0, %v2477_v62  ;;  %316 = vst.msk [vmem:[#allocation3 + $0x78] sm:$0xff] %vm284_vm0, %v2477_v62  ;;  %v1292_v8 = vmax.f32 %v2813_v43, %v2850_v3  ;;  %v2854_v15 = vpop.f32.mrf.mxu1  ;;  %v1289_v19 = vmax.f32 %v1288_v55, %v2810_v38 }
 0x146   : > { %317 = vst.msk [vmem:[#allocation4] sm:$0xff] %vm284_vm0, %v2477_v62  ;;  %319 = vst.msk [vmem:[#allocation4 + $0x10] sm:$0xff] %vm284_vm0, %v2477_v62  ;;  %v2857_v24 = vpop.f32.mrf.mxu0 }
 0x147   : > { %320 = vst.msk [vmem:[#allocation4 + $0x18] sm:$0xff] %vm284_vm0, %v2477_v62  ;;  %321 = vst.msk [vmem:[#allocation4 + $0x20] sm:$0xff] %vm284_vm0, %v2477_v62  ;;  %v2859_v31 = vpop.f32.mrf.mxu1  ;;  %1290 = vmax.xlane.f32.xlu0 %v1289_v19  ;;  %v1293_v36 = vmax.f32 %v1292_v8, %v2815_v51 }
 0x148   : > { %322 = vst.msk [vmem:[#allocation4 + $0x28] sm:$0xff] %vm284_vm0, %v2477_v62  ;;  %323 = vst.msk [vmem:[#allocation4 + $0x30] sm:$0xff] %vm284_vm0, %v2477_v62  ;;  %v2862_v40 = vpop.f32.mrf.mxu0 }
 0x149   : > { %324 = vst.msk [vmem:[#allocation4 + $0x38] sm:$0xff] %vm284_vm0, %v2477_v62  ;;  %325 = vst.msk [vmem:[#allocation4 + $0x40] sm:$0xff] %vm284_vm0, %v2477_v62  ;;  %v2866_v22 = vpop.f32.mrf.mxu1 }
 0x14a   : > { %326 = vst.msk [vmem:[#allocation4 + $0x48] sm:$0xff] %vm284_vm0, %v2477_v62  ;;  %327 = vst.msk [vmem:[#allocation4 + $0x50] sm:$0xff] %vm284_vm0, %v2477_v62  ;;  %v2869_v43 = vpop.f32.mrf.mxu0 }
 0x14b   : > { %328 = vst.msk [vmem:[#allocation4 + $0x58] sm:$0xff] %vm284_vm0, %v2477_v62  ;;  %329 = vst.msk [vmem:[#allocation4 + $0x60] sm:$0xff] %vm284_vm0, %v2477_v62  ;;  %v2872_v19 = vpop.f32.mrf.mxu1 }
 0x14c   : > { %330 = vst.msk [vmem:[#allocation4 + $0x68] sm:$0xff] %vm284_vm0, %v2477_v62  ;;  %331 = vst.msk [vmem:[#allocation4 + $0x70] sm:$0xff] %vm284_vm0, %v2477_v62  ;;  %v2874_v8 = vpop.f32.mrf.mxu0 }
 0x14d   : > { %332 = vst.msk [vmem:[#allocation4 + $0x78] sm:$0xff] %vm284_vm0, %v2477_v62  ;;  %3702 = vst [vmem:[#allocation20_spill] sm:$0xff] %v2850_v3  ;;  %v1297_v62 = vmax.f32 %v2857_v24, %v2862_v40  ;;  %v1294_v3 = vmax.f32 %v1293_v36, %v2854_v15  ;;  %v1302_v51 = vmax.f32 %v2869_v43, %v2874_v8  ;;  %v2880_v10 = vpop.f32.mrf.mxu1 }
 0x14e   : > { %3703 = vst [vmem:[#allocation21_spill] sm:$0xff] %v2854_v15  ;;  %3704 = vst [vmem:[#allocation22_spill] sm:$0xff] %v2857_v24  ;;  %v882_v15 = vld [vmem:[%s2602_s15 + $0x18] sm:$0xff] }
 0x14f   : > { %3705 = vst [vmem:[#allocation23_spill] sm:$0xff] %v2859_v31  ;;  %3706 = vst [vmem:[#allocation24_spill] sm:$0xff] %v2862_v40  ;;  %1295 = vmax.xlane.f32.xlu1 %v1294_v3  ;;  %v1298_v55 = vmax.f32 %v1297_v62, %v2859_v31  ;;  %v1303_v17 = vmax.f32 %v1302_v51, %v2872_v19  ;;  %v881_v3 = vld [vmem:[%s2602_s15 + $0x10] sm:$0xff]  ;;  %v883_v62 = vld [vmem:[%s2602_s15 + $0x20] sm:$0xff]  ;;  %v2886_v31 = vpop.permute.xlu0 %923 }
 0x150   : > { %3707 = vst [vmem:[#allocation25_spill] sm:$0xff] %v2866_v22  ;;  %3708 = vst [vmem:[#allocation26_spill] sm:$0xff] %v2869_v43  ;;  %v2888_v40 = vld [vmem:[#allocation2] sm:$0xff] }
 0x151   : > { %3709 = vst [vmem:[#allocation27_spill] sm:$0xff] %v2872_v19  ;;  %3710 = vst [vmem:[#allocation28_spill] sm:$0xff] %v2874_v8  ;;  %v1299_v12 = vmax.f32 %v1298_v55, %v2866_v22  ;;  %v1304_v36 = vmax.f32 %v1303_v17, %v2880_v10  ;;  %v2895_v55 = vld [vmem:[#allocation2 + $0x8] sm:$0xff]  ;;  %v890_v19 = vld [vmem:[%s2602_s15 + $0x58] sm:$0xff] }
 0x152   : > { %3711 = vst [vmem:[#allocation29_spill] sm:$0xff] %v2880_v10  ;;  %3712 = vst [vmem:[#allocation30_spill] sm:$0xff] %v2888_v40  ;;  %v892_v10 = vld [vmem:[%s2602_s15 + $0x68] sm:$0xff] }
 0x153   : > { %1300 = vmax.xlane.f32.xlu0 %v1299_v12  ;;  %1305 = vmax.xlane.f32.xlu1 %v1304_v36  ;;  %v2890_v8 = vpop.permute.xlu0 %926  ;;  %3714 = vst [vmem:[#allocation32_spill] sm:$0xff] %v2895_v55 }
 0x164   : > { %929 = vperm.xlu1 %2218, %v881_v3   ;;  %v2905_v3 = vld [vmem:[#allocation2 + $0x10] sm:$0xff] }
 0x165   : > { %3716 = vst [vmem:[#allocation34_spill] sm:$0xff] %v2905_v3 }
 0x168   : > { %935 = vperm.xlu1 %2218, %v883_v62  }
 0x169   : > { %932 = vperm.xlu0 %2217, %v882_v15  }
 0x1a0   : > { %v1231_v12 = vpop.xlane.xlu1 %1230 }
 0x1a1   : > { %v2893_v51 = vmax.f32 %v2888_v40, %v1231_v12  ;;  %v2915_v40 = vld [vmem:[#allocation2 + $0x18] sm:$0xff] }
 0x1a2   : > { %3718 = vst [vmem:[#allocation36_spill] sm:$0xff] %v2915_v40 }
 0x1a3   : > { %3713 = vst [vmem:[#allocation31_spill] sm:$0xff] %v2893_v51  ;;  %1787 = vst.msk [vmem:[#allocation2] sm:$0xff] %vm284_vm0, %v2893_v51  ;;  %1405 = vperm.xlu1 %2218, %v2893_v51  }
 0x1a4   : > { %v1236_v15 = vpop.xlane.xlu0 %1235 }
 0x1a5   : > { %v2903_v36 = vmax.f32 %v2895_v55, %v1236_v15  ;;  %v2925_v55 = vld [vmem:[#allocation2 + $0x20] sm:$0xff] }
 0x1a6   : > { %3720 = vst [vmem:[#allocation38_spill] sm:$0xff] %v2925_v55 }
 0x1a7   : > { %3715 = vst [vmem:[#allocation33_spill] sm:$0xff] %v2903_v36  ;;  %1788 = vst.msk [vmem:[#allocation2 + $0x8] sm:$0xff] %vm284_vm0, %v2903_v36  ;;  %1410 = vperm.xlu0 %2217, %v2903_v36   ;;  %v2935_v36 = vld [vmem:[#allocation2 + $0x28] sm:$0xff] }
 0x1a8   : > { %v1241_v12 = vpop.xlane.xlu0 %1240  ;;  %3722 = vst [vmem:[#allocation40_spill] sm:$0xff] %v2935_v36 }
 0x1a9   : > { %v2913_v17 = vmax.f32 %v2905_v3, %v1241_v12 }
 0x1ab   : > { %3717 = vst [vmem:[#allocation35_spill] sm:$0xff] %v2913_v17  ;;  %1789 = vst.msk [vmem:[#allocation2 + $0x10] sm:$0xff] %vm284_vm0, %v2913_v17  ;;  %1415 = vperm.xlu1 %2218, %v2913_v17   ;;  %v2945_v17 = vld [vmem:[#allocation2 + $0x30] sm:$0xff] }
 0x1ac   : > { %v1246_v62 = vpop.xlane.xlu1 %1245  ;;  %3724 = vst [vmem:[#allocation42_spill] sm:$0xff] %v2945_v17 }
 0x1ad   : > { %v2923_v51 = vmax.f32 %v2915_v40, %v1246_v62 }
 0x1af   : > { %3719 = vst [vmem:[#allocation37_spill] sm:$0xff] %v2923_v51  ;;  %1790 = vst.msk [vmem:[#allocation2 + $0x18] sm:$0xff] %vm284_vm0, %v2923_v51  ;;  %1420 = vperm.xlu0 %2217, %v2923_v51  }
 0x1b0   : > { %v1251_v15 = vpop.xlane.xlu0 %1250 }
 0x1b1   : > { %v2933_v3 = vmax.f32 %v2925_v55, %v1251_v15  ;;  %v2955_v55 = vld [vmem:[#allocation2 + $0x38] sm:$0xff] }
 0x1b2   : > { %3726 = vst [vmem:[#allocation44_spill] sm:$0xff] %v2955_v55 }
 0x1b3   : > { %3721 = vst [vmem:[#allocation39_spill] sm:$0xff] %v2933_v3  ;;  %1791 = vst.msk [vmem:[#allocation2 + $0x20] sm:$0xff] %vm284_vm0, %v2933_v3  ;;  %1425 = vperm.xlu1 %2218, %v2933_v3   ;;  %v2965_v3 = vld [vmem:[#allocation2 + $0x40] sm:$0xff] }
 0x1b4   : > { %v1256_v12 = vpop.xlane.xlu1 %1255  ;;  %3728 = vst [vmem:[#allocation46_spill] sm:$0xff] %v2965_v3 }
 0x1b5   : > { %v2943_v40 = vmax.f32 %v2935_v36, %v1256_v12 }
 0x1b7   : > { %3723 = vst [vmem:[#allocation41_spill] sm:$0xff] %v2943_v40  ;;  %1792 = vst.msk [vmem:[#allocation2 + $0x28] sm:$0xff] %vm284_vm0, %v2943_v40  ;;  %1430 = vperm.xlu0 %2217, %v2943_v40  }
 0x1b8   : > { %v1261_v62 = vpop.xlane.xlu0 %1260 }
 0x1b9   : > { %v2953_v51 = vmax.f32 %v2945_v17, %v1261_v62  ;;  %v2975_v17 = vld [vmem:[#allocation2 + $0x48] sm:$0xff] }
 0x1ba   : > { %3730 = vst [vmem:[#allocation48_spill] sm:$0xff] %v2975_v17 }
 0x1bb   : > { %3725 = vst [vmem:[#allocation43_spill] sm:$0xff] %v2953_v51  ;;  %1793 = vst.msk [vmem:[#allocation2 + $0x30] sm:$0xff] %vm284_vm0, %v2953_v51  ;;  %1435 = vperm.xlu1 %2218, %v2953_v51   ;;  %v2985_v51 = vld [vmem:[#allocation2 + $0x50] sm:$0xff] }
 0x1bc   : > { %v1266_v15 = vpop.xlane.xlu1 %1265  ;;  %3732 = vst [vmem:[#allocation50_spill] sm:$0xff] %v2985_v51 }
 0x1bd   : > { %v2963_v36 = vmax.f32 %v2955_v55, %v1266_v15 }
 0x1bf   : > { %3727 = vst [vmem:[#allocation45_spill] sm:$0xff] %v2963_v36  ;;  %1794 = vst.msk [vmem:[#allocation2 + $0x38] sm:$0xff] %vm284_vm0, %v2963_v36  ;;  %1440 = vperm.xlu0 %2217, %v2963_v36  }
 0x1c0   : > { %v1271_v12 = vpop.xlane.xlu0 %1270 }
 0x1c1   : > { %v2973_v40 = vmax.f32 %v2965_v3, %v1271_v12  ;;  %v2995_v3 = vld [vmem:[#allocation2 + $0x58] sm:$0xff] }
 0x1c2   : > { %3734 = vst [vmem:[#allocation52_spill] sm:$0xff] %v2995_v3 }
 0x1c3   : > { %3729 = vst [vmem:[#allocation47_spill] sm:$0xff] %v2973_v40  ;;  %1795 = vst.msk [vmem:[#allocation2 + $0x40] sm:$0xff] %vm284_vm0, %v2973_v40  ;;  %1445 = vperm.xlu1 %2218, %v2973_v40   ;;  %v3005_v40 = vld [vmem:[#allocation2 + $0x60] sm:$0xff] }
 0x1c4   : > { %v1276_v62 = vpop.xlane.xlu1 %1275  ;;  %3736 = vst [vmem:[#allocation54_spill] sm:$0xff] %v3005_v40 }
 0x1c5   : > { %v2983_v55 = vmax.f32 %v2975_v17, %v1276_v62 }
 0x1c7   : > { %3731 = vst [vmem:[#allocation49_spill] sm:$0xff] %v2983_v55  ;;  %1796 = vst.msk [vmem:[#allocation2 + $0x48] sm:$0xff] %vm284_vm0, %v2983_v55  ;;  %1450 = vperm.xlu0 %2217, %v2983_v55  }
 0x1c8   : > { %v1281_v15 = vpop.xlane.xlu0 %1280 }
 0x1c9   : > { %v2993_v36 = vmax.f32 %v2985_v51, %v1281_v15  ;;  %v3036_v51 = vld [vmem:[#allocation2 + $0x78] sm:$0xff] }
 0x1ca   : > { %3742 = vst [vmem:[#allocation60_spill] sm:$0xff] %v3036_v51 }
 0x1cb   : > { %3733 = vst [vmem:[#allocation51_spill] sm:$0xff] %v2993_v36  ;;  %1797 = vst.msk [vmem:[#allocation2 + $0x50] sm:$0xff] %vm284_vm0, %v2993_v36  ;;  %1455 = vperm.xlu1 %2218, %v2993_v36   ;;  %v3015_v36 = vld [vmem:[#allocation2 + $0x68] sm:$0xff] }
 0x1cc   : > { %v1286_v12 = vpop.xlane.xlu1 %1285  ;;  %3738 = vst [vmem:[#allocation56_spill] sm:$0xff] %v3015_v36 }
 0x1cd   : > { %v3003_v17 = vmax.f32 %v2995_v3, %v1286_v12 }
 0x1cf   : > { %3735 = vst [vmem:[#allocation53_spill] sm:$0xff] %v3003_v17  ;;  %1798 = vst.msk [vmem:[#allocation2 + $0x58] sm:$0xff] %vm284_vm0, %v3003_v17  ;;  %1460 = vperm.xlu0 %2217, %v3003_v17   ;;  %v3025_v17 = vld [vmem:[#allocation2 + $0x70] sm:$0xff] }
 0x1d0   : > { %v1291_v62 = vpop.xlane.xlu0 %1290  ;;  %3740 = vst [vmem:[#allocation58_spill] sm:$0xff] %v3025_v17 }
 0x1d1   : > { %v3013_v55 = vmax.f32 %v3005_v40, %v1291_v62  ;;  %v885_v40 = vld [vmem:[%s2602_s15 + $0x30] sm:$0xff] }
 0x1d3   : > { %3737 = vst [vmem:[#allocation55_spill] sm:$0xff] %v3013_v55  ;;  %1799 = vst.msk [vmem:[#allocation2 + $0x60] sm:$0xff] %vm284_vm0, %v3013_v55  ;;  %1465 = vperm.xlu1 %2218, %v3013_v55  }
 0x1d8   : > { %v1296_v15 = vpop.xlane.xlu1 %1295 }
 0x1d9   : > { %v3023_v3 = vmax.f32 %v3015_v36, %v1296_v15  ;;  %v884_v36 = vld [vmem:[%s2602_s15 + $0x28] sm:$0xff]  ;;  %v886_v15 = vld [vmem:[%s2602_s15 + $0x38] sm:$0xff] }
 0x1db   : > { %3739 = vst [vmem:[#allocation57_spill] sm:$0xff] %v3023_v3  ;;  %1800 = vst.msk [vmem:[#allocation2 + $0x68] sm:$0xff] %vm284_vm0, %v3023_v3  ;;  %1470 = vperm.xlu0 %2217, %v3023_v3   ;;  %v887_v3 = vld [vmem:[%s2602_s15 + $0x40] sm:$0xff] }
 0x1dc   : > { %v1301_v12 = vpop.xlane.xlu0 %1300  ;;  %v1306_v62 = vpop.xlane.xlu1 %1305 }
 0x1dd   : > { %v3034_v55 = vmax.f32 %v3025_v17, %v1301_v12  ;;  %v3046_v12 = vmax.f32 %v3036_v51, %v1306_v62  ;;  %v888_v17 = vld [vmem:[%s2602_s15 + $0x48] sm:$0xff]  ;;  %v893_v62 = vld [vmem:[%s2602_s15 + $0x70] sm:$0xff]  ;;  %v894_v51 = vld [vmem:[%s2602_s15 + $0x78] sm:$0xff] }
 0x1df   : > { %3741 = vst [vmem:[#allocation59_spill] sm:$0xff] %v3034_v55  ;;  %1801 = vst.msk [vmem:[#allocation2 + $0x70] sm:$0xff] %vm284_vm0, %v3034_v55  ;;  %941 = vperm.xlu0 %2217, %v885_v40   ;;  %1475 = vperm.xlu1 %2218, %v3034_v55   ;;  %v889_v40 = vld [vmem:[%s2602_s15 + $0x50] sm:$0xff]  ;;  %v891_v55 = vld [vmem:[%s2602_s15 + $0x60] sm:$0xff] }
 0x1e0   : > { %3743 = vst [vmem:[#allocation61_spill] sm:$0xff] %v3046_v12  ;;  %1802 = vst.msk [vmem:[#allocation2 + $0x78] sm:$0xff] %vm284_vm0, %v3046_v12 }
 0x1e3   : > { %947 = vperm.xlu0 %2217, %v887_v3   ;;  %938 = vperm.xlu1 %2218, %v884_v36   ;;  %v895_v36 = vlaneseq }
 0x1e5   : > { %v3061_v3 = vand.u32 127, %v895_v36  ;;  %v930_v36 = vpop.permute.xlu1 %929 }
 0x1e7   : > { %953 = vperm.xlu0 %2217, %v889_v40   ;;  %944 = vperm.xlu1 %2218, %v886_v15   ;;  %v3064_v40 = vadd.s32 128, %v3061_v3  ;;  %vm974_vm2 = vcmp.eq.s32.totalorder %v3061_v3, %v2890_v8  ;;  %vm970_vm7 = vcmp.eq.s32.totalorder %v3061_v3, %v2886_v31  ;;  %vm978_vm11 = vcmp.eq.s32.totalorder %v3061_v3, %v930_v36 }
 0x1e8   : > { %v1034_v24 = vsel %vm970_vm7, %v2659_v44, 0.0  ;;  %v1042_v47 = vsel %vm978_vm11, %v2681_v56, 0.0 }
 0x1e9   : > { %vm975_vm1 = vcmp.eq.s32.totalorder %v3064_v40, %v2890_v8  ;;  %vm971_vm6 = vcmp.eq.s32.totalorder %v3064_v40, %v2886_v31  ;;  %vm979_vm12 = vcmp.eq.s32.totalorder %v3064_v40, %v930_v36 }
 0x1ea   : > { %v1035_v22 = vsel %vm971_vm6, %v2663_v46, 0.0  ;;  %v1043_v41 = vsel %vm979_vm12, %v2686_v59, 0.0 }
 0x1eb   : > { %959 = vperm.xlu0 %2217, %v891_v55   ;;  %950 = vperm.xlu1 %2218, %v888_v17   ;;  %v933_v55 = vpop.permute.xlu0 %932  ;;  %v3069_v17 = vadd.s32 256, %v3061_v3 }
 0x1ec   : > { %vm982_vm3 = vcmp.eq.s32.totalorder %v3061_v3, %v933_v55  ;;  %vm983_vm4 = vcmp.eq.s32.totalorder %v3064_v40, %v933_v55 }
 0x1ed   : > { %vm976_vm5 = vcmp.eq.s32.totalorder %v3069_v17, %v2890_v8  ;;  %v1046_v15 = vsel %vm982_vm3, %v2693_v63, 0.0  ;;  %vm984_vm9 = vcmp.eq.s32.totalorder %v3069_v17, %v933_v55  ;;  %vm972_vm10 = vcmp.eq.s32.totalorder %v3069_v17, %v2886_v31 }
 0x1ee   : > { %v1040_v43 = vsel %vm976_vm5, %v2671_v50, 0.0  ;;  %v1048_v42 = vsel %vm984_vm9, %v2695_v0, 0.0 }
 0x1ef   : > { %965 = vperm.xlu0 %2217, %v893_v62   ;;  %956 = vperm.xlu1 %2218, %v890_v19   ;;  %v1038_v19 = vsel %vm974_vm2, %v2669_v49, 0.0  ;;  %v1047_v62 = vsel %vm983_vm4, %v2698_v2, 0.0  ;;  %vm980_vm2 = vcmp.eq.s32.totalorder %v3069_v17, %v930_v36 }
 0x1f3   : > { %962 = vperm.xlu1 %2218, %v892_v10   ;;  %1480 = vperm.xlu0 %2217, %v3046_v12   ;;  %v1039_v10 = vsel %vm975_vm1, %v2674_v52, 0.0  ;;  %v3084_v12 = vadd.s32 384, %v3061_v3 }
 0x1f5   : > { %vm977_vm8 = vcmp.eq.s32.totalorder %v3084_v12, %v2890_v8  ;;  %v1098_v8 = vadd.f32 %v1035_v22, %v1034_v24  ;;  %vm985_vm13 = vcmp.eq.s32.totalorder %v3084_v12, %v933_v55  ;;  %vm973_vm1 = vcmp.eq.s32.totalorder %v3084_v12, %v2886_v31 }
 0x1f6   : > { %v1041_v53 = vsel %vm977_vm8, %v2678_v54, 0.0  ;;  %v1049_v38 = vsel %vm985_vm13, %v2702_v4, 0.0  ;;  %v1037_v55 = vsel %vm973_vm1, %v2667_v48, 0.0  ;;  %vm981_vm3 = vcmp.eq.s32.totalorder %v3084_v12, %v930_v36 }
 0x1f7   : > { %968 = vperm.xlu1 %2218, %v894_v51   ;;  %v1103_v51 = vadd.f32 %v1039_v10, %v1038_v19  ;;  %v1113_v19 = vadd.f32 %v1047_v62, %v1046_v15  ;;  %v1036_v62 = vsel %vm972_vm10, %v2661_v45, 0.0 }
 0x1f9   : > { %v1104_v10 = vadd.f32 %v1103_v51, %v1040_v43  ;;  %v936_v43 = vpop.permute.xlu1 %935  ;;  %v1114_v15 = vadd.f32 %v1113_v19, %v1048_v42  ;;  %v1108_v42 = vadd.f32 %v1043_v41, %v1042_v47  ;;  %v1044_v19 = vsel %vm980_vm2, %v2683_v57, 0.0 }
 0x1fa   : > { %vm986_vm14 = vcmp.eq.s32.totalorder %v3061_v3, %v936_v43  ;;  %vm987_vm15 = vcmp.eq.s32.totalorder %v3064_v40, %v936_v43  ;;  %vm988_vm4 = vcmp.eq.s32.totalorder %v3069_v17, %v936_v43  ;;  %vm989_vm5 = vcmp.eq.s32.totalorder %v3084_v12, %v936_v43 }
 0x1fb   : > { %v1105_v51 = vadd.f32 %v1104_v10, %v1041_v53  ;;  %v1115_v32 = vadd.f32 %v1114_v15, %v1049_v38  ;;  %v1099_v53 = vadd.f32 %v1098_v8, %v1036_v62  ;;  %v1050_v22 = vsel %vm986_vm14, %v2705_v6, 0.0 }
 0x1fc   : > { %v1051_v24 = vsel %vm987_vm15, %v2710_v9, 0.0  ;;  %v1109_v38 = vadd.f32 %v1108_v42, %v1044_v19  ;;  %v1045_v8 = vsel %vm981_vm3, %v2690_v61, 0.0 }
 0x1fd   : > { %v1100_v10 = vadd.f32 %v1099_v53, %v1037_v55  ;;  %v1118_v31 = vadd.f32 %v1051_v24, %v1050_v22 }
 0x1fe   : > { %v1110_v41 = vadd.f32 %v1109_v38, %v1045_v8 }
 0x212   : > { %1106 = vadd.xlane.f32.xlu0 %v1105_v51  ;;  %v1053_v51 = vsel %vm989_vm5, %v2714_v11, 0.0 }
 0x216   : > { %1116 = vadd.xlane.f32.xlu0 %v1115_v32  ;;  %v1052_v32 = vsel %vm988_vm4, %v2707_v7, 0.0 }
 0x217   : > { %v1119_v47 = vadd.f32 %v1118_v31, %v1052_v32 }
 0x219   : > { %v1120_v15 = vadd.f32 %v1119_v47, %v1053_v51 }
 0x21b   : > { %1101 = vadd.xlane.f32.xlu1 %v1100_v10 }
 0x21e   : > { %v1406_v24 = vpop.permute.xlu1 %1405 }
 0x21f   : > { %1111 = vadd.xlane.f32.xlu1 %v1110_v41  ;;  %v1483_v43 = vsub.f32 %v2659_v44, %v1406_v24  ;;  %v1484_v31 = vsub.f32 %v2663_v46, %v1406_v24  ;;  %v1485_v8 = vsub.f32 %v2661_v45, %v1406_v24 }
 0x221   : > { %v1551_v32 = vmul.f32 1.442695, %v1485_v8 }
 0x222   : > { %v1411_v62 = vpop.permute.xlu0 %1410 }
 0x223   : > { %1121 = vadd.xlane.f32.xlu1 %v1120_v15  ;;  %v1487_v36 = vsub.f32 %v2669_v49, %v1411_v62  ;;  %v1488_v53 = vsub.f32 %v2674_v52, %v1411_v62  ;;  %v1489_v42 = vsub.f32 %v2671_v50, %v1411_v62  ;;  %v1490_v22 = vsub.f32 %v2678_v54, %v1411_v62 }
 0x224   : > { %v1486_v52 = vsub.f32 %v2667_v48, %v1406_v24  ;;  %v1547_v50 = vmul.f32 1.442695, %v1483_v43  ;;  %v1549_v54 = vmul.f32 1.442695, %v1484_v31 }
 0x225   : > { %v1555_v55 = vmul.f32 1.442695, %v1487_v36  ;;  %v1557_v10 = vmul.f32 1.442695, %v1488_v53  ;;  %v1559_v19 = vmul.f32 1.442695, %v1489_v42 }
 0x226   : > { %v1561_v38 = vmul.f32 1.442695, %v1490_v22  ;;  %v1416_v49 = vpop.permute.xlu1 %1415  ;;  %v1553_v15 = vmul.f32 1.442695, %v1486_v52 }
 0x227   : > { %2259 = vpow2.f32 %v1555_v55  ;;  %v1491_v45 = vsub.f32 %v2681_v56, %v1416_v49  ;;  %v1492_v36 = vsub.f32 %v2686_v59, %v1416_v49 }
 0x228   : > { %2261 = vpow2.f32 %v1557_v10 }
 0x229   : > { %2263 = vpow2.f32 %v1559_v19  ;;  %v1563_v22 = vmul.f32 1.442695, %v1491_v45  ;;  %v1565_v24 = vmul.f32 1.442695, %v1492_v36  ;;  %v1494_v19 = vsub.f32 %v2690_v61, %v1416_v49 }
 0x22a   : > { %2265 = vpow2.f32 %v1561_v38 }
 0x22b   : > { %2267 = vpow2.f32 %v1547_v50 }
 0x22c   : > { %2269 = vpow2.f32 %v1549_v54 }
 0x22d   : > { %2271 = vpow2.f32 %v1551_v32 }
 0x22e   : > { %v1426_v41 = vpop.permute.xlu1 %1425 }
 0x22f   : > { %v1499_v47 = vsub.f32 %v2705_v6, %v1426_v41  ;;  %v1500_v51 = vsub.f32 %v2710_v9, %v1426_v41  ;;  %v1501_v44 = vsub.f32 %v2707_v7, %v1426_v41  ;;  %v1502_v46 = vsub.f32 %v2714_v11, %v1426_v41  ;;  %v1421_v11 = vpop.permute.xlu0 %1420 }
 0x230   : > { %v1493_v6 = vsub.f32 %v2683_v57, %v1416_v49  ;;  %v1495_v50 = vsub.f32 %v2693_v63, %v1421_v11  ;;  %v1496_v61 = vsub.f32 %v2698_v2, %v1421_v11  ;;  %v1498_v63 = vsub.f32 %v2702_v4, %v1421_v11 }
 0x231   : > { %v1579_v62 = vmul.f32 1.442695, %v1499_v47  ;;  %v1581_v48 = vmul.f32 1.442695, %v1500_v51  ;;  %v1583_v53 = vmul.f32 1.442695, %v1501_v44  ;;  %v1497_v51 = vsub.f32 %v2695_v0, %v1421_v11 }
 0x232   : > { %v1585_v9 = vmul.f32 1.442695, %v1502_v46  ;;  %v1567_v57 = vmul.f32 1.442695, %v1493_v6  ;;  %v1569_v47 = vmul.f32 1.442695, %v1494_v19 }
 0x233   : > { %2273 = vpow2.f32 %v1579_v62  ;;  %v1571_v46 = vmul.f32 1.442695, %v1495_v50  ;;  %v1573_v62 = vmul.f32 1.442695, %v1496_v61 }
 0x234   : > { %v2260_v42 = vpop.eup %2259  ;;  %2275 = vpow2.f32 %v1581_v48  ;;  %v1431_v48 = vpop.permute.xlu0 %1430 }
 0x235   : > { %v2262_v7 = vpop.eup %2261  ;;  %2277 = vpow2.f32 %v1553_v15  ;;  %v1503_v4 = vsub.f32 %v2717_v13, %v1431_v48 }
 0x236   : > { %2279 = vpow2.f32 %v1583_v53  ;;  %v1436_v55 = vpop.permute.xlu1 %1435  ;;  %v1680_v56 = vadd.f32 %v2262_v7, %v2260_v42  ;;  %v2264_v10 = vpop.eup %2263 }
 0x237   : > { %v1507_v59 = vsub.f32 %v2729_v20, %v1436_v55  ;;  %v1508_v43 = vsub.f32 %v2734_v23, %v1436_v55  ;;  %v1509_v38 = vsub.f32 %v2731_v21, %v1436_v55  ;;  %2281 = vpow2.f32 %v1585_v9  ;;  %v2266_v52 = vpop.eup %2265 }
 0x238   : > { %v1510_v31 = vsub.f32 %v2738_v25, %v1436_v55  ;;  %v1681_v8 = vadd.f32 %v2264_v10, %v1680_v56  ;;  %2283 = vpow2.f32 %v1563_v22  ;;  %v3143_v15 = vpop.eup %2267  ;;  %v1575_v9 = vmul.f32 1.442695, %v1497_v51 }
 0x239   : > { %v1595_v54 = vmul.f32 1.442695, %v1507_v59  ;;  %v1597_v32 = vmul.f32 1.442695, %v1508_v43  ;;  %2285 = vpow2.f32 %v1565_v24  ;;  %v1599_v49 = vmul.f32 1.442695, %v1509_v38  ;;  %v3145_v45 = vpop.eup %2269 }
 0x23a   : > { %v1682_v41 = vadd.f32 %v2266_v52, %v1681_v8  ;;  %v1601_v44 = vmul.f32 1.442695, %v1510_v31  ;;  %v3148_v36 = vpop.eup %2271  ;;  %v1504_v56 = vsub.f32 %v2722_v16, %v1431_v48  ;;  %v1577_v43 = vmul.f32 1.442695, %v1498_v63  ;;  %v3160_v61 = vpop.permute.xlu0 %1440 }
 0x23b   : > { %2287 = vpow2.f32 %v1595_v54  ;;  %v1505_v38 = vsub.f32 %v2719_v14, %v1431_v48  ;;  %v1587_v52 = vmul.f32 1.442695, %v1503_v4  ;;  %v1506_v54 = vsub.f32 %v2726_v18, %v1431_v48 }
 0x23c   : > { %2289 = vpow2.f32 %v1597_v32  ;;  %1683 = vadd.xlane.f32.xlu1 %v1682_v41  ;;  %v1589_v32 = vmul.f32 1.442695, %v1504_v56  ;;  %v1511_v48 = vsub.f32 %v2741_v27, %v3160_v61 }
 0x23d   : > { %2291 = vpow2.f32 %v1567_v57  ;;  %v1591_v63 = vmul.f32 1.442695, %v1505_v38 }
 0x23e   : > { %2293 = vpow2.f32 %v1599_v49  ;;  %v1446_v2 = vpop.permute.xlu1 %1445 }
 0x23f   : > { %2295 = vpow2.f32 %v1569_v47  ;;  %v1515_v0 = vsub.f32 %v2753_v34, %v1446_v2  ;;  %v1516_v53 = vsub.f32 %v2758_v37, %v1446_v2  ;;  %v1517_v42 = vsub.f32 %v2755_v35, %v1446_v2 }
 0x240   : > { %v2274_v6 = vpop.eup %2273  ;;  %2297 = vpow2.f32 %v1601_v44  ;;  %v1518_v7 = vsub.f32 %v2762_v39, %v1446_v2 }
 0x241   : > { %v2276_v22 = vpop.eup %2275  ;;  %2299 = vpow2.f32 %v1571_v46  ;;  %v1611_v24 = vmul.f32 1.442695, %v1515_v0  ;;  %v1613_v11 = vmul.f32 1.442695, %v1516_v53  ;;  %v1615_v10 = vmul.f32 1.442695, %v1517_v42 }
 0x242   : > { %v3155_v55 = vpop.eup %2277  ;;  %2301 = vpow2.f32 %v1573_v62  ;;  %v1695_v19 = vadd.f32 %v2276_v22, %v2274_v6  ;;  %v1617_v57 = vmul.f32 1.442695, %v1518_v7  ;;  %v1593_v6 = vmul.f32 1.442695, %v1506_v54 }
 0x243   : > { %v2280_v59 = vpop.eup %2279  ;;  %2303 = vpow2.f32 %v1611_v24 }
 0x244   : > { %2305 = vpow2.f32 %v1613_v11  ;;  %v1696_v31 = vadd.f32 %v2280_v59, %v1695_v19  ;;  %v2282_v8 = vpop.eup %2281  ;;  %v1512_v19 = vsub.f32 %v2746_v30, %v3160_v61  ;;  %v1603_v59 = vmul.f32 1.442695, %v1511_v48 }
 0x245   : > { %2307 = vpow2.f32 %v1575_v9  ;;  %v2284_v50 = vpop.eup %2283  ;;  %v3169_v9 = vpop.permute.xlu0 %1450 }
 0x246   : > { %2309 = vpow2.f32 %v1615_v10  ;;  %v1456_v49 = vpop.permute.xlu1 %1455  ;;  %v1697_v41 = vadd.f32 %v2282_v8, %v1696_v31  ;;  %v2286_v47 = vpop.eup %2285 }
 0x247   : > { %2311 = vpow2.f32 %v1577_v43  ;;  %v1523_v51 = vsub.f32 %v2777_v58, %v1456_v49  ;;  %v1524_v44 = vsub.f32 %v2782_v1, %v1456_v49  ;;  %v1525_v62 = vsub.f32 %v2779_v60, %v1456_v49 }
 0x248   : > { %v2288_v46 = vpop.eup %2287  ;;  %2313 = vpow2.f32 %v1617_v57  ;;  %1698 = vadd.xlane.f32.xlu1 %v1697_v41  ;;  %v1526_v7 = vsub.f32 %v2786_v5, %v1456_v49  ;;  %v1685_v48 = vadd.f32 %v2286_v47, %v2284_v50 }
 0x249   : > { %v2290_v2 = vpop.eup %2289  ;;  %2315 = vpow2.f32 %v1587_v52  ;;  %v1627_v0 = vmul.f32 1.442695, %v1523_v51  ;;  %v1629_v53 = vmul.f32 1.442695, %v1524_v44  ;;  %v1631_v11 = vmul.f32 1.442695, %v1525_v62 }
 0x24a   : > { %v3167_v42 = vpop.eup %2291  ;;  %2317 = vpow2.f32 %v1589_v32  ;;  %v1705_v22 = vadd.f32 %v2290_v2, %v2288_v46  ;;  %v1633_v38 = vmul.f32 1.442695, %v1526_v7  ;;  %v3176_v57 = vpop.permute.xlu0 %1460  ;;  %v1675_v52 = vadd.f32 %v3145_v45, %v3143_v15  ;;  %v3744_v46 = vld [vmem:[#allocation8_spill] sm:$0xff]  ;;  %v3745_v62 = vld [vmem:[#allocation17_spill] sm:$0xff] }
 0x24b   : > { %v2294_v4 = vpop.eup %2293  ;;  %2319 = vpow2.f32 %v1627_v0  ;;  %v1513_v32 = vsub.f32 %v2743_v28, %v3160_v61  ;;  %v1605_v45 = vmul.f32 1.442695, %v1512_v19  ;;  %v3746_v7 = vld [vmem:[#allocation9_spill] sm:$0xff] }
 0x24c   : > { %v3172_v24 = vpop.eup %2295  ;;  %2321 = vpow2.f32 %v1629_v53  ;;  %v1706_v56 = vadd.f32 %v2294_v4, %v1705_v22  ;;  %v1519_v22 = vsub.f32 %v3746_v7, %v3169_v9 }
 0x24d   : > { %v2298_v10 = vpop.eup %2297  ;;  %2323 = vpow2.f32 %v1591_v63  ;;  %v1514_v63 = vsub.f32 %v3744_v46, %v3160_v61 }
 0x24e   : > { %v2300_v43 = vpop.eup %2299  ;;  %2325 = vpow2.f32 %v1593_v6  ;;  %v1466_v31 = vpop.permute.xlu1 %1465  ;;  %v1707_v8 = vadd.f32 %v2298_v10, %v1706_v56 }
 0x24f   : > { %v2302_v54 = vpop.eup %2301  ;;  %v1531_v49 = vsub.f32 %v2801_v26, %v1466_v31  ;;  %v1532_v41 = vsub.f32 %v2806_v33, %v1466_v31  ;;  %v1533_v51 = vsub.f32 %v2803_v29, %v1466_v31  ;;  %2327 = vpow2.f32 %v1631_v11 }
 0x250   : > { %v2304_v44 = vpop.eup %2303  ;;  %v1534_v2 = vsub.f32 %v3745_v62, %v1466_v31  ;;  %1708 = vadd.xlane.f32.xlu1 %v1707_v8  ;;  %2329 = vpow2.f32 %v1603_v59  ;;  %v1607_v11 = vmul.f32 1.442695, %v1513_v32  ;;  %v3747_v31 = vld [vmem:[#allocation11_spill] sm:$0xff]  ;;  %v1690_v50 = vadd.f32 %v2302_v54, %v2300_v43  ;;  %v3749_v32 = vld [vmem:[#allocation12_spill] sm:$0xff] }
 0x251   : > { %v2306_v15 = vpop.eup %2305  ;;  %v1643_v0 = vmul.f32 1.442695, %v1531_v49  ;;  %v1645_v53 = vmul.f32 1.442695, %v1532_v41  ;;  %2331 = vpow2.f32 %v1633_v38  ;;  %v1647_v4 = vmul.f32 1.442695, %v1533_v51 }
 0x252   : > { %v2308_v6 = vpop.eup %2307  ;;  %v1715_v10 = vadd.f32 %v2306_v15, %v2304_v44  ;;  %v1520_v8 = vsub.f32 %v3747_v31, %v3169_v9  ;;  %v1649_v19 = vmul.f32 1.442695, %v1534_v2  ;;  %v3197_v49 = vadd.f32 %v3148_v36, %v1675_v52  ;;  %v3748_v51 = vld [vmem:[#allocation10_spill] sm:$0xff] }
 0x253   : > { %v2310_v61 = vpop.eup %2309  ;;  %2333 = vpow2.f32 %v1643_v0  ;;  %v1609_v41 = vmul.f32 1.442695, %v1514_v63  ;;  %v1521_v44 = vsub.f32 %v3748_v51, %v3169_v9  ;;  %v1522_v15 = vsub.f32 %v3749_v32, %v3169_v9  ;;  %v3750_v63 = vld [vmem:[#allocation22_spill] sm:$0xff]  ;;  %v3751_v9 = vld [vmem:[#allocation24_spill] sm:$0xff]  ;;  %v3753_v51 = vld [vmem:[#allocation25_spill] sm:$0xff] }
 0x254   : > { %v3194_v47 = vpop.eup %2311  ;;  %2335 = vpow2.f32 %v1645_v53  ;;  %v1716_v59 = vadd.f32 %v2310_v61, %v1715_v10  ;;  %v1619_v0 = vmul.f32 1.442695, %v1519_v22  ;;  %v3206_v53 = vadd.f32 %v3167_v42, %v1685_v48  ;;  %v3752_v22 = vld [vmem:[#allocation23_spill] sm:$0xff] }
 0x255   : > { %v2314_v38 = vpop.eup %2313  ;;  %2337 = vpow2.f32 %v1605_v45  ;;  %v1621_v52 = vmul.f32 1.442695, %v1520_v8  ;;  %v3209_v10 = vadd.f32 %v2308_v6, %v1690_v50  ;;  %v1623_v42 = vmul.f32 1.442695, %v1521_v44 }
 0x256   : > { %v3190_v56 = vpop.permute.xlu0 %1470  ;;  %v2316_v46 = vpop.eup %2315  ;;  %2339 = vpow2.f32 %v1647_v4  ;;  %v1717_v2 = vadd.f32 %v2314_v38, %v1716_v59  ;;  %v1625_v48 = vmul.f32 1.442695, %v1522_v15 }
 0x257   : > { %v2318_v36 = vpop.eup %2317  ;;  %2341 = vpow2.f32 %v1607_v11 }
 0x258   : > { %v2320_v61 = vpop.eup %2319  ;;  %2343 = vpow2.f32 %v1649_v19  ;;  %1718 = vadd.xlane.f32.xlu1 %v1717_v2  ;;  %v3218_v31 = vadd.f32 %v2318_v36, %v2316_v46  ;;  %v3756_v46 = vld [vmem:[#allocation14_spill] sm:$0xff] }
 0x259   : > { %v2322_v59 = vpop.eup %2321  ;;  %2345 = vpow2.f32 %v1609_v41  ;;  %v3755_v41 = vld [vmem:[#allocation15_spill] sm:$0xff]  ;;  %v1529_v36 = vsub.f32 %v3756_v46, %v3176_v57  ;;  %v3758_v46 = vld [vmem:[#allocation18_spill] sm:$0xff] }
 0x25a   : > { %v3203_v43 = vpop.permute.xlu0 %941  ;;  %v1476_v54 = vpop.permute.xlu1 %1475  ;;  %2347 = vpow2.f32 %v1619_v0  ;;  %v1528_v44 = vsub.f32 %v3755_v41, %v3176_v57 }
 0x25b   : > { %v1539_v45 = vsub.f32 %v3750_v63, %v1476_v54  ;;  %v1540_v32 = vsub.f32 %v3751_v9, %v1476_v54  ;;  %v1541_v4 = vsub.f32 %v3752_v22, %v1476_v54  ;;  %v1542_v28 = vsub.f32 %v3753_v51, %v1476_v54  ;;  %v3214_v11 = vpop.eup %2323  ;;  %v3754_v54 = vld [vmem:[#allocation13_spill] sm:$0xff] }
 0x25c   : > { %v3220_v7 = vpop.eup %2325  ;;  %v1527_v2 = vsub.f32 %v3754_v54, %v3176_v57  ;;  %vm994_vm10 = vcmp.eq.s32.totalorder %v3061_v3, %v3203_v43  ;;  %vm995_vm11 = vcmp.eq.s32.totalorder %v3064_v40, %v3203_v43  ;;  %vm996_vm14 = vcmp.eq.s32.totalorder %v3069_v17, %v3203_v43 }
 0x25d   : > { %v1659_v38 = vmul.f32 1.442695, %v1539_v45  ;;  %v1661_v8 = vmul.f32 1.442695, %v1540_v32  ;;  %v1663_v6 = vmul.f32 1.442695, %v1541_v4  ;;  %v1725_v32 = vadd.f32 %v2322_v59, %v2320_v61  ;;  %v2328_v0 = vpop.eup %2327 }
 0x25e   : > { %v3216_v50 = vpop.permute.xlu0 %947  ;;  %v939_v19 = vpop.permute.xlu1 %938  ;;  %v1665_v15 = vmul.f32 1.442695, %v1542_v28  ;;  %v1637_v59 = vmul.f32 1.442695, %v1528_v44  ;;  %v3760_v44 = vld [vmem:[#allocation19_spill] sm:$0xff]  ;;  %vm997_vm2 = vcmp.eq.s32.totalorder %v3084_v12, %v3203_v43 }
 0x25f   : > { %2349 = vpow2.f32 %v1659_v38  ;;  %vm990_vm6 = vcmp.eq.s32.totalorder %v3061_v3, %v939_v19  ;;  %vm991_vm7 = vcmp.eq.s32.totalorder %v3064_v40, %v939_v19  ;;  %v3232_v54 = vpop.eup %2329  ;;  %v3757_v38 = vld [vmem:[#allocation16_spill] sm:$0xff]  ;;  %v1726_v28 = vadd.f32 %v2328_v0, %v1725_v32 }
 0x260   : > { %2351 = vpow2.f32 %v1661_v8  ;;  %v1054_v45 = vsel %vm990_vm6, %v2717_v13, 0.0  ;;  %v1055_v4 = vsel %vm991_vm7, %v2722_v16, 0.0  ;;  %v1530_v41 = vsub.f32 %v3757_v38, %v3176_v57  ;;  %v2332_v61 = vpop.eup %2331  ;;  %v3759_v32 = vld [vmem:[#allocation20_spill] sm:$0xff] }
 0x261   : > { %2353 = vpow2.f32 %v1621_v52  ;;  %vm992_vm8 = vcmp.eq.s32.totalorder %v3069_v17, %v939_v19  ;;  %v1635_v52 = vmul.f32 1.442695, %v1527_v2  ;;  %v1535_v13 = vsub.f32 %v3758_v46, %v3190_v56  ;;  %v2334_v30 = vpop.eup %2333 }
 0x262   : > { %2355 = vpow2.f32 %v1663_v6  ;;  %v3236_v8 = vpop.permute.xlu0 %953  ;;  %v1727_v16 = vadd.f32 %v2332_v61, %v1726_v28  ;;  %vm993_vm9 = vcmp.eq.s32.totalorder %v3084_v12, %v939_v19  ;;  %v1123_v27 = vadd.f32 %v1055_v4, %v1054_v45  ;;  %v2336_v57 = vpop.eup %2335 }
 0x263   : > { %2357 = vpow2.f32 %v1623_v42  ;;  %v1639_v6 = vmul.f32 1.442695, %v1529_v36  ;;  %v1536_v0 = vsub.f32 %v3759_v32, %v3190_v56  ;;  %v1056_v38 = vsel %vm992_vm8, %v2719_v14, 0.0  ;;  %v3245_v42 = vpop.eup %2337 }
 0x264   : > { %2359 = vpow2.f32 %v1665_v15  ;;  %v1641_v2 = vmul.f32 1.442695, %v1530_v41  ;;  %v1537_v46 = vsub.f32 %v3760_v44, %v3190_v56  ;;  %1728 = vadd.xlane.f32.xlu1 %v1727_v16  ;;  %v1124_v28 = vadd.f32 %v1123_v27, %v1056_v38  ;;  %v2340_v45 = vpop.eup %2339 }
 0x265   : > { %2361 = vpow2.f32 %v1625_v48  ;;  %v1735_v61 = vadd.f32 %v2336_v57, %v2334_v30  ;;  %v1057_v14 = vsel %vm993_vm9, %v2726_v18, 0.0  ;;  %v3258_v48 = vpop.eup %2341  ;;  %v1651_v41 = vmul.f32 1.442695, %v1535_v13 }
 0x266   : > { %v3249_v15 = vpop.permute.xlu0 %959  ;;  %2363 = vpow2.f32 %v1635_v52  ;;  %v1125_v36 = vadd.f32 %v1124_v28, %v1057_v14  ;;  %v2344_v27 = vpop.eup %2343  ;;  %v1653_v30 = vmul.f32 1.442695, %v1536_v0  ;;  %v1655_v52 = vmul.f32 1.442695, %v1537_v46 }
 0x267   : > { %2365 = vpow2.f32 %v1637_v59  ;;  %v1736_v4 = vadd.f32 %v2340_v45, %v1735_v61  ;;  %v3260_v38 = vpop.eup %2345  ;;  %v1058_v18 = vsel %vm994_vm10, %v2729_v20, 0.0  ;;  %v1059_v19 = vsel %vm995_vm11, %v2734_v23, 0.0 }
 0x268   : > { %2367 = vpow2.f32 %v1639_v6  ;;  %1126 = vadd.xlane.f32.xlu0 %v1125_v36  ;;  %v3272_v59 = vpop.eup %2347  ;;  %vm1002_vm12 = vcmp.eq.s32.totalorder %v3061_v3, %v3216_v50  ;;  %vm1003_vm13 = vcmp.eq.s32.totalorder %v3064_v40, %v3216_v50  ;;  %v1677_v46 = vadd.f32 %v3155_v55, %v3197_v49 }
 0x269   : > { %v1737_v57 = vadd.f32 %v2344_v27, %v1736_v4  ;;  %2369 = vpow2.f32 %v1641_v2  ;;  %v1687_v20 = vadd.f32 %v3172_v24, %v3206_v53  ;;  %v1692_v23 = vadd.f32 %v3194_v47, %v3209_v10  ;;  %v3761_v2 = vld [vmem:[#allocation21_spill] sm:$0xff]  ;;  %v3762_v53 = vld [vmem:[#allocation26_spill] sm:$0xff] }
 0x26a   : > { %v3262_v16 = vpop.permute.xlu0 %965  ;;  %2371 = vpow2.f32 %v1651_v41  ;;  %v1701_v6 = vadd.f32 %v3214_v11, %v3218_v31  ;;  %v1538_v28 = vsub.f32 %v3761_v2, %v3190_v56  ;;  %v1128_v55 = vadd.f32 %v1059_v19, %v1058_v18  ;;  %v3763_v11 = vld [vmem:[#allocation28_spill] sm:$0xff] }
 0x26b   : > { %1738 = vadd.xlane.f32.xlu1 %v1737_v57  ;;  %2373 = vpow2.f32 %v1653_v30  ;;  %v1066_v31 = vsel %vm1002_vm12, %v2753_v34, 0.0  ;;  %v1067_v56 = vsel %vm1003_vm13, %v2758_v37, 0.0  ;;  %vm1010_vm15 = vcmp.eq.s32.totalorder %v3061_v3, %v3236_v8  ;;  %v3764_v57 = vld [vmem:[#allocation27_spill] sm:$0xff] }
 0x26c   : > { %v2350_v13 = vpop.eup %2349  ;;  %2375 = vpow2.f32 %v1655_v52  ;;  %1678 = vadd.xlane.f32.xlu0 %v1677_v46  ;;  %vm1011_vm1 = vcmp.eq.s32.totalorder %v3064_v40, %v3236_v8  ;;  %v1060_v37 = vsel %vm996_vm14, %v2731_v21, 0.0  ;;  %vm1004_vm3 = vcmp.eq.s32.totalorder %v3069_v17, %v3216_v50 }
 0x26d   : > { %v2352_v0 = vpop.eup %2351  ;;  %v1129_v27 = vadd.f32 %v1128_v55, %v1060_v37  ;;  %v1138_v30 = vadd.f32 %v1067_v56, %v1066_v31  ;;  %v1074_v21 = vsel %vm1010_vm15, %v2777_v58, 0.0  ;;  %v1075_v46 = vsel %vm1011_vm1, %v2782_v1, 0.0  ;;  %v3351_v31 = vpop.permute.xlu1 %944 }
 0x26e   : > { %v2354_v49 = vpop.eup %2353  ;;  %v3290_v61 = vpop.permute.xlu0 %1480  ;;  %v1745_v24 = vadd.f32 %v2352_v0, %v2350_v13  ;;  %v1657_v13 = vmul.f32 1.442695, %v1538_v28  ;;  %v1702_v0 = vadd.f32 %v3220_v7, %v1701_v6  ;;  %v1710_v55 = vadd.f32 %v3245_v42, %v3232_v54 }
 0x26f   : > { %v2356_v47 = vpop.eup %2355  ;;  %v1543_v10 = vsub.f32 %v3762_v53, %v3290_v61  ;;  %v1544_v45 = vsub.f32 %v3763_v11, %v3290_v61  ;;  %v1545_v18 = vsub.f32 %v3764_v57, %v3290_v61  ;;  %vm1018_vm4 = vcmp.eq.s32.totalorder %v3061_v3, %v3249_v15 }
 0x270   : > { %v3308_v14 = vpop.eup %2357  ;;  %v1746_v34 = vadd.f32 %v2356_v47, %v1745_v24  ;;  %1688 = vadd.xlane.f32.xlu0 %v1687_v20  ;;  %vm1019_vm5 = vcmp.eq.s32.totalorder %v3064_v40, %v3249_v15  ;;  %v1061_v58 = vsel %vm997_vm2, %v2738_v25, 0.0  ;;  %vm1005_vm6 = vcmp.eq.s32.totalorder %v3084_v12, %v3216_v50  ;;  %v3765_v20 = vld [vmem:[#allocation29_spill] sm:$0xff] }
 0x271   : > { %v2360_v41 = vpop.eup %2359  ;;  %v1667_v36 = vmul.f32 1.442695, %v1543_v10  ;;  %v1669_v4 = vmul.f32 1.442695, %v1544_v45  ;;  %v1068_v7 = vsel %vm1004_vm3, %v2755_v35, 0.0  ;;  %vm1012_vm7 = vcmp.eq.s32.totalorder %v3069_v17, %v3236_v8 }
 0x272   : > { %v3318_v52 = vpop.eup %2361  ;;  %v1747_v19 = vadd.f32 %v2360_v41, %v1746_v34  ;;  %v1148_v54 = vadd.f32 %v1075_v46, %v1074_v21  ;;  %v1546_v6 = vsub.f32 %v3765_v20, %v3290_v61  ;;  %v1671_v28 = vmul.f32 1.442695, %v1545_v18 }
 0x273   : > { %2377 = vpow2.f32 %v1667_v36  ;;  %v2364_v24 = vpop.eup %2363  ;;  %v1130_v25 = vadd.f32 %v1129_v27, %v1061_v58  ;;  %v1139_v43 = vadd.f32 %v1138_v30, %v1068_v7  ;;  %v1711_v56 = vadd.f32 %v3258_v48, %v1710_v55 }
 0x274   : > { %2379 = vpow2.f32 %v1669_v4  ;;  %1748 = vadd.xlane.f32.xlu1 %v1747_v19  ;;  %v2366_v1 = vpop.eup %2365  ;;  %1693 = vadd.xlane.f32.xlu0 %v1692_v23  ;;  %v1720_v47 = vadd.f32 %v2354_v49, %v3272_v59  ;;  %v1082_v35 = vsel %vm1018_vm4, %v2801_v26, 0.0  ;;  %v1083_v61 = vsel %vm1019_vm5, %v2806_v33, 0.0  ;;  %v3390_v4 = vpop.permute.xlu1 %950 }
 0x275   : > { %v2368_v42 = vpop.eup %2367  ;;  %2381 = vpow2.f32 %v1657_v13  ;;  %vm1026_vm8 = vcmp.eq.s32.totalorder %v3061_v3, %v3262_v16  ;;  %vm1027_vm9 = vcmp.eq.s32.totalorder %v3064_v40, %v3262_v16  ;;  %v1076_v48 = vsel %vm1012_vm7, %v2779_v60, 0.0 }
 0x276   : > { %v2370_v10 = vpop.eup %2369  ;;  %v1069_v33 = vsel %vm1005_vm6, %v2762_v39, 0.0  ;;  %vm1013_vm10 = vcmp.eq.s32.totalorder %v3084_v12, %v3236_v8  ;;  %v1149_v59 = vadd.f32 %v1148_v54, %v1076_v48  ;;  %vm1020_vm11 = vcmp.eq.s32.totalorder %v3069_v17, %v3249_v15 }
 0x277   : > { %v2372_v26 = vpop.eup %2371  ;;  %2383 = vpow2.f32 %v1671_v28  ;;  %v1673_v49 = vmul.f32 1.442695, %v1546_v6  ;;  %v1140_v45 = vadd.f32 %v1139_v43, %v1069_v33  ;;  %v1158_v34 = vadd.f32 %v1083_v61, %v1082_v35  ;;  %v3770_v61 = vld [vmem:[#allocation6_spill] sm:$0xff] }
 0x278   : > { %1131 = vadd.xlane.f32.xlu1 %v1130_v25  ;;  %v2374_v23 = vpop.eup %2373  ;;  %1703 = vadd.xlane.f32.xlu0 %v1702_v0  ;;  %v1090_v50 = vsel %vm1026_vm8, %v3750_v63, 0.0  ;;  %v1091_v39 = vsel %vm1027_vm9, %v3751_v9, 0.0  ;;  %v1712_v8 = vadd.f32 %v3260_v38, %v1711_v56  ;;  %v1077_v37 = vsel %vm1013_vm10, %v2786_v5, 0.0  ;;  %v3768_v25 = vld [vmem:[#allocation9_spill] sm:$0xff]  ;;  %v3769_v56 = vld [vmem:[#allocation11_spill] sm:$0xff] }
 0x279   : > { %v2376_v60 = vpop.eup %2375  ;;  %v1721_v41 = vadd.f32 %v3308_v14, %v1720_v47  ;;  %v1730_v36 = vadd.f32 %v2366_v1, %v2364_v24  ;;  %v1150_v27 = vadd.f32 %v1149_v59, %v1077_v37  ;;  %vm1021_vm12 = vcmp.eq.s32.totalorder %v3084_v12, %v3249_v15  ;;  %v3771_v59 = vld [vmem:[#allocation13_spill] sm:$0xff] }
 0x27a   : > { %v1084_v63 = vsel %vm1020_vm11, %v2803_v29, 0.0  ;;  %2385 = vpow2.f32 %v1673_v49  ;;  %vm1028_vm13 = vcmp.eq.s32.totalorder %v3069_v17, %v3262_v16  ;;  %v1168_v5 = vadd.f32 %v1091_v39, %v1090_v50  ;;  %v3772_v49 = vld [vmem:[#allocation15_spill] sm:$0xff]  ;;  %v3774_v50 = vld [vmem:[#allocation10_spill] sm:$0xff] }
 0x27b   : > { %v1159_v9 = vadd.f32 %v1158_v34, %v1084_v63  ;;  %v1722_v14 = vadd.f32 %v3318_v52, %v1721_v41  ;;  %v1731_v30 = vadd.f32 %v2368_v42, %v1730_v36  ;;  %v1740_v18 = vadd.f32 %v2374_v23, %v2372_v26  ;;  %v957_v52 = vpop.permute.xlu1 %956  ;;  %v3775_v36 = vld [vmem:[#allocation18_spill] sm:$0xff] }
 0x27c   : > { %1141 = vadd.xlane.f32.xlu1 %v1140_v45  ;;  %1713 = vadd.xlane.f32.xlu0 %v1712_v8  ;;  %vm998_vm14 = vcmp.eq.s32.totalorder %v3061_v3, %v3351_v31  ;;  %v1085_v15 = vsel %vm1021_vm12, %v3745_v62, 0.0  ;;  %v1092_v29 = vsel %vm1028_vm13, %v3752_v22, 0.0  ;;  %vm999_vm15 = vcmp.eq.s32.totalorder %v3064_v40, %v3351_v31  ;;  %v3766_v62 = vld [vmem:[#allocation5_spill] sm:$0xff]  ;;  %v3767_v22 = vld [vmem:[#allocation7_spill] sm:$0xff] }
 0x27d   : > { %v1160_v21 = vadd.f32 %v1159_v9, %v1085_v15  ;;  %vm1029_vm1 = vcmp.eq.s32.totalorder %v3084_v12, %v3262_v16  ;;  %v1169_v46 = vadd.f32 %v1168_v5, %v1092_v29  ;;  %v1732_v13 = vadd.f32 %v2370_v10, %v1731_v30  ;;  %v3776_v9 = vld [vmem:[#allocation12_spill] sm:$0xff] }
 0x27e   : > { %v1741_v0 = vadd.f32 %v2376_v60, %v1740_v18  ;;  %v1093_v58 = vsel %vm1029_vm1, %v3753_v51, 0.0  ;;  %v1062_v1 = vsel %vm998_vm14, %v3766_v62, 0.0  ;;  %v1063_v7 = vsel %vm999_vm15, %v3767_v22, 0.0  ;;  %v3773_v60 = vld [vmem:[#allocation8_spill] sm:$0xff] }
 0x27f   : > { %vm1006_vm2 = vcmp.eq.s32.totalorder %v3061_v3, %v3390_v4  ;;  %vm1007_vm3 = vcmp.eq.s32.totalorder %v3064_v40, %v3390_v4  ;;  %v1170_v16 = vadd.f32 %v1169_v46, %v1093_v58  ;;  %vm1000_vm4 = vcmp.eq.s32.totalorder %v3069_v17, %v3351_v31  ;;  %v963_v28 = vpop.permute.xlu1 %962  ;;  %v909_v58 = vld [vmem:[#allocation4 + $0x18] sm:$0xff] }
 0x280   : > { %v2378_v38 = vpop.eup %2377  ;;  %1151 = vadd.xlane.f32.xlu1 %v1150_v27  ;;  %1723 = vadd.xlane.f32.xlu0 %v1722_v14  ;;  %v1133_v51 = vadd.f32 %v1063_v7, %v1062_v1  ;;  %v1070_v43 = vsel %vm1006_vm2, %v3768_v25, 0.0  ;;  %v1071_v47 = vsel %vm1007_vm3, %v3769_v56, 0.0  ;;  %vm1014_vm5 = vcmp.eq.s32.totalorder %v3061_v3, %v957_v52  ;;  %v908_v7 = vld [vmem:[#allocation4 + $0x10] sm:$0xff] }
 0x281   : > { %v2380_v19 = vpop.eup %2379  ;;  %vm1015_vm6 = vcmp.eq.s32.totalorder %v3064_v40, %v957_v52  ;;  %vm1001_vm7 = vcmp.eq.s32.totalorder %v3084_v12, %v3351_v31  ;;  %v1064_v10 = vsel %vm1000_vm4, %v3770_v61, 0.0  ;;  %vm1008_vm8 = vcmp.eq.s32.totalorder %v3069_v17, %v3390_v4  ;;  %v3783_v56 = vld [vmem:[#allocation39_spill] sm:$0xff] }
 0x282   : > { %v1750_v55 = vadd.f32 %v2380_v19, %v2378_v38  ;;  %v2382_v24 = vpop.eup %2381  ;;  %v1134_v26 = vadd.f32 %v1133_v51, %v1064_v10  ;;  %v1143_v33 = vadd.f32 %v1071_v47, %v1070_v43  ;;  %v1078_v23 = vsel %vm1014_vm5, %v3771_v59, 0.0  ;;  %v3780_v51 = vld [vmem:[#allocation33_spill] sm:$0xff]  ;;  %v3782_v43 = vld [vmem:[#allocation38_spill] sm:$0xff] }
 0x283   : > { %v1742_v42 = vadd.f32 %v2382_v24, %v1741_v0  ;;  %v1079_v45 = vsel %vm1015_vm6, %v3772_v49, 0.0  ;;  %vm1022_vm9 = vcmp.eq.s32.totalorder %v3061_v3, %v963_v28  ;;  %vm1023_vm10 = vcmp.eq.s32.totalorder %v3064_v40, %v963_v28  ;;  %v969_v34 = vpop.permute.xlu1 %968  ;;  %v1324_v10 = vld [vmem:[#allocation3 + $0x8] sm:$0xff] }
 0x284   : > { %1161 = vadd.xlane.f32.xlu1 %v1160_v21  ;;  %1733 = vadd.xlane.f32.xlu0 %v1732_v13  ;;  %v2384_v54 = vpop.eup %2383  ;;  %v1065_v31 = vsel %vm1001_vm7, %v3773_v60, 0.0  ;;  %vm1009_vm11 = vcmp.eq.s32.totalorder %v3084_v12, %v3390_v4  ;;  %v1072_v39 = vsel %vm1008_vm8, %v3774_v50, 0.0  ;;  %vm1016_vm12 = vcmp.eq.s32.totalorder %v3069_v17, %v957_v52  ;;  %v3777_v4 = vld [vmem:[#allocation14_spill] sm:$0xff]  ;;  %v3789_v60 = vld [vmem:[#allocation47_spill] sm:$0xff] }
 0x285   : > { %v1751_v6 = vadd.f32 %v2384_v54, %v1750_v55  ;;  %v1135_v8 = vadd.f32 %v1134_v26, %v1065_v31  ;;  %v1144_v37 = vadd.f32 %v1143_v33, %v1072_v39  ;;  %v1153_v41 = vadd.f32 %v1079_v45, %v1078_v23  ;;  %v910_v54 = vld [vmem:[#allocation4 + $0x20] sm:$0xff]  ;;  %v3786_v26 = vld [vmem:[#allocation43_spill] sm:$0xff] }
 0x286   : > { %v1086_v27 = vsel %vm1022_vm9, %v3775_v36, 0.0  ;;  %v1087_v63 = vsel %vm1023_vm10, %v3759_v32, 0.0  ;;  %vm1030_vm13 = vcmp.eq.s32.totalorder %v3061_v3, %v969_v34  ;;  %vm1031_vm14 = vcmp.eq.s32.totalorder %v3064_v40, %v969_v34  ;;  %v3778_v3 = vld [vmem:[#allocation16_spill] sm:$0xff] }
 0x287   : > { %v2386_v35 = vpop.eup %2385  ;;  %v1073_v5 = vsel %vm1009_vm11, %v3776_v9, 0.0  ;;  %vm1017_vm15 = vcmp.eq.s32.totalorder %v3084_v12, %v957_v52  ;;  %v1080_v38 = vsel %vm1016_vm12, %v3777_v4, 0.0  ;;  %vm1024_vm1 = vcmp.eq.s32.totalorder %v3069_v17, %v963_v28  ;;  %v907_v52 = vld [vmem:[#allocation4 + $0x8] sm:$0xff]  ;;  %v1329_v9 = vld [vmem:[#allocation3 + $0x30] sm:$0xff] }
 0x288   : > { %1171 = vadd.xlane.f32.xlu1 %v1170_v16  ;;  %1743 = vadd.xlane.f32.xlu0 %v1742_v42  ;;  %v1752_v48 = vadd.f32 %v2386_v35, %v1751_v6  ;;  %v1145_v14 = vadd.f32 %v1144_v37, %v1073_v5  ;;  %v1154_v30 = vadd.f32 %v1153_v41, %v1080_v38  ;;  %v1094_v19 = vsel %vm1030_vm13, %v3762_v53, 0.0  ;;  %v3791_v5 = vld [vmem:[#allocation50_spill] sm:$0xff]  ;;  %v3792_v4 = vld [vmem:[#allocation51_spill] sm:$0xff] }
 0x289   : > { %v1163_v18 = vadd.f32 %v1087_v63, %v1086_v27  ;;  %v1095_v32 = vsel %vm1031_vm14, %v3763_v11, 0.0  ;;  %v1081_v15 = vsel %vm1017_vm15, %v3778_v3, 0.0  ;;  %vm1025_vm2 = vcmp.eq.s32.totalorder %v3084_v12, %v963_v28 }
 0x28a   : > { %v1088_v40 = vsel %vm1024_vm1, %v3760_v44, 0.0  ;;  %v1155_v29 = vadd.f32 %v1154_v30, %v1081_v15  ;;  %vm1032_vm3 = vcmp.eq.s32.totalorder %v3069_v17, %v969_v34  ;;  %v1173_v46 = vadd.f32 %v1095_v32, %v1094_v19  ;;  %v3794_v15 = vld [vmem:[#allocation54_spill] sm:$0xff] }
 0x28b   : > { %v1164_v21 = vadd.f32 %v1163_v18, %v1088_v40  ;;  %v1089_v0 = vsel %vm1025_vm2, %v3761_v2, 0.0  ;;  %v1096_v53 = vsel %vm1032_vm3, %v3764_v57, 0.0  ;;  %vm1033_vm4 = vcmp.eq.s32.totalorder %v3084_v12, %v969_v34  ;;  %v906_v2 = vld [vmem:[#allocation4] sm:$0xff]  ;;  %v3788_v34 = vld [vmem:[#allocation46_spill] sm:$0xff]  ;;  %v3795_v40 = vld [vmem:[#allocation55_spill] sm:$0xff] }
 0x28c   : > { %1753 = vadd.xlane.f32.xlu0 %v1752_v48  ;;  %v1174_v24 = vadd.f32 %v1173_v46, %v1096_v53  ;;  %v1097_v17 = vsel %vm1033_vm4, %v3765_v20, 0.0  ;;  %v3779_v20 = vld [vmem:[#allocation32_spill] sm:$0xff]  ;;  %v3784_v47 = vsub.f32 %v3782_v43, %v3783_v56  ;;  %v3785_v48 = vld [vmem:[#allocation42_spill] sm:$0xff]  ;;  %v3790_v31 = vsub.f32 %v3788_v34, %v3789_v60 }
 0x28d   : > { %v1165_v55 = vadd.f32 %v1164_v21, %v1089_v0  ;;  %v3781_v28 = vsub.f32 %v3779_v20, %v3780_v51  ;;  %v3787_v33 = vsub.f32 %v3785_v48, %v3786_v26  ;;  %v3793_v38 = vsub.f32 %v3791_v5, %v3792_v4  ;;  %v3798_v0 = vld [vmem:[#allocation31_spill] sm:$0xff]  ;;  %v3810_v48 = vld [vmem:[#allocation41_spill] sm:$0xff] }
 0x28e   : > { %v1175_v1 = vadd.f32 %v1174_v24, %v1097_v17  ;;  %v1363_v35 = vmul.f32 1.442695, %v3784_v47  ;;  %v1371_v50 = vmul.f32 1.442695, %v3790_v31  ;;  %v1807_v24 = vld [vmem:[#allocation2 + $0x8] sm:$0xff]  ;;  %v1335_v31 = vld [vmem:[#allocation3 + $0x60] sm:$0xff] }
 0x28f   : > { %v1357_v25 = vmul.f32 1.442695, %v3781_v28  ;;  %v1367_v59 = vmul.f32 1.442695, %v3787_v33  ;;  %v3806_v28 = vld [vmem:[#allocation36_spill] sm:$0xff] }
 0x290   : > { %1136 = vadd.xlane.f32.xlu0 %v1135_v8  ;;  %v1327_v8 = vld [vmem:[#allocation3 + $0x20] sm:$0xff] }
 0x291   : > { %2387 = vpow2.f32 %v1357_v25  ;;  %v3807_v25 = vld [vmem:[#allocation37_spill] sm:$0xff] }
 0x292   : > { %2389 = vpow2.f32 %v1363_v35  ;;  %v3808_v43 = vsub.f32 %v3806_v28, %v3807_v25  ;;  %v1333_v35 = vld [vmem:[#allocation3 + $0x50] sm:$0xff] }
 0x293   : > { %2391 = vpow2.f32 %v1367_v59 }
 0x294   : > { %1146 = vadd.xlane.f32.xlu0 %v1145_v14  ;;  %2393 = vpow2.f32 %v1371_v50  ;;  %v1375_v14 = vmul.f32 1.442695, %v3793_v38  ;;  %v1361_v56 = vmul.f32 1.442695, %v3808_v43 }
 0x298   : > { %1156 = vadd.xlane.f32.xlu0 %v1155_v29  ;;  %v3796_v29 = vsub.f32 %v3794_v15, %v3795_v40 }
 0x29a   : > { %v1379_v21 = vmul.f32 1.442695, %v3796_v29 }
 0x29b   : > { %v1107_v13 = vpop.xlane.xlu0 %1106 }
 0x29c   : > { %v1179_v11 = vadd.f32 %v1107_v13, %v907_v52  ;;  %1166 = vadd.xlane.f32.xlu0 %v1165_v55  ;;  %v1331_v52 = vld [vmem:[#allocation3 + $0x40] sm:$0xff]  ;;  %v3797_v13 = vld [vmem:[#allocation30_spill] sm:$0xff] }
 0x29d   : > { %v3799_v53 = vsub.f32 %v3797_v13, %v3798_v0 }
 0x29e   : > { %1196 = vst.msk [vmem:[#allocation4 + $0x8] sm:$0xff] %vm284_vm0, %v1179_v11  ;;  %v2388_v61 = vpop.eup %2387 }
 0x29f   : > { %v1117_v44 = vpop.xlane.xlu0 %1116  ;;  %v1388_v23 = vmul.f32 %v2388_v61, %v1324_v10  ;;  %v2390_v39 = vpop.eup %2389  ;;  %v1355_v11 = vmul.f32 1.442695, %v3799_v53  ;;  %v3809_v10 = vld [vmem:[#allocation40_spill] sm:$0xff]  ;;  %v1325_v53 = vld [vmem:[#allocation3 + $0x10] sm:$0xff] }
 0x2a0   : > { %v1181_v62 = vadd.f32 %v1117_v44, %v909_v58  ;;  %1176 = vadd.xlane.f32.xlu0 %v1175_v1  ;;  %v1391_v41 = vmul.f32 %v2390_v39, %v1327_v8  ;;  %v2392_v63 = vpop.eup %2391  ;;  %v3811_v26 = vsub.f32 %v3809_v10, %v3810_v48  ;;  %v3812_v39 = vld [vmem:[#allocation44_spill] sm:$0xff]  ;;  %v3813_v8 = vld [vmem:[#allocation45_spill] sm:$0xff] }
 0x2a1   : > { %v1393_v30 = vmul.f32 %v2392_v63, %v1329_v9  ;;  %v2394_v3 = vpop.eup %2393  ;;  %v911_v63 = vld [vmem:[#allocation4 + $0x28] sm:$0xff]  ;;  %v3824_v48 = vld [vmem:[#allocation60_spill] sm:$0xff] }
 0x2a2   : > { %1198 = vst.msk [vmem:[#allocation4 + $0x18] sm:$0xff] %vm284_vm0, %v1181_v62  ;;  %v1395_v44 = vmul.f32 %v2394_v3, %v1331_v52  ;;  %v1919_v62 = vld [vmem:[%s3484_s27 + $0x8] sm:$0xff]  ;;  %v1365_v33 = vmul.f32 1.442695, %v3811_v26  ;;  %v3816_v3 = vld [vmem:[#allocation49_spill] sm:$0xff] }
 0x2a3   : > { %v3825_v26 = vld [vmem:[#allocation61_spill] sm:$0xff] }
 0x2a4   : > { %v1102_v22 = vpop.xlane.xlu1 %1101 }
 0x2a5   : > { %v1178_v57 = vadd.f32 %v1102_v22, %v906_v2  ;;  %v1887_v17 = vld [vmem:[#allocation4 + $0x8] sm:$0xff]  ;;  %v3801_v22 = vld [vmem:[#allocation35_spill] sm:$0xff] }
 0x2a6   : > { %v3800_v2 = vld [vmem:[#allocation34_spill] sm:$0xff] }
 0x2a7   : > { %1195 = vst.msk [vmem:[#allocation4] sm:$0xff] %vm284_vm0, %v1178_v57  ;;  %v3802_v57 = vsub.f32 %v3800_v2, %v3801_v22 }
 0x2a8   : > { %v1112_v12 = vpop.xlane.xlu1 %1111 }
 0x2a9   : > { %v1180_v16 = vadd.f32 %v1112_v12, %v908_v7  ;;  %v1359_v7 = vmul.f32 1.442695, %v3802_v57 }
 0x2ab   : > { %1197 = vst.msk [vmem:[#allocation4 + $0x10] sm:$0xff] %vm284_vm0, %v1180_v16 }
 0x2ac   : > { %v1122_v42 = vpop.xlane.xlu1 %1121 }
 0x2ad   : > { %v1182_v6 = vadd.f32 %v1122_v42, %v910_v54  ;;  %v3803_v54 = vld [vmem:[#allocation58_spill] sm:$0xff]  ;;  %v3804_v42 = vld [vmem:[#allocation59_spill] sm:$0xff] }
 0x2af   : > { %1199 = vst.msk [vmem:[#allocation4 + $0x20] sm:$0xff] %vm284_vm0, %v1182_v6  ;;  %v3805_v6 = vsub.f32 %v3803_v54, %v3804_v42 }
 0x2b1   : > { %v1383_v20 = vmul.f32 1.442695, %v3805_v6 }
 0x2c5   : > { %v1684_v49 = vpop.xlane.xlu1 %1683 }
 0x2c6   : > { %v1756_v45 = vadd.f32 %v1684_v49, %v1388_v23  ;;  %v1810_v49 = vld [vmem:[#allocation2 + $0x20] sm:$0xff] }
 0x2c8   : > { %1772 = vst.msk [vmem:[#allocation3 + $0x8] sm:$0xff] %vm284_vm0, %v1756_v45 }
 0x2cf   : > { %v1823_v37 = vld [vmem:[#allocation3 + $0x8] sm:$0xff] }
 0x2d0   : > { %2395 = vlog2.f32 %v1823_v37  ;;  %v3814_v37 = vsub.f32 %v3812_v39, %v3813_v8  ;;  %v1330_v39 = vld [vmem:[#allocation3 + $0x38] sm:$0xff]  ;;  %v914_v8 = vld [vmem:[#allocation4 + $0x40] sm:$0xff] }
 0x2d1   : > { %v1699_v36 = vpop.xlane.xlu1 %1698  ;;  %2397 = vpow2.f32 %v1375_v14  ;;  %v1323_v14 = vld [vmem:[#allocation3] sm:$0xff] }
 0x2d2   : > { %v1759_v27 = vadd.f32 %v1699_v36, %v1391_v41  ;;  %v1369_v41 = vmul.f32 1.442695, %v3814_v37  ;;  %v1890_v36 = vld [vmem:[#allocation4 + $0x20] sm:$0xff] }
 0x2d4   : > { %1775 = vst.msk [vmem:[#allocation3 + $0x20] sm:$0xff] %vm284_vm0, %v1759_v27  ;;  %v1922_v27 = vld [vmem:[%s3484_s27 + $0x20] sm:$0xff] }
 0x2d9   : > { %v1709_v18 = vpop.xlane.xlu1 %1708 }
 0x2da   : > { %v1761_v19 = vadd.f32 %v1709_v18, %v1393_v30 }
 0x2db   : > { %v1826_v32 = vld [vmem:[#allocation3 + $0x20] sm:$0xff] }
 0x2dc   : > { %2399 = vlog2.f32 %v1826_v32  ;;  %1777 = vst.msk [vmem:[#allocation3 + $0x30] sm:$0xff] %vm284_vm0, %v1761_v19  ;;  %v3815_v32 = vld [vmem:[#allocation48_spill] sm:$0xff] }
 0x2dd   : > { %v2396_v46 = vpop.eup %2395  ;;  %2401 = vpow2.f32 %v1379_v21  ;;  %v3817_v15 = vsub.f32 %v3815_v32, %v3816_v3  ;;  %v1812_v3 = vld [vmem:[#allocation2 + $0x30] sm:$0xff] }
 0x2de   : > { %v1841_v55 = vmul.f32 0.6931472, %v2396_v46  ;;  %2403 = vpow2.f32 %v1355_v11  ;;  %v2398_v47 = vpop.eup %2397  ;;  %v3818_v11 = vld [vmem:[#allocation52_spill] sm:$0xff] }
 0x2df   : > { %2405 = vpow2.f32 %v1359_v7  ;;  %v1397_v23 = vmul.f32 %v2398_v47, %v1333_v35  ;;  %v1373_v40 = vmul.f32 1.442695, %v3817_v15  ;;  %v1326_v7 = vld [vmem:[#allocation3 + $0x18] sm:$0xff]  ;;  %v1328_v35 = vld [vmem:[#allocation3 + $0x28] sm:$0xff] }
 0x2e0   : > { %v1871_v58 = vadd.f32 %v1841_v55, %v1807_v24  ;;  %2407 = vpow2.f32 %v1383_v20  ;;  %v3819_v55 = vld [vmem:[#allocation53_spill] sm:$0xff] }
 0x2e1   : > { %v1719_v1 = vpop.xlane.xlu1 %1718  ;;  %2409 = vpow2.f32 %v1361_v56  ;;  %v3820_v24 = vsub.f32 %v3818_v11, %v3819_v55 }
 0x2e2   : > { %v1903_v12 = vsub.f32 %v1871_v58, %v1887_v17  ;;  %v1763_v16 = vadd.f32 %v1719_v1, %v1395_v44  ;;  %2411 = vpow2.f32 %v1365_v33  ;;  %v3826_v33 = vsub.f32 %v3824_v48, %v3825_v26 }
 0x2e3   : > { %v1828_v4 = vld [vmem:[#allocation3 + $0x30] sm:$0xff]  ;;  %2413 = vpow2.f32 %v1369_v41  ;;  %v1377_v58 = vmul.f32 1.442695, %v3820_v24  ;;  %v918_v24 = vld [vmem:[#allocation4 + $0x60] sm:$0xff] }
 0x2e4   : > { %v1935_v51 = vmul.f32 %v1919_v62, %v1903_v12  ;;  %1779 = vst.msk [vmem:[#allocation3 + $0x40] sm:$0xff] %vm284_vm0, %v1763_v16  ;;  %2415 = vlog2.f32 %v1828_v4  ;;  %v1337_v62 = vld [vmem:[#allocation3 + $0x70] sm:$0xff]  ;;  %v3821_v12 = vld [vmem:[#allocation56_spill] sm:$0xff]  ;;  %v3822_v16 = vld [vmem:[#allocation57_spill] sm:$0xff] }
 0x2e5   : > { %2417 = vpow2.f32 %v1373_v40  ;;  %v3823_v54 = vsub.f32 %v3821_v12, %v3822_v16  ;;  %v1332_v4 = vld [vmem:[#allocation3 + $0x48] sm:$0xff] }
 0x2e6   : > { %1951 = vst.msk [vmem:[%s3497_s19 + $0x8] sm:$0xff] %vm284_vm0, %v1935_v51 }
 0x2e7   : > { %v1381_v42 = vmul.f32 1.442695, %v3823_v54 }
 0x2e9   : > { %v2400_v61 = vpop.eup %2399 }
 0x2ea   : > { %v1847_v59 = vmul.f32 0.6931472, %v2400_v61  ;;  %v2402_v50 = vpop.eup %2401  ;;  %v912_v61 = vld [vmem:[#allocation4 + $0x30] sm:$0xff] }
 0x2eb   : > { %v2404_v5 = vpop.eup %2403  ;;  %v1399_v19 = vmul.f32 %v2402_v50, %v1335_v31  ;;  %v1830_v13 = vld [vmem:[#allocation3 + $0x40] sm:$0xff] }
 0x2ec   : > { %v1874_v34 = vadd.f32 %v1847_v59, %v1810_v49  ;;  %v1387_v21 = vmul.f32 %v2404_v5, %v1323_v14  ;;  %v2406_v52 = vpop.eup %2405  ;;  %2419 = vlog2.f32 %v1830_v13  ;;  %v1385_v59 = vmul.f32 1.442695, %v3826_v33 }
 0x2ed   : > { %v1729_v45 = vpop.xlane.xlu1 %1728  ;;  %v2408_v17 = vpop.eup %2407  ;;  %v1389_v2 = vmul.f32 %v2406_v52, %v1325_v53  ;;  %2421 = vpow2.f32 %v1377_v58  ;;  %v1924_v53 = vld [vmem:[%s3484_s27 + $0x30] sm:$0xff] }
 0x2ee   : > { %v1765_v60 = vadd.f32 %v1729_v45, %v1397_v23  ;;  %v1906_v9 = vsub.f32 %v1874_v34, %v1890_v36  ;;  %v2410_v22 = vpop.eup %2409  ;;  %v1401_v20 = vmul.f32 %v2408_v17, %v1337_v62  ;;  %v1814_v62 = vld [vmem:[#allocation2 + $0x40] sm:$0xff] }
 0x2ef   : > { %v1390_v28 = vmul.f32 %v2410_v22, %v1326_v7  ;;  %v2412_v43 = vpop.eup %2411 }
 0x2f0   : > { %1781 = vst.msk [vmem:[#allocation3 + $0x50] sm:$0xff] %vm284_vm0, %v1765_v60  ;;  %v1938_v30 = vmul.f32 %v1922_v27, %v1906_v9  ;;  %v2414_v45 = vpop.eup %2413  ;;  %v1392_v34 = vmul.f32 %v2412_v43, %v1328_v35  ;;  %v1816_v43 = vld [vmem:[#allocation2 + $0x50] sm:$0xff] }
 0x2f1   : > { %v1127_v38 = vpop.xlane.xlu0 %1126  ;;  %v2416_v31 = vpop.eup %2415  ;;  %v1394_v9 = vmul.f32 %v2414_v45, %v1330_v39  ;;  %v1886_v39 = vld [vmem:[#allocation4] sm:$0xff] }
 0x2f2   : > { %v1183_v18 = vadd.f32 %v1127_v38, %v911_v63  ;;  %1954 = vst.msk [vmem:[%s3497_s19 + $0x20] sm:$0xff] %vm284_vm0, %v1938_v30  ;;  %v2418_v27 = vpop.eup %2417  ;;  %v1851_v63 = vmul.f32 0.6931472, %v2416_v31  ;;  %v1338_v31 = vld [vmem:[#allocation3 + $0x78] sm:$0xff] }
 0x2f3   : > { %v1396_v40 = vmul.f32 %v2418_v27, %v1332_v4 }
 0x2f4   : > { %v1739_v29 = vpop.xlane.xlu1 %1738  ;;  %1200 = vst.msk [vmem:[#allocation4 + $0x28] sm:$0xff] %vm284_vm0, %v1183_v18  ;;  %v916_v18 = vld [vmem:[#allocation4 + $0x50] sm:$0xff] }
 0x2f5   : > { %v1767_v46 = vadd.f32 %v1739_v29, %v1399_v19  ;;  %v1679_v0 = vpop.xlane.xlu0 %1678 }
 0x2f6   : > { %v1755_v44 = vadd.f32 %v1679_v0, %v1387_v21  ;;  %v1334_v0 = vld [vmem:[#allocation3 + $0x58] sm:$0xff] }
 0x2f7   : > { %1783 = vst.msk [vmem:[#allocation3 + $0x60] sm:$0xff] %vm284_vm0, %v1767_v46  ;;  %v1832_v1 = vld [vmem:[#allocation3 + $0x50] sm:$0xff]  ;;  %v1876_v46 = vadd.f32 %v1851_v63, %v1812_v3 }
 0x2f8   : > { %1771 = vst.msk [vmem:[#allocation3] sm:$0xff] %vm284_vm0, %v1755_v44  ;;  %2423 = vlog2.f32 %v1832_v1 }
 0x2f9   : > { %v1689_v57 = vpop.xlane.xlu0 %1688  ;;  %2425 = vpow2.f32 %v1381_v42  ;;  %v2420_v38 = vpop.eup %2419  ;;  %v1336_v42 = vld [vmem:[#allocation3 + $0x68] sm:$0xff] }
 0x2fa   : > { %v1757_v6 = vadd.f32 %v1689_v57, %v1389_v2  ;;  %v2422_v32 = vpop.eup %2421  ;;  %v1855_v52 = vmul.f32 0.6931472, %v2420_v38  ;;  %v1808_v38 = vld [vmem:[#allocation2 + $0x10] sm:$0xff] }
 0x2fb   : > { %v1398_v22 = vmul.f32 %v2422_v32, %v1334_v0  ;;  %v1920_v32 = vld [vmem:[%s3484_s27 + $0x10] sm:$0xff] }
 0x2fc   : > { %1773 = vst.msk [vmem:[#allocation3 + $0x10] sm:$0xff] %vm284_vm0, %v1757_v6  ;;  %v1878_v16 = vadd.f32 %v1855_v52, %v1814_v62  ;;  %v1820_v0 = vld [vmem:[#allocation2 + $0x70] sm:$0xff]  ;;  %v913_v62 = vld [vmem:[#allocation4 + $0x38] sm:$0xff] }
 0x2fd   : > { %v1749_v51 = vpop.xlane.xlu1 %1748  ;;  %v1694_v47 = vpop.xlane.xlu0 %1693 }
 0x2fe   : > { %v1769_v25 = vadd.f32 %v1749_v51, %v1401_v20  ;;  %v1834_v56 = vld [vmem:[#allocation3 + $0x60] sm:$0xff]  ;;  %v1758_v10 = vadd.f32 %v1694_v47, %v1390_v28 }
 0x2ff   : > { %v1822_v23 = vld [vmem:[#allocation3] sm:$0xff]  ;;  %2427 = vlog2.f32 %v1834_v56 }
 0x300   : > { %1785 = vst.msk [vmem:[#allocation3 + $0x70] sm:$0xff] %vm284_vm0, %v1769_v25  ;;  %2429 = vlog2.f32 %v1822_v23  ;;  %1774 = vst.msk [vmem:[#allocation3 + $0x18] sm:$0xff] %vm284_vm0, %v1758_v10  ;;  %v1926_v20 = vld [vmem:[%s3484_s27 + $0x40] sm:$0xff]  ;;  %v920_v25 = vld [vmem:[#allocation4 + $0x70] sm:$0xff] }
 0x301   : > { %v1132_v49 = vpop.xlane.xlu1 %1131  ;;  %v1704_v50 = vpop.xlane.xlu0 %1703  ;;  %2431 = vpow2.f32 %v1385_v59 }
 0x302   : > { %v1184_v60 = vadd.f32 %v1132_v49, %v912_v61  ;;  %v1760_v37 = vadd.f32 %v1704_v50, %v1392_v34  ;;  %v1806_v61 = vld [vmem:[#allocation2] sm:$0xff] }
 0x303   : > { %v1824_v41 = vld [vmem:[#allocation3 + $0x10] sm:$0xff]  ;;  %v1918_v49 = vld [vmem:[%s3484_s27] sm:$0xff] }
 0x304   : > { %1201 = vst.msk [vmem:[#allocation4 + $0x30] sm:$0xff] %vm284_vm0, %v1184_v60  ;;  %2433 = vlog2.f32 %v1824_v41  ;;  %1776 = vst.msk [vmem:[#allocation3 + $0x28] sm:$0xff] %vm284_vm0, %v1760_v37 }
 0x305   : > { %v1142_v36 = vpop.xlane.xlu1 %1141  ;;  %v1714_v30 = vpop.xlane.xlu0 %1713 }
 0x306   : > { %v1186_v5 = vadd.f32 %v1142_v36, %v914_v8  ;;  %v1762_v19 = vadd.f32 %v1714_v30, %v1394_v9  ;;  %v2424_v21 = vpop.eup %2423  ;;  %v1928_v8 = vld [vmem:[%s3484_s27 + $0x50] sm:$0xff]  ;;  %v1818_v36 = vld [vmem:[#allocation2 + $0x60] sm:$0xff] }
 0x307   : > { %v1836_v14 = vld [vmem:[#allocation3 + $0x70] sm:$0xff]  ;;  %v1825_v15 = vld [vmem:[#allocation3 + $0x18] sm:$0xff]  ;;  %v2426_v17 = vpop.eup %2425  ;;  %v1859_v2 = vmul.f32 0.6931472, %v2424_v21  ;;  %v1930_v21 = vld [vmem:[%s3484_s27 + $0x60] sm:$0xff] }
 0x308   : > { %2435 = vlog2.f32 %v1836_v14  ;;  %1203 = vst.msk [vmem:[#allocation4 + $0x40] sm:$0xff] %vm284_vm0, %v1186_v5  ;;  %1778 = vst.msk [vmem:[#allocation3 + $0x38] sm:$0xff] %vm284_vm0, %v1762_v19  ;;  %v1400_v33 = vmul.f32 %v2426_v17, %v1336_v42 }
 0x309   : > { %v1152_v29 = vpop.xlane.xlu1 %1151  ;;  %2437 = vlog2.f32 %v1825_v15  ;;  %v1724_v55 = vpop.xlane.xlu0 %1723  ;;  %v1880_v48 = vadd.f32 %v1859_v2, %v1816_v43  ;;  %v1921_v2 = vld [vmem:[%s3484_s27 + $0x18] sm:$0xff] }
 0x30a   : > { %v1188_v13 = vadd.f32 %v1152_v29, %v916_v18  ;;  %v1764_v44 = vadd.f32 %v1724_v55, %v1396_v40  ;;  %v1888_v29 = vld [vmem:[#allocation4 + $0x10] sm:$0xff] }
 0x30b   : > { %v1892_v11 = vld [vmem:[#allocation4 + $0x30] sm:$0xff]  ;;  %v1827_v1 = vld [vmem:[#allocation3 + $0x28] sm:$0xff] }
 0x30c   : > { %v1908_v58 = vsub.f32 %v1876_v46, %v1892_v11  ;;  %1205 = vst.msk [vmem:[#allocation4 + $0x50] sm:$0xff] %vm284_vm0, %v1188_v13  ;;  %v2428_v7 = vpop.eup %2427  ;;  %2439 = vlog2.f32 %v1827_v1  ;;  %1780 = vst.msk [vmem:[#allocation3 + $0x48] sm:$0xff] %vm284_vm0, %v1764_v44 }
 0x30d   : > { %v1162_v57 = vpop.xlane.xlu1 %1161  ;;  %v2430_v6 = vpop.eup %2429  ;;  %v1863_v26 = vmul.f32 0.6931472, %v2428_v7 }
 0x30e   : > { %v1940_v12 = vmul.f32 %v1924_v53, %v1908_v58  ;;  %v1190_v54 = vadd.f32 %v1162_v57, %v918_v24  ;;  %v1734_v28 = vpop.xlane.xlu0 %1733  ;;  %v1839_v56 = vmul.f32 0.6931472, %v2430_v6  ;;  %v2432_v23 = vpop.eup %2431  ;;  %v1809_v58 = vld [vmem:[#allocation2 + $0x18] sm:$0xff] }
 0x30f   : > { %v1894_v51 = vld [vmem:[#allocation4 + $0x40] sm:$0xff]  ;;  %v1766_v35 = vadd.f32 %v1734_v28, %v1398_v22  ;;  %v1829_v10 = vld [vmem:[#allocation3 + $0x38] sm:$0xff]  ;;  %v1882_v30 = vadd.f32 %v1863_v26, %v1818_v36  ;;  %v1402_v18 = vmul.f32 %v2432_v23, %v1338_v31  ;;  %v1923_v26 = vld [vmem:[%s3484_s27 + $0x28] sm:$0xff] }
 0x310   : > { %1956 = vst.msk [vmem:[%s3497_s19 + $0x30] sm:$0xff] %vm284_vm0, %v1940_v12  ;;  %v1910_v47 = vsub.f32 %v1878_v16, %v1894_v51  ;;  %1207 = vst.msk [vmem:[#allocation4 + $0x60] sm:$0xff] %vm284_vm0, %v1190_v54  ;;  %v1870_v45 = vadd.f32 %v1839_v56, %v1806_v61  ;;  %2441 = vlog2.f32 %v1829_v10  ;;  %v1889_v12 = vld [vmem:[#allocation4 + $0x18] sm:$0xff]  ;;  %v1932_v16 = vld [vmem:[%s3484_s27 + $0x70] sm:$0xff] }
 0x311   : > { %v1172_v59 = vpop.xlane.xlu1 %1171  ;;  %1782 = vst.msk [vmem:[#allocation3 + $0x58] sm:$0xff] %vm284_vm0, %v1766_v35  ;;  %v2434_v50 = vpop.eup %2433  ;;  %v915_v56 = vld [vmem:[#allocation4 + $0x48] sm:$0xff]  ;;  %v1925_v36 = vld [vmem:[%s3484_s27 + $0x38] sm:$0xff] }
 0x312   : > { %v1942_v34 = vmul.f32 %v1926_v20, %v1910_v47  ;;  %v1192_v60 = vadd.f32 %v1172_v59, %v920_v25  ;;  %v1744_v41 = vpop.xlane.xlu0 %1743  ;;  %v1902_v27 = vsub.f32 %v1870_v45, %v1886_v39  ;;  %v1843_v63 = vmul.f32 0.6931472, %v2434_v50  ;;  %v1811_v25 = vld [vmem:[#allocation2 + $0x28] sm:$0xff]  ;;  %v1813_v50 = vld [vmem:[#allocation2 + $0x38] sm:$0xff] }
 0x313   : > { %v1896_v37 = vld [vmem:[#allocation4 + $0x50] sm:$0xff]  ;;  %v1768_v5 = vadd.f32 %v1744_v41, %v1400_v33  ;;  %v1831_v14 = vld [vmem:[#allocation3 + $0x48] sm:$0xff] }
 0x314   : > { %1958 = vst.msk [vmem:[%s3497_s19 + $0x40] sm:$0xff] %vm284_vm0, %v1942_v34  ;;  %v1912_v9 = vsub.f32 %v1880_v48, %v1896_v37  ;;  %1209 = vst.msk [vmem:[#allocation4 + $0x70] sm:$0xff] %vm284_vm0, %v1192_v60  ;;  %v1934_v19 = vmul.f32 %v1918_v49, %v1902_v27  ;;  %v1872_v3 = vadd.f32 %v1843_v63, %v1808_v38  ;;  %2443 = vlog2.f32 %v1831_v14  ;;  %v1891_v48 = vld [vmem:[#allocation4 + $0x28] sm:$0xff]  ;;  %v917_v34 = vld [vmem:[#allocation4 + $0x58] sm:$0xff] }
 0x315   : > { %v2436_v4 = vpop.eup %2435  ;;  %1784 = vst.msk [vmem:[#allocation3 + $0x68] sm:$0xff] %vm284_vm0, %v1768_v5  ;;  %v919_v63 = vld [vmem:[#allocation4 + $0x68] sm:$0xff] }
 0x316   : > { %v1944_v15 = vmul.f32 %v1928_v8, %v1912_v9  ;;  %v2438_v40 = vpop.eup %2437  ;;  %v1867_v52 = vmul.f32 0.6931472, %v2436_v4  ;;  %v1754_v13 = vpop.xlane.xlu0 %1753  ;;  %1950 = vst.msk [vmem:[%s3497_s19] sm:$0xff] %vm284_vm0, %v1934_v19  ;;  %v1904_v53 = vsub.f32 %v1872_v3, %v1888_v29  ;;  %v1815_v4 = vld [vmem:[#allocation2 + $0x48] sm:$0xff] }
 0x317   : > { %v1898_v46 = vld [vmem:[#allocation4 + $0x60] sm:$0xff]  ;;  %v1845_v11 = vmul.f32 0.6931472, %v2438_v40  ;;  %v1770_v24 = vadd.f32 %v1754_v13, %v1402_v18 }
 0x318   : > { %1960 = vst.msk [vmem:[%s3497_s19 + $0x50] sm:$0xff] %vm284_vm0, %v1944_v15  ;;  %v1914_v55 = vsub.f32 %v1882_v30, %v1898_v46  ;;  %v1833_v44 = vld [vmem:[#allocation3 + $0x58] sm:$0xff]  ;;  %v1884_v17 = vadd.f32 %v1867_v52, %v1820_v0  ;;  %v1936_v1 = vmul.f32 %v1920_v32, %v1904_v53  ;;  %v1927_v32 = vld [vmem:[%s3484_s27 + $0x48] sm:$0xff] }
 0x319   : > { %v1873_v22 = vadd.f32 %v1845_v11, %v1809_v58  ;;  %2445 = vlog2.f32 %v1833_v44  ;;  %1786 = vst.msk [vmem:[#allocation3 + $0x78] sm:$0xff] %vm284_vm0, %v1770_v24  ;;  %v2440_v7 = vpop.eup %2439  ;;  %v921_v15 = vld [vmem:[#allocation4 + $0x78] sm:$0xff]  ;;  %v1819_v44 = vld [vmem:[#allocation2 + $0x68] sm:$0xff] }
 0x31a   : > { %v1946_v57 = vmul.f32 %v1930_v21, %v1914_v55  ;;  %v1137_v42 = vpop.xlane.xlu0 %1136  ;;  %1952 = vst.msk [vmem:[%s3497_s19 + $0x10] sm:$0xff] %vm284_vm0, %v1936_v1  ;;  %v1849_v20 = vmul.f32 0.6931472, %v2440_v7  ;;  %v1817_v21 = vld [vmem:[#allocation2 + $0x58] sm:$0xff] }
 0x31b   : > { %v1900_v54 = vld [vmem:[#allocation4 + $0x70] sm:$0xff]  ;;  %v1905_v6 = vsub.f32 %v1873_v22, %v1889_v12  ;;  %v1185_v28 = vadd.f32 %v1137_v42, %v913_v62  ;;  %v1929_v11 = vld [vmem:[%s3484_s27 + $0x58] sm:$0xff] }
 0x31c   : > { %1962 = vst.msk [vmem:[%s3497_s19 + $0x60] sm:$0xff] %vm284_vm0, %v1946_v57  ;;  %v1916_v51 = vsub.f32 %v1884_v17, %v1900_v54  ;;  %v1835_v43 = vld [vmem:[#allocation3 + $0x68] sm:$0xff]  ;;  %v1875_v35 = vadd.f32 %v1849_v20, %v1811_v25  ;;  %v1821_v7 = vld [vmem:[#allocation2 + $0x78] sm:$0xff] }
 0x31d   : > { %v1937_v47 = vmul.f32 %v1921_v2, %v1905_v6  ;;  %2447 = vlog2.f32 %v1835_v43  ;;  %1202 = vst.msk [vmem:[#allocation4 + $0x38] sm:$0xff] %vm284_vm0, %v1185_v28  ;;  %v2442_v10 = vpop.eup %2441  ;;  %v1931_v2 = vld [vmem:[%s3484_s27 + $0x68] sm:$0xff]  ;;  %v1933_v54 = vld [vmem:[%s3484_s27 + $0x78] sm:$0xff] }
 0x31e   : > { %v1948_v61 = vmul.f32 %v1932_v16, %v1916_v51  ;;  %v1147_v33 = vpop.xlane.xlu0 %1146  ;;  %v1907_v59 = vsub.f32 %v1875_v35, %v1891_v48  ;;  %v1853_v23 = vmul.f32 0.6931472, %v2442_v10 }
 0x31f   : > { %1953 = vst.msk [vmem:[%s3497_s19 + $0x18] sm:$0xff] %vm284_vm0, %v1937_v47  ;;  %v1187_v49 = vadd.f32 %v1147_v33, %v915_v56 }
 0x320   : > { %1964 = vst.msk [vmem:[%s3497_s19 + $0x70] sm:$0xff] %vm284_vm0, %v1948_v61  ;;  %v1837_v45 = vld [vmem:[#allocation3 + $0x78] sm:$0xff]  ;;  %v1939_v60 = vmul.f32 %v1923_v26, %v1907_v59  ;;  %v1877_v8 = vadd.f32 %v1853_v23, %v1813_v50 }
 0x321   : > { %2449 = vlog2.f32 %v1837_v45  ;;  %1204 = vst.msk [vmem:[#allocation4 + $0x48] sm:$0xff] %vm284_vm0, %v1187_v49  ;;  %v2444_v31 = vpop.eup %2443 }
 0x322   : > { %v1157_v39 = vpop.xlane.xlu0 %1156  ;;  %1955 = vst.msk [vmem:[%s3497_s19 + $0x28] sm:$0xff] %vm284_vm0, %v1939_v60  ;;  %v1857_v37 = vmul.f32 0.6931472, %v2444_v31 }
 0x323   : > { %v1189_v41 = vadd.f32 %v1157_v39, %v917_v34 }
 0x324   : > { %v1893_v27 = vld [vmem:[#allocation4 + $0x38] sm:$0xff]  ;;  %v1879_v30 = vadd.f32 %v1857_v37, %v1815_v4 }
 0x325   : > { %v1909_v9 = vsub.f32 %v1877_v8, %v1893_v27  ;;  %1206 = vst.msk [vmem:[#allocation4 + $0x58] sm:$0xff] %vm284_vm0, %v1189_v41 }
 0x326   : > { %v2446_v5 = vpop.eup %2445  ;;  %v1167_v38 = vpop.xlane.xlu0 %1166 }
 0x327   : > { %v1941_v14 = vmul.f32 %v1925_v36, %v1909_v9  ;;  %v1861_v18 = vmul.f32 0.6931472, %v2446_v5  ;;  %v1191_v19 = vadd.f32 %v1167_v38, %v919_v63 }
 0x328   : > { %v1895_v3 = vld [vmem:[#allocation4 + $0x48] sm:$0xff] }
 0x329   : > { %1957 = vst.msk [vmem:[%s3497_s19 + $0x38] sm:$0xff] %vm284_vm0, %v1941_v14  ;;  %v1911_v40 = vsub.f32 %v1879_v30, %v1895_v3  ;;  %1208 = vst.msk [vmem:[#allocation4 + $0x68] sm:$0xff] %vm284_vm0, %v1191_v19  ;;  %v1881_v13 = vadd.f32 %v1861_v18, %v1817_v21 }
 0x32a   : > { %v2448_v29 = vpop.eup %2447  ;;  %v1177_v46 = vpop.xlane.xlu0 %1176 }
 0x32b   : > { %v1943_v52 = vmul.f32 %v1927_v32, %v1911_v40  ;;  %v1865_v0 = vmul.f32 0.6931472, %v2448_v29  ;;  %v1193_v53 = vadd.f32 %v1177_v46, %v921_v15 }
 0x32c   : > { %v1897_v55 = vld [vmem:[#allocation4 + $0x58] sm:$0xff] }
 0x32d   : > { %1959 = vst.msk [vmem:[%s3497_s19 + $0x48] sm:$0xff] %vm284_vm0, %v1943_v52  ;;  %v1913_v24 = vsub.f32 %v1881_v13, %v1897_v55  ;;  %1210 = vst.msk [vmem:[#allocation4 + $0x78] sm:$0xff] %vm284_vm0, %v1193_v53  ;;  %v1883_v62 = vadd.f32 %v1865_v0, %v1819_v44 }
 0x32e   : > { %v2450_v58 = vpop.eup %2449 }
 0x32f   : > { %v1945_v17 = vmul.f32 %v1929_v11, %v1913_v24  ;;  %v1869_v1 = vmul.f32 0.6931472, %v2450_v58 }
 0x330   : > { %v1899_v22 = vld [vmem:[#allocation4 + $0x68] sm:$0xff] }
 0x331   : > { %1961 = vst.msk [vmem:[%s3497_s19 + $0x58] sm:$0xff] %vm284_vm0, %v1945_v17  ;;  %v1915_v57 = vsub.f32 %v1883_v62, %v1899_v22  ;;  %v1885_v16 = vadd.f32 %v1869_v1, %v1821_v7 }
 0x333   : > { %v1947_v12 = vmul.f32 %v1931_v2, %v1915_v57 }
 0x334   : > { %v1901_v42 = vld [vmem:[#allocation4 + $0x78] sm:$0xff] }
 0x335   : > { %1963 = vst.msk [vmem:[%s3497_s19 + $0x68] sm:$0xff] %vm284_vm0, %v1947_v12  ;;  %v1917_v6 = vsub.f32 %v1885_v16, %v1901_v42 }
 0x337   : > { %v1949_v20 = vmul.f32 %v1933_v54, %v1917_v6 }
 0x339   : > { %1965 = vst.msk [vmem:[%s3497_s19 + $0x78] sm:$0xff] %vm284_vm0, %v1949_v20 }
 0x33a PF: > { %s14_s17 = sadd.s32 1, %s2473_s17   ;;  %s3827_s15 = smov %s2469_s16 }
 0x33b   : > { %p11_p5 = scmp.ge.s32.totalorder %s14_s17, 4   ;;  %s3828_s16 = smov %s3830_s18 }
 0x33d   :  { %13 = sbr.rel (!%p11_p5) target bundleno = 2 (0x2), region = 83 }

</bundles_post_ra>
